<compile_context>
chip_gen: v5e
topology: v5e:2x2
jax: 0.10.0
libtpu: 0.0.40
codegen_flags: <defaults>
</compile_context>

<pallas_src>
import functools

import jax
import jax.numpy as jnp
from jax import lax
from jax.experimental import pallas as pl
from jax.experimental.pallas import tpu as pltpu


def basic_block_kernel(x_ref, w1_ref, b1_ref, w2_ref, b2_ref, o_ref, *, img_w):
    # x_ref : (Hp, Wp, Cp) bf16  padded input slab for one batch element
    #                            (H padded by (2, 4); W: 1 left zero col, zeros up to Wp)
    # w*_ref: (9, Cp, Cp)  bf16  conv taps (index = kh*3 + kw) with BN scale folded in
    # b*_ref: (1, Cp)      f32   folded BatchNorm bias
    # o_ref : (TH, Wp, Cp) f32   output tile; image cols 0..W-1 valid, rest trimmed later
    TH, Wp, Cp = o_ref.shape
    W = img_w
    h = pl.program_id(1)
    last = pl.num_programs(1) - 1
    r0 = h * TH

    M2 = TH * Wp                # flattened final tile
    Mm = (TH + 3) * Wp          # conv1 activation: rows -1 .. TH+1 (+1 spare), flattened
    LD1 = (TH + 4) * Wp         # conv1 matmul M
    LD2 = M2 + 24               # conv2 matmul M
    ZPAD = 16                   # one bf16 sublane tile of zeros prepended before conv2

    # One contiguous slab load; Wp % 16 == 0 so collapsing (rows, Wp) into the sublane
    # dim is a layout-preserving reshape for bf16.  Every MXU operand below is a dense,
    # tile-aligned slice of this value.
    x_flat = x_ref[pl.ds(r0, TH + 6), :, :].reshape((TH + 6) * Wp, Cp)

    # ---- conv1 (3x3, SAME, stride 1, no bias) + BN1 (scale folded) + ReLU ----------
    acc1 = None
    for kw in range(3):
        z = None
        for kh in range(3):  # kh shift (kh*Wp) is tile aligned -> free input slice
            part = jnp.dot(x_flat[kh * Wp: kh * Wp + LD1],
                           w1_ref[kh * 3 + kw],
                           preferred_element_type=jnp.float32)
            z = part if z is None else z + part
        zs = z[kw: kw + Mm]  # only kw = 1, 2 need a sublane realign of the f32 result
        acc1 = zs if acc1 is None else acc1 + zs
    y1 = jnp.maximum(acc1 + b1_ref[...], 0.0).reshape(TH + 3, Wp, Cp)

    # conv2 padding: zero the columns right of the image and the out-of-image halo
    # rows.  The zeroed trailing columns of each row double as conv2's left-halo zeros.
    col = lax.broadcasted_iota(jnp.int32, (TH + 3, Wp, Cp), 1)
    row = lax.broadcasted_iota(jnp.int32, (TH + 3, Wp, Cp), 0)
    keep = (col < W) & ((row > 0) | (h > 0)) & ((row < TH + 1) | (h < last))
    y1m = jnp.where(keep, y1, 0.0).reshape(Mm, Cp).astype(jnp.bfloat16)
    # Tile-aligned zero prepend (no relayout) so conv2's "-1 column" reads hit zeros.
    y1p = jnp.concatenate([jnp.zeros((ZPAD, Cp), jnp.bfloat16), y1m], axis=0)

    # ---- conv2 (3x3, SAME, stride 1, no bias) + BN2 (scale folded) ------------------
    acc2 = None
    for kw in range(3):
        z = None
        for kh in range(3):
            part = jnp.dot(y1p[kh * Wp: kh * Wp + LD2],
                           w2_ref[kh * 3 + kw],
                           preferred_element_type=jnp.float32)
            z = part if z is None else z + part
        zs = z[kw + ZPAD - 1: kw + ZPAD - 1 + M2]
        acc2 = zs if acc2 is None else acc2 + zs

    # ---- identity shortcut + final ReLU ---------------------------------------------
    res = x_flat[2 * Wp + 1: 2 * Wp + 1 + M2].astype(jnp.float32)
    out = jnp.maximum(acc2 + b2_ref[...] + res, 0.0)
    o_ref[...] = out.reshape(TH, Wp, Cp).astype(o_ref.dtype)  # dense full-width store


def _pick_tile_h(H, Wp, Cp):
    """Full image height for small feature maps (keeps the matmul M large on the
    14x14 / 7x7 stages), otherwise the largest divisor of H whose per-step f32
    intermediates stay within a few MiB of VMEM."""
    if H <= 32:
        return H
    budget = 8 * 1024 * 1024
    for t in sorted((d for d in range(1, H + 1) if H % d == 0), reverse=True):
        if (t + 6) * Wp * Cp * 10 <= budget:
            return t
    return 1
    # TODO(synk): for 7x7 stages with large Cp, fold several batch elements into the
    #             matmul M dimension instead of relying on H alone.


def fold_bn(gamma, beta, mean, var, eps=1e-5):
    scale = gamma / jnp.sqrt(var + eps)
    bias = beta - mean * scale
    return scale, bias


def basic_block_pallas(x, w1, w2, s1, b1, s2, b2):
    """x: (N, H, W, C) f32; w*: (3, 3, Cin, Cout); s*, b*: (Cout,) folded BN scale/bias."""
    N, H, W, C = x.shape
    Cout = w1.shape[-1]
    assert C == Cout, "identity shortcut requires Cin == Cout (default BasicBlock2D)"
    assert w2.shape[-2] == Cout and w2.shape[-1] == Cout

    Cp = ((Cout + 127) // 128) * 128      # lane-dense channels
    Wp = ((W + 2 + 15) // 16) * 16        # padded width, bf16 sublane-tile aligned
    TH = _pick_tile_h(H, Wp, Cp)
    HT = H // TH
    Hp = H + 6                            # 2 top halo rows + spare bottom rows

    # Fold BN scale into the conv weights; bf16 activations/weights (f32 accumulation),
    # biases / epilogue stay f32.
    w1f = (w1 * s1).astype(jnp.bfloat16)
    w2f = (w2 * s2).astype(jnp.bfloat16)
    xb = x.astype(jnp.bfloat16)

    xp = jnp.pad(xb, ((0, 0), (2, 4), (1, Wp - W - 1), (0, Cp - C)))
    w1p = jnp.pad(w1f, ((0, 0), (0, 0), (0, Cp - C), (0, Cp - Cout))).reshape(9, Cp, Cp)
    w2p = jnp.pad(w2f, ((0, 0), (0, 0), (0, Cp - Cout), (0, Cp - Cout))).reshape(9, Cp, Cp)
    b1p = jnp.pad(b1, (0, Cp - Cout)).reshape(1, Cp).astype(jnp.float32)
    b2p = jnp.pad(b2, (0, Cp - Cout)).reshape(1, Cp).astype(jnp.float32)

    cost = pl.CostEstimate(
        flops=4 * 9 * N * H * Wp * Cp * Cp,
        transcendentals=0,
        bytes_accessed=(N * Hp * Wp * Cp * 2 + 2 * 9 * Cp * Cp * 2 + 2 * 4 * Cp
                        + N * H * Wp * Cp * 4),
    )

    out = pl.pallas_call(
        functools.partial(basic_block_kernel, img_w=W),
        out_shape=jax.ShapeDtypeStruct((N, H, Wp, Cp), jnp.float32),
        grid_spec=pltpu.PrefetchScalarGridSpec(
            num_scalar_prefetch=0,
            grid=(N, HT),
            in_specs=[
                # Whole padded slab per batch element (block index constant over h ->
                # DMA'd once per n); each h step slices its rows with pl.ds in-kernel.
                # TODO(synk): for very large spatial sizes on v7x, switch to a
                #             halo-windowed x spec instead of the full slab.
                pl.BlockSpec((None, Hp, Wp, Cp), lambda n, h: (n, 0, 0, 0)),
                # TODO(synk): constant-index weights/biases: add
                #             pipeline_mode=pl.Buffered(1) for Cp=512 on v7x.
                pl.BlockSpec((9, Cp, Cp), lambda n, h: (0, 0, 0)),
                pl.BlockSpec((1, Cp), lambda n, h: (0, 0)),
                pl.BlockSpec((9, Cp, Cp), lambda n, h: (0, 0, 0)),
                pl.BlockSpec((1, Cp), lambda n, h: (0, 0)),
            ],
            out_specs=pl.BlockSpec((None, TH, Wp, Cp), lambda n, h: (n, h, 0, 0)),
        ),
        compiler_params=pltpu.CompilerParams(
            dimension_semantics=("parallel", "parallel"),
            # 64-96 MiB is fine on v5e/v6e (128 MiB physical); keep <= ~56 MiB for v7x.
            vmem_limit_bytes=56 * 1024 * 1024,
        ),
        cost_estimate=cost,
    )(xp, w1p, b1p, w2p, b2p)

    # TODO(synk): downstream layers could consume the (Wp, Cp)-padded layout directly
    #             and skip this HBM round trip.
    return out[:, :, :W, :C]


def ref_forward(x, w1, w2, b1, b2):
    """Pure-JAX reference on identically bf16-rounded operands, f32 accumulation."""
    dn = ("NHWC", "HWIO", "NHWC")
    p = lax.Precision.HIGHEST
    y = lax.conv_general_dilated(x, w1, (1, 1), "SAME", dimension_numbers=dn, precision=p)
    y = jnp.maximum(y + b1, 0.0)
    y = y.astype(jnp.bfloat16).astype(jnp.float32)   # kernel feeds conv2 bf16 activations
    y = lax.conv_general_dilated(y, w2, (1, 1), "SAME", dimension_numbers=dn, precision=p)
    return jnp.maximum(y + b2 + x, 0.0)


if __name__ == "__main__":
    key = jax.random.PRNGKey(0)
    ks = jax.random.split(key, 11)

    # Small shapes: batch=2, channels=4, spatial 16x16 (PyTorch layout NCHW).
    N, C, H, W = 2, 4, 16, 16

    x_nchw = jax.random.normal(ks[0], (N, C, H, W), jnp.float32)
    x = jnp.transpose(x_nchw, (0, 2, 3, 1))                 # NHWC

    # Conv weights: torch layout (Cout, Cin, kH, kW) -> (kH, kW, Cin, Cout).
    w1_t = 0.1 * jax.random.normal(ks[1], (C, C, 3, 3), jnp.float32)
    w2_t = 0.1 * jax.random.normal(ks[2], (C, C, 3, 3), jnp.float32)
    w1 = jnp.transpose(w1_t, (2, 3, 1, 0))
    w2 = jnp.transpose(w2_t, (2, 3, 1, 0))

    # BatchNorm2d params (eval-mode running stats), deterministic init.
    g1 = 1.0 + 0.1 * jax.random.normal(ks[3], (C,), jnp.float32)
    be1 = 0.1 * jax.random.normal(ks[4], (C,), jnp.float32)
    m1 = 0.1 * jax.random.normal(ks[5], (C,), jnp.float32)
    v1 = 1.0 + 0.1 * jnp.abs(jax.random.normal(ks[6], (C,), jnp.float32))
    g2 = 1.0 + 0.1 * jax.random.normal(ks[7], (C,), jnp.float32)
    be2 = 0.1 * jax.random.normal(ks[8], (C,), jnp.float32)
    m2 = 0.1 * jax.random.normal(ks[9], (C,), jnp.float32)
    v2 = 1.0 + 0.1 * jnp.abs(jax.random.normal(ks[10], (C,), jnp.float32))

    s1, bb1 = fold_bn(g1, be1, m1, v1)
    s2, bb2 = fold_bn(g2, be2, m2, v2)

    out = basic_block_pallas(x, w1, w2, s1, bb1, s2, bb2)
    out = jax.block_until_ready(out)

    # Reference uses the same bf16-rounded activations / folded weights as the kernel,
    # so only f32 summation order (and isolated 1-ULP bf16 boundary effects) differ.
    xr = x.astype(jnp.bfloat16).astype(jnp.float32)
    w1r = (w1 * s1).astype(jnp.bfloat16).astype(jnp.float32)
    w2r = (w2 * s2).astype(jnp.bfloat16).astype(jnp.float32)
    ref = ref_forward(xr, w1r, w2r, bb1, bb2)

    assert out.shape == (N, H, W, C)
    assert jnp.allclose(out, ref, atol=2e-3, rtol=2e-3), "mismatch vs JAX reference"

    print("KERNEL_OK")
</pallas_src>

<mosaic_0001>
module attributes {stable_mosaic.version = 11 : i64} {
  func.func @basic_block_kernel(%arg0: i32, %arg1: i32, %arg2: memref<1x22x32x128xbf16, #tpu.memory_space<vmem>>, %arg3: memref<9x128x128xbf16, #tpu.memory_space<vmem>>, %arg4: memref<1x128xf32, #tpu.memory_space<vmem>>, %arg5: memref<9x128x128xbf16, #tpu.memory_space<vmem>>, %arg6: memref<1x128xf32, #tpu.memory_space<vmem>>, %arg7: memref<1x16x32x128xf32, #tpu.memory_space<vmem>>) attributes {dimension_semantics = [#tpu.dimension_semantics<parallel>, #tpu.dimension_semantics<parallel>], iteration_bounds = array<i64: 2, 1>, scalar_prefetch = 0 : i64, scratch_operands = 0 : i64, tpu.core_type = #tpu.core_type<tc>, window_params = [{transform_indices = @transform_0, window_bounds = array<i64: 1, 22, 32, 128>}, {pipeline_mode = #tpu.pipeline_mode<synchronous>, transform_indices = @transform_1, window_bounds = array<i64: 9, 128, 128>}, {pipeline_mode = #tpu.pipeline_mode<synchronous>, transform_indices = @transform_2, window_bounds = array<i64: 1, 128>}, {pipeline_mode = #tpu.pipeline_mode<synchronous>, transform_indices = @transform_3, window_bounds = array<i64: 9, 128, 128>}, {pipeline_mode = #tpu.pipeline_mode<synchronous>, transform_indices = @transform_4, window_bounds = array<i64: 1, 128>}, {transform_indices = @transform_5, window_bounds = array<i64: 1, 16, 32, 128>}]} {
    %c16_i32 = arith.constant 16 : i32
    %0 = arith.muli %arg1, %c16_i32 : i32
    %c0 = arith.constant 0 : index
    %1 = arith.index_cast %0 : i32 to index
    %c0_0 = arith.constant 0 : index
    %c0_1 = arith.constant 0 : index
    %2 = vector.load %arg2[%c0, %1, %c0_0, %c0_1] : memref<1x22x32x128xbf16, #tpu.memory_space<vmem>>, vector<1x22x32x128xbf16>
    %3 = vector.shape_cast %2 : vector<1x22x32x128xbf16> to vector<22x32x128xbf16>
    %4 = vector.shape_cast %3 : vector<22x32x128xbf16> to vector<704x128xbf16>
    %5 = vector.extract_strided_slice %4 {offsets = [0, 0], sizes = [640, 128], strides = [1, 1]} : vector<704x128xbf16> to vector<640x128xbf16>
    %c0_2 = arith.constant 0 : index
    %c0_3 = arith.constant 0 : index
    %c0_4 = arith.constant 0 : index
    %6 = vector.load %arg3[%c0_2, %c0_3, %c0_4] : memref<9x128x128xbf16, #tpu.memory_space<vmem>>, vector<1x128x128xbf16>
    %7 = vector.shape_cast %6 : vector<1x128x128xbf16> to vector<128x128xbf16>
    %cst = arith.constant dense<0.000000e+00> : vector<640x128xf32>
    %8 = tpu.matmul %5, %7, %cst {dimension_numbers = #tpu.dot_dimension_numbers<[1], [0], [0], [1], [0, 0, 1, 1], [], []>} : vector<640x128xbf16>, vector<128x128xbf16>, vector<640x128xf32> -> vector<640x128xf32>
    %9 = vector.extract_strided_slice %4 {offsets = [32, 0], sizes = [640, 128], strides = [1, 1]} : vector<704x128xbf16> to vector<640x128xbf16>
    %c3 = arith.constant 3 : index
    %c0_5 = arith.constant 0 : index
    %c0_6 = arith.constant 0 : index
    %10 = vector.load %arg3[%c3, %c0_5, %c0_6] : memref<9x128x128xbf16, #tpu.memory_space<vmem>>, vector<1x128x128xbf16>
    %11 = vector.shape_cast %10 : vector<1x128x128xbf16> to vector<128x128xbf16>
    %cst_7 = arith.constant dense<0.000000e+00> : vector<640x128xf32>
    %12 = tpu.matmul %9, %11, %cst_7 {dimension_numbers = #tpu.dot_dimension_numbers<[1], [0], [0], [1], [0, 0, 1, 1], [], []>} : vector<640x128xbf16>, vector<128x128xbf16>, vector<640x128xf32> -> vector<640x128xf32>
    %13 = arith.addf %8, %12 : vector<640x128xf32>
    %14 = vector.extract_strided_slice %4 {offsets = [64, 0], sizes = [640, 128], strides = [1, 1]} : vector<704x128xbf16> to vector<640x128xbf16>
    %c6 = arith.constant 6 : index
    %c0_8 = arith.constant 0 : index
    %c0_9 = arith.constant 0 : index
    %15 = vector.load %arg3[%c6, %c0_8, %c0_9] : memref<9x128x128xbf16, #tpu.memory_space<vmem>>, vector<1x128x128xbf16>
    %16 = vector.shape_cast %15 : vector<1x128x128xbf16> to vector<128x128xbf16>
    %cst_10 = arith.constant dense<0.000000e+00> : vector<640x128xf32>
    %17 = tpu.matmul %14, %16, %cst_10 {dimension_numbers = #tpu.dot_dimension_numbers<[1], [0], [0], [1], [0, 0, 1, 1], [], []>} : vector<640x128xbf16>, vector<128x128xbf16>, vector<640x128xf32> -> vector<640x128xf32>
    %18 = arith.addf %13, %17 : vector<640x128xf32>
    %19 = vector.extract_strided_slice %18 {offsets = [0, 0], sizes = [608, 128], strides = [1, 1]} : vector<640x128xf32> to vector<608x128xf32>
    %20 = vector.extract_strided_slice %4 {offsets = [0, 0], sizes = [640, 128], strides = [1, 1]} : vector<704x128xbf16> to vector<640x128xbf16>
    %c1 = arith.constant 1 : index
    %c0_11 = arith.constant 0 : index
    %c0_12 = arith.constant 0 : index
    %21 = vector.load %arg3[%c1, %c0_11, %c0_12] : memref<9x128x128xbf16, #tpu.memory_space<vmem>>, vector<1x128x128xbf16>
    %22 = vector.shape_cast %21 : vector<1x128x128xbf16> to vector<128x128xbf16>
    %cst_13 = arith.constant dense<0.000000e+00> : vector<640x128xf32>
    %23 = tpu.matmul %20, %22, %cst_13 {dimension_numbers = #tpu.dot_dimension_numbers<[1], [0], [0], [1], [0, 0, 1, 1], [], []>} : vector<640x128xbf16>, vector<128x128xbf16>, vector<640x128xf32> -> vector<640x128xf32>
    %24 = vector.extract_strided_slice %4 {offsets = [32, 0], sizes = [640, 128], strides = [1, 1]} : vector<704x128xbf16> to vector<640x128xbf16>
    %c4 = arith.constant 4 : index
    %c0_14 = arith.constant 0 : index
    %c0_15 = arith.constant 0 : index
    %25 = vector.load %arg3[%c4, %c0_14, %c0_15] : memref<9x128x128xbf16, #tpu.memory_space<vmem>>, vector<1x128x128xbf16>
    %26 = vector.shape_cast %25 : vector<1x128x128xbf16> to vector<128x128xbf16>
    %cst_16 = arith.constant dense<0.000000e+00> : vector<640x128xf32>
    %27 = tpu.matmul %24, %26, %cst_16 {dimension_numbers = #tpu.dot_dimension_numbers<[1], [0], [0], [1], [0, 0, 1, 1], [], []>} : vector<640x128xbf16>, vector<128x128xbf16>, vector<640x128xf32> -> vector<640x128xf32>
    %28 = arith.addf %23, %27 : vector<640x128xf32>
    %29 = vector.extract_strided_slice %4 {offsets = [64, 0], sizes = [640, 128], strides = [1, 1]} : vector<704x128xbf16> to vector<640x128xbf16>
    %c7 = arith.constant 7 : index
    %c0_17 = arith.constant 0 : index
    %c0_18 = arith.constant 0 : index
    %30 = vector.load %arg3[%c7, %c0_17, %c0_18] : memref<9x128x128xbf16, #tpu.memory_space<vmem>>, vector<1x128x128xbf16>
    %31 = vector.shape_cast %30 : vector<1x128x128xbf16> to vector<128x128xbf16>
    %cst_19 = arith.constant dense<0.000000e+00> : vector<640x128xf32>
    %32 = tpu.matmul %29, %31, %cst_19 {dimension_numbers = #tpu.dot_dimension_numbers<[1], [0], [0], [1], [0, 0, 1, 1], [], []>} : vector<640x128xbf16>, vector<128x128xbf16>, vector<640x128xf32> -> vector<640x128xf32>
    %33 = arith.addf %28, %32 : vector<640x128xf32>
    %34 = vector.extract_strided_slice %33 {offsets = [1, 0], sizes = [608, 128], strides = [1, 1]} : vector<640x128xf32> to vector<608x128xf32>
    %35 = arith.addf %19, %34 : vector<608x128xf32>
    %36 = vector.extract_strided_slice %4 {offsets = [0, 0], sizes = [640, 128], strides = [1, 1]} : vector<704x128xbf16> to vector<640x128xbf16>
    %c2 = arith.constant 2 : index
    %c0_20 = arith.constant 0 : index
    %c0_21 = arith.constant 0 : index
    %37 = vector.load %arg3[%c2, %c0_20, %c0_21] : memref<9x128x128xbf16, #tpu.memory_space<vmem>>, vector<1x128x128xbf16>
    %38 = vector.shape_cast %37 : vector<1x128x128xbf16> to vector<128x128xbf16>
    %cst_22 = arith.constant dense<0.000000e+00> : vector<640x128xf32>
    %39 = tpu.matmul %36, %38, %cst_22 {dimension_numbers = #tpu.dot_dimension_numbers<[1], [0], [0], [1], [0, 0, 1, 1], [], []>} : vector<640x128xbf16>, vector<128x128xbf16>, vector<640x128xf32> -> vector<640x128xf32>
    %40 = vector.extract_strided_slice %4 {offsets = [32, 0], sizes = [640, 128], strides = [1, 1]} : vector<704x128xbf16> to vector<640x128xbf16>
    %c5 = arith.constant 5 : index
    %c0_23 = arith.constant 0 : index
    %c0_24 = arith.constant 0 : index
    %41 = vector.load %arg3[%c5, %c0_23, %c0_24] : memref<9x128x128xbf16, #tpu.memory_space<vmem>>, vector<1x128x128xbf16>
    %42 = vector.shape_cast %41 : vector<1x128x128xbf16> to vector<128x128xbf16>
    %cst_25 = arith.constant dense<0.000000e+00> : vector<640x128xf32>
    %43 = tpu.matmul %40, %42, %cst_25 {dimension_numbers = #tpu.dot_dimension_numbers<[1], [0], [0], [1], [0, 0, 1, 1], [], []>} : vector<640x128xbf16>, vector<128x128xbf16>, vector<640x128xf32> -> vector<640x128xf32>
    %44 = arith.addf %39, %43 : vector<640x128xf32>
    %45 = vector.extract_strided_slice %4 {offsets = [64, 0], sizes = [640, 128], strides = [1, 1]} : vector<704x128xbf16> to vector<640x128xbf16>
    %c8 = arith.constant 8 : index
    %c0_26 = arith.constant 0 : index
    %c0_27 = arith.constant 0 : index
    %46 = vector.load %arg3[%c8, %c0_26, %c0_27] : memref<9x128x128xbf16, #tpu.memory_space<vmem>>, vector<1x128x128xbf16>
    %47 = vector.shape_cast %46 : vector<1x128x128xbf16> to vector<128x128xbf16>
    %cst_28 = arith.constant dense<0.000000e+00> : vector<640x128xf32>
    %48 = tpu.matmul %45, %47, %cst_28 {dimension_numbers = #tpu.dot_dimension_numbers<[1], [0], [0], [1], [0, 0, 1, 1], [], []>} : vector<640x128xbf16>, vector<128x128xbf16>, vector<640x128xf32> -> vector<640x128xf32>
    %49 = arith.addf %44, %48 : vector<640x128xf32>
    %50 = vector.extract_strided_slice %49 {offsets = [2, 0], sizes = [608, 128], strides = [1, 1]} : vector<640x128xf32> to vector<608x128xf32>
    %51 = arith.addf %35, %50 : vector<608x128xf32>
    %c0_29 = arith.constant 0 : index
    %c0_30 = arith.constant 0 : index
    %52 = vector.load %arg4[%c0_29, %c0_30] : memref<1x128xf32, #tpu.memory_space<vmem>>, vector<1x128xf32>
    %53 = vector.broadcast %52 : vector<1x128xf32> to vector<608x128xf32>
    %54 = arith.addf %51, %53 : vector<608x128xf32>
    %cst_31 = arith.constant 0.000000e+00 : f32
    %55 = vector.broadcast %cst_31 : f32 to vector<608x128xf32>
    %56 = arith.maximumf %54, %55 : vector<608x128xf32>
    %57 = vector.shape_cast %56 : vector<608x128xf32> to vector<19x32x128xf32>
    %58 = tpu.iota {dimensions = array<i32: 1>} : vector<19x32x128xi32>
    %59 = tpu.iota {dimensions = array<i32: 0>} : vector<19x32x128xi32>
    %c16_i32_32 = arith.constant 16 : i32
    %60 = vector.broadcast %c16_i32_32 : i32 to vector<19x32x128xi32>
    %61 = arith.cmpi slt, %58, %60 : vector<19x32x128xi32>
    %c0_i32 = arith.constant 0 : i32
    %62 = vector.broadcast %c0_i32 : i32 to vector<19x32x128xi32>
    %63 = arith.cmpi sgt, %59, %62 : vector<19x32x128xi32>
    %c0_i32_33 = arith.constant 0 : i32
    %64 = arith.cmpi sgt, %arg1, %c0_i32_33 : i32
    %65 = vector.broadcast %64 : i1 to vector<19x32x128xi1>
    %66 = arith.ori %63, %65 : vector<19x32x128xi1>
    %67 = arith.andi %61, %66 : vector<19x32x128xi1>
    %c17_i32 = arith.constant 17 : i32
    %68 = vector.broadcast %c17_i32 : i32 to vector<19x32x128xi32>
    %69 = arith.cmpi slt, %59, %68 : vector<19x32x128xi32>
    %c0_i32_34 = arith.constant 0 : i32
    %70 = arith.cmpi slt, %arg1, %c0_i32_34 : i32
    %71 = vector.broadcast %70 : i1 to vector<19x32x128xi1>
    %72 = arith.ori %69, %71 : vector<19x32x128xi1>
    %73 = arith.andi %67, %72 : vector<19x32x128xi1>
    %cst_35 = arith.constant 0.000000e+00 : f32
    %74 = vector.broadcast %cst_35 : f32 to vector<19x32x128xf32>
    %75 = arith.select %73, %57, %74 : vector<19x32x128xi1>, vector<19x32x128xf32>
    %76 = vector.shape_cast %75 : vector<19x32x128xf32> to vector<608x128xf32>
    %77 = arith.truncf %76 : vector<608x128xf32> to vector<608x128xbf16>
    %cst_36 = arith.constant 0.000000e+00 : bf16
    %78 = vector.broadcast %cst_36 : bf16 to vector<16x128xbf16>
    %79 = tpu.concatenate %78, %77 in 0 : vector<16x128xbf16>, vector<608x128xbf16> -> vector<624x128xbf16>
    %80 = vector.extract_strided_slice %79 {offsets = [0, 0], sizes = [536, 128], strides = [1, 1]} : vector<624x128xbf16> to vector<536x128xbf16>
    %c0_37 = arith.constant 0 : index
    %c0_38 = arith.constant 0 : index
    %c0_39 = arith.constant 0 : index
    %81 = vector.load %arg5[%c0_37, %c0_38, %c0_39] : memref<9x128x128xbf16, #tpu.memory_space<vmem>>, vector<1x128x128xbf16>
    %82 = vector.shape_cast %81 : vector<1x128x128xbf16> to vector<128x128xbf16>
    %cst_40 = arith.constant dense<0.000000e+00> : vector<536x128xf32>
    %83 = tpu.matmul %80, %82, %cst_40 {dimension_numbers = #tpu.dot_dimension_numbers<[1], [0], [0], [1], [0, 0, 1, 1], [], []>} : vector<536x128xbf16>, vector<128x128xbf16>, vector<536x128xf32> -> vector<536x128xf32>
    %84 = vector.extract_strided_slice %79 {offsets = [32, 0], sizes = [536, 128], strides = [1, 1]} : vector<624x128xbf16> to vector<536x128xbf16>
    %c3_41 = arith.constant 3 : index
    %c0_42 = arith.constant 0 : index
    %c0_43 = arith.constant 0 : index
    %85 = vector.load %arg5[%c3_41, %c0_42, %c0_43] : memref<9x128x128xbf16, #tpu.memory_space<vmem>>, vector<1x128x128xbf16>
    %86 = vector.shape_cast %85 : vector<1x128x128xbf16> to vector<128x128xbf16>
    %cst_44 = arith.constant dense<0.000000e+00> : vector<536x128xf32>
    %87 = tpu.matmul %84, %86, %cst_44 {dimension_numbers = #tpu.dot_dimension_numbers<[1], [0], [0], [1], [0, 0, 1, 1], [], []>} : vector<536x128xbf16>, vector<128x128xbf16>, vector<536x128xf32> -> vector<536x128xf32>
    %88 = arith.addf %83, %87 : vector<536x128xf32>
    %89 = vector.extract_strided_slice %79 {offsets = [64, 0], sizes = [536, 128], strides = [1, 1]} : vector<624x128xbf16> to vector<536x128xbf16>
    %c6_45 = arith.constant 6 : index
    %c0_46 = arith.constant 0 : index
    %c0_47 = arith.constant 0 : index
    %90 = vector.load %arg5[%c6_45, %c0_46, %c0_47] : memref<9x128x128xbf16, #tpu.memory_space<vmem>>, vector<1x128x128xbf16>
    %91 = vector.shape_cast %90 : vector<1x128x128xbf16> to vector<128x128xbf16>
    %cst_48 = arith.constant dense<0.000000e+00> : vector<536x128xf32>
    %92 = tpu.matmul %89, %91, %cst_48 {dimension_numbers = #tpu.dot_dimension_numbers<[1], [0], [0], [1], [0, 0, 1, 1], [], []>} : vector<536x128xbf16>, vector<128x128xbf16>, vector<536x128xf32> -> vector<536x128xf32>
    %93 = arith.addf %88, %92 : vector<536x128xf32>
    %94 = vector.extract_strided_slice %93 {offsets = [15, 0], sizes = [512, 128], strides = [1, 1]} : vector<536x128xf32> to vector<512x128xf32>
    %95 = vector.extract_strided_slice %79 {offsets = [0, 0], sizes = [536, 128], strides = [1, 1]} : vector<624x128xbf16> to vector<536x128xbf16>
    %c1_49 = arith.constant 1 : index
    %c0_50 = arith.constant 0 : index
    %c0_51 = arith.constant 0 : index
    %96 = vector.load %arg5[%c1_49, %c0_50, %c0_51] : memref<9x128x128xbf16, #tpu.memory_space<vmem>>, vector<1x128x128xbf16>
    %97 = vector.shape_cast %96 : vector<1x128x128xbf16> to vector<128x128xbf16>
    %cst_52 = arith.constant dense<0.000000e+00> : vector<536x128xf32>
    %98 = tpu.matmul %95, %97, %cst_52 {dimension_numbers = #tpu.dot_dimension_numbers<[1], [0], [0], [1], [0, 0, 1, 1], [], []>} : vector<536x128xbf16>, vector<128x128xbf16>, vector<536x128xf32> -> vector<536x128xf32>
    %99 = vector.extract_strided_slice %79 {offsets = [32, 0], sizes = [536, 128], strides = [1, 1]} : vector<624x128xbf16> to vector<536x128xbf16>
    %c4_53 = arith.constant 4 : index
    %c0_54 = arith.constant 0 : index
    %c0_55 = arith.constant 0 : index
    %100 = vector.load %arg5[%c4_53, %c0_54, %c0_55] : memref<9x128x128xbf16, #tpu.memory_space<vmem>>, vector<1x128x128xbf16>
    %101 = vector.shape_cast %100 : vector<1x128x128xbf16> to vector<128x128xbf16>
    %cst_56 = arith.constant dense<0.000000e+00> : vector<536x128xf32>
    %102 = tpu.matmul %99, %101, %cst_56 {dimension_numbers = #tpu.dot_dimension_numbers<[1], [0], [0], [1], [0, 0, 1, 1], [], []>} : vector<536x128xbf16>, vector<128x128xbf16>, vector<536x128xf32> -> vector<536x128xf32>
    %103 = arith.addf %98, %102 : vector<536x128xf32>
    %104 = vector.extract_strided_slice %79 {offsets = [64, 0], sizes = [536, 128], strides = [1, 1]} : vector<624x128xbf16> to vector<536x128xbf16>
    %c7_57 = arith.constant 7 : index
    %c0_58 = arith.constant 0 : index
    %c0_59 = arith.constant 0 : index
    %105 = vector.load %arg5[%c7_57, %c0_58, %c0_59] : memref<9x128x128xbf16, #tpu.memory_space<vmem>>, vector<1x128x128xbf16>
    %106 = vector.shape_cast %105 : vector<1x128x128xbf16> to vector<128x128xbf16>
    %cst_60 = arith.constant dense<0.000000e+00> : vector<536x128xf32>
    %107 = tpu.matmul %104, %106, %cst_60 {dimension_numbers = #tpu.dot_dimension_numbers<[1], [0], [0], [1], [0, 0, 1, 1], [], []>} : vector<536x128xbf16>, vector<128x128xbf16>, vector<536x128xf32> -> vector<536x128xf32>
    %108 = arith.addf %103, %107 : vector<536x128xf32>
    %109 = vector.extract_strided_slice %108 {offsets = [16, 0], sizes = [512, 128], strides = [1, 1]} : vector<536x128xf32> to vector<512x128xf32>
    %110 = arith.addf %94, %109 : vector<512x128xf32>
    %111 = vector.extract_strided_slice %79 {offsets = [0, 0], sizes = [536, 128], strides = [1, 1]} : vector<624x128xbf16> to vector<536x128xbf16>
    %c2_61 = arith.constant 2 : index
    %c0_62 = arith.constant 0 : index
    %c0_63 = arith.constant 0 : index
    %112 = vector.load %arg5[%c2_61, %c0_62, %c0_63] : memref<9x128x128xbf16, #tpu.memory_space<vmem>>, vector<1x128x128xbf16>
    %113 = vector.shape_cast %112 : vector<1x128x128xbf16> to vector<128x128xbf16>
    %cst_64 = arith.constant dense<0.000000e+00> : vector<536x128xf32>
    %114 = tpu.matmul %111, %113, %cst_64 {dimension_numbers = #tpu.dot_dimension_numbers<[1], [0], [0], [1], [0, 0, 1, 1], [], []>} : vector<536x128xbf16>, vector<128x128xbf16>, vector<536x128xf32> -> vector<536x128xf32>
    %115 = vector.extract_strided_slice %79 {offsets = [32, 0], sizes = [536, 128], strides = [1, 1]} : vector<624x128xbf16> to vector<536x128xbf16>
    %c5_65 = arith.constant 5 : index
    %c0_66 = arith.constant 0 : index
    %c0_67 = arith.constant 0 : index
    %116 = vector.load %arg5[%c5_65, %c0_66, %c0_67] : memref<9x128x128xbf16, #tpu.memory_space<vmem>>, vector<1x128x128xbf16>
    %117 = vector.shape_cast %116 : vector<1x128x128xbf16> to vector<128x128xbf16>
    %cst_68 = arith.constant dense<0.000000e+00> : vector<536x128xf32>
    %118 = tpu.matmul %115, %117, %cst_68 {dimension_numbers = #tpu.dot_dimension_numbers<[1], [0], [0], [1], [0, 0, 1, 1], [], []>} : vector<536x128xbf16>, vector<128x128xbf16>, vector<536x128xf32> -> vector<536x128xf32>
    %119 = arith.addf %114, %118 : vector<536x128xf32>
    %120 = vector.extract_strided_slice %79 {offsets = [64, 0], sizes = [536, 128], strides = [1, 1]} : vector<624x128xbf16> to vector<536x128xbf16>
    %c8_69 = arith.constant 8 : index
    %c0_70 = arith.constant 0 : index
    %c0_71 = arith.constant 0 : index
    %121 = vector.load %arg5[%c8_69, %c0_70, %c0_71] : memref<9x128x128xbf16, #tpu.memory_space<vmem>>, vector<1x128x128xbf16>
    %122 = vector.shape_cast %121 : vector<1x128x128xbf16> to vector<128x128xbf16>
    %cst_72 = arith.constant dense<0.000000e+00> : vector<536x128xf32>
    %123 = tpu.matmul %120, %122, %cst_72 {dimension_numbers = #tpu.dot_dimension_numbers<[1], [0], [0], [1], [0, 0, 1, 1], [], []>} : vector<536x128xbf16>, vector<128x128xbf16>, vector<536x128xf32> -> vector<536x128xf32>
    %124 = arith.addf %119, %123 : vector<536x128xf32>
    %125 = vector.extract_strided_slice %124 {offsets = [17, 0], sizes = [512, 128], strides = [1, 1]} : vector<536x128xf32> to vector<512x128xf32>
    %126 = arith.addf %110, %125 : vector<512x128xf32>
    %127 = vector.extract_strided_slice %4 {offsets = [65, 0], sizes = [512, 128], strides = [1, 1]} : vector<704x128xbf16> to vector<512x128xbf16>
    %128 = arith.extf %127 : vector<512x128xbf16> to vector<512x128xf32>
    %c0_73 = arith.constant 0 : index
    %c0_74 = arith.constant 0 : index
    %129 = vector.load %arg6[%c0_73, %c0_74] : memref<1x128xf32, #tpu.memory_space<vmem>>, vector<1x128xf32>
    %130 = vector.broadcast %129 : vector<1x128xf32> to vector<512x128xf32>
    %131 = arith.addf %126, %130 : vector<512x128xf32>
    %132 = arith.addf %131, %128 : vector<512x128xf32>
    %cst_75 = arith.constant 0.000000e+00 : f32
    %133 = vector.broadcast %cst_75 : f32 to vector<512x128xf32>
    %134 = arith.maximumf %132, %133 : vector<512x128xf32>
    %135 = vector.shape_cast %134 : vector<512x128xf32> to vector<16x32x128xf32>
    %c0_76 = arith.constant 0 : index
    %c0_77 = arith.constant 0 : index
    %c0_78 = arith.constant 0 : index
    %c0_79 = arith.constant 0 : index
    %136 = vector.load %arg7[%c0_76, %c0_77, %c0_78, %c0_79] : memref<1x16x32x128xf32, #tpu.memory_space<vmem>>, vector<1x16x32x128xf32>
    %137 = vector.shape_cast %136 : vector<1x16x32x128xf32> to vector<16x32x128xf32>
    %138 = vector.shape_cast %135 : vector<16x32x128xf32> to vector<1x16x32x128xf32>
    tpu.vector_store %arg7[%c0_76, %c0_77, %c0_78, %c0_79], %138 {strides = array<i32>} : memref<1x16x32x128xf32, #tpu.memory_space<vmem>>, vector<1x16x32x128xf32>,
    return
  }
  func.func @transform_0(%arg0: i32, %arg1: i32) -> (i32, i32, i32, i32) {
    %c0_i32 = arith.constant 0 : i32
    %c0_i32_0 = arith.constant 0 : i32
    %c0_i32_1 = arith.constant 0 : i32
    %c0_i32_2 = arith.constant 0 : i32
    return %arg0, %c0_i32, %c0_i32_0, %c0_i32_1 : i32, i32, i32, i32
  }
  func.func @transform_1(%arg0: i32, %arg1: i32) -> (i32, i32, i32) {
    %c0_i32 = arith.constant 0 : i32
    %c0_i32_0 = arith.constant 0 : i32
    %c0_i32_1 = arith.constant 0 : i32
    %c0_i32_2 = arith.constant 0 : i32
    return %c0_i32, %c0_i32_0, %c0_i32_1 : i32, i32, i32
  }
  func.func @transform_2(%arg0: i32, %arg1: i32) -> (i32, i32) {
    %c0_i32 = arith.constant 0 : i32
    %c0_i32_0 = arith.constant 0 : i32
    %c0_i32_1 = arith.constant 0 : i32
    return %c0_i32, %c0_i32_0 : i32, i32
  }
  func.func @transform_3(%arg0: i32, %arg1: i32) -> (i32, i32, i32) {
    %c0_i32 = arith.constant 0 : i32
    %c0_i32_0 = arith.constant 0 : i32
    %c0_i32_1 = arith.constant 0 : i32
    %c0_i32_2 = arith.constant 0 : i32
    return %c0_i32, %c0_i32_0, %c0_i32_1 : i32, i32, i32
  }
  func.func @transform_4(%arg0: i32, %arg1: i32) -> (i32, i32) {
    %c0_i32 = arith.constant 0 : i32
    %c0_i32_0 = arith.constant 0 : i32
    %c0_i32_1 = arith.constant 0 : i32
    return %c0_i32, %c0_i32_0 : i32, i32
  }
  func.func @transform_5(%arg0: i32, %arg1: i32) -> (i32, i32, i32, i32) {
    %c0_i32 = arith.constant 0 : i32
    %c0_i32_0 = arith.constant 0 : i32
    %c0_i32_1 = arith.constant 0 : i32
    return %arg0, %arg1, %c0_i32, %c0_i32_0 : i32, i32, i32, i32
  }
}

</mosaic_0001>

<bundles_post_ra>
// kernel: tpu_custom_call.1
= control target key start
LH: loop header
LB: loop body
LE: loop exit
PB: predicated region body
PF: predicated region fallthrough
CT: control target
= control target key end

     0   :  { %s13041_s0 = inlined_call_operand.hbm [shape: bf16[2,22,32,128], index: 0, kind: input, shape index: {}]   ;;  %s13042_s1 = inlined_call_operand.hbm [shape: bf16[9,128,128], index: 1, kind: input, shape index: {}]   ;;  %s13043_s2 = inlined_call_operand.vmem [shape: f32[1,128], index: 2, kind: input, shape index: {}]   ;;  %s13044_s3 = inlined_call_operand.hbm [shape: bf16[9,128,128], index: 3, kind: input, shape index: {}]   ;;  %s13045_s4 = inlined_call_operand.vmem [shape: f32[1,128], index: 4, kind: input, shape index: {}]   ;;  %s13046_s5 = inlined_call_operand.hbm [shape: f32[2,16,32,128], index: 5, kind: output, shape index: {}]  }
   0x1   :  { %13060 = sst [smem:[#allocation103_spill]] %s13042_s1 }
   0x2   :  { %13061 = sst [smem:[#allocation104_spill]] %s13044_s3 }
   0x3   :  { %10 = vsyncpa [#allocation3], 0 }
   0x4   :  { %12 = vsyncpa [#allocation3 + $0x1], 0 }
   0x5   :  { %13 = vsyncpa [#allocation6], 0 }
   0x6   :  { %14 = vsyncpa [#allocation4], 0 }
   0x7   :  { %16 = vsyncpa [#allocation4 + $0x1], 0  ;;  %s9946_s18 = smov 0   ;;  %s9948_s19 = smov 0  }
   0x8   :  { %s9950_s20 = smov 0   ;;  %s9952_s21 = smov 0  }
   0x9   :  { %s9954_s22 = smov 0   ;;  %s9956_s23 = smov 0  }
   0xa LB: > { %s8566_s24 = sadd.s32 4294967295, %s9906_s23   ;;  %s8567_s25 = sadd.s32 4294967294, %s9906_s23   ;;  %s9906_s23 = sphi %s9956_s23, %s22_s23   ;;  %s9902_s22 = sphi %s9954_s22, %s13529_s22   ;;  %s9898_s21 = sphi %s9952_s21, %s13528_s21   ;;  %s9894_s20 = sphi %s9950_s20, %s13527_s20   ;;  %s9890_s19 = sphi %s9948_s19, %s13526_s19   ;;  %s9886_s18 = sphi %s9946_s18, %s13525_s18  }
   0xb   : > { %p54_p0 = scmp.ne.s32.totalorder %s9890_s19, %s9886_s18  ;;  %p9980_p1 = scmp.eq.s32.totalorder %s8566_s24, 0 }
   0xc   : > { %p9984_p2 = scmp.eq.s32.totalorder %s8566_s24, 1  ;;  %p170_p3 = scmp.eq.s32.totalorder %s8567_s25, 1 }
   0xd   : > { %p9990_p4 = por %p9980_p1, %p54_p0  ;;  %p8568_p5 = scmp.ge.s32.totalorder %s9906_s23, 1 }
   0xe   : > { %p9995_p6 = por %p170_p3, %p54_p0  ;;  %p177_p7 = scmp.lt.s32.totalorder %s9906_s23, 3 }
   0xf   : > { %s13066_s1 = sld [smem:[#allocation103_spill]]  ;;  %s9908_s9 = smov [#allocation5]  }
  0x10   : > { %p10003_p8 = pnand %p8568_p5, %p177_p7  ;;  %s190_s10 = sshll.u32 %s9908_s9, 4  ;;  %s191_s10 = int_to_ptr.vmem [resolvable:$true] %s190_s10 }
  0x11   : > { %p8571_p11 = scmp.ge.s32.totalorder %s9906_s23, 2  ;;  %s13068_s3 = sld [smem:[#allocation104_spill]] }
  0x12   : > { %p9562_p9 = pneg %p10003_p8  ;;  %s13047_s14 = smov 64  }
  0x13   : > { %s13048_s15 = smov 4   ;;  %s9911_s16 = smov [#allocation7]  }
  0x14   : > { %p9563_p10 = pnand %p9562_p9, %p9980_p1  ;;  %s207_s17 = sshll.u32 %s9911_s16, 4  ;;  %s208_s17 = int_to_ptr.vmem [resolvable:$true] %s207_s17 }
  0x15   : > { %s188_s7 = sshll.u32 %s13066_s1, 4  ;;  %s34_s24 = sadd.s32 1, %s9902_s22  ;;  %s189_s7 = int_to_ptr.hbm [resolvable:$true] %s188_s7 }
  0x16   : > { %9565 = dma.hbm_to_vmem [thread:$0]  (!%p9563_p10), %s189_s7, 9216, %s191_s10, [#allocation6], %s13047_s14, %s13047_s14, %s13048_s15  }
  0x17   : > { %s205_s13 = sshll.u32 %s13068_s3, 4  ;;  %s41_s25 = sadd.s32 1, %s9894_s20  ;;  %s206_s13 = int_to_ptr.hbm [resolvable:$true] %s205_s13 }
  0x18   : > { %9568 = dma.hbm_to_vmem [thread:$0]  (!%p9563_p10), %s206_s13, 9216, %s208_s17, [#allocation6], %s13047_s14, %s13047_s14, %s13048_s15  }
  0x19   : > { %p36_p12 = scmp.ge.s32.totalorder %s34_s24, 2  ;;  %p48_p13 = scmp.ne.s32.totalorder %s9894_s20, %s9890_s19 }
  0x1a   : > { %p49_p0 = scmp.eq.s32.totalorder %s9906_s23, 0  ;;  %p9579_p3 = scmp.lt.s32.totalorder %s9906_s23, 2 }
  0x1b   : > { %s13531_s24 = smov (%p36_p12, %s34_s24), 0  ;;  %p10031_p7 = por %p9984_p2, %p48_p13 }
  0x1c   : > { %p50_p5 = por %p49_p0, %p48_p13  ;;  %s38_s6 = ssub.s32 %s9902_s22, %s13531_s24 }
  0x1d   : > { %s224_s7 = sand.u32 1, %s9894_s20   ;;  %p39_p9 = scmp.eq.s32.totalorder %s38_s6, 0 }
  0x1e   : > { %s9547_s9 = smul.u32 352, %s224_s7  ;;  %p9570_p10 = pnand %p9579_p3, %p50_p5 }
  0x1f   : > { %s10039_s10 = scalar_select %p39_p9, %s9894_s20, %s41_s25  }
  0x20   : > { %s9548_s11 = smul.u32 352, %s9902_s22  ;;  %s228_s12 = scalar_lea.vmem [#allocation2], %s9547_s9 }
  0x21   : > { %s236_s13 = sshll.u32 %s228_s12, 4  ;;  %s225_s15 = scalar_lea.sflag [#allocation3], %s224_s7  ;;  %s237_s13 = int_to_ptr.vmem [resolvable:$true] %s236_s13 }
  0x22   : > { %s233_s14 = scalar_lea.hbm %s13041_s0, %s9548_s11  ;;  %s13070_s1 = smov 4  }
  0x23   : > { %s234_s27 = sshll.u32 %s233_s14, 4  ;;  %s13071_s3 = smov 64   ;;  %s235_s27 = int_to_ptr.hbm [resolvable:$true] %s234_s27 }
  0x24   : > { %9572 = dma.hbm_to_vmem [thread:$0]  (!%p9570_p10), %s235_s27, 5632, %s237_s13, %s225_s15, %s13071_s3, %s13071_s3, %s13070_s1  }
  0x25   : > { %248 = sbr.rel (%p10003_p8) target bundleno = 3508 (0xdb4), region = 40 }
  0x2a   : > { %s10051_s25 = sand.u32 1, %s9890_s19  }
  0x2b   : > { %s9549_s6 = smul.u32 352, %s10051_s25  ;;  %s251_s9 = scalar_lea.sflag [#allocation3], %s10051_s25 }
  0x2d   : > { %s10055_s11 = scalar_lea.vmem [#allocation2], %s9549_s6 }
  0x2e   : > { %9873 = dma.done.wait (%p9990_p4), %s251_s9, 5632  }
  0x2f   : > { %9875 = vsyncadd (%p9990_p4), %s251_s9, 4294961664 }
  0x30   : > { %9877 = dma.done.wait (%p9980_p1), [#allocation6], 18432  }
  0x31   : > { %9879 = vsyncadd (%p9980_p1), [#allocation6], 4294948864  ;;  %v9393_v0 = vld [vmem:[#allocation5 + $0xf8] sm:$0xff]  ;;  %v9392_v2 = vld [vmem:[#allocation5 + $0xf0] sm:$0xff]  ;;  %vm2484_vm0 = vcmask 1046528   ;;  %vm3739_vm1 = vcmask 1045504  }
  0x32   : > { %v9385_v1 = vld [vmem:[#allocation5 + $0x38] sm:$0xff]  ;;  %707 = vmatpush.bf16.msra.mxu0 %v9393_v0  ;;  %v9384_v3 = vld [vmem:[#allocation5 + $0x30] sm:$0xff]  ;;  %9523 = vmatpush.bf16.msra.mxu3 %v9393_v0  ;;  %v9391_v4 = vld [vmem:[#allocation5 + $0xe8] sm:$0xff]  ;;  %s8576_s15 = sshll.u32 %s10051_s25, 9  ;;  %vm8184_vm2 = vcmask 1040384   ;;  %s9522_s27 = sshll.u32 %s9898_s21, 9 }
  0x33   : > { %970 = vmatpush.bf16.msra.mxu1 %v9385_v1  ;;  %v9383_v5 = vld [vmem:[#allocation5 + $0x28] sm:$0xff]  ;;  %v9401_v6 = vld [vmem:[#allocation5 + $0x1b8] sm:$0xff]  ;;  %v9390_v7 = vld [vmem:[#allocation5 + $0xe0] sm:$0xff]  ;;  %s12261_s7 = scalar_lea.vmem [#allocation8], %s8576_s15  ;;  %s8443_s3 = scalar_lea.sflag [#allocation4], %s10051_s25 }
  0x34   : > { %9539 = vmatpush.bf16.msra.mxu2 %v9401_v6  ;;  %v9382_v8 = vld [vmem:[#allocation5 + $0x20] sm:$0xff]  ;;  %v9389_v9 = vld [vmem:[#allocation5 + $0xd8] sm:$0xff]  ;;  %v9388_v11 = vld [vmem:[#allocation5 + $0xd0] sm:$0xff]  ;;  %s8458_s21 = sshll.u32 %s12261_s7, 4  ;;  %s9840_s15 = scalar_lea.hbm %s13046_s5, 1024  ;;  %s8459_s21 = int_to_ptr.vmem [resolvable:$true] %s8458_s21 }
  0x35   : > { %v9381_v10 = vld [vmem:[#allocation5 + $0x18] sm:$0xff]  ;;  %v9380_v12 = vld [vmem:[#allocation5 + $0x10] sm:$0xff]  ;;  %v9387_v13 = vld [vmem:[#allocation5 + $0xc8] sm:$0xff] }
  0x36   : > { %708 = vmatpush.bf16.msra.mxu0 %v9392_v2  ;;  %9524 = vmatpush.bf16.msra.mxu3 %v9392_v2  ;;  %v9379_v14 = vld [vmem:[#allocation5 + $0x8] sm:$0xff]  ;;  %v9386_v15 = vld [vmem:[#allocation5 + $0xc0] sm:$0xff]  ;;  %v10066_v17 = vld [vmem:[%s10055_s11 + $0x10] sm:$0xff] }
  0x37   : > { %971 = vmatpush.bf16.msra.mxu1 %v9384_v3  ;;  %v9378_v16 = vld [vmem:[#allocation5] sm:$0xff]  ;;  %v10071_v19 = vld [vmem:[%s10055_s11 + $0x18] sm:$0xff]  ;;  %v9335_v20 = vld [vmem:[%s10055_s11 + $0x8] sm:$0xff] }
  0x38   : > { %v9334_v18 = vld [vmem:[%s10055_s11] sm:$0xff]  ;;  %v9400_v22 = vld [vmem:[#allocation5 + $0x1b0] sm:$0xff]  ;;  %v10081_v23 = vld [vmem:[%s10055_s11 + $0x28] sm:$0xff] }
  0x39   : > { %v10076_v21 = vld [vmem:[%s10055_s11 + $0x20] sm:$0xff]  ;;  %9540 = vmatpush.bf16.msra.mxu2 %v9400_v22  ;;  %v10086_v24 = vld [vmem:[%s10055_s11 + $0x30] sm:$0xff]  ;;  %v10095_v26 = vld [vmem:[%s10055_s11 + $0x38] sm:$0xff] }
  0x3a   : > { %709 = vmatpush.bf16.msra.mxu0 %v9391_v4  ;;  %9525 = vmatpush.bf16.msra.mxu3 %v9391_v4  ;;  %v10091_v25 = vld [vmem:[%s10055_s11 + $0x140] sm:$0xff]  ;;  %v10100_v27 = vld [vmem:[%s10055_s11 + $0x148] sm:$0xff]  ;;  %v10118_v31 = vld [vmem:[%s10055_s11 + $0xd0] sm:$0xff] }
  0x3b   : > { %972 = vmatpush.bf16.msra.mxu1 %v9383_v5  ;;  %v10104_v28 = vld [vmem:[%s10055_s11 + $0x40] sm:$0xff]  ;;  %v10109_v29 = vld [vmem:[%s10055_s11 + $0xc8] sm:$0xff]  ;;  %v10122_v33 = vld [vmem:[%s10055_s11 + $0x50] sm:$0xff] }
  0x3c   : > { %v10113_v30 = vld [vmem:[%s10055_s11 + $0x48] sm:$0xff]  ;;  %v10127_v36 = vld [vmem:[%s10055_s11 + $0xd8] sm:$0xff]  ;;  %v10136_v42 = vld [vmem:[%s10055_s11 + $0xe0] sm:$0xff] }
  0x3d   : > { %v9399_v32 = vld [vmem:[#allocation5 + $0x1a8] sm:$0xff]  ;;  %v10131_v39 = vld [vmem:[%s10055_s11 + $0x58] sm:$0xff]  ;;  %v10140_v45 = vld [vmem:[%s10055_s11 + $0x60] sm:$0xff] }
  0x3e   : > { %710 = vmatpush.bf16.msra.mxu0 %v9390_v7  ;;  %9526 = vmatpush.bf16.msra.mxu3 %v9390_v7  ;;  %v10147_v49 = vld [vmem:[%s10055_s11 + $0xe8] sm:$0xff]  ;;  %v10158_v56 = vld [vmem:[%s10055_s11 + $0xf0] sm:$0xff]  ;;  %v9398_v59 = vld [vmem:[#allocation5 + $0x1a0] sm:$0xff] }
  0x3f   : > { %973 = vmatpush.bf16.msra.mxu1 %v9382_v8  ;;  %9541 = vmatpush.bf16.msra.mxu2 %v9399_v32  ;;  %v10153_v53 = vld [vmem:[%s10055_s11 + $0x68] sm:$0xff]  ;;  %v9397_v60 = vld [vmem:[#allocation5 + $0x198] sm:$0xff]  ;;  %v10162_v61 = vld [vmem:[%s10055_s11 + $0x70] sm:$0xff] }
  0x40   : > { %v10169_v2 = vld [vmem:[%s10055_s11 + $0xf8] sm:$0xff] }
  0x42   : > { %711 = vmatpush.bf16.msra.mxu0 %v9389_v9  ;;  %9527 = vmatpush.bf16.msra.mxu3 %v9389_v9  ;;  %v10175_v9 = vld [vmem:[%s10055_s11 + $0x98] sm:$0xff] }
  0x43   : > { %974 = vmatpush.bf16.msra.mxu1 %v9381_v10  ;;  %9542 = vmatpush.bf16.msra.mxu2 %v9398_v59 }
  0x46   : > { %712 = vmatpush.bf16.msra.mxu0 %v9388_v11  ;;  %9528 = vmatpush.bf16.msra.mxu3 %v9388_v11 }
  0x47   : > { %975 = vmatpush.bf16.msra.mxu1 %v9380_v12  ;;  %9543 = vmatpush.bf16.msra.mxu2 %v9397_v60 }
  0x4a   : > { %713 = vmatpush.bf16.msra.mxu0 %v9387_v13  ;;  %9529 = vmatpush.bf16.msra.mxu3 %v9387_v13 }
  0x4b   : > { %976 = vmatpush.bf16.msra.mxu1 %v9379_v14 }
  0x4e   : > { %714 = vmatpush.bf16.msra.mxu0 %v9386_v15  ;;  %9530 = vmatpush.bf16.msra.mxu3 %v9386_v15 }
  0x4f   : > { %977 = vmatpush.bf16.msra.mxu1 %v9378_v16 }
  0x51   : > { %715 = vmatmul.bf16.vlgmr.msra.gmra.mxu0 %v10066_v17  ;;  %903 = vmatmul.bf16.vlgmr.msra.gmra.mxu3 %v10091_v25 }
  0x52   : > { %1250 = vmatpush.bf16.msrb.mxu0 %v9401_v6  ;;  %9531 = vmatpush.bf16.msrb.mxu3 %v9385_v1  ;;  %v9396_v1 = vld [vmem:[#allocation5 + $0x190] sm:$0xff] }
  0x53   : > { %978 = vmatmul.bf16.vlgmr.msra.gmra.mxu1 %v9334_v18  ;;  %9544 = vmatpush.bf16.msra.mxu2 %v9396_v1 }
  0x56   : > { %9532 = vmatpush.bf16.msrb.mxu3 %v9384_v3  ;;  %1251 = vmatpush.bf16.msrb.mxu0 %v9400_v22  ;;  %v9395_v3 = vld [vmem:[#allocation5 + $0x188] sm:$0xff]  ;;  %v10191_v22 = vld [vmem:[%s10055_s11 + $0x80] sm:$0xff] }
  0x57   : > { %9545 = vmatpush.bf16.msra.mxu2 %v9395_v3 }
  0x5a   : > { %9533 = vmatpush.bf16.msrb.mxu3 %v9383_v5  ;;  %1252 = vmatpush.bf16.msrb.mxu0 %v9399_v32 }
  0x5e   : > { %9534 = vmatpush.bf16.msrb.mxu3 %v9382_v8  ;;  %1253 = vmatpush.bf16.msrb.mxu0 %v9398_v59  ;;  %v9394_v8 = vld [vmem:[#allocation5 + $0x180] sm:$0xff] }
  0x5f   : > { %9546 = vmatpush.bf16.msra.mxu2 %v9394_v8 }
  0x61   : > { %720 = vmatmul.bf16.gmra.mxu0 %v10071_v19  ;;  %906 = vmatmul.bf16.gmra.mxu3 %v10100_v27 }
  0x62   : > { %9535 = vmatpush.bf16.msrb.mxu3 %v9381_v10  ;;  %1254 = vmatpush.bf16.msrb.mxu0 %v9397_v60  ;;  %v10178_v10 = vld [vmem:[%s10055_s11 + $0x78] sm:$0xff]  ;;  %v10220_v60 = vld [vmem:[%s10055_s11 + $0xb0] sm:$0xff] }
  0x63   : > { %983 = vmatmul.bf16.gmra.mxu1 %v9335_v20  ;;  %1333 = vmatmul.bf16.vlgmr.msra.gmra.mxu2 %v10175_v9  ;;  %v10188_v20 = vld [vmem:[%s10055_s11 + $0xa0] sm:$0xff] }
  0x66   : > { %9536 = vmatpush.bf16.msrb.mxu3 %v9380_v12  ;;  %1255 = vmatpush.bf16.msrb.mxu0 %v9396_v1 }
  0x6a   : > { %9537 = vmatpush.bf16.msrb.mxu3 %v9379_v14  ;;  %1256 = vmatpush.bf16.msrb.mxu0 %v9395_v3  ;;  %v10184_v14 = vld [vmem:[%s10055_s11 + $0x100] sm:$0xff] }
  0x6e   : > { %9538 = vmatpush.bf16.msrb.mxu3 %v9378_v16  ;;  %1257 = vmatpush.bf16.msrb.mxu0 %v9394_v8 }
  0x71   : > { %725 = vmatmul.bf16.gmra.mxu0 %v10076_v21  ;;  %1103 = vmatmul.bf16.vlgmr.msrb.gmra.mxu3 %v10109_v29 }
  0x73   : > { %988 = vmatmul.bf16.gmra.mxu1 %v10066_v17  ;;  %1338 = vmatmul.bf16.gmra.mxu2 %v10188_v20 }
  0x81   : > { %730 = vmatmul.bf16.gmra.mxu0 %v10081_v23  ;;  %1108 = vmatmul.bf16.gmra.mxu3 %v10118_v31 }
  0x83   : > { %993 = vmatmul.bf16.gmra.mxu1 %v10071_v19 }
  0x91   : > { %735 = vmatmul.bf16.gmra.mxu0 %v10086_v24  ;;  %1113 = vmatmul.bf16.gmra.mxu3 %v10127_v36 }
  0x93   : > { %998 = vmatmul.bf16.gmra.mxu1 %v10076_v21 }
  0xa1   : > { %740 = vmatmul.bf16.gmra.mxu0 %v10095_v26  ;;  %1118 = vmatmul.bf16.gmra.mxu3 %v10136_v42 }
  0xa3   : > { %1003 = vmatmul.bf16.gmra.mxu1 %v10081_v23 }
  0xb1   : > { %745 = vmatmul.bf16.gmra.mxu0 %v10104_v28  ;;  %1123 = vmatmul.bf16.gmra.mxu3 %v10147_v49 }
  0xb3   : > { %1008 = vmatmul.bf16.gmra.mxu1 %v10086_v24 }
  0xc1   : > { %750 = vmatmul.bf16.gmra.mxu0 %v10113_v30  ;;  %1128 = vmatmul.bf16.gmra.mxu3 %v10158_v56 }
  0xc3   : > { %1013 = vmatmul.bf16.gmra.mxu1 %v10095_v26 }
  0xce   : > { %v716_v34 = vpop.f32.mrf.mxu0 }
  0xd0   : > { %v979_v35 = vpop.f32.mrf.mxu1 }
  0xd1   : > { %755 = vmatmul.bf16.gmra.mxu0 %v10122_v33  ;;  %1133 = vmatmul.bf16.gmra.mxu3 %v10169_v2 }
  0xd3   : > { %1018 = vmatmul.bf16.gmra.mxu1 %v10104_v28 }
  0xd4   : > { %v904_v7 = vpop.f32.mrf.mxu3 }
  0xd6   : > { %v718_v37 = vpop.f32.mrf.mxu0 }
  0xd8   : > { %v981_v38 = vpop.f32.mrf.mxu1 }
  0xd9   : > { %v10199_v38 = vld [vmem:[%s10055_s11 + $0x108] sm:$0xff] }
  0xdc   : > { %v905_v13 = vpop.f32.mrf.mxu3 }
  0xdd   : > { %v10239_v13 = vld [vmem:[%s10055_s11 + $0xb8] sm:$0xff] }
  0xde   : > { %v721_v40 = vpop.f32.mrf.mxu0 }
  0xe0   : > { %v984_v41 = vpop.f32.mrf.mxu1 }
  0xe1   : > { %760 = vmatmul.bf16.gmra.mxu0 %v10131_v39  ;;  %1138 = vmatmul.bf16.gmra.mxu3 %v10184_v14 }
  0xe3   : > { %1023 = vmatmul.bf16.gmra.mxu1 %v10113_v30 }
  0xe4   : > { %v907_v18 = vpop.f32.mrf.mxu3 }
  0xe6   : > { %v723_v43 = vpop.f32.mrf.mxu0 }
  0xe8   : > { %v986_v44 = vpop.f32.mrf.mxu1 }
  0xec   : > { %v908_v37 = vpop.f32.mrf.mxu3 }
  0xee   : > { %v726_v46 = vpop.f32.mrf.mxu0 }
  0xf0   : > { %v989_v47 = vpop.f32.mrf.mxu1 }
  0xf1   : > { %v10142_v48 = vadd.f32 %v989_v47, %v726_v46  ;;  %765 = vmatmul.bf16.gmra.mxu0 %v10140_v45  ;;  %1143 = vmatmul.bf16.gmra.mxu3 %v10199_v38  ;;  %v10205_v46 = vld [vmem:[%s10055_s11 + $0xa8] sm:$0xff] }
  0xf2   : > { %v10208_v47 = vld [vmem:[%s10055_s11 + $0x88] sm:$0xff]  ;;  %1343 = vmatmul.bf16.gmra.mxu2 %v10205_v46 }
  0xf3   : > { %1028 = vmatmul.bf16.gmra.mxu1 %v10122_v33 }
  0xf4   : > { %v1104_v44 = vpop.f32.mrf.mxu3 }
  0xf6   : > { %v728_v50 = vpop.f32.mrf.mxu0 }
  0xf8   : > { %v991_v51 = vpop.f32.mrf.mxu1 }
  0xf9   : > { %v10150_v52 = vadd.f32 %v991_v51, %v728_v50 }
  0xfe   : > { %v731_v54 = vpop.f32.mrf.mxu0 }
  0xff   : > { %v1106_v54 = vpop.f32.mrf.mxu3 }
 0x100   : > { %v994_v55 = vpop.f32.mrf.mxu1 }
 0x101   : > { %770 = vmatmul.bf16.gmra.mxu0 %v10153_v53  ;;  %v10214_v55 = vld [vmem:[%s10055_s11 + $0x110] sm:$0xff] }
 0x102   : > { %1148 = vmatmul.bf16.gmra.mxu3 %v10214_v55  ;;  %1348 = vmatmul.bf16.gmra.mxu2 %v10220_v60 }
 0x103   : > { %1033 = vmatmul.bf16.gmra.mxu1 %v10131_v39 }
 0x106   : > { %v733_v57 = vpop.f32.mrf.mxu0 }
 0x107   : > { %v10217_v59 = vpop.f32.mrf.mxu3 }
 0x108   : > { %v996_v58 = vpop.f32.mrf.mxu1 }
 0x10e   : > { %v736_v62 = vpop.f32.mrf.mxu0 }
 0x110   : > { %v999_v63 = vpop.f32.mrf.mxu1 }
 0x111   : > { %v10164_v0 = vadd.f32 %v999_v63, %v736_v62  ;;  %775 = vmatmul.bf16.gmra.mxu0 %v10162_v61  ;;  %v10223_v62 = vld [vmem:[%s10055_s11 + $0x90] sm:$0xff] }
 0x112   : > { %1353 = vmatmul.bf16.gmra.mxu2 %v10239_v13 }
 0x113   : > { %1038 = vmatmul.bf16.gmra.mxu1 %v10140_v45 }
 0x116   : > { %v738_v4 = vpop.f32.mrf.mxu0 }
 0x118   : > { %v1001_v5 = vpop.f32.mrf.mxu1 }
 0x119   : > { %v10172_v6 = vadd.f32 %v1001_v5, %v738_v4  ;;  %v10228_v4 = vpop.f32.mrf.mxu3  ;;  %v10233_v5 = vld [vmem:[%s10055_s11 + $0x118] sm:$0xff] }
 0x11a   : > { %13073 = vst [vmem:[#allocation13_spill] sm:$0xff] %v10228_v4  ;;  %1153 = vmatmul.bf16.gmra.mxu3 %v10233_v5 }
 0x11e   : > { %v741_v11 = vpop.f32.mrf.mxu0 }
 0x120   : > { %v1004_v12 = vpop.f32.mrf.mxu1 }
 0x121   : > { %780 = vmatmul.bf16.gmra.mxu0 %v10178_v10  ;;  %v1114_v12 = vpop.f32.mrf.mxu3 }
 0x123   : > { %1043 = vmatmul.bf16.gmra.mxu1 %v10153_v53 }
 0x126   : > { %v743_v15 = vpop.f32.mrf.mxu0 }
 0x128   : > { %v1006_v16 = vpop.f32.mrf.mxu1 }
 0x129   : > { %v1116_v18 = vpop.f32.mrf.mxu3 }
 0x12a   : > { %v9417_v18 = vld [vmem:[#allocation5 + $0x138] sm:$0xff] }
 0x12b   : > { %1609 = vmatpush.bf16.msra.mxu3 %v9417_v18  ;;  %v10283_v18 = vld [vmem:[%s10055_s11 + $0x138] sm:$0xff] }
 0x12e   : > { %v746_v32 = vpop.f32.mrf.mxu0 }
 0x130   : > { %v1009_v34 = vpop.f32.mrf.mxu1 }
 0x131   : > { %v10194_v35 = vadd.f32 %v1009_v34, %v746_v32  ;;  %785 = vmatmul.bf16.gmra.mxu0 %v10191_v22  ;;  %v10245_v32 = vld [vmem:[%s10055_s11 + $0x120] sm:$0xff] }
 0x132   : > { %1158 = vmatmul.bf16.gmra.mxu3 %v10245_v32 }
 0x133   : > { %1048 = vmatmul.bf16.gmra.mxu1 %v10162_v61 }
 0x136   : > { %v748_v40 = vpop.f32.mrf.mxu0 }
 0x138   : > { %v1011_v41 = vpop.f32.mrf.mxu1 }
 0x139   : > { %v10202_v43 = vadd.f32 %v1011_v41, %v748_v40  ;;  %v10248_v40 = vpop.f32.mrf.mxu3  ;;  %v10251_v41 = vld [vmem:[%s10055_s11 + $0xc0] sm:$0xff] }
 0x13a   : > { %1358 = vmatmul.bf16.gmra.mxu2 %v10251_v41 }
 0x13e   : > { %v751_v50 = vpop.f32.mrf.mxu0 }
 0x140   : > { %v1014_v51 = vpop.f32.mrf.mxu1 }
 0x141   : > { %790 = vmatmul.bf16.gmra.mxu0 %v10208_v47  ;;  %v10256_v54 = vpop.f32.mrf.mxu3 }
 0x142   : > { %13076 = vst [vmem:[#allocation16_spill] sm:$0xff] %v10256_v54 }
 0x143   : > { %1053 = vmatmul.bf16.gmra.mxu1 %v10178_v10 }
 0x146   : > { %v753_v57 = vpop.f32.mrf.mxu0 }
 0x147   : > { %v10261_v57 = vld [vmem:[%s10055_s11 + $0x128] sm:$0xff] }
 0x148   : > { %v1016_v58 = vpop.f32.mrf.mxu1  ;;  %1163 = vmatmul.bf16.gmra.mxu3 %v10261_v57 }
 0x14a   : > { %1363 = vmatmul.bf16.gmra.mxu2 %v10109_v29 }
 0x14e   : > { %v756_v63 = vpop.f32.mrf.mxu0 }
 0x150   : > { %v1019_v1 = vpop.f32.mrf.mxu1 }
 0x151   : > { %v10226_v3 = vadd.f32 %v1019_v1, %v756_v63  ;;  %795 = vmatmul.bf16.gmra.mxu0 %v10223_v62 }
 0x153   : > { %13072 = vst [vmem:[#allocation12_spill] sm:$0xff] %v10226_v3  ;;  %1058 = vmatmul.bf16.gmra.mxu1 %v10191_v22 }
 0x156   : > { %v758_v7 = vpop.f32.mrf.mxu0 }
 0x158   : > { %v1021_v8 = vpop.f32.mrf.mxu1 }
 0x159   : > { %v10236_v11 = vadd.f32 %v1021_v8, %v758_v7  ;;  %v1124_v7 = vpop.f32.mrf.mxu3 }
 0x15a   : > { %1368 = vmatmul.bf16.gmra.mxu2 %v10118_v31 }
 0x15b   : > { %13074 = vst [vmem:[#allocation14_spill] sm:$0xff] %v10236_v11 }
 0x15e   : > { %v761_v15 = vpop.f32.mrf.mxu0 }
 0x160   : > { %v1024_v16 = vpop.f32.mrf.mxu1 }
 0x161   : > { %800 = vmatmul.bf16.gmra.mxu0 %v10175_v9  ;;  %v1126_v15 = vpop.f32.mrf.mxu3  ;;  %v10270_v16 = vld [vmem:[%s10055_s11 + $0x130] sm:$0xff] }
 0x162   : > { %1166 = vmatmul.bf16.gmra.mxu3 %v10270_v16  ;;  %v9414_v15 = vld [vmem:[#allocation5 + $0x120] sm:$0xff] }
 0x163   : > { %1063 = vmatmul.bf16.gmra.mxu1 %v10208_v47 }
 0x166   : > { %v763_v34 = vpop.f32.mrf.mxu0 }
 0x168   : > { %v1026_v37 = vpop.f32.mrf.mxu1 }
 0x16a   : > { %1373 = vmatmul.bf16.gmra.mxu2 %v10127_v36 }
 0x16e   : > { %v766_v44 = vpop.f32.mrf.mxu0 }
 0x170   : > { %v1029_v50 = vpop.f32.mrf.mxu1 }
 0x171   : > { %v10254_v51 = vadd.f32 %v1029_v50, %v766_v44  ;;  %805 = vmatmul.bf16.gmra.mxu0 %v10188_v20  ;;  %v9416_v44 = vld [vmem:[#allocation5 + $0x130] sm:$0xff]  ;;  %v10273_v50 = vpop.f32.mrf.mxu3 }
 0x172   : > { %1610 = vmatpush.bf16.msra.mxu3 %v9416_v44 }
 0x173   : > { %13075 = vst [vmem:[#allocation15_spill] sm:$0xff] %v10254_v51  ;;  %1068 = vmatmul.bf16.gmra.mxu1 %v10223_v62  ;;  %1169 = vmatmul.bf16.gmra.mxu3 %v10283_v18 }
 0x176   : > { %v768_v58 = vpop.f32.mrf.mxu0 }
 0x178   : > { %v1031_v63 = vpop.f32.mrf.mxu1 }
 0x179   : > { %v10264_v1 = vadd.f32 %v1031_v63, %v768_v58  ;;  %v9415_v58 = vld [vmem:[#allocation5 + $0x128] sm:$0xff] }
 0x17a   : > { %1611 = vmatpush.bf16.msra.mxu3 %v9415_v58  ;;  %1378 = vmatmul.bf16.gmra.mxu2 %v10136_v42 }
 0x17b   : > { %13077 = vst [vmem:[#allocation17_spill] sm:$0xff] %v10264_v1  ;;  %v9410_v1 = vld [vmem:[#allocation5 + $0x100] sm:$0xff] }
 0x17e   : > { %v771_v8 = vpop.f32.mrf.mxu0  ;;  %1612 = vmatpush.bf16.msra.mxu3 %v9414_v15  ;;  %v1334_v15 = vpop.f32.mrf.mxu2 }
 0x180   : > { %v1034_v12 = vpop.f32.mrf.mxu1 }
 0x181   : > { %810 = vmatmul.bf16.gmra.mxu0 %v10205_v46  ;;  %v10278_v12 = vpop.f32.mrf.mxu3 }
 0x182   : > { %13079 = vst [vmem:[#allocation19_spill] sm:$0xff] %v10278_v12  ;;  %v9411_v12 = vld [vmem:[#allocation5 + $0x108] sm:$0xff] }
 0x183   : > { %1073 = vmatmul.bf16.gmra.mxu1 %v10175_v9 }
 0x186   : > { %v773_v34 = vpop.f32.mrf.mxu0 }
 0x187   : > { %v9413_v34 = vld [vmem:[#allocation5 + $0x118] sm:$0xff] }
 0x188   : > { %v1036_v37 = vpop.f32.mrf.mxu1  ;;  %1613 = vmatpush.bf16.msra.mxu3 %v9413_v34 }
 0x18a   : > { %1383 = vmatmul.bf16.gmra.mxu2 %v10147_v49 }
 0x18e   : > { %v776_v63 = vpop.f32.mrf.mxu0 }
 0x190   : > { %v1039_v7 = vpop.f32.mrf.mxu1 }
 0x191   : > { %v10276_v8 = vadd.f32 %v1039_v7, %v776_v63  ;;  %815 = vmatmul.bf16.gmra.mxu0 %v10220_v60  ;;  %v1134_v63 = vpop.f32.mrf.mxu3  ;;  %v9412_v7 = vld [vmem:[#allocation5 + $0x110] sm:$0xff] }
 0x192   : > { %1614 = vmatpush.bf16.msra.mxu3 %v9412_v7  ;;  %v1336_v63 = vpop.f32.mrf.mxu2 }
 0x193   : > { %13078 = vst [vmem:[#allocation18_spill] sm:$0xff] %v10276_v8  ;;  %1078 = vmatmul.bf16.gmra.mxu1 %v10188_v20 }
 0x196   : > { %v778_v37 = vpop.f32.mrf.mxu0  ;;  %1615 = vmatpush.bf16.msra.mxu3 %v9411_v12 }
 0x198   : > { %v1041_v44 = vpop.f32.mrf.mxu1 }
 0x199   : > { %v10286_v58 = vadd.f32 %v1041_v44, %v778_v37  ;;  %v1136_v8 = vpop.f32.mrf.mxu3 }
 0x19a   : > { %1616 = vmatpush.bf16.msra.mxu3 %v9410_v1  ;;  %v1339_v7 = vpop.f32.mrf.mxu2  ;;  %1388 = vmatmul.bf16.gmra.mxu2 %v10158_v56 }
 0x19b   : > { %13080 = vst [vmem:[#allocation20_spill] sm:$0xff] %v10286_v58 }
 0x19d   : > { %1617 = vmatmul.bf16.vlgmr.msra.gmra.mxu3 %v10066_v17 }
 0x19e   : > { %v781_v54 = vpop.f32.mrf.mxu0 }
 0x1a0   : > { %v1044_v4 = vpop.f32.mrf.mxu1 }
 0x1a1   : > { %820 = vmatmul.bf16.gmra.mxu0 %v10239_v13  ;;  %v10292_v44 = vpop.f32.mrf.mxu3 }
 0x1a3   : > { %1083 = vmatmul.bf16.gmra.mxu1 %v10205_v46 }
 0x1a6   : > { %v783_v34 = vpop.f32.mrf.mxu0 }
 0x1a7   : > { %v1341_v34 = vpop.f32.mrf.mxu2 }
 0x1a8   : > { %v1046_v37 = vpop.f32.mrf.mxu1 }
 0x1a9   : > { %v10297_v8 = vpop.f32.mrf.mxu3 }
 0x1aa   : > { %13082 = vst [vmem:[#allocation22_spill] sm:$0xff] %v10297_v8  ;;  %1393 = vmatmul.bf16.gmra.mxu2 %v10169_v2 }
 0x1ad   : > { %1622 = vmatmul.bf16.gmra.mxu3 %v10071_v19 }
 0x1ae   : > { %v786_v54 = vpop.f32.mrf.mxu0 }
 0x1b0   : > { %v1049_v4 = vpop.f32.mrf.mxu1 }
 0x1b1   : > { %v10295_v12 = vadd.f32 %v1049_v4, %v786_v54  ;;  %825 = vmatmul.bf16.gmra.mxu0 %v10251_v41  ;;  %v1144_v15 = vpop.f32.mrf.mxu3  ;;  %v1344_v4 = vpop.f32.mrf.mxu2 }
 0x1b3   : > { %13081 = vst [vmem:[#allocation21_spill] sm:$0xff] %v10295_v12  ;;  %1088 = vmatmul.bf16.gmra.mxu1 %v10220_v60 }
 0x1b6   : > { %v10302_v17 = vpop.f32.mrf.mxu0 }
 0x1b7   : > { %13083 = vst [vmem:[#allocation23_spill] sm:$0xff] %v10302_v17 }
 0x1b8   : > { %v10304_v1 = vpop.f32.mrf.mxu1 }
 0x1b9   : > { %13084 = vst [vmem:[#allocation24_spill] sm:$0xff] %v10304_v1  ;;  %v1146_v54 = vpop.f32.mrf.mxu3  ;;  %v1346_v17 = vpop.f32.mrf.mxu2 }
 0x1ba   : > { %1398 = vmatmul.bf16.gmra.mxu2 %v10184_v14 }
 0x1bd   : > { %1627 = vmatmul.bf16.gmra.mxu3 %v10076_v21 }
 0x1be   : > { %v791_v37 = vpop.f32.mrf.mxu0 }
 0x1c0   : > { %v1054_v63 = vpop.f32.mrf.mxu1 }
 0x1c1   : > { %830 = vmatmul.bf16.gmra.mxu0 %v10109_v29  ;;  %v1149_v12 = vpop.f32.mrf.mxu3  ;;  %v1349_v37 = vpop.f32.mrf.mxu2 }
 0x1c3   : > { %1093 = vmatmul.bf16.gmra.mxu1 %v10239_v13 }
 0x1c6   : > { %v793_v8 = vpop.f32.mrf.mxu0 }
 0x1c8   : > { %v1056_v19 = vpop.f32.mrf.mxu1 }
 0x1c9   : > { %v1151_v51 = vpop.f32.mrf.mxu3  ;;  %v1351_v17 = vpop.f32.mrf.mxu2 }
 0x1ca   : > { %1403 = vmatmul.bf16.gmra.mxu2 %v10199_v38 }
 0x1cd   : > { %1632 = vmatmul.bf16.gmra.mxu3 %v10081_v23 }
 0x1ce   : > { %v796_v15 = vpop.f32.mrf.mxu0 }
 0x1d0   : > { %v1059_v1 = vpop.f32.mrf.mxu1 }
 0x1d1   : > { %v1060_v58 = vadd.f32 %v1059_v1, %v796_v15  ;;  %835 = vmatmul.bf16.gmra.mxu0 %v10118_v31  ;;  %v1154_v12 = vpop.f32.mrf.mxu3 }
 0x1d3   : > { %v10311_v63 = vadd.f32 %v1339_v7, %v1060_v58  ;;  %1098 = vmatmul.bf16.gmra.mxu1 %v10251_v41  ;;  %v1354_v58 = vpop.f32.mrf.mxu2 }
 0x1d5   : > { %13085 = vst [vmem:[#allocation25_spill] sm:$0xff] %v10311_v63 }
 0x1d6   : > { %v798_v54 = vpop.f32.mrf.mxu0 }
 0x1d8   : > { %v1061_v8 = vpop.f32.mrf.mxu1 }
 0x1d9   : > { %v1062_v4 = vadd.f32 %v1061_v8, %v798_v54  ;;  %v1156_v15 = vpop.f32.mrf.mxu3 }
 0x1da   : > { %1408 = vmatmul.bf16.gmra.mxu2 %v10214_v55 }
 0x1db   : > { %v10316_v19 = vadd.f32 %v1341_v34, %v1062_v4  ;;  %v1356_v3 = vpop.f32.mrf.mxu2 }
 0x1dd   : > { %13086 = vst [vmem:[#allocation26_spill] sm:$0xff] %v10316_v19  ;;  %1637 = vmatmul.bf16.gmra.mxu3 %v10086_v24 }
 0x1de   : > { %v801_v1 = vpop.f32.mrf.mxu0 }
 0x1e0   : > { %v1064_v51 = vpop.f32.mrf.mxu1 }
 0x1e1   : > { %840 = vmatmul.bf16.gmra.mxu0 %v10127_v36  ;;  %v1159_v11 = vpop.f32.mrf.mxu3 }
 0x1e3   : > { %v1359_v12 = vpop.f32.mrf.mxu2 }
 0x1e6   : > { %v803_v7 = vpop.f32.mrf.mxu0 }
 0x1e8   : > { %v1066_v63 = vpop.f32.mrf.mxu1 }
 0x1e9   : > { %v1161_v4 = vpop.f32.mrf.mxu3 }
 0x1ea   : > { %1413 = vmatmul.bf16.gmra.mxu2 %v10233_v5 }
 0x1eb   : > { %v1361_v63 = vpop.f32.mrf.mxu2 }
 0x1ed   : > { %1642 = vmatmul.bf16.gmra.mxu3 %v10095_v26 }
 0x1ee   : > { %v806_v54 = vpop.f32.mrf.mxu0 }
 0x1f0   : > { %v1069_v8 = vpop.f32.mrf.mxu1 }
 0x1f1   : > { %v1070_v34 = vadd.f32 %v1069_v8, %v806_v54  ;;  %845 = vmatmul.bf16.gmra.mxu0 %v10136_v42  ;;  %v1164_v58 = vpop.f32.mrf.mxu3 }
 0x1f3   : > { %v10322_v19 = vadd.f32 %v1349_v37, %v1070_v34  ;;  %v1364_v8 = vpop.f32.mrf.mxu2 }
 0x1f5   : > { %13087 = vst [vmem:[#allocation27_spill] sm:$0xff] %v10322_v19 }
 0x1f6   : > { %v808_v1 = vpop.f32.mrf.mxu0 }
 0x1f8   : > { %v1071_v51 = vpop.f32.mrf.mxu1 }
 0x1f9   : > { %v1072_v15 = vadd.f32 %v1071_v51, %v808_v1  ;;  %v1165_v54 = vpop.f32.mrf.mxu3 }
 0x1fa   : > { %1418 = vmatmul.bf16.gmra.mxu2 %v10245_v32 }
 0x1fb   : > { %v10326_v11 = vadd.f32 %v1351_v17, %v1072_v15  ;;  %v1366_v19 = vpop.f32.mrf.mxu2 }
 0x1fd   : > { %13088 = vst [vmem:[#allocation28_spill] sm:$0xff] %v10326_v11  ;;  %1647 = vmatmul.bf16.gmra.mxu3 %v10104_v28 }
 0x1fe   : > { %v811_v3 = vpop.f32.mrf.mxu0 }
 0x200   : > { %v1074_v7 = vpop.f32.mrf.mxu1 }
 0x201   : > { %850 = vmatmul.bf16.gmra.mxu0 %v10147_v49  ;;  %v1167_v4 = vpop.f32.mrf.mxu3 }
 0x203   : > { %v1369_v58 = vpop.f32.mrf.mxu2 }
 0x206   : > { %v813_v37 = vpop.f32.mrf.mxu0 }
 0x208   : > { %v1076_v34 = vpop.f32.mrf.mxu1 }
 0x209   : > { %v1168_v15 = vpop.f32.mrf.mxu3 }
 0x20a   : > { %1423 = vmatmul.bf16.gmra.mxu2 %v10261_v57 }
 0x20b   : > { %v1371_v37 = vpop.f32.mrf.mxu2 }
 0x20d   : > { %1652 = vmatmul.bf16.gmra.mxu3 %v10113_v30 }
 0x20e   : > { %v816_v1 = vpop.f32.mrf.mxu0 }
 0x210   : > { %v1079_v51 = vpop.f32.mrf.mxu1 }
 0x211   : > { %v1080_v17 = vadd.f32 %v1079_v51, %v816_v1  ;;  %855 = vmatmul.bf16.gmra.mxu0 %v10158_v56  ;;  %v1170_v8 = vpop.f32.mrf.mxu3 }
 0x213   : > { %v10332_v11 = vadd.f32 %v1359_v12, %v1080_v17  ;;  %v1374_v51 = vpop.f32.mrf.mxu2 }
 0x215   : > { %13089 = vst [vmem:[#allocation29_spill] sm:$0xff] %v10332_v11 }
 0x216   : > { %v818_v3 = vpop.f32.mrf.mxu0 }
 0x218   : > { %v1081_v7 = vpop.f32.mrf.mxu1 }
 0x219   : > { %v1082_v54 = vadd.f32 %v1081_v7, %v818_v3  ;;  %v1171_v1 = vpop.f32.mrf.mxu3 }
 0x21a   : > { %1428 = vmatmul.bf16.gmra.mxu2 %v10270_v16 }
 0x21b   : > { %v10336_v34 = vadd.f32 %v1361_v63, %v1082_v54  ;;  %v1376_v11 = vpop.f32.mrf.mxu2 }
 0x21d   : > { %13090 = vst [vmem:[#allocation30_spill] sm:$0xff] %v10336_v34  ;;  %1657 = vmatmul.bf16.gmra.mxu3 %v10122_v33 }
 0x21e   : > { %v821_v19 = vpop.f32.mrf.mxu0 }
 0x220   : > { %v1084_v4 = vpop.f32.mrf.mxu1 }
 0x221   : > { %860 = vmatmul.bf16.gmra.mxu0 %v10169_v2  ;;  %v1618_v15 = vpop.f32.mrf.mxu3 }
 0x223   : > { %v1379_v8 = vpop.f32.mrf.mxu2 }
 0x226   : > { %v823_v12 = vpop.f32.mrf.mxu0 }
 0x228   : > { %v1086_v17 = vpop.f32.mrf.mxu1 }
 0x229   : > { %v1620_v54 = vpop.f32.mrf.mxu3 }
 0x22a   : > { %1433 = vmatmul.bf16.gmra.mxu2 %v10283_v18 }
 0x22b   : > { %v1381_v12 = vpop.f32.mrf.mxu2 }
 0x22d   : > { %1662 = vmatmul.bf16.gmra.mxu3 %v10131_v39 }
 0x22e   : > { %v826_v3 = vpop.f32.mrf.mxu0 }
 0x230   : > { %v1089_v7 = vpop.f32.mrf.mxu1 }
 0x231   : > { %v1090_v63 = vadd.f32 %v1089_v7, %v826_v3  ;;  %865 = vmatmul.bf16.gmra.mxu0 %v10184_v14  ;;  %v1623_v51 = vpop.f32.mrf.mxu3 }
 0x233   : > { %v10342_v34 = vadd.f32 %v1369_v58, %v1090_v63  ;;  %v1384_v7 = vpop.f32.mrf.mxu2 }
 0x235   : > { %13091 = vst [vmem:[#allocation31_spill] sm:$0xff] %v10342_v34 }
 0x236   : > { %v828_v19 = vpop.f32.mrf.mxu0 }
 0x238   : > { %v1091_v4 = vpop.f32.mrf.mxu1 }
 0x239   : > { %v1092_v1 = vadd.f32 %v1091_v4, %v828_v19  ;;  %v1625_v3 = vpop.f32.mrf.mxu3 }
 0x23a   : > { %1438 = vmatmul.bf16.gmra.mxu2 %v10091_v25 }
 0x23b   : > { %v10346_v17 = vadd.f32 %v1371_v37, %v1092_v1  ;;  %v1386_v34 = vpop.f32.mrf.mxu2 }
 0x23d   : > { %13092 = vst [vmem:[#allocation32_spill] sm:$0xff] %v10346_v17  ;;  %1667 = vmatmul.bf16.gmra.mxu3 %v10140_v45 }
 0x23e   : > { %v831_v11 = vpop.f32.mrf.mxu0 }
 0x240   : > { %v1094_v15 = vpop.f32.mrf.mxu1 }
 0x241   : > { %870 = vmatmul.bf16.gmra.mxu0 %v10199_v38  ;;  %v10351_v54 = vpop.f32.mrf.mxu3 }
 0x243   : > { %v1389_v51 = vpop.f32.mrf.mxu2 }
 0x246   : > { %v833_v58 = vpop.f32.mrf.mxu0 }
 0x248   : > { %v1096_v63 = vpop.f32.mrf.mxu1 }
 0x249   : > { %v10354_v1 = vpop.f32.mrf.mxu3 }
 0x24a   : > { %1443 = vmatmul.bf16.gmra.mxu2 %v10100_v27  ;;  %v9409_v27 = vld [vmem:[#allocation5 + $0x78] sm:$0xff] }
 0x24b   : > { %v10362_v34 = vpop.f32.mrf.mxu2  ;;  %1861 = vmatpush.bf16.msra.mxu0 %v9409_v27 }
 0x24c   : > { %13094 = vst [vmem:[#allocation34_spill] sm:$0xff] %v10362_v34 }
 0x24d   : > { %1672 = vmatmul.bf16.gmra.mxu3 %v10153_v53 }
 0x24e   : > { %v836_v19 = vpop.f32.mrf.mxu0 }
 0x250   : > { %v1099_v37 = vpop.f32.mrf.mxu1 }
 0x251   : > { %v1100_v4 = vadd.f32 %v1099_v37, %v836_v19  ;;  %875 = vmatmul.bf16.gmra.mxu0 %v10214_v55  ;;  %v10360_v58 = vpop.f32.mrf.mxu3 }
 0x253   : > { %v10356_v11 = vadd.f32 %v1379_v8, %v1100_v4  ;;  %v1394_v17 = vpop.f32.mrf.mxu2 }
 0x255   : > { %13093 = vst [vmem:[#allocation33_spill] sm:$0xff] %v10356_v11 }
 0x256   : > { %v838_v15 = vpop.f32.mrf.mxu0 }
 0x258   : > { %v1101_v3 = vpop.f32.mrf.mxu1 }
 0x259   : > { %v1102_v7 = vadd.f32 %v1101_v3, %v838_v15  ;;  %v1635_v37 = vpop.f32.mrf.mxu3 }
 0x25b   : > { %v10364_v63 = vadd.f32 %v1381_v12, %v1102_v7  ;;  %v1396_v11 = vpop.f32.mrf.mxu2 }
 0x25d   : > { %13095 = vst [vmem:[#allocation35_spill] sm:$0xff] %v10364_v63  ;;  %1677 = vmatmul.bf16.gmra.mxu3 %v10162_v61 }
 0x25e   : > { %v841_v19 = vpop.f32.mrf.mxu0 }
 0x261   : > { %880 = vmatmul.bf16.gmra.mxu0 %v10233_v5  ;;  %v10369_v4 = vpop.f32.mrf.mxu3 }
 0x263   : > { %v1399_v7 = vpop.f32.mrf.mxu2 }
 0x266   : > { %v843_v8 = vpop.f32.mrf.mxu0 }
 0x269   : > { %v10373_v12 = vpop.f32.mrf.mxu3 }
 0x26b   : > { %v10383_v37 = vpop.f32.mrf.mxu2 }
 0x26c   : > { %13098 = vst [vmem:[#allocation38_spill] sm:$0xff] %v10383_v37 }
 0x26d   : > { %1682 = vmatmul.bf16.gmra.mxu3 %v10178_v10 }
 0x26e   : > { %v846_v15 = vpop.f32.mrf.mxu0 }
 0x26f   : > { %v1110_v3 = vadd.f32 %v10217_v59, %v846_v15 }
 0x271   : > { %v10375_v34 = vadd.f32 %v1389_v51, %v1110_v3  ;;  %885 = vmatmul.bf16.gmra.mxu0 %v10245_v32  ;;  %v10381_v19 = vpop.f32.mrf.mxu3 }
 0x273   : > { %13096 = vst [vmem:[#allocation36_spill] sm:$0xff] %v10375_v34  ;;  %v1404_v59 = vpop.f32.mrf.mxu2 }
 0x276   : > { %v10379_v17 = vpop.f32.mrf.mxu0 }
 0x277   : > { %13097 = vst [vmem:[#allocation37_spill] sm:$0xff] %v10379_v17 }
 0x279   : > { %v1645_v11 = vpop.f32.mrf.mxu3 }
 0x27b   : > { %v1406_v15 = vpop.f32.mrf.mxu2 }
 0x27c   : > { %v9425_v15 = vld [vmem:[#allocation5 + $0x1f8] sm:$0xff] }
 0x27d   : > { %1687 = vmatmul.bf16.gmra.mxu3 %v10191_v22  ;;  %2130 = vmatpush.bf16.msrb.mxu1 %v9425_v15 }
 0x27e   : > { %v851_v25 = vpop.f32.mrf.mxu0 }
 0x281   : > { %890 = vmatmul.bf16.gmra.mxu0 %v10261_v57  ;;  %v10388_v8 = vpop.f32.mrf.mxu3 }
 0x283   : > { %v1409_v63 = vpop.f32.mrf.mxu2 }
 0x286   : > { %v853_v51 = vpop.f32.mrf.mxu0 }
 0x287   : > { %v9441_v51 = vld [vmem:[#allocation5 + $0x178] sm:$0xff] }
 0x288   : > { %2864 = vmatpush.bf16.msrb.mxu2 %v9441_v51 }
 0x289   : > { %v10391_v34 = vpop.f32.mrf.mxu3 }
 0x28a   : > { %13099 = vst [vmem:[#allocation39_spill] sm:$0xff] %v10391_v34 }
 0x28b   : > { %v10401_v59 = vpop.f32.mrf.mxu2 }
 0x28c   : > { %13103 = vst [vmem:[#allocation43_spill] sm:$0xff] %v10401_v59 }
 0x28d   : > { %1692 = vmatmul.bf16.gmra.mxu3 %v10208_v47 }
 0x28e   : > { %v856_v3 = vpop.f32.mrf.mxu0 }
 0x28f   : > { %v1120_v17 = vadd.f32 %v10248_v40, %v856_v3 }
 0x291   : > { %v10393_v37 = vadd.f32 %v1399_v7, %v1120_v17  ;;  %895 = vmatmul.bf16.gmra.mxu0 %v10270_v16  ;;  %v10399_v11 = vpop.f32.mrf.mxu3 }
 0x292   : > { %13102 = vst [vmem:[#allocation42_spill] sm:$0xff] %v10399_v11  ;;  %v9408_v11 = vld [vmem:[#allocation5 + $0x70] sm:$0xff] }
 0x293   : > { %13100 = vst [vmem:[#allocation40_spill] sm:$0xff] %v10393_v37  ;;  %v1414_v34 = vpop.f32.mrf.mxu2  ;;  %1862 = vmatpush.bf16.msra.mxu0 %v9408_v11  ;;  %v9440_v11 = vld [vmem:[#allocation5 + $0x170] sm:$0xff] }
 0x294   : > { %2865 = vmatpush.bf16.msrb.mxu2 %v9440_v11 }
 0x296   : > { %v10397_v25 = vpop.f32.mrf.mxu0 }
 0x297   : > { %13101 = vst [vmem:[#allocation41_spill] sm:$0xff] %v10397_v25 }
 0x299   : > { %v1655_v3 = vpop.f32.mrf.mxu3 }
 0x29b   : > { %v1416_v27 = vpop.f32.mrf.mxu2 }
 0x29d   : > { %1697 = vmatmul.bf16.gmra.mxu3 %v10223_v62 }
 0x29e   : > { %v861_v40 = vpop.f32.mrf.mxu0 }
 0x2a1   : > { %900 = vmatmul.bf16.gmra.mxu0 %v10283_v18  ;;  %v10405_v17 = vpop.f32.mrf.mxu3 }
 0x2a3   : > { %v1419_v51 = vpop.f32.mrf.mxu2 }
 0x2a6   : > { %v863_v7 = vpop.f32.mrf.mxu0 }
 0x2a9   : > { %v10408_v59 = vpop.f32.mrf.mxu3 }
 0x2ab   : > { %v10418_v3 = vpop.f32.mrf.mxu2 }
 0x2ac   : > { %13106 = vst [vmem:[#allocation46_spill] sm:$0xff] %v10418_v3 }
 0x2ad   : > { %1702 = vmatmul.bf16.gmra.mxu3 %v10175_v9 }
 0x2ae   : > { %v866_v25 = vpop.f32.mrf.mxu0 }
 0x2af   : > { %v1130_v37 = vadd.f32 %v10273_v50, %v866_v25 }
 0x2b1   : > { %v10410_v40 = vadd.f32 %v1409_v63, %v1130_v37  ;;  %1258 = vmatmul.bf16.vlgmr.msrb.gmra.mxu0 %v10076_v21  ;;  %v10416_v15 = vpop.f32.mrf.mxu3  ;;  %v9407_v37 = vld [vmem:[#allocation5 + $0x68] sm:$0xff] }
 0x2b2   : > { %1863 = vmatpush.bf16.msra.mxu0 %v9407_v37 }
 0x2b3   : > { %13104 = vst [vmem:[#allocation44_spill] sm:$0xff] %v10410_v40  ;;  %v1424_v50 = vpop.f32.mrf.mxu2 }
 0x2b6   : > { %v10414_v34 = vpop.f32.mrf.mxu0 }
 0x2b7   : > { %13105 = vst [vmem:[#allocation45_spill] sm:$0xff] %v10414_v34 }
 0x2b9   : > { %v1665_v27 = vpop.f32.mrf.mxu3 }
 0x2bb   : > { %v1426_v21 = vpop.f32.mrf.mxu2 }
 0x2bd   : > { %1707 = vmatmul.bf16.gmra.mxu3 %v10188_v20 }
 0x2be   : > { %v871_v7 = vpop.f32.mrf.mxu0 }
 0x2c1   : > { %1263 = vmatmul.bf16.gmra.mxu0 %v10081_v23  ;;  %v10422_v25 = vpop.f32.mrf.mxu3  ;;  %v9424_v23 = vld [vmem:[#allocation5 + $0x1f0] sm:$0xff] }
 0x2c2   : > { %2131 = vmatpush.bf16.msrb.mxu1 %v9424_v23 }
 0x2c3   : > { %v1429_v7 = vpop.f32.mrf.mxu2 }
 0x2c6   : > { %v873_v63 = vpop.f32.mrf.mxu0 }
 0x2c9   : > { %v10425_v40 = vpop.f32.mrf.mxu3 }
 0x2cb   : > { %v1431_v63 = vpop.f32.mrf.mxu2 }
 0x2cd   : > { %1712 = vmatmul.bf16.gmra.mxu3 %v10205_v46 }
 0x2ce   : > { %v876_v9 = vpop.f32.mrf.mxu0 }
 0x2cf   : > { %v1140_v34 = vadd.f32 %v10292_v44, %v876_v9 }
 0x2d1   : > { %v10427_v27 = vadd.f32 %v1419_v51, %v1140_v34  ;;  %1268 = vmatmul.bf16.gmra.mxu0 %v10086_v24  ;;  %v10433_v50 = vpop.f32.mrf.mxu3  ;;  %v9406_v34 = vld [vmem:[#allocation5 + $0x60] sm:$0xff] }
 0x2d2   : > { %1864 = vmatpush.bf16.msra.mxu0 %v9406_v34 }
 0x2d3   : > { %13107 = vst [vmem:[#allocation47_spill] sm:$0xff] %v10427_v27  ;;  %v1434_v44 = vpop.f32.mrf.mxu2  ;;  %v9448_v27 = vld [vmem:[#allocation5 + $0x230] sm:$0xff] }
 0x2d6   : > { %v10431_v20 = vpop.f32.mrf.mxu0 }
 0x2d7   : > { %13108 = vst [vmem:[#allocation48_spill] sm:$0xff] %v10431_v20  ;;  %v10568_v20 = vld [vmem:[%s10055_s11 + $0x18] sm:$0xff] }
 0x2d9   : > { %v1675_v21 = vpop.f32.mrf.mxu3 }
 0x2db   : > { %v1436_v24 = vpop.f32.mrf.mxu2 }
 0x2dc   : > { %v9405_v24 = vld [vmem:[#allocation5 + $0x58] sm:$0xff] }
 0x2dd   : > { %1717 = vmatmul.bf16.gmra.mxu3 %v10220_v60  ;;  %v9439_v60 = vld [vmem:[#allocation5 + $0x168] sm:$0xff]  ;;  %1865 = vmatpush.bf16.msra.mxu0 %v9405_v24 }
 0x2de   : > { %v881_v37 = vpop.f32.mrf.mxu0  ;;  %2866 = vmatpush.bf16.msrb.mxu2 %v9439_v60  ;;  %v9404_v60 = vld [vmem:[#allocation5 + $0x50] sm:$0xff] }
 0x2e1   : > { %1273 = vmatmul.bf16.gmra.mxu0 %v10095_v26  ;;  %v10437_v9 = vpop.f32.mrf.mxu3 }
 0x2e2   : > { %1866 = vmatpush.bf16.msra.mxu0 %v9404_v60 }
 0x2e3   : > { %v1439_v7 = vpop.f32.mrf.mxu2 }
 0x2e6   : > { %v883_v51 = vpop.f32.mrf.mxu0 }
 0x2e7   : > { %v9423_v51 = vld [vmem:[#allocation5 + $0x1e8] sm:$0xff] }
 0x2e8   : > { %2132 = vmatpush.bf16.msrb.mxu1 %v9423_v51 }
 0x2e9   : > { %v10439_v46 = vpop.f32.mrf.mxu3 }
 0x2eb   : > { %v1441_v26 = vpop.f32.mrf.mxu2 }
 0x2ed   : > { %1722 = vmatmul.bf16.gmra.mxu3 %v10239_v13 }
 0x2ee   : > { %v886_v11 = vpop.f32.mrf.mxu0 }
 0x2f1   : > { %1278 = vmatmul.bf16.gmra.mxu0 %v10104_v28  ;;  %v10443_v63 = vpop.f32.mrf.mxu3 }
 0x2f3   : > { %v1444_v44 = vpop.f32.mrf.mxu2 }
 0x2f6   : > { %v888_v23 = vpop.f32.mrf.mxu0 }
 0x2f9   : > { %v1685_v21 = vpop.f32.mrf.mxu3 }
 0x2fb   : > { %v1445_v13 = vpop.f32.mrf.mxu2 }
 0x2fc   : > { %v9403_v13 = vld [vmem:[#allocation5 + $0x48] sm:$0xff] }
 0x2fd   : > { %1727 = vmatmul.bf16.gmra.mxu3 %v10251_v41  ;;  %1867 = vmatpush.bf16.msra.mxu0 %v9403_v13 }
 0x2fe   : > { %v891_v37 = vpop.f32.mrf.mxu0 }
 0x301   : > { %1283 = vmatmul.bf16.gmra.mxu0 %v10113_v30  ;;  %v10447_v28 = vpop.f32.mrf.mxu3 }
 0x306   : > { %v893_v34 = vpop.f32.mrf.mxu0 }
 0x307   : > { %v9422_v34 = vld [vmem:[#allocation5 + $0x1e0] sm:$0xff] }
 0x308   : > { %2133 = vmatpush.bf16.msrb.mxu1 %v9422_v34 }
 0x309   : > { %v10449_v7 = vpop.f32.mrf.mxu3 }
 0x30d   : > { %1732 = vmatmul.bf16.gmra.mxu3 %v10109_v29  ;;  %v9438_v29 = vld [vmem:[#allocation5 + $0x160] sm:$0xff] }
 0x30e   : > { %v896_v11 = vpop.f32.mrf.mxu0  ;;  %2867 = vmatpush.bf16.msrb.mxu2 %v9438_v29  ;;  %v9437_v29 = vld [vmem:[#allocation5 + $0x158] sm:$0xff] }
 0x311   : > { %1288 = vmatmul.bf16.gmra.mxu0 %v10122_v33  ;;  %v10453_v26 = vpop.f32.mrf.mxu3 }
 0x312   : > { %2868 = vmatpush.bf16.msrb.mxu2 %v9437_v29 }
 0x316   : > { %v898_v23 = vpop.f32.mrf.mxu0 }
 0x319   : > { %v1695_v37 = vpop.f32.mrf.mxu3 }
 0x31d   : > { %1737 = vmatmul.bf16.gmra.mxu3 %v10118_v31 }
 0x31e   : > { %v901_v30 = vpop.f32.mrf.mxu0 }
 0x321   : > { %1293 = vmatmul.bf16.gmra.mxu0 %v10131_v39  ;;  %v10457_v21 = vpop.f32.mrf.mxu3 }
 0x322   : > { %13109 = vst [vmem:[#allocation49_spill] sm:$0xff] %v10457_v21 }
 0x326   : > { %v902_v41 = vpop.f32.mrf.mxu0 }
 0x329   : > { %v10459_v51 = vpop.f32.mrf.mxu3 }
 0x32a   : > { %13110 = vst [vmem:[#allocation50_spill] sm:$0xff] %v10459_v51 }
 0x32d   : > { %1742 = vmatmul.bf16.gmra.mxu3 %v10127_v36 }
 0x32e   : > { %v1259_v44 = vpop.f32.mrf.mxu0 }
 0x32f   : > { %v9402_v44 = vld [vmem:[#allocation5 + $0x40] sm:$0xff] }
 0x330   : > { %1868 = vmatpush.bf16.msra.mxu0 %v9402_v44 }
 0x331   : > { %1298 = vmatmul.bf16.gmra.mxu0 %v10140_v45  ;;  %v10463_v24 = vpop.f32.mrf.mxu3 }
 0x332   : > { %13111 = vst [vmem:[#allocation51_spill] sm:$0xff] %v10463_v24 }
 0x336   : > { %v1261_v33 = vpop.f32.mrf.mxu0 }
 0x339   : > { %v1705_v39 = vpop.f32.mrf.mxu3 }
 0x33a   : > { %v9433_v39 = vld [vmem:[#allocation5 + $0xb8] sm:$0xff] }
 0x33b   : > { %3116 = vmatpush.bf16.msrb.mxu3 %v9433_v39 }
 0x33d   : > { %1747 = vmatmul.bf16.gmra.mxu3 %v10136_v42 }
 0x33e   : > { %v1264_v31 = vpop.f32.mrf.mxu0 }
 0x33f   : > { %v9420_v31 = vld [vmem:[#allocation5 + $0x1d0] sm:$0xff] }
 0x341   : > { %1303 = vmatmul.bf16.gmra.mxu0 %v10153_v53  ;;  %v10467_v23 = vpop.f32.mrf.mxu3 }
 0x342   : > { %13112 = vst [vmem:[#allocation52_spill] sm:$0xff] %v10467_v23 }
 0x346   : > { %v1266_v11 = vpop.f32.mrf.mxu0 }
 0x347   : > { %v9419_v11 = vld [vmem:[#allocation5 + $0x1c8] sm:$0xff] }
 0x349   : > { %v10472_v36 = vpop.f32.mrf.mxu3 }
 0x34a   : > { %13113 = vst [vmem:[#allocation53_spill] sm:$0xff] %v10472_v36 }
 0x34d   : > { %1752 = vmatmul.bf16.gmra.mxu3 %v10147_v49 }
 0x34e   : > { %v1269_v45 = vpop.f32.mrf.mxu0 }
 0x34f   : > { %v10470_v30 = vadd.f32 %v1269_v45, %v10142_v48  ;;  %v9418_v45 = vld [vmem:[#allocation5 + $0x1c0] sm:$0xff] }
 0x351   : > { %1308 = vmatmul.bf16.gmra.mxu0 %v10162_v61  ;;  %v10479_v41 = vpop.f32.mrf.mxu3  ;;  %v9421_v61 = vld [vmem:[#allocation5 + $0x1d8] sm:$0xff] }
 0x352   : > { %13114 = vst [vmem:[#allocation54_spill] sm:$0xff] %v10479_v41  ;;  %2134 = vmatpush.bf16.msrb.mxu1 %v9421_v61  ;;  %v9436_v61 = vld [vmem:[#allocation5 + $0x150] sm:$0xff]  ;;  %v9426_v41 = vld [vmem:[#allocation5 + $0x80] sm:$0xff] }
 0x353   : > { %2869 = vmatpush.bf16.msrb.mxu2 %v9436_v61 }
 0x356   : > { %v1271_v37 = vpop.f32.mrf.mxu0  ;;  %2135 = vmatpush.bf16.msrb.mxu1 %v9420_v31  ;;  %v10522_v31 = vld [vmem:[%s10055_s11] sm:$0xff] }
 0x357   : > { %v10477_v53 = vadd.f32 %v1271_v37, %v10150_v52 }
 0x359   : > { %v1715_v60 = vpop.f32.mrf.mxu3 }
 0x35a   : > { %2136 = vmatpush.bf16.msrb.mxu1 %v9419_v11  ;;  %v13122_v11 = vld [vmem:[#allocation12_spill] sm:$0xff] }
 0x35d   : > { %1757 = vmatmul.bf16.gmra.mxu3 %v10158_v56 }
 0x35e   : > { %v1274_v42 = vpop.f32.mrf.mxu0  ;;  %2137 = vmatpush.bf16.msrb.mxu1 %v9418_v45 }
 0x361   : > { %1313 = vmatmul.bf16.gmra.mxu0 %v10178_v10  ;;  %v10483_v33 = vpop.f32.mrf.mxu3 }
 0x362   : > { %13115 = vst [vmem:[#allocation55_spill] sm:$0xff] %v10483_v33 }
 0x366   : > { %v1276_v48 = vpop.f32.mrf.mxu0 }
 0x369   : > { %v10488_v34 = vpop.f32.mrf.mxu3 }
 0x36a   : > { %13116 = vst [vmem:[#allocation56_spill] sm:$0xff] %v10488_v34 }
 0x36d   : > { %1762 = vmatmul.bf16.gmra.mxu3 %v10169_v2  ;;  %v9449_v2 = vld [vmem:[#allocation5 + $0x238] sm:$0xff] }
 0x36e   : > { %v1279_v49 = vpop.f32.mrf.mxu0  ;;  %3385 = vmatpush.bf16.msrb.mxu0 %v9449_v2  ;;  %v10542_v2 = vld [vmem:[%s10055_s11 + $0x38] sm:$0xff] }
 0x36f   : > { %v10486_v52 = vadd.f32 %v1279_v49, %v10164_v0 }
 0x371   : > { %1318 = vmatmul.bf16.gmra.mxu0 %v10191_v22  ;;  %v10495_v13 = vpop.f32.mrf.mxu3  ;;  %v10499_v22 = vld [vmem:[%s10055_s11 + $0x20] sm:$0xff] }
 0x372   : > { %13117 = vst [vmem:[#allocation57_spill] sm:$0xff] %v10495_v13  ;;  %2138 = vmatmul.bf16.vlgmr.msrb.gmra.mxu1 %v10499_v22  ;;  %3386 = vmatpush.bf16.msrb.mxu0 %v9448_v27  ;;  %v9656_v13 = vld [vmem:[%s10055_s11 + $0x148] sm:$0xff] }
 0x376   : > { %v1281_v10 = vpop.f32.mrf.mxu0 }
 0x377   : > { %v10493_v56 = vadd.f32 %v1281_v10, %v10172_v6 }
 0x379   : > { %v1725_v37 = vpop.f32.mrf.mxu3 }
 0x37a   : > { %v10538_v37 = vld [vmem:[%s10055_s11 + $0x8] sm:$0xff] }
 0x37d   : > { %1767 = vmatmul.bf16.gmra.mxu3 %v10184_v14 }
 0x37e   : > { %v1284_v0 = vpop.f32.mrf.mxu0 }
 0x381   : > { %1323 = vmatmul.bf16.gmra.mxu0 %v10208_v47  ;;  %v10503_v42 = vpop.f32.mrf.mxu3  ;;  %v10512_v47 = vld [vmem:[%s10055_s11 + $0x28] sm:$0xff] }
 0x382   : > { %13118 = vst [vmem:[#allocation58_spill] sm:$0xff] %v10503_v42  ;;  %2143 = vmatmul.bf16.gmra.mxu1 %v10512_v47 }
 0x386   : > { %v1286_v6 = vpop.f32.mrf.mxu0 }
 0x387   : > { %v13124_v6 = vld [vmem:[#allocation14_spill] sm:$0xff] }
 0x389   : > { %v10508_v29 = vpop.f32.mrf.mxu3 }
 0x38a   : > { %13119 = vst [vmem:[#allocation59_spill] sm:$0xff] %v10508_v29 }
 0x38d   : > { %1772 = vmatmul.bf16.gmra.mxu3 %v10199_v38 }
 0x38e   : > { %v1289_v60 = vpop.f32.mrf.mxu0 }
 0x38f   : > { %v10506_v44 = vadd.f32 %v1289_v60, %v10194_v35 }
 0x391   : > { %1328 = vmatmul.bf16.gmra.mxu0 %v10223_v62  ;;  %v10519_v49 = vpop.f32.mrf.mxu3  ;;  %v10526_v62 = vld [vmem:[%s10055_s11 + $0x30] sm:$0xff] }
 0x392   : > { %13120 = vst [vmem:[#allocation60_spill] sm:$0xff] %v10519_v49  ;;  %2148 = vmatmul.bf16.gmra.mxu1 %v10526_v62  ;;  %v10609_v49 = vld [vmem:[%s10055_s11 + $0x60] sm:$0xff] }
 0x396   : > { %v1291_v14 = vpop.f32.mrf.mxu0 }
 0x397   : > { %v10517_v48 = vadd.f32 %v1291_v14, %v10202_v43 }
 0x399   : > { %v1735_v10 = vpop.f32.mrf.mxu3 }
 0x39a   : > { %v10552_v10 = vld [vmem:[%s10055_s11 + $0x10] sm:$0xff] }
 0x39d   : > { %1777 = vmatmul.bf16.gmra.mxu3 %v10214_v55 }
 0x39e   : > { %v1294_v35 = vpop.f32.mrf.mxu0 }
 0x3a1   : > { %1869 = vmatmul.bf16.vlgmr.msra.gmra.mxu0 %v10522_v31  ;;  %v10530_v43 = vpop.f32.mrf.mxu3 }
 0x3a2   : > { %13121 = vst [vmem:[#allocation61_spill] sm:$0xff] %v10530_v43  ;;  %2153 = vmatmul.bf16.gmra.mxu1 %v10542_v2 }
 0x3a6   : > { %v1296_v38 = vpop.f32.mrf.mxu0 }
 0x3a7   : > { %v10556_v38 = vld [vmem:[%s10055_s11 + $0x40] sm:$0xff] }
 0x3a9   : > { %v10535_v45 = vpop.f32.mrf.mxu3 }
 0x3aa   : > { %13123 = vst [vmem:[#allocation12_spill] sm:$0xff] %v10535_v45 }
 0x3ad   : > { %1782 = vmatmul.bf16.gmra.mxu3 %v10233_v5 }
 0x3ae   : > { %v1299_v39 = vpop.f32.mrf.mxu0 }
 0x3af   : > { %v10533_v0 = vadd.f32 %v1299_v39, %v13122_v11  ;;  %v9435_v39 = vld [vmem:[#allocation5 + $0x148] sm:$0xff]  ;;  %v9432_v11 = vld [vmem:[#allocation5 + $0xb0] sm:$0xff] }
 0x3b0   : > { %2870 = vmatpush.bf16.msrb.mxu2 %v9435_v39  ;;  %3117 = vmatpush.bf16.msrb.mxu3 %v9432_v11  ;;  %v13129_v39 = vld [vmem:[#allocation17_spill] sm:$0xff] }
 0x3b1   : > { %1874 = vmatmul.bf16.gmra.mxu0 %v10538_v37  ;;  %v10549_v14 = vpop.f32.mrf.mxu3 }
 0x3b2   : > { %13125 = vst [vmem:[#allocation14_spill] sm:$0xff] %v10549_v14  ;;  %2158 = vmatmul.bf16.gmra.mxu1 %v10556_v38 }
 0x3b6   : > { %v1301_v55 = vpop.f32.mrf.mxu0 }
 0x3b7   : > { %v10547_v60 = vadd.f32 %v1301_v55, %v13124_v6 }
 0x3b9   : > { %v1745_v35 = vpop.f32.mrf.mxu3 }
 0x3bd   : > { %1787 = vmatmul.bf16.gmra.mxu3 %v10245_v32  ;;  %v10572_v32 = vld [vmem:[%s10055_s11 + $0x48] sm:$0xff] }
 0x3be   : > { %v1304_v61 = vpop.f32.mrf.mxu0 }
 0x3bf   : > { %v13127_v61 = vld [vmem:[#allocation15_spill] sm:$0xff] }
 0x3c1   : > { %1879 = vmatmul.bf16.gmra.mxu0 %v10552_v10  ;;  %v10560_v55 = vpop.f32.mrf.mxu3 }
 0x3c2   : > { %13126 = vst [vmem:[#allocation62_spill] sm:$0xff] %v10560_v55  ;;  %2163 = vmatmul.bf16.gmra.mxu1 %v10572_v32  ;;  %v10583_v55 = vld [vmem:[%s10055_s11 + $0x50] sm:$0xff] }
 0x3c6   : > { %v1306_v5 = vpop.f32.mrf.mxu0 }
 0x3c9   : > { %v10565_v3 = vpop.f32.mrf.mxu3 }
 0x3ca   : > { %13128 = vst [vmem:[#allocation15_spill] sm:$0xff] %v10565_v3 }
 0x3cd   : > { %1792 = vmatmul.bf16.gmra.mxu3 %v10261_v57 }
 0x3ce   : > { %v1309_v6 = vpop.f32.mrf.mxu0 }
 0x3cf   : > { %v10563_v35 = vadd.f32 %v1309_v6, %v13127_v61 }
 0x3d1   : > { %1884 = vmatmul.bf16.gmra.mxu0 %v10568_v20  ;;  %v10579_v6 = vpop.f32.mrf.mxu3 }
 0x3d2   : > { %13130 = vst [vmem:[#allocation17_spill] sm:$0xff] %v10579_v6  ;;  %2168 = vmatmul.bf16.gmra.mxu1 %v10583_v55 }
 0x3d6   : > { %v1311_v5 = vpop.f32.mrf.mxu0 }
 0x3d7   : > { %v10577_v11 = vadd.f32 %v1311_v5, %v13129_v39  ;;  %v9376_v5 = vld [vmem:[%s10055_s11 + $0x150] sm:$0xff] }
 0x3d8   : > { %v13132_v39 = vld [vmem:[#allocation18_spill] sm:$0xff]  ;;  %1446 = vmatmul.bf16.gmra.mxu2 %v9376_v5  ;;  %v9377_v5 = vld [vmem:[%s10055_s11 + $0x158] sm:$0xff] }
 0x3d9   : > { %v1755_v3 = vpop.f32.mrf.mxu3 }
 0x3da   : > { %v10597_v3 = vld [vmem:[%s10055_s11 + $0x58] sm:$0xff] }
 0x3dd   : > { %1797 = vmatmul.bf16.gmra.mxu3 %v10270_v16 }
 0x3de   : > { %v1314_v61 = vpop.f32.mrf.mxu0 }
 0x3df   : > { %v13134_v61 = vld [vmem:[#allocation20_spill] sm:$0xff] }
 0x3e1   : > { %1889 = vmatmul.bf16.gmra.mxu0 %v10499_v22  ;;  %v10587_v14 = vpop.f32.mrf.mxu3 }
 0x3e2   : > { %13131 = vst [vmem:[#allocation63_spill] sm:$0xff] %v10587_v14  ;;  %2173 = vmatmul.bf16.gmra.mxu1 %v10597_v3  ;;  %v9434_v14 = vld [vmem:[#allocation5 + $0x140] sm:$0xff] }
 0x3e3   : > { %2871 = vmatpush.bf16.msrb.mxu2 %v9434_v14 }
 0x3e6   : > { %v1316_v27 = vpop.f32.mrf.mxu0 }
 0x3e8   : > { %1449 = vmatmul.bf16.gmra.mxu2 %v9377_v5 }
 0x3e9   : > { %v10593_v6 = vpop.f32.mrf.mxu3 }
 0x3ea   : > { %13133 = vst [vmem:[#allocation18_spill] sm:$0xff] %v10593_v6 }
 0x3ed   : > { %1802 = vmatmul.bf16.gmra.mxu3 %v10283_v18  ;;  %v9654_v18 = vld [vmem:[%s10055_s11 + $0x140] sm:$0xff] }
 0x3ee   : > { %v1319_v57 = vpop.f32.mrf.mxu0 }
 0x3ef   : > { %v10591_v45 = vadd.f32 %v1319_v57, %v13132_v39  ;;  %v2139_v43 = vpop.f32.mrf.mxu1 }
 0x3f0   : > { %v9430_v43 = vld [vmem:[#allocation5 + $0xa0] sm:$0xff] }
 0x3f1   : > { %1894 = vmatmul.bf16.gmra.mxu0 %v10512_v47  ;;  %v10604_v57 = vpop.f32.mrf.mxu3 }
 0x3f2   : > { %13135 = vst [vmem:[#allocation20_spill] sm:$0xff] %v10604_v57  ;;  %2178 = vmatmul.bf16.gmra.mxu1 %v10609_v49 }
 0x3f6   : > { %v1321_v16 = vpop.f32.mrf.mxu0 }
 0x3f7   : > { %v10602_v27 = vadd.f32 %v1321_v16, %v13134_v61  ;;  %v9431_v61 = vld [vmem:[#allocation5 + $0xa8] sm:$0xff]  ;;  %v2141_v14 = vpop.f32.mrf.mxu1 }
 0x3f8   : > { %3118 = vmatpush.bf16.msrb.mxu3 %v9431_v61  ;;  %2872 = vmatmul.bf16.vlgmr.msrb.gmra.mxu2 %v10552_v10  ;;  %v13139_v14 = vld [vmem:[#allocation23_spill] sm:$0xff]  ;;  %v13140_v61 = vld [vmem:[#allocation24_spill] sm:$0xff] }
 0x3f9   : > { %v1765_v6 = vpop.f32.mrf.mxu3 }
 0x3fa   : > { %v13137_v6 = vld [vmem:[#allocation21_spill] sm:$0xff] }
 0x3fc   : > { %3119 = vmatpush.bf16.msrb.mxu3 %v9430_v43  ;;  %v9427_v43 = vld [vmem:[#allocation5 + $0x88] sm:$0xff] }
 0x3fd   : > { %1806 = vmatmul.bf16.gmra.mxu3 %v9654_v18  ;;  %v9429_v18 = vld [vmem:[#allocation5 + $0x98] sm:$0xff] }
 0x3fe   : > { %v1324_v39 = vpop.f32.mrf.mxu0 }
 0x3ff   : > { %v2144_v42 = vpop.f32.mrf.mxu1 }
 0x400   : > { %3120 = vmatpush.bf16.msrb.mxu3 %v9429_v18  ;;  %v10636_v18 = vld [vmem:[%s10055_s11 + $0x70] sm:$0xff] }
 0x401   : > { %1899 = vmatmul.bf16.gmra.mxu0 %v10526_v62  ;;  %v10613_v29 = vpop.f32.mrf.mxu3 }
 0x402   : > { %13136 = vst [vmem:[#allocation64_spill] sm:$0xff] %v10613_v29  ;;  %v1052_v29 = vadd.f32 %v13140_v61, %v13139_v14  ;;  %v9457_v14 = vld [vmem:[#allocation7 + $0x38] sm:$0xff] }
 0x403   : > { %4897 = vmatpush.bf16.msra.mxu2 %v9457_v14 }
 0x406   : > { %v1326_v16 = vpop.f32.mrf.mxu0 }
 0x407   : > { %v10623_v16 = vld [vmem:[%s10055_s11 + $0x68] sm:$0xff]  ;;  %v2146_v34 = vpop.f32.mrf.mxu1 }
 0x408   : > { %2183 = vmatmul.bf16.gmra.mxu1 %v10623_v16  ;;  %2877 = vmatmul.bf16.gmra.mxu2 %v10568_v20 }
 0x409   : > { %v10618_v57 = vpop.f32.mrf.mxu3 }
 0x40a   : > { %13138 = vst [vmem:[#allocation21_spill] sm:$0xff] %v10618_v57 }
 0x40d   : > { %1809 = vmatmul.bf16.gmra.mxu3 %v9656_v13  ;;  %v9447_v13 = vld [vmem:[#allocation5 + $0x228] sm:$0xff] }
 0x40e   : > { %v1329_v39 = vpop.f32.mrf.mxu0  ;;  %3387 = vmatpush.bf16.msrb.mxu0 %v9447_v13 }
 0x40f   : > { %v10616_v5 = vadd.f32 %v1329_v39, %v13137_v6  ;;  %v9428_v6 = vld [vmem:[#allocation5 + $0x90] sm:$0xff]  ;;  %v2149_v23 = vpop.f32.mrf.mxu1 }
 0x410   : > { %3121 = vmatpush.bf16.msrb.mxu3 %v9428_v6  ;;  %v9465_v6 = vld [vmem:[#allocation7 + $0xf8] sm:$0xff] }
 0x411   : > { %1904 = vmatmul.bf16.gmra.mxu0 %v10542_v2  ;;  %v10631_v57 = vpop.f32.mrf.mxu3  ;;  %4673 = vmatpush.bf16.msra.mxu1 %v9465_v6 }
 0x412   : > { %13141 = vst [vmem:[#allocation23_spill] sm:$0xff] %v10631_v57  ;;  %v10657_v57 = vld [vmem:[%s10055_s11 + $0x80] sm:$0xff] }
 0x414   : > { %3122 = vmatpush.bf16.msrb.mxu3 %v9427_v43 }
 0x416   : > { %v1331_v39 = vpop.f32.mrf.mxu0 }
 0x417   : > { %v10629_v42 = vadd.f32 %v1331_v39, %v1052_v29  ;;  %v2151_v29 = vpop.f32.mrf.mxu1 }
 0x418   : > { %3123 = vmatpush.bf16.msrb.mxu3 %v9426_v41  ;;  %2188 = vmatmul.bf16.gmra.mxu1 %v10636_v18  ;;  %v10647_v41 = vld [vmem:[%s10055_s11 + $0x78] sm:$0xff] }
 0x419   : > { %v1775_v36 = vpop.f32.mrf.mxu3  ;;  %2882 = vmatmul.bf16.gmra.mxu2 %v10499_v22 }
 0x41d   : > { %3124 = vmatmul.bf16.vlgmr.msrb.gmra.mxu3 %v10522_v31 }
 0x41e   : > { %v1870_v33 = vpop.f32.mrf.mxu0 }
 0x41f   : > { %v2154_v39 = vpop.f32.mrf.mxu1 }
 0x421   : > { %1909 = vmatmul.bf16.gmra.mxu0 %v10556_v38  ;;  %v10640_v33 = vpop.f32.mrf.mxu3 }
 0x422   : > { %13142 = vst [vmem:[#allocation24_spill] sm:$0xff] %v10640_v33 }
 0x426   : > { %v1872_v34 = vpop.f32.mrf.mxu0 }
 0x427   : > { %v2156_v13 = vpop.f32.mrf.mxu1 }
 0x428   : > { %2193 = vmatmul.bf16.gmra.mxu1 %v10647_v41 }
 0x429   : > { %v10642_v61 = vpop.f32.mrf.mxu3  ;;  %2887 = vmatmul.bf16.gmra.mxu2 %v10512_v47 }
 0x42a   : > { %13143 = vst [vmem:[#allocation65_spill] sm:$0xff] %v10642_v61 }
 0x42d   : > { %3129 = vmatmul.bf16.gmra.mxu3 %v10538_v37 }
 0x42e   : > { %v1875_v36 = vpop.f32.mrf.mxu0 }
 0x42f   : > { %v2159_v61 = vpop.f32.mrf.mxu1 }
 0x431   : > { %1914 = vmatmul.bf16.gmra.mxu0 %v10572_v32  ;;  %v10651_v43 = vpop.f32.mrf.mxu3 }
 0x432   : > { %13144 = vst [vmem:[#allocation66_spill] sm:$0xff] %v10651_v43 }
 0x436   : > { %v1877_v31 = vpop.f32.mrf.mxu0 }
 0x437   : > { %v2161_v13 = vpop.f32.mrf.mxu1 }
 0x438   : > { %2198 = vmatmul.bf16.gmra.mxu1 %v10657_v57 }
 0x439   : > { %v1785_v14 = vpop.f32.mrf.mxu3  ;;  %2892 = vmatmul.bf16.gmra.mxu2 %v10526_v62 }
 0x43d   : > { %3134 = vmatmul.bf16.gmra.mxu3 %v10552_v10 }
 0x43e   : > { %v1880_v34 = vpop.f32.mrf.mxu0 }
 0x43f   : > { %v1881_v36 = vadd.f32 %v1880_v34, %v10351_v54  ;;  %v2164_v10 = vpop.f32.mrf.mxu1 }
 0x441   : > { %v2338_v33 = vadd.f32 %v2149_v23, %v1881_v36  ;;  %1919 = vmatmul.bf16.gmra.mxu0 %v10583_v55  ;;  %v1788_v6 = vpop.f32.mrf.mxu3 }
 0x442   : > { %v10682_v6 = vld [vmem:[%s10055_s11 + $0x90] sm:$0xff] }
 0x443   : > { %v2492_v34 = vrot.slane %v2338_v33, 1 }
 0x446   : > { %v1882_v37 = vpop.f32.mrf.mxu0 }
 0x447   : > { %v1883_v31 = vadd.f32 %v1882_v37, %v10354_v1 }
 0x449   : > { %v2339_v54 = vadd.f32 %v2151_v29, %v1883_v31  ;;  %v1790_v51 = vpop.f32.mrf.mxu3  ;;  %v10670_v29 = vld [vmem:[%s10055_s11 + $0x88] sm:$0xff]  ;;  %2897 = vmatmul.bf16.gmra.mxu2 %v10542_v2 }
 0x44a   : > { %2203 = vmatmul.bf16.gmra.mxu1 %v10670_v29 }
 0x44b   : > { %v2494_v23 = vrot.slane %v2339_v54, 1 }
 0x44d   : > { %v2495_v36 = vsel %vm2484_vm0, %v2492_v34, %v2494_v23  ;;  %3139 = vmatmul.bf16.gmra.mxu3 %v10568_v20 }
 0x44e   : > { %v10664_v14 = vadd.f32 %v2495_v36, %v10470_v30  ;;  %v1885_v43 = vpop.f32.mrf.mxu0 }
 0x44f   : > { %v1886_v24 = vadd.f32 %v1885_v43, %v10360_v58 }
 0x451   : > { %v2340_v21 = vadd.f32 %v2154_v39, %v1886_v24  ;;  %1924 = vmatmul.bf16.gmra.mxu0 %v10597_v3  ;;  %v1793_v51 = vpop.f32.mrf.mxu3  ;;  %v2166_v24 = vpop.f32.mrf.mxu1 }
 0x453   : > { %v2496_v1 = vrot.slane %v2340_v21, 1 }
 0x455   : > { %v2497_v33 = vsel %vm2484_vm0, %v2494_v23, %v2496_v1 }
 0x456   : > { %v10676_v30 = vadd.f32 %v2497_v33, %v10477_v53  ;;  %v1887_v58 = vpop.f32.mrf.mxu0 }
 0x459   : > { %v1795_v37 = vpop.f32.mrf.mxu3  ;;  %v2169_v21 = vpop.f32.mrf.mxu1  ;;  %2902 = vmatmul.bf16.gmra.mxu2 %v10556_v38 }
 0x45a   : > { %2208 = vmatmul.bf16.gmra.mxu1 %v10682_v6  ;;  %v9446_v37 = vld [vmem:[#allocation5 + $0x220] sm:$0xff] }
 0x45b   : > { %3388 = vmatpush.bf16.msrb.mxu0 %v9446_v37 }
 0x45d   : > { %3144 = vmatmul.bf16.gmra.mxu3 %v10499_v22 }
 0x45e   : > { %v1890_v39 = vpop.f32.mrf.mxu0 }
 0x45f   : > { %v1891_v43 = vadd.f32 %v1890_v39, %v10369_v4  ;;  %v1447_v39 = vpop.f32.mrf.mxu2 }
 0x461   : > { %v2342_v31 = vadd.f32 %v2159_v61, %v1891_v43  ;;  %1929 = vmatmul.bf16.gmra.mxu0 %v10609_v49  ;;  %v1798_v54 = vpop.f32.mrf.mxu3  ;;  %v2171_v34 = vpop.f32.mrf.mxu1 }
 0x463   : > { %v2500_v23 = vrot.slane %v2342_v31, 1 }
 0x466   : > { %v1892_v20 = vpop.f32.mrf.mxu0 }
 0x467   : > { %v1893_v53 = vadd.f32 %v1892_v20, %v10373_v12 }
 0x469   : > { %v2343_v4 = vadd.f32 %v2161_v13, %v1893_v53  ;;  %v1800_v51 = vpop.f32.mrf.mxu3  ;;  %v2174_v24 = vpop.f32.mrf.mxu1  ;;  %v10695_v13 = vld [vmem:[%s10055_s11 + $0x98] sm:$0xff]  ;;  %2907 = vmatmul.bf16.gmra.mxu2 %v10572_v32 }
 0x46a   : > { %2213 = vmatmul.bf16.gmra.mxu1 %v10695_v13  ;;  %v1448_v53 = vpop.f32.mrf.mxu2  ;;  %v13145_v51 = vld [vmem:[#allocation39_spill] sm:$0xff] }
 0x46b   : > { %v2502_v36 = vrot.slane %v2343_v4, 1 }
 0x46d   : > { %v2503_v61 = vsel %vm2484_vm0, %v2500_v23, %v2502_v36  ;;  %3149 = vmatmul.bf16.gmra.mxu3 %v10512_v47 }
 0x46e   : > { %v10689_v1 = vadd.f32 %v2503_v61, %v10486_v52  ;;  %v1895_v33 = vpop.f32.mrf.mxu0 }
 0x46f   : > { %v1896_v58 = vadd.f32 %v1895_v33, %v10381_v19  ;;  %v10707_v33 = vld [vmem:[%s10055_s11 + $0xa0] sm:$0xff] }
 0x471   : > { %v2344_v22 = vadd.f32 %v2164_v10, %v1896_v58  ;;  %1934 = vmatmul.bf16.gmra.mxu0 %v10623_v16  ;;  %v9456_v10 = vld [vmem:[#allocation7 + $0x30] sm:$0xff]  ;;  %v1803_v31 = vpop.f32.mrf.mxu3  ;;  %v2176_v20 = vpop.f32.mrf.mxu1 }
 0x472   : > { %4898 = vmatpush.bf16.msra.mxu2 %v9456_v10  ;;  %v1450_v47 = vpop.f32.mrf.mxu2  ;;  %v13146_v20 = vld [vmem:[#allocation42_spill] sm:$0xff] }
 0x473   : > { %v2504_v12 = vrot.slane %v2344_v22, 1 }
 0x475   : > { %v2505_v43 = vsel %vm2484_vm0, %v2502_v36, %v2504_v12 }
 0x476   : > { %v10701_v52 = vadd.f32 %v2505_v43, %v10493_v56  ;;  %v1897_v19 = vpop.f32.mrf.mxu0  ;;  %v9464_v56 = vld [vmem:[#allocation7 + $0xf0] sm:$0xff] }
 0x477   : > { %4674 = vmatpush.bf16.msra.mxu1 %v9464_v56 }
 0x479   : > { %v1805_v23 = vpop.f32.mrf.mxu3  ;;  %v2179_v61 = vpop.f32.mrf.mxu1  ;;  %2912 = vmatmul.bf16.gmra.mxu2 %v10583_v55 }
 0x47a   : > { %2218 = vmatmul.bf16.gmra.mxu1 %v10707_v33  ;;  %v1451_v19 = vpop.f32.mrf.mxu2 }
 0x47d   : > { %3154 = vmatmul.bf16.gmra.mxu3 %v10526_v62 }
 0x47e   : > { %v1900_v54 = vpop.f32.mrf.mxu0 }
 0x47f   : > { %v1901_v4 = vadd.f32 %v1900_v54, %v10388_v8 }
 0x481   : > { %v2346_v36 = vadd.f32 %v2169_v21, %v1901_v4  ;;  %1939 = vmatmul.bf16.gmra.mxu0 %v10636_v18  ;;  %v1807_v8 = vpop.f32.mrf.mxu3  ;;  %v2181_v12 = vpop.f32.mrf.mxu1 }
 0x483   : > { %v2508_v39 = vrot.slane %v2346_v36, 1  ;;  %v2873_v36 = vpop.f32.mrf.mxu2 }
 0x486   : > { %v1902_v58 = vpop.f32.mrf.mxu0 }
 0x487   : > { %v1903_v22 = vadd.f32 %v1902_v58, %v13145_v51 }
 0x489   : > { %v2347_v21 = vadd.f32 %v2171_v34, %v1903_v22  ;;  %v1808_v54 = vpop.f32.mrf.mxu3  ;;  %v2184_v62 = vpop.f32.mrf.mxu1  ;;  %v10720_v34 = vld [vmem:[%s10055_s11 + $0xa8] sm:$0xff]  ;;  %2917 = vmatmul.bf16.gmra.mxu2 %v10597_v3 }
 0x48a   : > { %2223 = vmatmul.bf16.gmra.mxu1 %v10720_v34 }
 0x48b   : > { %v2510_v43 = vrot.slane %v2347_v21, 1  ;;  %v2875_v51 = vpop.f32.mrf.mxu2 }
 0x48d   : > { %v2511_v37 = vsel %vm2484_vm0, %v2508_v39, %v2510_v43  ;;  %3159 = vmatmul.bf16.gmra.mxu3 %v10542_v2 }
 0x48e   : > { %v10714_v10 = vadd.f32 %v2511_v37, %v10506_v44  ;;  %v1905_v31 = vpop.f32.mrf.mxu0 }
 0x48f   : > { %v1906_v53 = vadd.f32 %v1905_v31, %v13146_v20 }
 0x491   : > { %v2348_v4 = vadd.f32 %v2174_v24, %v1906_v53  ;;  %1944 = vmatmul.bf16.gmra.mxu0 %v10647_v41  ;;  %v1810_v24 = vpop.f32.mrf.mxu3  ;;  %v2186_v58 = vpop.f32.mrf.mxu1 }
 0x493   : > { %v2512_v23 = vrot.slane %v2348_v4, 1 }
 0x495   : > { %v2513_v44 = vsel %vm2484_vm0, %v2510_v43, %v2512_v23  ;;  %v10732_v43 = vld [vmem:[%s10055_s11 + $0xb0] sm:$0xff] }
 0x496   : > { %v10726_v56 = vadd.f32 %v2513_v44, %v10517_v48  ;;  %v1907_v47 = vpop.f32.mrf.mxu0  ;;  %v2878_v48 = vpop.f32.mrf.mxu2 }
 0x499   : > { %v1811_v21 = vpop.f32.mrf.mxu3  ;;  %v2189_v39 = vpop.f32.mrf.mxu1  ;;  %2922 = vmatmul.bf16.gmra.mxu2 %v10609_v49 }
 0x49a   : > { %2228 = vmatmul.bf16.gmra.mxu1 %v10732_v43 }
 0x49d   : > { %3164 = vmatmul.bf16.gmra.mxu3 %v10556_v38 }
 0x49e   : > { %v1910_v22 = vpop.f32.mrf.mxu0  ;;  %v2880_v54 = vpop.f32.mrf.mxu2 }
 0x49f   : > { %v1911_v8 = vadd.f32 %v1910_v22, %v10405_v17 }
 0x4a1   : > { %v2350_v19 = vadd.f32 %v2179_v61, %v1911_v8  ;;  %1949 = vmatmul.bf16.gmra.mxu0 %v10657_v57  ;;  %v3125_v31 = vpop.f32.mrf.mxu3  ;;  %v2191_v17 = vpop.f32.mrf.mxu1 }
 0x4a2   : > { %v9445_v31 = vld [vmem:[#allocation5 + $0x218] sm:$0xff] }
 0x4a3   : > { %v2516_v53 = vrot.slane %v2350_v19, 1  ;;  %3389 = vmatpush.bf16.msrb.mxu0 %v9445_v31 }
 0x4a6   : > { %v1912_v2 = vpop.f32.mrf.mxu0  ;;  %v2883_v58 = vpop.f32.mrf.mxu2 }
 0x4a7   : > { %v1913_v37 = vadd.f32 %v1912_v2, %v10408_v59 }
 0x4a9   : > { %v2351_v20 = vadd.f32 %v2181_v12, %v1913_v37  ;;  %v3127_v47 = vpop.f32.mrf.mxu3  ;;  %v2194_v38 = vpop.f32.mrf.mxu1  ;;  %v10745_v12 = vld [vmem:[%s10055_s11 + $0xb8] sm:$0xff]  ;;  %2927 = vmatmul.bf16.gmra.mxu2 %v10623_v16 }
 0x4aa   : > { %2233 = vmatmul.bf16.gmra.mxu1 %v10745_v12 }
 0x4ab   : > { %v2518_v61 = vrot.slane %v2351_v20, 1  ;;  %v10757_v20 = vld [vmem:[%s10055_s11 + $0xc0] sm:$0xff] }
 0x4ad   : > { %v2519_v4 = vsel %vm2484_vm0, %v2516_v53, %v2518_v61  ;;  %3169 = vmatmul.bf16.gmra.mxu3 %v10572_v32 }
 0x4ae   : > { %v10739_v23 = vadd.f32 %v2519_v4, %v10533_v0  ;;  %v1915_v36 = vpop.f32.mrf.mxu0  ;;  %v2885_v8 = vpop.f32.mrf.mxu2 }
 0x4af   : > { %v1916_v44 = vadd.f32 %v1915_v36, %v10416_v15 }
 0x4b1   : > { %v2352_v24 = vadd.f32 %v2184_v62, %v1916_v44  ;;  %1954 = vmatmul.bf16.gmra.mxu0 %v10670_v29  ;;  %v3130_v62 = vpop.f32.mrf.mxu3  ;;  %v2196_v22 = vpop.f32.mrf.mxu1 }
 0x4b2   : > { %v10774_v22 = vld [vmem:[%s10055_s11 + $0xc8] sm:$0xff] }
 0x4b3   : > { %v2520_v59 = vrot.slane %v2352_v24, 1 }
 0x4b5   : > { %v2521_v0 = vsel %vm2484_vm0, %v2518_v61, %v2520_v59 }
 0x4b6   : > { %v10751_v15 = vadd.f32 %v2521_v0, %v10547_v60  ;;  %v1917_v51 = vpop.f32.mrf.mxu0  ;;  %v2888_v60 = vpop.f32.mrf.mxu2  ;;  %v9455_v0 = vld [vmem:[#allocation7 + $0x28] sm:$0xff] }
 0x4b7   : > { %4899 = vmatpush.bf16.msra.mxu2 %v9455_v0 }
 0x4b9   : > { %v3132_v48 = vpop.f32.mrf.mxu3  ;;  %v2199_v2 = vpop.f32.mrf.mxu1  ;;  %2932 = vmatmul.bf16.gmra.mxu2 %v10636_v18 }
 0x4ba   : > { %2238 = vmatmul.bf16.gmra.mxu1 %v10757_v20 }
 0x4bd   : > { %3174 = vmatmul.bf16.gmra.mxu3 %v10583_v55 }
 0x4be   : > { %v1920_v21 = vpop.f32.mrf.mxu0  ;;  %v2890_v44 = vpop.f32.mrf.mxu2 }
 0x4bf   : > { %v1921_v19 = vadd.f32 %v1920_v21, %v10422_v25 }
 0x4c1   : > { %v2354_v37 = vadd.f32 %v2189_v39, %v1921_v19  ;;  %1959 = vmatmul.bf16.gmra.mxu0 %v10682_v6  ;;  %v3135_v25 = vpop.f32.mrf.mxu3  ;;  %v2201_v61 = vpop.f32.mrf.mxu1  ;;  %v9463_v19 = vld [vmem:[#allocation7 + $0xe8] sm:$0xff] }
 0x4c2   : > { %v10762_v39 = vadd.f32 %v3135_v25, %v2883_v58  ;;  %4675 = vmatpush.bf16.msra.mxu1 %v9463_v19  ;;  %v10805_v19 = vld [vmem:[%s10055_s11 + $0xd8] sm:$0xff] }
 0x4c3   : > { %v2524_v4 = vrot.slane %v2354_v37, 1 }
 0x4c6   : > { %v1922_v32 = vpop.f32.mrf.mxu0 }
 0x4c7   : > { %v1923_v53 = vadd.f32 %v1922_v32, %v10425_v40 }
 0x4c9   : > { %v2355_v54 = vadd.f32 %v2191_v17, %v1923_v53  ;;  %v3137_v40 = vpop.f32.mrf.mxu3  ;;  %v2204_v51 = vpop.f32.mrf.mxu1  ;;  %2937 = vmatmul.bf16.gmra.mxu2 %v10647_v41 }
 0x4ca   : > { %v10770_v17 = vadd.f32 %v3137_v40, %v2885_v8  ;;  %2243 = vmatmul.bf16.gmra.mxu1 %v10774_v22 }
 0x4cb   : > { %v2526_v36 = vrot.slane %v2355_v54, 1 }
 0x4cd   : > { %v2527_v47 = vsel %vm2484_vm0, %v2524_v4, %v2526_v36  ;;  %3179 = vmatmul.bf16.gmra.mxu3 %v10597_v3 }
 0x4ce   : > { %v10766_v24 = vadd.f32 %v2527_v47, %v10563_v35  ;;  %v1925_v59 = vpop.f32.mrf.mxu0  ;;  %v2893_v35 = vpop.f32.mrf.mxu2 }
 0x4cf   : > { %v1926_v55 = vadd.f32 %v1925_v59, %v10433_v50 }
 0x4d1   : > { %v2356_v62 = vadd.f32 %v2194_v38, %v1926_v55  ;;  %1964 = vmatmul.bf16.gmra.mxu0 %v10695_v13  ;;  %v3140_v8 = vpop.f32.mrf.mxu3  ;;  %v2206_v48 = vpop.f32.mrf.mxu1 }
 0x4d2   : > { %v10782_v37 = vadd.f32 %v3140_v8, %v2888_v60 }
 0x4d3   : > { %v2528_v58 = vrot.slane %v2356_v62, 1 }
 0x4d5   : > { %v2529_v21 = vsel %vm2484_vm0, %v2526_v36, %v2528_v58 }
 0x4d6   : > { %v10780_v50 = vadd.f32 %v2529_v21, %v10577_v11  ;;  %v1927_v38 = vpop.f32.mrf.mxu0  ;;  %v2895_v31 = vpop.f32.mrf.mxu2  ;;  %v10788_v11 = vld [vmem:[%s10055_s11 + $0xd0] sm:$0xff] }
 0x4d8   : > { %13147 = vst [vmem:[#allocation39_spill] sm:$0xff] %v10780_v50 }
 0x4d9   : > { %v3142_v25 = vpop.f32.mrf.mxu3  ;;  %v2209_v54 = vpop.f32.mrf.mxu1  ;;  %2942 = vmatmul.bf16.gmra.mxu2 %v10657_v57 }
 0x4da   : > { %2248 = vmatmul.bf16.gmra.mxu1 %v10788_v11 }
 0x4dd   : > { %3184 = vmatmul.bf16.gmra.mxu3 %v10609_v49 }
 0x4de   : > { %v1930_v32 = vpop.f32.mrf.mxu0  ;;  %v2898_v3 = vpop.f32.mrf.mxu2 }
 0x4df   : > { %v1931_v53 = vadd.f32 %v1930_v32, %v10437_v9 }
 0x4e1   : > { %v2358_v4 = vadd.f32 %v2199_v2, %v1931_v53  ;;  %1969 = vmatmul.bf16.gmra.mxu0 %v10707_v33  ;;  %v3145_v44 = vpop.f32.mrf.mxu3  ;;  %v2211_v47 = vpop.f32.mrf.mxu1 }
 0x4e2   : > { %v10793_v59 = vadd.f32 %v3145_v44, %v2893_v35 }
 0x4e3   : > { %v2532_v2 = vrot.slane %v2358_v4, 1 }
 0x4e6   : > { %v1932_v60 = vpop.f32.mrf.mxu0  ;;  %v2900_v55 = vpop.f32.mrf.mxu2 }
 0x4e7   : > { %v1933_v36 = vadd.f32 %v1932_v60, %v10439_v46 }
 0x4e9   : > { %v2359_v9 = vadd.f32 %v2201_v61, %v1933_v36  ;;  %v3147_v21 = vpop.f32.mrf.mxu3  ;;  %v2214_v38 = vpop.f32.mrf.mxu1  ;;  %2947 = vmatmul.bf16.gmra.mxu2 %v10670_v29 }
 0x4ea   : > { %v10801_v61 = vadd.f32 %v3147_v21, %v2895_v31  ;;  %2253 = vmatmul.bf16.gmra.mxu1 %v10805_v19 }
 0x4eb   : > { %v2534_v0 = vrot.slane %v2359_v9, 1 }
 0x4ed   : > { %v2535_v40 = vsel %vm2484_vm0, %v2532_v2, %v2534_v0  ;;  %3189 = vmatmul.bf16.gmra.mxu3 %v10623_v16  ;;  %v10819_v16 = vld [vmem:[%s10055_s11 + $0xe0] sm:$0xff] }
 0x4ee   : > { %v10797_v62 = vadd.f32 %v2535_v40, %v10591_v45  ;;  %v1935_v58 = vpop.f32.mrf.mxu0  ;;  %v2903_v8 = vpop.f32.mrf.mxu2 }
 0x4ef   : > { %v1936_v49 = vadd.f32 %v1935_v58, %v10443_v63 }
 0x4f0   : > { %13148 = vst [vmem:[#allocation42_spill] sm:$0xff] %v10797_v62 }
 0x4f1   : > { %v2360_v46 = vadd.f32 %v2204_v51, %v1936_v49  ;;  %1974 = vmatmul.bf16.gmra.mxu0 %v10720_v34  ;;  %v3150_v48 = vpop.f32.mrf.mxu3  ;;  %v2216_v31 = vpop.f32.mrf.mxu1 }
 0x4f2   : > { %v10813_v32 = vadd.f32 %v3150_v48, %v2898_v3  ;;  %v9444_v31 = vld [vmem:[#allocation5 + $0x210] sm:$0xff] }
 0x4f3   : > { %v2536_v35 = vrot.slane %v2360_v46, 1  ;;  %3390 = vmatpush.bf16.msrb.mxu0 %v9444_v31 }
 0x4f5   : > { %v2537_v45 = vsel %vm2484_vm0, %v2534_v0, %v2536_v35 }
 0x4f6   : > { %v10811_v63 = vadd.f32 %v2537_v45, %v10602_v27  ;;  %v1937_v51 = vpop.f32.mrf.mxu0  ;;  %v2905_v53 = vpop.f32.mrf.mxu2 }
 0x4f7   : > { %v10836_v51 = vld [vmem:[%s10055_s11 + $0xe8] sm:$0xff] }
 0x4f8   : > { %13149 = vst [vmem:[#allocation67_spill] sm:$0xff] %v10811_v63 }
 0x4f9   : > { %v3152_v60 = vpop.f32.mrf.mxu3  ;;  %v2219_v36 = vpop.f32.mrf.mxu1  ;;  %2952 = vmatmul.bf16.gmra.mxu2 %v10682_v6 }
 0x4fa   : > { %2258 = vmatmul.bf16.gmra.mxu1 %v10819_v16 }
 0x4fd   : > { %3194 = vmatmul.bf16.gmra.mxu3 %v10636_v18 }
 0x4fe   : > { %v1940_v25 = vpop.f32.mrf.mxu0  ;;  %v2908_v27 = vpop.f32.mrf.mxu2 }
 0x4ff   : > { %v1941_v4 = vadd.f32 %v1940_v25, %v10447_v28 }
 0x501   : > { %v2362_v44 = vadd.f32 %v2209_v54, %v1941_v4  ;;  %1979 = vmatmul.bf16.gmra.mxu0 %v10732_v43  ;;  %v3155_v2 = vpop.f32.mrf.mxu3  ;;  %v2221_v0 = vpop.f32.mrf.mxu1 }
 0x502   : > { %v10824_v55 = vadd.f32 %v3155_v2, %v2903_v8 }
 0x503   : > { %v2540_v54 = vrot.slane %v2362_v44, 1 }
 0x506   : > { %v1942_v3 = vpop.f32.mrf.mxu0  ;;  %v2910_v58 = vpop.f32.mrf.mxu2 }
 0x507   : > { %v1943_v9 = vadd.f32 %v1942_v3, %v10449_v7 }
 0x509   : > { %v2363_v28 = vadd.f32 %v2211_v47, %v1943_v9  ;;  %v3157_v35 = vpop.f32.mrf.mxu3  ;;  %v2224_v45 = vpop.f32.mrf.mxu1  ;;  %v13152_v9 = vld [vmem:[#allocation49_spill] sm:$0xff]  ;;  %2957 = vmatmul.bf16.gmra.mxu2 %v10695_v13 }
 0x50a   : > { %v10832_v47 = vadd.f32 %v3157_v35, %v2905_v53  ;;  %2263 = vmatmul.bf16.gmra.mxu1 %v10836_v51  ;;  %v9454_v53 = vld [vmem:[#allocation7 + $0x20] sm:$0xff] }
 0x50b   : > { %v2542_v40 = vrot.slane %v2363_v28, 1  ;;  %4900 = vmatpush.bf16.msra.mxu2 %v9454_v53  ;;  %v13154_v53 = vld [vmem:[#allocation25_spill] sm:$0xff] }
 0x50d   : > { %v2543_v49 = vsel %vm2484_vm0, %v2540_v54, %v2542_v40  ;;  %3199 = vmatmul.bf16.gmra.mxu3 %v10647_v41 }
 0x50e   : > { %v10828_v21 = vadd.f32 %v2543_v49, %v10616_v5  ;;  %v1945_v46 = vpop.f32.mrf.mxu0  ;;  %v2913_v48 = vpop.f32.mrf.mxu2  ;;  %v13153_v49 = vld [vmem:[#allocation50_spill] sm:$0xff] }
 0x50f   : > { %v1946_v18 = vadd.f32 %v1945_v46, %v10453_v26 }
 0x510   : > { %13150 = vst [vmem:[#allocation68_spill] sm:$0xff] %v10828_v21  ;;  %v9453_v21 = vld [vmem:[#allocation7 + $0x18] sm:$0xff] }
 0x511   : > { %v2364_v7 = vadd.f32 %v2214_v38, %v1946_v18  ;;  %1984 = vmatmul.bf16.gmra.mxu0 %v10745_v12  ;;  %v3160_v25 = vpop.f32.mrf.mxu3  ;;  %v2226_v4 = vpop.f32.mrf.mxu1  ;;  %4901 = vmatpush.bf16.msra.mxu2 %v9453_v21  ;;  %v13173_v21 = vld [vmem:[#allocation30_spill] sm:$0xff] }
 0x512   : > { %v10844_v60 = vadd.f32 %v3160_v25, %v2908_v27 }
 0x513   : > { %v2544_v8 = vrot.slane %v2364_v7, 1 }
 0x515   : > { %v2545_v5 = vsel %vm2484_vm0, %v2542_v40, %v2544_v8  ;;  %v10850_v40 = vld [vmem:[%s10055_s11 + $0xf0] sm:$0xff] }
 0x516   : > { %v10842_v26 = vadd.f32 %v2545_v5, %v10629_v42  ;;  %v1947_v38 = vpop.f32.mrf.mxu0  ;;  %v2915_v44 = vpop.f32.mrf.mxu2  ;;  %v9462_v42 = vld [vmem:[#allocation7 + $0xe0] sm:$0xff] }
 0x517   : > { %4676 = vmatpush.bf16.msra.mxu1 %v9462_v42 }
 0x518   : > { %13151 = vst [vmem:[#allocation69_spill] sm:$0xff] %v10842_v26 }
 0x519   : > { %v3162_v28 = vpop.f32.mrf.mxu3  ;;  %v2229_v54 = vpop.f32.mrf.mxu1  ;;  %2962 = vmatmul.bf16.gmra.mxu2 %v10707_v33 }
 0x51a   : > { %2268 = vmatmul.bf16.gmra.mxu1 %v10850_v40 }
 0x51d   : > { %3204 = vmatmul.bf16.gmra.mxu3 %v10657_v57 }
 0x51e   : > { %v1950_v3 = vpop.f32.mrf.mxu0  ;;  %v2918_v58 = vpop.f32.mrf.mxu2 }
 0x51f   : > { %v1951_v2 = vadd.f32 %v1950_v3, %v13152_v9  ;;  %v13156_v3 = vld [vmem:[#allocation51_spill] sm:$0xff] }
 0x521   : > { %v2366_v41 = vadd.f32 %v2219_v36, %v1951_v2  ;;  %1989 = vmatmul.bf16.gmra.mxu0 %v10757_v20  ;;  %v3165_v18 = vpop.f32.mrf.mxu3  ;;  %v2231_v35 = vpop.f32.mrf.mxu1 }
 0x522   : > { %v10855_v36 = vadd.f32 %v3165_v18, %v2913_v48 }
 0x523   : > { %v2548_v8 = vrot.slane %v2366_v41, 1  ;;  %v10867_v41 = vld [vmem:[%s10055_s11 + $0xf8] sm:$0xff] }
 0x526   : > { %v1952_v27 = vpop.f32.mrf.mxu0  ;;  %v2920_v38 = vpop.f32.mrf.mxu2 }
 0x527   : > { %v1953_v46 = vadd.f32 %v1952_v27, %v13153_v49  ;;  %v13157_v49 = vld [vmem:[#allocation26_spill] sm:$0xff] }
 0x529   : > { %v2367_v7 = vadd.f32 %v2221_v0, %v1953_v46  ;;  %v3167_v9 = vpop.f32.mrf.mxu3  ;;  %v2234_v2 = vpop.f32.mrf.mxu1  ;;  %2967 = vmatmul.bf16.gmra.mxu2 %v10720_v34 }
 0x52a   : > { %v10863_v0 = vadd.f32 %v3167_v9, %v2915_v44  ;;  %2273 = vmatmul.bf16.gmra.mxu1 %v10867_v41  ;;  %v13160_v9 = vld [vmem:[#allocation53_spill] sm:$0xff] }
 0x52b   : > { %v2550_v5 = vrot.slane %v2367_v7, 1 }
 0x52d   : > { %v2551_v31 = vsel %vm2484_vm0, %v2548_v8, %v2550_v5  ;;  %3209 = vmatmul.bf16.gmra.mxu3 %v10670_v29  ;;  %v10881_v29 = vld [vmem:[%s10055_s11 + $0x100] sm:$0xff] }
 0x52e   : > { %v10859_v25 = vadd.f32 %v2551_v31, %v13154_v53  ;;  %v1955_v4 = vpop.f32.mrf.mxu0  ;;  %v2923_v42 = vpop.f32.mrf.mxu2  ;;  %v13159_v31 = vld [vmem:[#allocation52_spill] sm:$0xff] }
 0x52f   : > { %v1956_v57 = vadd.f32 %v1955_v4, %v13156_v3 }
 0x530   : > { %13155 = vst [vmem:[#allocation49_spill] sm:$0xff] %v10859_v25 }
 0x531   : > { %v2368_v28 = vadd.f32 %v2224_v45, %v1956_v57  ;;  %1994 = vmatmul.bf16.gmra.mxu0 %v10774_v22  ;;  %v3170_v18 = vpop.f32.mrf.mxu3  ;;  %v2236_v44 = vpop.f32.mrf.mxu1 }
 0x532   : > { %v10875_v7 = vadd.f32 %v3170_v18, %v2918_v58 }
 0x533   : > { %v2552_v48 = vrot.slane %v2368_v28, 1 }
 0x535   : > { %v2553_v27 = vsel %vm2484_vm0, %v2550_v5, %v2552_v48 }
 0x536   : > { %v10873_v46 = vadd.f32 %v2553_v27, %v13157_v49  ;;  %v1957_v45 = vpop.f32.mrf.mxu0  ;;  %v2925_v8 = vpop.f32.mrf.mxu2 }
 0x538   : > { %13158 = vst [vmem:[#allocation50_spill] sm:$0xff] %v10873_v46  ;;  %v13163_v46 = vld [vmem:[#allocation54_spill] sm:$0xff] }
 0x539   : > { %v3172_v4 = vpop.f32.mrf.mxu3  ;;  %v2239_v3 = vpop.f32.mrf.mxu1  ;;  %2972 = vmatmul.bf16.gmra.mxu2 %v10732_v43 }
 0x53a   : > { %2278 = vmatmul.bf16.gmra.mxu1 %v10881_v29 }
 0x53d   : > { %3214 = vmatmul.bf16.gmra.mxu3 %v10682_v6 }
 0x53e   : > { %v1960_v38 = vpop.f32.mrf.mxu0  ;;  %v2928_v5 = vpop.f32.mrf.mxu2 }
 0x53f   : > { %v1961_v53 = vadd.f32 %v1960_v38, %v13159_v31  ;;  %v13161_v31 = vld [vmem:[#allocation27_spill] sm:$0xff] }
 0x541   : > { %v2370_v57 = vadd.f32 %v2229_v54, %v1961_v53  ;;  %1999 = vmatmul.bf16.gmra.mxu0 %v10788_v11  ;;  %v3175_v48 = vpop.f32.mrf.mxu3  ;;  %v2241_v27 = vpop.f32.mrf.mxu1 }
 0x542   : > { %v10886_v45 = vadd.f32 %v3175_v48, %v2923_v42 }
 0x543   : > { %v2556_v54 = vrot.slane %v2370_v57, 1  ;;  %v10898_v57 = vld [vmem:[%s10055_s11 + $0x108] sm:$0xff] }
 0x546   : > { %v1962_v58 = vpop.f32.mrf.mxu0  ;;  %v2930_v44 = vpop.f32.mrf.mxu2 }
 0x547   : > { %v1963_v28 = vadd.f32 %v1962_v58, %v13160_v9 }
 0x549   : > { %v2371_v49 = vadd.f32 %v2231_v35, %v1963_v28  ;;  %v3177_v25 = vpop.f32.mrf.mxu3  ;;  %v2244_v26 = vpop.f32.mrf.mxu1  ;;  %2977 = vmatmul.bf16.gmra.mxu2 %v10745_v12 }
 0x54a   : > { %v10894_v35 = vadd.f32 %v3177_v25, %v2925_v8  ;;  %2283 = vmatmul.bf16.gmra.mxu1 %v10898_v57 }
 0x54b   : > { %v2558_v18 = vrot.slane %v2371_v49, 1 }
 0x54d   : > { %v2559_v38 = vsel %vm2484_vm0, %v2556_v54, %v2558_v18  ;;  %3219 = vmatmul.bf16.gmra.mxu3 %v10695_v13  ;;  %v9443_v13 = vld [vmem:[#allocation5 + $0x208] sm:$0xff] }
 0x54e   : > { %v10890_v53 = vadd.f32 %v2559_v38, %v13161_v31  ;;  %v1965_v4 = vpop.f32.mrf.mxu0  ;;  %v2933_v9 = vpop.f32.mrf.mxu2  ;;  %v13166_v38 = vld [vmem:[#allocation55_spill] sm:$0xff]  ;;  %3391 = vmatpush.bf16.msrb.mxu0 %v9443_v13 }
 0x54f   : > { %v1966_v6 = vadd.f32 %v1965_v4, %v13163_v46  ;;  %v13164_v46 = vld [vmem:[#allocation28_spill] sm:$0xff] }
 0x550   : > { %13162 = vst [vmem:[#allocation25_spill] sm:$0xff] %v10890_v53 }
 0x551   : > { %v2372_v58 = vadd.f32 %v2234_v2, %v1966_v6  ;;  %2004 = vmatmul.bf16.gmra.mxu0 %v10805_v19  ;;  %v3180_v49 = vpop.f32.mrf.mxu3  ;;  %v2246_v25 = vpop.f32.mrf.mxu1 }
 0x552   : > { %v10906_v8 = vadd.f32 %v3180_v49, %v2928_v5 }
 0x553   : > { %v2560_v42 = vrot.slane %v2372_v58, 1 }
 0x555   : > { %v2561_v28 = vsel %vm2484_vm0, %v2558_v18, %v2560_v42  ;;  %v10912_v18 = vld [vmem:[%s10055_s11 + $0x110] sm:$0xff] }
 0x556   : > { %v10904_v48 = vadd.f32 %v2561_v28, %v13164_v46  ;;  %v1967_v2 = vpop.f32.mrf.mxu0  ;;  %v2935_v54 = vpop.f32.mrf.mxu2  ;;  %v13167_v28 = vld [vmem:[#allocation56_spill] sm:$0xff] }
 0x558   : > { %13165 = vst [vmem:[#allocation51_spill] sm:$0xff] %v10904_v48  ;;  %v13169_v48 = vld [vmem:[#allocation29_spill] sm:$0xff] }
 0x559   : > { %v3182_v4 = vpop.f32.mrf.mxu3  ;;  %v2249_v6 = vpop.f32.mrf.mxu1  ;;  %2982 = vmatmul.bf16.gmra.mxu2 %v10757_v20 }
 0x55a   : > { %2288 = vmatmul.bf16.gmra.mxu1 %v10912_v18 }
 0x55d   : > { %3224 = vmatmul.bf16.gmra.mxu3 %v10707_v33  ;;  %v13171_v33 = vld [vmem:[#allocation57_spill] sm:$0xff] }
 0x55e   : > { %v1970_v44 = vpop.f32.mrf.mxu0  ;;  %v2938_v42 = vpop.f32.mrf.mxu2 }
 0x55f   : > { %v1971_v31 = vadd.f32 %v1970_v44, %v13166_v38 }
 0x561   : > { %v2374_v58 = vadd.f32 %v2239_v3, %v1971_v31  ;;  %2009 = vmatmul.bf16.gmra.mxu0 %v10819_v16  ;;  %v3185_v2 = vpop.f32.mrf.mxu3  ;;  %v2251_v49 = vpop.f32.mrf.mxu1 }
 0x562   : > { %v10917_v3 = vadd.f32 %v3185_v2, %v2933_v9 }
 0x563   : > { %v2564_v44 = vrot.slane %v2374_v58, 1  ;;  %v10929_v58 = vld [vmem:[%s10055_s11 + $0x118] sm:$0xff] }
 0x564   : > { %13168 = vst [vmem:[#allocation26_spill] sm:$0xff] %v10917_v3 }
 0x566   : > { %v1972_v5 = vpop.f32.mrf.mxu0  ;;  %v2940_v31 = vpop.f32.mrf.mxu2 }
 0x567   : > { %v1973_v46 = vadd.f32 %v1972_v5, %v13167_v28 }
 0x569   : > { %v2375_v25 = vadd.f32 %v2241_v27, %v1973_v46  ;;  %v3187_v5 = vpop.f32.mrf.mxu3  ;;  %v2254_v28 = vpop.f32.mrf.mxu1  ;;  %2987 = vmatmul.bf16.gmra.mxu2 %v10774_v22 }
 0x56a   : > { %v10925_v27 = vadd.f32 %v3187_v5, %v2935_v54  ;;  %2293 = vmatmul.bf16.gmra.mxu1 %v10929_v58 }
 0x56b   : > { %v2566_v38 = vrot.slane %v2375_v25, 1 }
 0x56c   : > { %13172 = vst [vmem:[#allocation53_spill] sm:$0xff] %v10925_v27 }
 0x56d   : > { %v2567_v4 = vsel %vm2484_vm0, %v2564_v44, %v2566_v38  ;;  %3229 = vmatmul.bf16.gmra.mxu3 %v10720_v34  ;;  %v10943_v34 = vld [vmem:[%s10055_s11 + $0x120] sm:$0xff] }
 0x56e   : > { %v10921_v53 = vadd.f32 %v2567_v4, %v13169_v48  ;;  %v1975_v13 = vpop.f32.mrf.mxu0  ;;  %v2943_v48 = vpop.f32.mrf.mxu2  ;;  %v13176_v4 = vld [vmem:[#allocation58_spill] sm:$0xff] }
 0x56f   : > { %v1976_v63 = vadd.f32 %v1975_v13, %v13171_v33 }
 0x570   : > { %13170 = vst [vmem:[#allocation52_spill] sm:$0xff] %v10921_v53 }
 0x571   : > { %v2376_v62 = vadd.f32 %v2244_v26, %v1976_v63  ;;  %2014 = vmatmul.bf16.gmra.mxu0 %v10836_v51  ;;  %v9461_v26 = vld [vmem:[#allocation7 + $0xd8] sm:$0xff]  ;;  %v3190_v54 = vpop.f32.mrf.mxu3  ;;  %v2256_v25 = vpop.f32.mrf.mxu1 }
 0x572   : > { %4677 = vmatpush.bf16.msra.mxu1 %v9461_v26  ;;  %v10937_v44 = vadd.f32 %v3190_v54, %v2938_v42 }
 0x573   : > { %v2568_v9 = vrot.slane %v2376_v62, 1 }
 0x574   : > { %13175 = vst [vmem:[#allocation54_spill] sm:$0xff] %v10937_v44  ;;  %v13181_v44 = vld [vmem:[#allocation60_spill] sm:$0xff] }
 0x575   : > { %v2569_v46 = vsel %vm2484_vm0, %v2566_v38, %v2568_v9 }
 0x576   : > { %v10935_v2 = vadd.f32 %v2569_v46, %v13173_v21  ;;  %v1977_v63 = vpop.f32.mrf.mxu0  ;;  %v2945_v62 = vpop.f32.mrf.mxu2  ;;  %v13177_v46 = vld [vmem:[#allocation59_spill] sm:$0xff] }
 0x578   : > { %13174 = vst [vmem:[#allocation27_spill] sm:$0xff] %v10935_v2 }
 0x579   : > { %v3192_v33 = vpop.f32.mrf.mxu3  ;;  %v2259_v5 = vpop.f32.mrf.mxu1  ;;  %2992 = vmatmul.bf16.gmra.mxu2 %v10788_v11 }
 0x57a   : > { %2298 = vmatmul.bf16.gmra.mxu1 %v10943_v34  ;;  %v13179_v33 = vld [vmem:[#allocation31_spill] sm:$0xff] }
 0x57d   : > { %3234 = vmatmul.bf16.gmra.mxu3 %v10732_v43 }
 0x57e   : > { %v1980_v31 = vpop.f32.mrf.mxu0  ;;  %v2948_v9 = vpop.f32.mrf.mxu2 }
 0x57f   : > { %v1981_v13 = vadd.f32 %v1980_v31, %v13176_v4 }
 0x581   : > { %v2378_v38 = vadd.f32 %v2249_v6, %v1981_v13  ;;  %2019 = vmatmul.bf16.gmra.mxu0 %v10850_v40  ;;  %v3195_v63 = vpop.f32.mrf.mxu3  ;;  %v2261_v26 = vpop.f32.mrf.mxu1 }
 0x582   : > { %v10948_v25 = vadd.f32 %v3195_v63, %v2943_v48 }
 0x583   : > { %v2572_v6 = vrot.slane %v2378_v38, 1  ;;  %v10960_v38 = vld [vmem:[%s10055_s11 + $0x128] sm:$0xff] }
 0x584   : > { %13178 = vst [vmem:[#allocation28_spill] sm:$0xff] %v10948_v25 }
 0x586   : > { %v1982_v42 = vpop.f32.mrf.mxu0  ;;  %v2950_v4 = vpop.f32.mrf.mxu2 }
 0x587   : > { %v1983_v21 = vadd.f32 %v1982_v42, %v13177_v46  ;;  %v13186_v4 = vld [vmem:[#allocation61_spill] sm:$0xff] }
 0x589   : > { %v2379_v54 = vadd.f32 %v2251_v49, %v1983_v21  ;;  %v3197_v27 = vpop.f32.mrf.mxu3  ;;  %v2264_v3 = vpop.f32.mrf.mxu1  ;;  %2997 = vmatmul.bf16.gmra.mxu2 %v10805_v19 }
 0x58a   : > { %v10956_v49 = vadd.f32 %v3197_v27, %v2945_v62  ;;  %2303 = vmatmul.bf16.gmra.mxu1 %v10960_v38 }
 0x58b   : > { %v2574_v31 = vrot.slane %v2379_v54, 1 }
 0x58c   : > { %13182 = vst [vmem:[#allocation56_spill] sm:$0xff] %v10956_v49 }
 0x58d   : > { %v2575_v13 = vsel %vm2484_vm0, %v2572_v6, %v2574_v31  ;;  %3239 = vmatmul.bf16.gmra.mxu3 %v10745_v12  ;;  %v10974_v12 = vld [vmem:[%s10055_s11 + $0x130] sm:$0xff] }
 0x58e   : > { %v10952_v2 = vadd.f32 %v2575_v13, %v13179_v33  ;;  %v1985_v53 = vpop.f32.mrf.mxu0  ;;  %v2953_v46 = vpop.f32.mrf.mxu2 }
 0x58f   : > { %v1986_v43 = vadd.f32 %v1985_v53, %v13181_v44  ;;  %v13183_v53 = vld [vmem:[#allocation32_spill] sm:$0xff] }
 0x590   : > { %13180 = vst [vmem:[#allocation55_spill] sm:$0xff] %v10952_v2 }
 0x591   : > { %v2380_v42 = vadd.f32 %v2254_v28, %v1986_v43  ;;  %2024 = vmatmul.bf16.gmra.mxu0 %v10867_v41  ;;  %v3200_v63 = vpop.f32.mrf.mxu3  ;;  %v2266_v27 = vpop.f32.mrf.mxu1 }
 0x592   : > { %v10968_v62 = vadd.f32 %v3200_v63, %v2948_v9 }
 0x593   : > { %v2576_v48 = vrot.slane %v2380_v42, 1 }
 0x594   : > { %13185 = vst [vmem:[#allocation57_spill] sm:$0xff] %v10968_v62  ;;  %v13191_v62 = vld [vmem:[#allocation14_spill] sm:$0xff] }
 0x595   : > { %v2577_v21 = vsel %vm2484_vm0, %v2574_v31, %v2576_v48  ;;  %v13187_v48 = vld [vmem:[#allocation12_spill] sm:$0xff] }
 0x596   : > { %v10966_v44 = vadd.f32 %v2577_v21, %v13183_v53  ;;  %v1987_v28 = vpop.f32.mrf.mxu0  ;;  %v2955_v54 = vpop.f32.mrf.mxu2 }
 0x598   : > { %13184 = vst [vmem:[#allocation29_spill] sm:$0xff] %v10966_v44 }
 0x599   : > { %v3202_v33 = vpop.f32.mrf.mxu3  ;;  %v2269_v43 = vpop.f32.mrf.mxu1  ;;  %3002 = vmatmul.bf16.gmra.mxu2 %v10819_v16 }
 0x59a   : > { %2308 = vmatmul.bf16.gmra.mxu1 %v10974_v12  ;;  %v13189_v33 = vld [vmem:[#allocation33_spill] sm:$0xff] }
 0x59d   : > { %3244 = vmatmul.bf16.gmra.mxu3 %v10757_v20 }
 0x59e   : > { %v1990_v6 = vpop.f32.mrf.mxu0  ;;  %v2958_v31 = vpop.f32.mrf.mxu2 }
 0x59f   : > { %v1991_v13 = vadd.f32 %v1990_v6, %v13186_v4 }
 0x5a1   : > { %v2382_v42 = vadd.f32 %v2259_v5, %v1991_v13  ;;  %2029 = vmatmul.bf16.gmra.mxu0 %v10881_v29  ;;  %v3205_v53 = vpop.f32.mrf.mxu3  ;;  %v2271_v28 = vpop.f32.mrf.mxu1 }
 0x5a2   : > { %v10979_v27 = vadd.f32 %v3205_v53, %v2953_v46  ;;  %v9442_v53 = vld [vmem:[#allocation5 + $0x200] sm:$0xff] }
 0x5a3   : > { %v2580_v5 = vrot.slane %v2382_v42, 1  ;;  %v10991_v42 = vld [vmem:[%s10055_s11 + $0x138] sm:$0xff]  ;;  %3392 = vmatpush.bf16.msrb.mxu0 %v9442_v53 }
 0x5a4   : > { %13188 = vst [vmem:[#allocation30_spill] sm:$0xff] %v10979_v27  ;;  %v13202_v27 = vld [vmem:[#allocation13_spill] sm:$0xff] }
 0x5a6   : > { %v1992_v9 = vpop.f32.mrf.mxu0  ;;  %v2960_v4 = vpop.f32.mrf.mxu2 }
 0x5a7   : > { %v1993_v21 = vadd.f32 %v1992_v9, %v13187_v48 }
 0x5a9   : > { %v2383_v63 = vadd.f32 %v2261_v26, %v1993_v21  ;;  %v3207_v49 = vpop.f32.mrf.mxu3  ;;  %v2274_v25 = vpop.f32.mrf.mxu1  ;;  %3007 = vmatmul.bf16.gmra.mxu2 %v10836_v51 }
 0x5aa   : > { %v10987_v26 = vadd.f32 %v3207_v49, %v2955_v54  ;;  %2313 = vmatmul.bf16.gmra.mxu1 %v10991_v42  ;;  %v9452_v49 = vld [vmem:[#allocation7 + $0x10] sm:$0xff] }
 0x5ab   : > { %v2582_v6 = vrot.slane %v2383_v63, 1  ;;  %4902 = vmatpush.bf16.msra.mxu2 %v9452_v49 }
 0x5ac   : > { %13192 = vst [vmem:[#allocation59_spill] sm:$0xff] %v10987_v26  ;;  %v13201_v26 = vld [vmem:[#allocation37_spill] sm:$0xff] }
 0x5ad   : > { %v2583_v13 = vsel %vm2484_vm0, %v2580_v5, %v2582_v6  ;;  %3249 = vmatmul.bf16.gmra.mxu3 %v10774_v22 }
 0x5ae   : > { %v10983_v44 = vadd.f32 %v2583_v13, %v13189_v33  ;;  %v1995_v2 = vpop.f32.mrf.mxu0  ;;  %v2963_v48 = vpop.f32.mrf.mxu2  ;;  %v13196_v33 = vld [vmem:[#allocation62_spill] sm:$0xff] }
 0x5af   : > { %v1996_v20 = vadd.f32 %v1995_v2, %v13191_v62  ;;  %v13193_v2 = vld [vmem:[#allocation35_spill] sm:$0xff] }
 0x5b0   : > { %13190 = vst [vmem:[#allocation58_spill] sm:$0xff] %v10983_v44 }
 0x5b1   : > { %v2384_v9 = vadd.f32 %v2264_v3, %v1996_v20  ;;  %2034 = vmatmul.bf16.gmra.mxu0 %v10898_v57  ;;  %v3210_v54 = vpop.f32.mrf.mxu3  ;;  %v2276_v63 = vpop.f32.mrf.mxu1 }
 0x5b2   : > { %v10999_v5 = vadd.f32 %v3210_v54, %v2958_v31 }
 0x5b3   : > { %v2584_v46 = vrot.slane %v2384_v9, 1 }
 0x5b4   : > { %13195 = vst [vmem:[#allocation60_spill] sm:$0xff] %v10999_v5  ;;  %v13200_v5 = vld [vmem:[#allocation17_spill] sm:$0xff] }
 0x5b5   : > { %v2585_v21 = vsel %vm2484_vm0, %v2582_v6, %v2584_v46  ;;  %v9460_v46 = vld [vmem:[#allocation7 + $0xd0] sm:$0xff] }
 0x5b6   : > { %v10997_v62 = vadd.f32 %v2585_v21, %v13193_v2  ;;  %v1997_v3 = vpop.f32.mrf.mxu0  ;;  %v2965_v4 = vpop.f32.mrf.mxu2  ;;  %v11005_v21 = vld [vmem:[%s10055_s11 + $0x140] sm:$0xff]  ;;  %4678 = vmatpush.bf16.msra.mxu1 %v9460_v46 }
 0x5b7   : > { %v13197_v3 = vld [vmem:[#allocation15_spill] sm:$0xff] }
 0x5b8   : > { %13194 = vst [vmem:[#allocation31_spill] sm:$0xff] %v10997_v62  ;;  %v13198_v62 = vld [vmem:[#allocation36_spill] sm:$0xff] }
 0x5b9   : > { %v3212_v6 = vpop.f32.mrf.mxu3  ;;  %v2279_v9 = vpop.f32.mrf.mxu1  ;;  %3012 = vmatmul.bf16.gmra.mxu2 %v10850_v40 }
 0x5ba   : > { %2318 = vmatmul.bf16.gmra.mxu1 %v11005_v21 }
 0x5bd   : > { %3254 = vmatmul.bf16.gmra.mxu3 %v10788_v11 }
 0x5be   : > { %v2000_v13 = vpop.f32.mrf.mxu0  ;;  %v2968_v2 = vpop.f32.mrf.mxu2 }
 0x5bf   : > { %v2001_v20 = vadd.f32 %v2000_v13, %v13196_v33 }
 0x5c1   : > { %v2386_v22 = vadd.f32 %v2269_v43, %v2001_v20  ;;  %2039 = vmatmul.bf16.gmra.mxu0 %v10912_v18  ;;  %v3215_v49 = vpop.f32.mrf.mxu3  ;;  %v2281_v54 = vpop.f32.mrf.mxu1 }
 0x5c2   : > { %v11010_v43 = vadd.f32 %v3215_v49, %v2963_v48 }
 0x5c3   : > { %v2588_v13 = vrot.slane %v2386_v22, 1 }
 0x5c6   : > { %v2002_v31 = vpop.f32.mrf.mxu0  ;;  %v2970_v20 = vpop.f32.mrf.mxu2 }
 0x5c7   : > { %v2003_v53 = vadd.f32 %v2002_v31, %v13197_v3  ;;  %v1112_v31 = vadd.f32 %v13202_v27, %v13201_v26 }
 0x5c9   : > { %v2387_v63 = vadd.f32 %v2271_v28, %v2003_v53  ;;  %v3217_v3 = vpop.f32.mrf.mxu3  ;;  %v2284_v50 = vpop.f32.mrf.mxu1  ;;  %v11024_v53 = vld [vmem:[%s10055_s11 + $0x148] sm:$0xff]  ;;  %3017 = vmatmul.bf16.gmra.mxu2 %v10867_v41 }
 0x5ca   : > { %v11020_v48 = vadd.f32 %v3217_v3, %v2965_v4  ;;  %2323 = vmatmul.bf16.gmra.mxu1 %v11024_v53 }
 0x5cb   : > { %v2590_v33 = vrot.slane %v2387_v63, 1 }
 0x5cc   : > { %13203 = vst [vmem:[#allocation61_spill] sm:$0xff] %v11020_v48 }
 0x5cd   : > { %v2591_v6 = vsel %vm2484_vm0, %v2588_v13, %v2590_v33  ;;  %3259 = vmatmul.bf16.gmra.mxu3 %v10805_v19 }
 0x5ce   : > { %v11014_v44 = vadd.f32 %v2591_v6, %v13198_v62  ;;  %v2005_v46 = vpop.f32.mrf.mxu0  ;;  %v13204_v62 = vld [vmem:[#allocation34_spill] sm:$0xff] }
 0x5cf   : > { %v2006_v11 = vadd.f32 %v2005_v46, %v13200_v5  ;;  %v1506_v49 = vadd.f32 %v13204_v62, %v1112_v31  ;;  %v2973_v5 = vpop.f32.mrf.mxu2  ;;  %v13207_v46 = vld [vmem:[#allocation63_spill] sm:$0xff]  ;;  %v13208_v62 = vld [vmem:[#allocation18_spill] sm:$0xff] }
 0x5d0   : > { %13199 = vst [vmem:[#allocation32_spill] sm:$0xff] %v11014_v44  ;;  %v13212_v44 = vld [vmem:[#allocation41_spill] sm:$0xff] }
 0x5d1   : > { %v2388_v28 = vadd.f32 %v2274_v25, %v2006_v11  ;;  %2044 = vmatmul.bf16.gmra.mxu0 %v10929_v58  ;;  %v3220_v4 = vpop.f32.mrf.mxu3  ;;  %v2286_v63 = vpop.f32.mrf.mxu1 }
 0x5d2   : > { %v11032_v13 = vadd.f32 %v3220_v4, %v2968_v2 }
 0x5d3   : > { %v2592_v22 = vrot.slane %v2388_v28, 1 }
 0x5d4   : > { %13206 = vst [vmem:[#allocation33_spill] sm:$0xff] %v11032_v13  ;;  %v13213_v13 = vld [vmem:[#allocation16_spill] sm:$0xff] }
 0x5d5   : > { %v2593_v27 = vsel %vm2484_vm0, %v2590_v33, %v2592_v22  ;;  %v9685_v33 = vld [vmem:[%s10055_s11 + $0x150] sm:$0xff] }
 0x5d6   : > { %v11030_v25 = vadd.f32 %v2593_v27, %v1506_v49  ;;  %v2007_v26 = vpop.f32.mrf.mxu0 }
 0x5d7   : > { %v2975_v20 = vpop.f32.mrf.mxu2 }
 0x5d8   : > { %13205 = vst [vmem:[#allocation12_spill] sm:$0xff] %v11030_v25  ;;  %v13211_v25 = vld [vmem:[#allocation20_spill] sm:$0xff] }
 0x5d9   : > { %v3222_v3 = vpop.f32.mrf.mxu3  ;;  %v2289_v28 = vpop.f32.mrf.mxu1  ;;  %3022 = vmatmul.bf16.gmra.mxu2 %v10881_v29 }
 0x5da   : > { %2327 = vmatmul.bf16.gmra.mxu1 %v9685_v33 }
 0x5dd   : > { %3264 = vmatmul.bf16.gmra.mxu3 %v10819_v16 }
 0x5de   : > { %v2010_v6 = vpop.f32.mrf.mxu0 }
 0x5df   : > { %v2011_v11 = vadd.f32 %v2010_v6, %v13207_v46  ;;  %v2978_v19 = vpop.f32.mrf.mxu2 }
 0x5e1   : > { %v2390_v31 = vadd.f32 %v2279_v9, %v2011_v11  ;;  %2049 = vmatmul.bf16.gmra.mxu0 %v10943_v34  ;;  %v3225_v49 = vpop.f32.mrf.mxu3  ;;  %v2291_v27 = vpop.f32.mrf.mxu1  ;;  %v13209_v11 = vld [vmem:[#allocation40_spill] sm:$0xff] }
 0x5e2   : > { %v11040_v4 = vadd.f32 %v3225_v49, %v2973_v5  ;;  %v13214_v49 = vld [vmem:[#allocation38_spill] sm:$0xff] }
 0x5e3   : > { %v2596_v63 = vrot.slane %v2390_v31, 1 }
 0x5e6   : > { %v2012_v22 = vpop.f32.mrf.mxu0 }
 0x5e7   : > { %v2013_v2 = vadd.f32 %v2012_v22, %v13208_v62  ;;  %v2980_v6 = vpop.f32.mrf.mxu2  ;;  %v1122_v22 = vadd.f32 %v13213_v13, %v13212_v44 }
 0x5e9   : > { %v2391_v26 = vadd.f32 %v2281_v54, %v2013_v2  ;;  %v3227_v62 = vpop.f32.mrf.mxu3  ;;  %v2294_v48 = vpop.f32.mrf.mxu1  ;;  %v9686_v2 = vld [vmem:[%s10055_s11 + $0x158] sm:$0xff]  ;;  %3027 = vmatmul.bf16.gmra.mxu2 %v10898_v57 }
 0x5ea   : > { %v11050_v5 = vadd.f32 %v3227_v62, %v2975_v20  ;;  %2330 = vmatmul.bf16.gmra.mxu1 %v9686_v2 }
 0x5eb   : > { %v2598_v9 = vrot.slane %v2391_v26, 1  ;;  %v1510_v26 = vadd.f32 %v13214_v49, %v1122_v22  ;;  %v13218_v22 = vld [vmem:[#allocation21_spill] sm:$0xff] }
 0x5ed   : > { %v2599_v46 = vsel %vm2484_vm0, %v2596_v63, %v2598_v9  ;;  %3269 = vmatmul.bf16.gmra.mxu3 %v10836_v51 }
 0x5ee   : > { %v11044_v3 = vadd.f32 %v2599_v46, %v13209_v11  ;;  %v2015_v33 = vpop.f32.mrf.mxu0 }
 0x5ef   : > { %v2016_v16 = vadd.f32 %v2015_v33, %v13211_v25  ;;  %v2983_v63 = vpop.f32.mrf.mxu2  ;;  %v13217_v33 = vld [vmem:[#allocation64_spill] sm:$0xff] }
 0x5f0   : > { %13210 = vst [vmem:[#allocation14_spill] sm:$0xff] %v11044_v3  ;;  %v13222_v3 = vld [vmem:[#allocation45_spill] sm:$0xff] }
 0x5f1   : > { %v2392_v54 = vadd.f32 %v2284_v50, %v2016_v16  ;;  %2054 = vmatmul.bf16.gmra.mxu0 %v10960_v38  ;;  %v3230_v50 = vpop.f32.mrf.mxu3  ;;  %v2296_v6 = vpop.f32.mrf.mxu1 }
 0x5f2   : > { %v11059_v46 = vadd.f32 %v3230_v50, %v2978_v19 }
 0x5f3   : > { %v2600_v31 = vrot.slane %v2392_v54, 1 }
 0x5f4   : > { %13216 = vst [vmem:[#allocation62_spill] sm:$0xff] %v11059_v46  ;;  %v13223_v46 = vld [vmem:[#allocation19_spill] sm:$0xff] }
 0x5f5   : > { %v2601_v25 = vsel %vm2484_vm0, %v2598_v9, %v2600_v31 }
 0x5f6   : > { %v11057_v44 = vadd.f32 %v2601_v25, %v1510_v26  ;;  %v2017_v13 = vpop.f32.mrf.mxu0 }
 0x5f7   : > { %v2985_v20 = vpop.f32.mrf.mxu2 }
 0x5f8   : > { %13215 = vst [vmem:[#allocation35_spill] sm:$0xff] %v11057_v44  ;;  %v13221_v44 = vld [vmem:[#allocation23_spill] sm:$0xff] }
 0x5f9   : > { %v3232_v62 = vpop.f32.mrf.mxu3  ;;  %v2299_v54 = vpop.f32.mrf.mxu1  ;;  %3032 = vmatmul.bf16.gmra.mxu2 %v10912_v18 }
 0x5fa   : > { %v9451_v62 = vld [vmem:[#allocation7 + $0x8] sm:$0xff] }
 0x5fb   : > { %4903 = vmatpush.bf16.msra.mxu2 %v9451_v62  ;;  %v13226_v62 = vld [vmem:[#allocation24_spill] sm:$0xff] }
 0x5fd   : > { %3274 = vmatmul.bf16.gmra.mxu3 %v10850_v40 }
 0x5fe   : > { %v2020_v11 = vpop.f32.mrf.mxu0 }
 0x5ff   : > { %v2021_v16 = vadd.f32 %v2020_v11, %v13217_v33  ;;  %v2988_v9 = vpop.f32.mrf.mxu2  ;;  %v13219_v11 = vld [vmem:[#allocation44_spill] sm:$0xff] }
 0x601   : > { %v2394_v2 = vadd.f32 %v2289_v28, %v2021_v16  ;;  %2058 = vmatmul.bf16.gmra.mxu0 %v10974_v12  ;;  %v3235_v49 = vpop.f32.mrf.mxu3  ;;  %v2301_v19 = vpop.f32.mrf.mxu1 }
 0x602   : > { %v11066_v25 = vadd.f32 %v3235_v49, %v2983_v63  ;;  %v13224_v49 = vld [vmem:[#allocation43_spill] sm:$0xff] }
 0x603   : > { %v2604_v13 = vrot.slane %v2394_v2, 1 }
 0x606   : > { %v2022_v51 = vpop.f32.mrf.mxu0 }
 0x607   : > { %v2023_v31 = vadd.f32 %v2022_v51, %v13218_v22  ;;  %v2990_v6 = vpop.f32.mrf.mxu2  ;;  %v1132_v51 = vadd.f32 %v13223_v46, %v13222_v3 }
 0x608   : > { %v9459_v6 = vld [vmem:[#allocation7 + $0xc8] sm:$0xff] }
 0x609   : > { %v2395_v26 = vadd.f32 %v2291_v27, %v2023_v31  ;;  %v3237_v22 = vpop.f32.mrf.mxu3  ;;  %v2304_v27 = vpop.f32.mrf.mxu1  ;;  %4679 = vmatpush.bf16.msra.mxu1 %v9459_v6  ;;  %3037 = vmatmul.bf16.gmra.mxu2 %v10929_v58 }
 0x60a   : > { %v11076_v2 = vadd.f32 %v3237_v22, %v2985_v20 }
 0x60b   : > { %v2606_v50 = vrot.slane %v2395_v26, 1  ;;  %v1514_v26 = vadd.f32 %v13224_v49, %v1132_v51  ;;  %v9687_v49 = vld [vmem:[%s10055_s11 + $0x20] sm:$0xff] }
 0x60d   : > { %v2607_v28 = vsel %vm2484_vm0, %v2604_v13, %v2606_v50  ;;  %3279 = vmatmul.bf16.gmra.mxu3 %v10867_v41 }
 0x60e   : > { %v11070_v33 = vadd.f32 %v2607_v28, %v13219_v11  ;;  %v2025_v16 = vpop.f32.mrf.mxu0 }
 0x60f   : > { %v2026_v40 = vadd.f32 %v2025_v16, %v13221_v44  ;;  %v2993_v13 = vpop.f32.mrf.mxu2 }
 0x610   : > { %13220 = vst [vmem:[#allocation15_spill] sm:$0xff] %v11070_v33 }
 0x611   : > { %v2396_v63 = vadd.f32 %v2294_v48, %v2026_v40  ;;  %2061 = vmatmul.bf16.gmra.mxu0 %v10991_v42  ;;  %v3240_v48 = vpop.f32.mrf.mxu3  ;;  %v2306_v28 = vpop.f32.mrf.mxu1 }
 0x612   : > { %v11084_v20 = vadd.f32 %v3240_v48, %v2988_v9 }
 0x613   : > { %v2608_v31 = vrot.slane %v2396_v63, 1 }
 0x615   : > { %v2609_v44 = vsel %vm2484_vm0, %v2606_v50, %v2608_v31  ;;  %v13227_v31 = vld [vmem:[#allocation65_spill] sm:$0xff] }
 0x616   : > { %v11082_v3 = vadd.f32 %v2609_v44, %v1514_v26  ;;  %v2027_v46 = vpop.f32.mrf.mxu0 }
 0x617   : > { %v2995_v11 = vpop.f32.mrf.mxu2 }
 0x618   : > { %13225 = vst [vmem:[#allocation36_spill] sm:$0xff] %v11082_v3  ;;  %v13231_v3 = vld [vmem:[#allocation22_spill] sm:$0xff] }
 0x619   : > { %v3242_v51 = vpop.f32.mrf.mxu3  ;;  %v2309_v22 = vpop.f32.mrf.mxu1  ;;  %3042 = vmatmul.bf16.gmra.mxu2 %v10943_v34 }
 0x61a   : > { %v13229_v22 = vld [vmem:[#allocation66_spill] sm:$0xff] }
 0x61d   : > { %3284 = vmatmul.bf16.gmra.mxu3 %v10881_v29 }
 0x61e   : > { %v2030_v16 = vpop.f32.mrf.mxu0 }
 0x61f   : > { %v2031_v40 = vadd.f32 %v2030_v16, %v13226_v62  ;;  %v2998_v41 = vpop.f32.mrf.mxu2  ;;  %v13228_v62 = vld [vmem:[#allocation47_spill] sm:$0xff] }
 0x621   : > { %v2398_v63 = vadd.f32 %v2299_v54, %v2031_v40  ;;  %3393 = vmatmul.bf16.vlgmr.msrb.gmra.mxu0 %v9687_v49  ;;  %v3245_v9 = vpop.f32.mrf.mxu3  ;;  %v2311_v44 = vpop.f32.mrf.mxu1  ;;  %v13230_v49 = vld [vmem:[#allocation48_spill] sm:$0xff] }
 0x622   : > { %v11091_v6 = vadd.f32 %v3245_v9, %v2993_v13 }
 0x623   : > { %v2612_v48 = vrot.slane %v2398_v63, 1 }
 0x626   : > { %v2032_v50 = vpop.f32.mrf.mxu0 }
 0x627   : > { %v2033_v26 = vadd.f32 %v2032_v50, %v13227_v31  ;;  %v3000_v16 = vpop.f32.mrf.mxu2  ;;  %v1142_v50 = vadd.f32 %v13231_v3, %v13230_v49 }
 0x629   : > { %v2399_v46 = vadd.f32 %v2301_v19, %v2033_v26  ;;  %v3247_v31 = vpop.f32.mrf.mxu3  ;;  %v2314_v33 = vpop.f32.mrf.mxu1  ;;  %v9688_v19 = vld [vmem:[%s10055_s11 + $0x28] sm:$0xff]  ;;  %v13232_v26 = vld [vmem:[#allocation46_spill] sm:$0xff]  ;;  %3047 = vmatmul.bf16.gmra.mxu2 %v10960_v38 }
 0x62a   : > { %v11101_v13 = vadd.f32 %v3247_v31, %v2995_v11  ;;  %v1518_v9 = vadd.f32 %v13232_v26, %v1142_v50  ;;  %v9690_v26 = vld [vmem:[%s10055_s11 + $0x38] sm:$0xff] }
 0x62b   : > { %v2614_v28 = vrot.slane %v2399_v46, 1 }
 0x62d   : > { %v2615_v54 = vsel %vm2484_vm0, %v2612_v48, %v2614_v28  ;;  %3289 = vmatmul.bf16.gmra.mxu3 %v10898_v57 }
 0x62e   : > { %v11095_v40 = vadd.f32 %v2615_v54, %v13228_v62  ;;  %v2035_v51 = vpop.f32.mrf.mxu0 }
 0x62f   : > { %v2036_v29 = vadd.f32 %v2035_v51, %v13229_v22  ;;  %v3003_v46 = vpop.f32.mrf.mxu2 }
 0x631   : > { %v2400_v44 = vadd.f32 %v2304_v27, %v2036_v29  ;;  %3398 = vmatmul.bf16.gmra.mxu0 %v9688_v19  ;;  %v3250_v33 = vpop.f32.mrf.mxu3  ;;  %v2316_v27 = vpop.f32.mrf.mxu1  ;;  %v9689_v29 = vld [vmem:[%s10055_s11 + $0x30] sm:$0xff] }
 0x632   : > { %v11109_v54 = vadd.f32 %v3250_v33, %v2998_v41  ;;  %v9450_v33 = vld [vmem:[#allocation7] sm:$0xff] }
 0x633   : > { %v2616_v63 = vrot.slane %v2400_v44, 1  ;;  %4904 = vmatpush.bf16.msra.mxu2 %v9450_v33 }
 0x635   : > { %v2617_v48 = vsel %vm2484_vm0, %v2614_v28, %v2616_v63 }
 0x636   : > { %v11107_v16 = vadd.f32 %v2617_v48, %v1518_v9  ;;  %v2037_v3 = vpop.f32.mrf.mxu0  ;;  %v9473_v48 = vld [vmem:[#allocation7 + $0x1b8] sm:$0xff] }
 0x637   : > { %v3005_v11 = vpop.f32.mrf.mxu2  ;;  %5138 = vmatpush.bf16.msra.mxu3 %v9473_v48 }
 0x638   : > { %13233 = vst [vmem:[#allocation17_spill] sm:$0xff] %v11107_v16 }
 0x639   : > { %v3252_v51 = vpop.f32.mrf.mxu3  ;;  %v2319_v22 = vpop.f32.mrf.mxu1  ;;  %3052 = vmatmul.bf16.gmra.mxu2 %v10974_v12 }
 0x63d   : > { %3294 = vmatmul.bf16.gmra.mxu3 %v10912_v18 }
 0x63e   : > { %v2040_v62 = vpop.f32.mrf.mxu0 }
 0x63f   : > { %v3008_v49 = vpop.f32.mrf.mxu2 }
 0x641   : > { %3403 = vmatmul.bf16.gmra.mxu0 %v9689_v29  ;;  %v3255_v28 = vpop.f32.mrf.mxu3  ;;  %v2321_v50 = vpop.f32.mrf.mxu1  ;;  %v9458_v29 = vld [vmem:[#allocation7 + $0xc0] sm:$0xff] }
 0x642   : > { %v11114_v31 = vadd.f32 %v3255_v28, %v3003_v46  ;;  %4680 = vmatpush.bf16.msra.mxu1 %v9458_v29  ;;  %v9691_v28 = vld [vmem:[%s10055_s11 + $0x40] sm:$0xff] }
 0x646   : > { %v2042_v57 = vpop.f32.mrf.mxu0 }
 0x647   : > { %v3010_v44 = vpop.f32.mrf.mxu2 }
 0x649   : > { %v3257_v19 = vpop.f32.mrf.mxu3  ;;  %v2324_v63 = vpop.f32.mrf.mxu1  ;;  %3057 = vmatmul.bf16.gmra.mxu2 %v10991_v42 }
 0x64a   : > { %v11117_v9 = vadd.f32 %v3257_v19, %v3005_v11 }
 0x64d   : > { %3299 = vmatmul.bf16.gmra.mxu3 %v10929_v58 }
 0x64e   : > { %v2045_v41 = vpop.f32.mrf.mxu0 }
 0x64f   : > { %v3013_v3 = vpop.f32.mrf.mxu2 }
 0x651   : > { %3408 = vmatmul.bf16.gmra.mxu0 %v9690_v26  ;;  %v3260_v46 = vpop.f32.mrf.mxu3  ;;  %v2326_v27 = vpop.f32.mrf.mxu1 }
 0x652   : > { %v11121_v62 = vadd.f32 %v3260_v46, %v3008_v49 }
 0x656   : > { %v2047_v18 = vpop.f32.mrf.mxu0 }
 0x657   : > { %v3015_v51 = vpop.f32.mrf.mxu2  ;;  %v9692_v18 = vld [vmem:[%s10055_s11 + $0x48] sm:$0xff] }
 0x659   : > { %v3262_v11 = vpop.f32.mrf.mxu3  ;;  %v2328_v57 = vpop.f32.mrf.mxu1  ;;  %3061 = vmatmul.bf16.gmra.mxu2 %v11005_v21 }
 0x65d   : > { %3304 = vmatmul.bf16.gmra.mxu3 %v10943_v34 }
 0x65e   : > { %v2050_v22 = vpop.f32.mrf.mxu0 }
 0x65f   : > { %v3018_v50 = vpop.f32.mrf.mxu2 }
 0x661   : > { %3413 = vmatmul.bf16.gmra.mxu0 %v9691_v28  ;;  %v3265_v44 = vpop.f32.mrf.mxu3  ;;  %v2329_v41 = vpop.f32.mrf.mxu1  ;;  %v9693_v28 = vld [vmem:[%s10055_s11 + $0x50] sm:$0xff] }
 0x662   : > { %v11126_v19 = vadd.f32 %v3265_v44, %v3013_v3  ;;  %v9471_v44 = vld [vmem:[#allocation7 + $0x1a8] sm:$0xff] }
 0x666   : > { %v2052_v58 = vpop.f32.mrf.mxu0 }
 0x667   : > { %v3020_v49 = vpop.f32.mrf.mxu2  ;;  %v9472_v58 = vld [vmem:[#allocation7 + $0x1b0] sm:$0xff] }
 0x668   : > { %5139 = vmatpush.bf16.msra.mxu3 %v9472_v58 }
 0x669   : > { %v3267_v26 = vpop.f32.mrf.mxu3  ;;  %v2331_v48 = vpop.f32.mrf.mxu1  ;;  %3064 = vmatmul.bf16.gmra.mxu2 %v11024_v53 }
 0x66a   : > { %v11129_v33 = vadd.f32 %v3267_v26, %v3015_v51  ;;  %v9694_v48 = vld [vmem:[%s10055_s11 + $0x58] sm:$0xff] }
 0x66c   : > { %5140 = vmatpush.bf16.msra.mxu3 %v9471_v44  ;;  %v9466_v44 = vld [vmem:[#allocation7 + $0x180] sm:$0xff] }
 0x66d   : > { %3309 = vmatmul.bf16.gmra.mxu3 %v10960_v38 }
 0x66e   : > { %v2055_v63 = vpop.f32.mrf.mxu0 }
 0x66f   : > { %v3023_v46 = vpop.f32.mrf.mxu2  ;;  %v9470_v63 = vld [vmem:[#allocation7 + $0x1a0] sm:$0xff] }
 0x670   : > { %5141 = vmatpush.bf16.msra.mxu3 %v9470_v63 }
 0x671   : > { %3418 = vmatmul.bf16.gmra.mxu0 %v9692_v18  ;;  %v3270_v27 = vpop.f32.mrf.mxu3  ;;  %v2332_v22 = vpop.f32.mrf.mxu1  ;;  %v13049_v18 = vmov 0  }
 0x672   : > { %v11133_v29 = vadd.f32 %v3270_v27, %v3018_v50 }
 0x676   : > { %v2057_v34 = vpop.f32.mrf.mxu0 }
 0x677   : > { %v11135_v3 = vpop.f32.mrf.mxu2 }
 0x679   : > { %v3272_v57 = vpop.f32.mrf.mxu3  ;;  %4905 = vmatmul.bf16.vlgmr.msra.gmra.mxu2 %v13049_v18 }
 0x67d   : > { %3313 = vmatmul.bf16.gmra.mxu3 %v10974_v12  ;;  %v9469_v12 = vld [vmem:[#allocation7 + $0x198] sm:$0xff] }
 0x67e   : > { %v2059_v11 = vpop.f32.mrf.mxu0  ;;  %5142 = vmatpush.bf16.msra.mxu3 %v9469_v12 }
 0x67f   : > { %v3028_v51 = vpop.f32.mrf.mxu2  ;;  %v9467_v11 = vld [vmem:[#allocation7 + $0x188] sm:$0xff] }
 0x681   : > { %3423 = vmatmul.bf16.gmra.mxu0 %v9693_v28  ;;  %v3275_v38 = vpop.f32.mrf.mxu3  ;;  %v9913_v28 = vmov 0.0|0.0  }
 0x682   : > { %v11140_v41 = vadd.f32 %v3275_v38, %v3023_v46  ;;  %v9468_v46 = vld [vmem:[#allocation7 + $0x190] sm:$0xff] }
 0x683   : > { %5143 = vmatpush.bf16.msra.mxu3 %v9468_v46 }
 0x686   : > { %v2060_v21 = vpop.f32.mrf.mxu0 }
 0x687   : > { %v3030_v50 = vpop.f32.mrf.mxu2  ;;  %v4444_v21 = vunpack.c.l.b16 %v9913_v28  ;;  %5144 = vmatpush.bf16.msra.mxu3 %v9467_v11  ;;  %v9481_v11 = vld [vmem:[#allocation7 + $0x78] sm:$0xff] }
 0x688   : > { %v9695_v50 = vld [vmem:[%s10055_s11 + $0x60] sm:$0xff]  ;;  %5684 = vmatpush.bf16.msrb.mxu2 %v9481_v11 }
 0x689   : > { %v11142_v26 = vpop.f32.mrf.mxu3  ;;  %v11151_v38 = vpack.c.b16 %v4444_v21, %v4444_v21 }
 0x68b   : > { %4681 = vmatmul.bf16.vlgmr.msra.gmra.mxu1 %v11151_v38  ;;  %4909 = vmatmul.bf16.gmra.mxu2 %v11151_v38 }
 0x68c   : > { %5145 = vmatpush.bf16.msra.mxu3 %v9466_v44 }
 0x68d   : > { %3316 = vmatmul.bf16.gmra.mxu3 %v10991_v42 }
 0x68e   : > { %v2062_v49 = vpop.f32.mrf.mxu0 }
 0x68f   : > { %v3033_v53 = vpop.f32.mrf.mxu2 }
 0x691   : > { %3428 = vmatmul.bf16.gmra.mxu0 %v9694_v48  ;;  %v3280_v27 = vpop.f32.mrf.mxu3 }
 0x692   : > { %v11147_v22 = vadd.f32 %v3280_v27, %v3028_v51  ;;  %v9696_v27 = vld [vmem:[%s10055_s11 + $0x68] sm:$0xff] }
 0x696   : > { %v2063_v34 = vpop.f32.mrf.mxu0 }
 0x697   : > { %v11149_v57 = vpop.f32.mrf.mxu2 }
 0x699   : > { %v3282_v42 = vpop.f32.mrf.mxu3 }
 0x69b   : > { %4914 = vmatmul.bf16.gmra.mxu2 %v11151_v38 }
 0x69d   : > { %5146 = vmatmul.bf16.vlgmr.msra.gmra.mxu3 %v11151_v38 }
 0x69e   : > { %v3394_v58 = vpop.f32.mrf.mxu0 }
 0x69f   : > { %v3038_v51 = vpop.f32.mrf.mxu2 }
 0x6a1   : > { %3433 = vmatmul.bf16.gmra.mxu0 %v9695_v50  ;;  %v3285_v63 = vpop.f32.mrf.mxu3  ;;  %v9489_v50 = vld [vmem:[#allocation7 + $0x138] sm:$0xff] }
 0x6a2   : > { %v11157_v34 = vadd.f32 %v3285_v63, %v3033_v53  ;;  %5461 = vmatpush.bf16.msrb.mxu1 %v9489_v50  ;;  %v9697_v63 = vld [vmem:[%s10055_s11 + $0x70] sm:$0xff] }
 0x6a6   : > { %v3396_v49 = vpop.f32.mrf.mxu0 }
 0x6a7   : > { %v3040_v48 = vpop.f32.mrf.mxu2 }
 0x6a9   : > { %v11159_v46 = vpop.f32.mrf.mxu3 }
 0x6ae   : > { %v3399_v12 = vpop.f32.mrf.mxu0 }
 0x6af   : > { %v3043_v28 = vpop.f32.mrf.mxu2 }
 0x6b1   : > { %3438 = vmatmul.bf16.gmra.mxu0 %v9696_v27  ;;  %v3290_v58 = vpop.f32.mrf.mxu3 }
 0x6b2   : > { %v11163_v49 = vadd.f32 %v3290_v58, %v3038_v51  ;;  %v11173_v58 = vld [vmem:[%s13043_s2] ss:$0 sm:$0xff] }
 0x6b6   : > { %v3401_v21 = vpop.f32.mrf.mxu0 }
 0x6b7   : > { %v3045_v44 = vpop.f32.mrf.mxu2 }
 0x6b9   : > { %v3292_v53 = vpop.f32.mrf.mxu3 }
 0x6be   : > { %v3404_v42 = vpop.f32.mrf.mxu0 }
 0x6bf   : > { %v3048_v48 = vpop.f32.mrf.mxu2  ;;  %v3593_v12 = vadd.f32 %v3404_v42, %v10762_v39 }
 0x6c0   : > { %v9698_v48 = vld [vmem:[%s10055_s11 + $0x78] sm:$0xff] }
 0x6c1   : > { %3443 = vmatmul.bf16.gmra.mxu0 %v9697_v63  ;;  %v3295_v28 = vpop.f32.mrf.mxu3  ;;  %v3747_v11 = vrot.slane %v3593_v12, 2 }
 0x6c6   : > { %v3406_v27 = vpop.f32.mrf.mxu0 }
 0x6c7   : > { %v3594_v18 = vadd.f32 %v3406_v27, %v10770_v17  ;;  %v3050_v50 = vpop.f32.mrf.mxu2 }
 0x6c9   : > { %v3749_v21 = vrot.slane %v3594_v18, 2  ;;  %v3297_v17 = vpop.f32.mrf.mxu3 }
 0x6cb   : > { %v3750_v44 = vsel %vm3739_vm1, %v3747_v11, %v3749_v21 }
 0x6cc   : > { %v3967_v51 = vadd.f32 %v3750_v44, %v10664_v14 }
 0x6ce   : > { %v3409_v53 = vpop.f32.mrf.mxu0  ;;  %v4045_v42 = vadd.f32 %v11173_v58, %v3967_v51 }
 0x6cf   : > { %v3595_v39 = vadd.f32 %v3409_v53, %v10782_v37  ;;  %v3053_v27 = vpop.f32.mrf.mxu2 }
 0x6d0   : > { %v4119_v12 = vmax.f32 %v4045_v42, 0.0 }
 0x6d1   : > { %v3751_v63 = vrot.slane %v3595_v39, 2  ;;  %3448 = vmatmul.bf16.gmra.mxu0 %v9698_v48  ;;  %v3300_v16 = vpop.f32.mrf.mxu3 }
 0x6d2   : > { %v4300_v44 = vpack.c.bf16 %v4119_v12, %v4119_v12 }
 0x6d3   : > { %v3752_v18 = vsel %vm3739_vm1, %v3749_v21, %v3751_v63  ;;  %v9699_v21 = vld [vmem:[%s10055_s11 + $0x80] sm:$0xff] }
 0x6d4   : > { %v3968_v14 = vadd.f32 %v3752_v18, %v10676_v30  ;;  %v4448_v53 = vunpack.c.l.b16 %v4300_v44 }
 0x6d6   : > { %v4046_v28 = vadd.f32 %v11173_v58, %v3968_v14  ;;  %v3411_v11 = vpop.f32.mrf.mxu0 }
 0x6d7   : > { %v3055_v17 = vpop.f32.mrf.mxu2 }
 0x6d8   : > { %v4120_v50 = vmax.f32 %v4046_v28, 0.0 }
 0x6d9   : > { %v3302_v30 = vpop.f32.mrf.mxu3 }
 0x6da   : > { %v4301_v37 = vpack.c.bf16 %v4120_v50, %v4120_v50 }
 0x6dc   : > { %v4449_v51 = vunpack.c.l.b16 %v4301_v37 }
 0x6de   : > { %v11181_v39 = vpack.c.b16 %v4449_v51, %v4448_v53  ;;  %v3414_v48 = vpop.f32.mrf.mxu0 }
 0x6df   : > { %v3058_v42 = vpop.f32.mrf.mxu2  ;;  %v3597_v63 = vadd.f32 %v3414_v48, %v10793_v59 }
 0x6e0   : > { %13234 = vst [vmem:[#allocation37_spill] sm:$0xff] %v11181_v39  ;;  %4685 = vmatmul.bf16.gmra.mxu1 %v11181_v39  ;;  %4919 = vmatmul.bf16.gmra.mxu2 %v11181_v39 }
 0x6e1   : > { %3453 = vmatmul.bf16.gmra.mxu0 %v9699_v21  ;;  %v3305_v12 = vpop.f32.mrf.mxu3  ;;  %v3755_v14 = vrot.slane %v3597_v63, 2 }
 0x6e6   : > { %v3416_v18 = vpop.f32.mrf.mxu0 }
 0x6e7   : > { %v3598_v16 = vadd.f32 %v3416_v18, %v10801_v61  ;;  %v3060_v44 = vpop.f32.mrf.mxu2  ;;  %v9700_v61 = vld [vmem:[%s10055_s11 + $0x88] sm:$0xff] }
 0x6e9   : > { %v3757_v27 = vrot.slane %v3598_v16, 2  ;;  %v3307_v59 = vpop.f32.mrf.mxu3 }
 0x6eb   : > { %v3758_v28 = vsel %vm3739_vm1, %v3755_v14, %v3757_v27 }
 0x6ec   : > { %v3971_v11 = vadd.f32 %v3758_v28, %v10689_v1 }
 0x6ee   : > { %v3419_v50 = vpop.f32.mrf.mxu0  ;;  %v4049_v53 = vadd.f32 %v11173_v58, %v3971_v11 }
 0x6ef   : > { %v3599_v37 = vadd.f32 %v3419_v50, %v10813_v32  ;;  %v3062_v1 = vpop.f32.mrf.mxu2  ;;  %v9480_v50 = vld [vmem:[#allocation7 + $0x70] sm:$0xff] }
 0x6f0   : > { %4690 = vmatmul.bf16.gmra.mxu1 %v11151_v38  ;;  %4924 = vmatmul.bf16.gmra.mxu2 %v11151_v38  ;;  %v4123_v48 = vmax.f32 %v4049_v53, 0.0 }
 0x6f1   : > { %v3759_v51 = vrot.slane %v3599_v37, 2  ;;  %3458 = vmatmul.bf16.gmra.mxu0 %v9700_v61  ;;  %v3310_v18 = vpop.f32.mrf.mxu3  ;;  %v9701_v37 = vld [vmem:[%s10055_s11 + $0x90] sm:$0xff]  ;;  %5685 = vmatpush.bf16.msrb.mxu2 %v9480_v50 }
 0x6f2   : > { %v4304_v32 = vpack.c.bf16 %v4123_v48, %v4123_v48 }
 0x6f3   : > { %v3760_v17 = vsel %vm3739_vm1, %v3757_v27, %v3759_v51  ;;  %v9488_v27 = vld [vmem:[#allocation7 + $0x130] sm:$0xff] }
 0x6f4   : > { %v3972_v30 = vadd.f32 %v3760_v17, %v10701_v52  ;;  %v4452_v12 = vunpack.c.l.b16 %v4304_v32  ;;  %5462 = vmatpush.bf16.msrb.mxu1 %v9488_v27 }
 0x6f6   : > { %v4050_v21 = vadd.f32 %v11173_v58, %v3972_v30  ;;  %v3421_v42 = vpop.f32.mrf.mxu0 }
 0x6f7   : > { %v3063_v28 = vpop.f32.mrf.mxu2 }
 0x6f8   : > { %v4124_v63 = vmax.f32 %v4050_v21, 0.0 }
 0x6f9   : > { %v3312_v52 = vpop.f32.mrf.mxu3 }
 0x6fa   : > { %v4305_v16 = vpack.c.bf16 %v4124_v63, %v4124_v63 }
 0x6fc   : > { %v4453_v14 = vunpack.c.l.b16 %v4305_v16 }
 0x6fe   : > { %v11198_v11 = vpack.c.b16 %v4453_v14, %v4452_v12  ;;  %v3424_v44 = vpop.f32.mrf.mxu0 }
 0x6ff   : > { %v3065_v53 = vpop.f32.mrf.mxu2  ;;  %v3601_v59 = vadd.f32 %v3424_v44, %v10824_v55 }
 0x700   : > { %4695 = vmatmul.bf16.gmra.mxu1 %v11198_v11  ;;  %4929 = vmatmul.bf16.gmra.mxu2 %v11198_v11 }
 0x701   : > { %5150 = vmatmul.bf16.gmra.mxu3 %v11198_v11  ;;  %3463 = vmatmul.bf16.gmra.mxu0 %v9701_v37  ;;  %v3314_v17 = vpop.f32.mrf.mxu3  ;;  %v3763_v48 = vrot.slane %v3601_v59, 2 }
 0x706   : > { %v3426_v51 = vpop.f32.mrf.mxu0 }
 0x707   : > { %v3602_v61 = vadd.f32 %v3426_v51, %v10832_v47  ;;  %v3066_v42 = vpop.f32.mrf.mxu2  ;;  %v9702_v47 = vld [vmem:[%s10055_s11 + $0x98] sm:$0xff] }
 0x708   : > { %v4682_v51 = vpop.f32.mrf.mxu1 }
 0x709   : > { %v3765_v30 = vrot.slane %v3602_v61, 2  ;;  %v3315_v55 = vpop.f32.mrf.mxu3 }
 0x70b   : > { %v3766_v1 = vsel %vm3739_vm1, %v3763_v48, %v3765_v30  ;;  %v9703_v48 = vld [vmem:[%s10055_s11 + $0xa0] sm:$0xff] }
 0x70c   : > { %v3975_v21 = vadd.f32 %v3766_v1, %v10714_v10 }
 0x70e   : > { %v3429_v32 = vpop.f32.mrf.mxu0  ;;  %v4053_v18 = vadd.f32 %v11173_v58, %v3975_v21 }
 0x70f   : > { %v3603_v63 = vadd.f32 %v3429_v32, %v10844_v60  ;;  %v4906_v28 = vpop.f32.mrf.mxu2 }
 0x710   : > { %4700 = vmatmul.bf16.gmra.mxu1 %v11151_v38  ;;  %4934 = vmatmul.bf16.gmra.mxu2 %v11151_v38  ;;  %v4127_v14 = vmax.f32 %v4053_v18, 0.0 }
 0x711   : > { %v3767_v16 = vrot.slane %v3603_v63, 2  ;;  %5155 = vmatmul.bf16.gmra.mxu3 %v11151_v38  ;;  %3468 = vmatmul.bf16.gmra.mxu0 %v9702_v47  ;;  %v3317_v52 = vpop.f32.mrf.mxu3 }
 0x712   : > { %v4308_v50 = vpack.c.bf16 %v4127_v14, %v4127_v14 }
 0x713   : > { %v3768_v12 = vsel %vm3739_vm1, %v3765_v30, %v3767_v16 }
 0x714   : > { %v3976_v10 = vadd.f32 %v3768_v12, %v10726_v56  ;;  %v4456_v53 = vunpack.c.l.b16 %v4308_v50 }
 0x716   : > { %v4054_v60 = vadd.f32 %v11173_v58, %v3976_v10  ;;  %v3431_v44 = vpop.f32.mrf.mxu0 }
 0x717   : > { %v11233_v14 = vpop.f32.mrf.mxu2 }
 0x718   : > { %v4128_v27 = vmax.f32 %v4054_v60, 0.0  ;;  %13235 = vst [vmem:[#allocation13_spill] sm:$0xff] %v11233_v14 }
 0x719   : > { %v3318_v56 = vpop.f32.mrf.mxu3 }
 0x71a   : > { %v4309_v37 = vpack.c.bf16 %v4128_v27, %v4128_v27  ;;  %v9487_v56 = vld [vmem:[#allocation7 + $0x128] sm:$0xff] }
 0x71b   : > { %5463 = vmatpush.bf16.msrb.mxu1 %v9487_v56 }
 0x71c   : > { %v4457_v59 = vunpack.c.l.b16 %v4309_v37 }
 0x71e   : > { %v11217_v61 = vpack.c.b16 %v4457_v59, %v4456_v53  ;;  %v3434_v17 = vpop.f32.mrf.mxu0 }
 0x71f   : > { %v3605_v30 = vadd.f32 %v3434_v17, %v10855_v36  ;;  %v4910_v52 = vpop.f32.mrf.mxu2  ;;  %v9479_v17 = vld [vmem:[#allocation7 + $0x68] sm:$0xff] }
 0x720   : > { %4705 = vmatmul.bf16.gmra.mxu1 %v11217_v61  ;;  %4939 = vmatmul.bf16.gmra.mxu2 %v11217_v61 }
 0x721   : > { %5160 = vmatmul.bf16.gmra.mxu3 %v11217_v61  ;;  %3473 = vmatmul.bf16.gmra.mxu0 %v9703_v48  ;;  %v5147_v42 = vpop.f32.mrf.mxu3  ;;  %v3771_v32 = vrot.slane %v3605_v30, 2 }
 0x722   : > { %5686 = vmatpush.bf16.msrb.mxu2 %v9479_v17 }
 0x726   : > { %v3436_v1 = vpop.f32.mrf.mxu0 }
 0x727   : > { %v3606_v21 = vadd.f32 %v3436_v1, %v10863_v0  ;;  %v9704_v0 = vld [vmem:[%s10055_s11 + $0xa8] sm:$0xff]  ;;  %v11245_v30 = vpop.f32.mrf.mxu2 }
 0x729   : > { %v3773_v63 = vrot.slane %v3606_v21, 2 }
 0x72b   : > { %v3774_v18 = vsel %vm3739_vm1, %v3771_v32, %v3773_v63 }
 0x72c   : > { %v3979_v55 = vadd.f32 %v3774_v18, %v10739_v23 }
 0x72e   : > { %v3439_v16 = vpop.f32.mrf.mxu0  ;;  %v4057_v12 = vadd.f32 %v11173_v58, %v3979_v55 }
 0x72f   : > { %v3607_v47 = vadd.f32 %v3439_v16, %v10875_v7 }
 0x730   : > { %4710 = vmatmul.bf16.gmra.mxu1 %v11151_v38  ;;  %4944 = vmatmul.bf16.gmra.mxu2 %v11151_v38  ;;  %v4131_v28 = vmax.f32 %v4057_v12, 0.0 }
 0x731   : > { %v3775_v36 = vrot.slane %v3607_v47, 2  ;;  %5165 = vmatmul.bf16.gmra.mxu3 %v11151_v38  ;;  %3478 = vmatmul.bf16.gmra.mxu0 %v9704_v0  ;;  %v4915_v47 = vpop.f32.mrf.mxu2 }
 0x732   : > { %v4312_v44 = vpack.c.bf16 %v4131_v28, %v4131_v28  ;;  %v11258_v28 = vpop.f32.mrf.mxu1 }
 0x733   : > { %v3776_v10 = vsel %vm3739_vm1, %v3773_v63, %v3775_v36  ;;  %13238 = vst [vmem:[#allocation63_spill] sm:$0xff] %v11258_v28 }
 0x734   : > { %v3980_v23 = vadd.f32 %v3776_v10, %v10751_v15  ;;  %v4460_v37 = vunpack.c.l.b16 %v4312_v44  ;;  %v9705_v15 = vld [vmem:[%s10055_s11 + $0xb0] sm:$0xff]  ;;  %v13237_v10 = vld [vmem:[#allocation39_spill] sm:$0xff] }
 0x736   : > { %v4058_v7 = vadd.f32 %v11173_v58, %v3980_v23  ;;  %v3441_v60 = vpop.f32.mrf.mxu0 }
 0x738   : > { %v4132_v50 = vmax.f32 %v4058_v7, 0.0 }
 0x739   : > { %v4917_v44 = vpop.f32.mrf.mxu2 }
 0x73a   : > { %v4313_v27 = vpack.c.bf16 %v4132_v50, %v4132_v50 }
 0x73c   : > { %v4461_v53 = vunpack.c.l.b16 %v4313_v27 }
 0x73e   : > { %v11238_v59 = vpack.c.b16 %v4461_v53, %v4460_v37  ;;  %v3444_v51 = vpop.f32.mrf.mxu0 }
 0x73f   : > { %v3609_v48 = vadd.f32 %v3444_v51, %v10886_v45 }
 0x740   : > { %13236 = vst [vmem:[#allocation34_spill] sm:$0xff] %v11238_v59  ;;  %4715 = vmatmul.bf16.gmra.mxu1 %v11238_v59  ;;  %4949 = vmatmul.bf16.gmra.mxu2 %v11238_v59 }
 0x741   : > { %5170 = vmatmul.bf16.gmra.mxu3 %v11238_v59  ;;  %3483 = vmatmul.bf16.gmra.mxu0 %v9705_v15  ;;  %v3779_v42 = vrot.slane %v3609_v48, 2  ;;  %v9707_v15 = vld [vmem:[%s10055_s11 + $0xc0] sm:$0xff] }
 0x746   : > { %v3446_v1 = vpop.f32.mrf.mxu0 }
 0x747   : > { %v3610_v21 = vadd.f32 %v3446_v1, %v10894_v35  ;;  %v9706_v35 = vld [vmem:[%s10055_s11 + $0xb8] sm:$0xff]  ;;  %v13240_v1 = vld [vmem:[#allocation26_spill] sm:$0xff] }
 0x749   : > { %v3781_v32 = vrot.slane %v3610_v21, 2 }
 0x74b   : > { %v3782_v63 = vsel %vm3739_vm1, %v3779_v42, %v3781_v32 }
 0x74c   : > { %v3983_v18 = vadd.f32 %v3782_v63, %v10766_v24  ;;  %v13241_v63 = vld [vmem:[#allocation53_spill] sm:$0xff] }
 0x74e   : > { %v3449_v55 = vpop.f32.mrf.mxu0  ;;  %v4061_v12 = vadd.f32 %v11173_v58, %v3983_v18 }
 0x74f   : > { %v3611_v16 = vadd.f32 %v3449_v55, %v10906_v8 }
 0x750   : > { %4720 = vmatmul.bf16.gmra.mxu1 %v11151_v38  ;;  %4954 = vmatmul.bf16.gmra.mxu2 %v11151_v38  ;;  %v4135_v0 = vmax.f32 %v4061_v12, 0.0 }
 0x751   : > { %v3783_v45 = vrot.slane %v3611_v16, 2  ;;  %5175 = vmatmul.bf16.gmra.mxu3 %v11151_v38  ;;  %3488 = vmatmul.bf16.gmra.mxu0 %v9706_v35 }
 0x752   : > { %v4316_v7 = vpack.c.bf16 %v4135_v0, %v4135_v0 }
 0x753   : > { %v3784_v36 = vsel %vm3739_vm1, %v3781_v32, %v3783_v45  ;;  %v13242_v45 = vld [vmem:[#allocation42_spill] sm:$0xff] }
 0x754   : > { %v3984_v24 = vadd.f32 %v3784_v36, %v13237_v10  ;;  %v4464_v27 = vunpack.c.l.b16 %v4316_v7 }
 0x756   : > { %v4062_v8 = vadd.f32 %v11173_v58, %v3984_v24  ;;  %v3451_v23 = vpop.f32.mrf.mxu0  ;;  %v13243_v24 = vld [vmem:[#allocation54_spill] sm:$0xff] }
 0x758   : > { %v4136_v60 = vmax.f32 %v4062_v8, 0.0 }
 0x75a   : > { %v4317_v50 = vpack.c.bf16 %v4136_v60, %v4136_v60  ;;  %v9708_v60 = vld [vmem:[%s10055_s11 + $0xc8] sm:$0xff] }
 0x75c   : > { %v4465_v37 = vunpack.c.l.b16 %v4317_v50 }
 0x75d   : > { %v4686_v53 = vpop.f32.mrf.mxu1 }
 0x75e   : > { %v11261_v51 = vpack.c.b16 %v4465_v37, %v4464_v27  ;;  %v4911_v17 = vadd.f32 %v4910_v52, %v4686_v53  ;;  %v3454_v56 = vpop.f32.mrf.mxu0 }
 0x75f   : > { %v3613_v21 = vadd.f32 %v3454_v56, %v13240_v1 }
 0x760   : > { %13239 = vst [vmem:[#allocation18_spill] sm:$0xff] %v11261_v51  ;;  %4725 = vmatmul.bf16.gmra.mxu1 %v11261_v51  ;;  %4959 = vmatmul.bf16.gmra.mxu2 %v11261_v51 }
 0x761   : > { %5180 = vmatmul.bf16.gmra.mxu3 %v11261_v51  ;;  %3493 = vmatmul.bf16.gmra.mxu0 %v9707_v15  ;;  %v3787_v55 = vrot.slane %v3613_v21, 2 }
 0x763   : > { %v4920_v48 = vpop.f32.mrf.mxu2 }
 0x765   : > { %v4688_v42 = vpop.f32.mrf.mxu1 }
 0x766   : > { %v3456_v32 = vpop.f32.mrf.mxu0 }
 0x767   : > { %v3614_v18 = vadd.f32 %v3456_v32, %v13241_v63 }
 0x769   : > { %v3789_v16 = vrot.slane %v3614_v18, 2 }
 0x76b   : > { %v3790_v52 = vsel %vm3739_vm1, %v3787_v55, %v3789_v16  ;;  %v4922_v12 = vpop.f32.mrf.mxu2 }
 0x76c   : > { %v3987_v35 = vadd.f32 %v3790_v52, %v13242_v45  ;;  %v11284_v52 = vpop.f32.mrf.mxu3 }
 0x76d   : > { %v4691_v36 = vpop.f32.mrf.mxu1  ;;  %13245 = vst [vmem:[#allocation40_spill] sm:$0xff] %v11284_v52 }
 0x76e   : > { %v11271_v0 = vadd.f32 %v4915_v47, %v4691_v36  ;;  %v3459_v10 = vpop.f32.mrf.mxu0  ;;  %v4065_v23 = vadd.f32 %v11173_v58, %v3987_v35  ;;  %v13244_v47 = vld [vmem:[#allocation67_spill] sm:$0xff] }
 0x76f   : > { %v3615_v8 = vadd.f32 %v3459_v10, %v13243_v24 }
 0x770   : > { %4730 = vmatmul.bf16.gmra.mxu1 %v11151_v38  ;;  %4964 = vmatmul.bf16.gmra.mxu2 %v11151_v38  ;;  %v4139_v37 = vmax.f32 %v4065_v23, 0.0  ;;  %v9486_v23 = vld [vmem:[#allocation7 + $0x120] sm:$0xff] }
 0x771   : > { %v3791_v7 = vrot.slane %v3615_v8, 2  ;;  %5185 = vmatmul.bf16.gmra.mxu3 %v11151_v38  ;;  %3498 = vmatmul.bf16.gmra.mxu0 %v9708_v60  ;;  %v9478_v8 = vld [vmem:[#allocation7 + $0x60] sm:$0xff] }
 0x772   : > { %v4320_v32 = vpack.c.bf16 %v4139_v37, %v4139_v37  ;;  %5687 = vmatpush.bf16.msrb.mxu2 %v9478_v8  ;;  %5464 = vmatpush.bf16.msrb.mxu1 %v9486_v23 }
 0x773   : > { %v3792_v50 = vsel %vm3739_vm1, %v3789_v16, %v3791_v7  ;;  %v4925_v27 = vpop.f32.mrf.mxu2 }
 0x774   : > { %v3988_v53 = vadd.f32 %v3792_v50, %v13244_v47  ;;  %v4468_v45 = vunpack.c.l.b16 %v4320_v32  ;;  %v13247_v50 = vld [vmem:[#allocation28_spill] sm:$0xff] }
 0x775   : > { %v4693_v56 = vpop.f32.mrf.mxu1 }
 0x776   : > { %v4066_v15 = vadd.f32 %v11173_v58, %v3988_v53  ;;  %v11282_v1 = vadd.f32 %v4917_v44, %v4693_v56  ;;  %v3461_v21 = vpop.f32.mrf.mxu0  ;;  %v9709_v44 = vld [vmem:[%s10055_s11 + $0xd0] sm:$0xff] }
 0x778   : > { %v4140_v63 = vmax.f32 %v4066_v15, 0.0  ;;  %v13248_v15 = vld [vmem:[#allocation56_spill] sm:$0xff] }
 0x77a   : > { %v4321_v18 = vpack.c.bf16 %v4140_v63, %v4140_v63 }
 0x77b   : > { %v4927_v55 = vpop.f32.mrf.mxu2 }
 0x77c   : > { %v4469_v35 = vunpack.c.l.b16 %v4321_v18  ;;  %v4913_v18 = vadd.f32 %v11245_v30, %v4688_v42  ;;  %v9710_v42 = vld [vmem:[%s10055_s11 + $0xd8] sm:$0xff] }
 0x77d   : > { %v4696_v16 = vpop.f32.mrf.mxu1 }
 0x77e   : > { %v11286_v36 = vpack.c.b16 %v4469_v35, %v4468_v45  ;;  %v11288_v10 = vadd.f32 %v4920_v48, %v4696_v16  ;;  %v3464_v24 = vpop.f32.mrf.mxu0  ;;  %v13249_v16 = vld [vmem:[#allocation68_spill] sm:$0xff] }
 0x77f   : > { %v3617_v37 = vadd.f32 %v3464_v24, %v13247_v50 }
 0x780   : > { %13246 = vst [vmem:[#allocation20_spill] sm:$0xff] %v11286_v36  ;;  %4735 = vmatmul.bf16.gmra.mxu1 %v11286_v36  ;;  %4969 = vmatmul.bf16.gmra.mxu2 %v11286_v36 }
 0x781   : > { %5190 = vmatmul.bf16.gmra.mxu3 %v11286_v36  ;;  %3503 = vmatmul.bf16.gmra.mxu0 %v9709_v44  ;;  %v3795_v32 = vrot.slane %v3617_v37, 2 }
 0x783   : > { %v4930_v7 = vpop.f32.mrf.mxu2 }
 0x784   : > { %v5151_v60 = vpop.f32.mrf.mxu3 }
 0x785   : > { %v11295_v47 = vadd.f32 %v5151_v60, %v4911_v17  ;;  %v4698_v48 = vpop.f32.mrf.mxu1  ;;  %v13250_v60 = vld [vmem:[#allocation57_spill] sm:$0xff] }
 0x786   : > { %v11297_v53 = vadd.f32 %v4922_v12, %v4698_v48  ;;  %v3466_v56 = vpop.f32.mrf.mxu0 }
 0x787   : > { %v3618_v21 = vadd.f32 %v3466_v56, %v13248_v15 }
 0x789   : > { %v3797_v63 = vrot.slane %v3618_v21, 2 }
 0x78b   : > { %v3798_v45 = vsel %vm3739_vm1, %v3795_v32, %v3797_v63  ;;  %v4932_v35 = vpop.f32.mrf.mxu2 }
 0x78c   : > { %v3991_v8 = vadd.f32 %v3798_v45, %v13249_v16  ;;  %v5153_v23 = vpop.f32.mrf.mxu3 }
 0x78d   : > { %v11303_v24 = vadd.f32 %v5153_v23, %v4913_v18  ;;  %v4701_v17 = vpop.f32.mrf.mxu1 }
 0x78e   : > { %v11305_v44 = vadd.f32 %v4925_v27, %v4701_v17  ;;  %v3469_v12 = vpop.f32.mrf.mxu0  ;;  %v4069_v37 = vadd.f32 %v11173_v58, %v3991_v8  ;;  %v13251_v27 = vld [vmem:[#allocation69_spill] sm:$0xff] }
 0x78f   : > { %v3619_v50 = vadd.f32 %v3469_v12, %v13250_v60 }
 0x790   : > { %4740 = vmatmul.bf16.gmra.mxu1 %v11151_v38  ;;  %4974 = vmatmul.bf16.gmra.mxu2 %v11151_v38  ;;  %v4143_v15 = vmax.f32 %v4069_v37, 0.0 }
 0x791   : > { %v3799_v30 = vrot.slane %v3619_v50, 2  ;;  %5195 = vmatmul.bf16.gmra.mxu3 %v11151_v38  ;;  %3508 = vmatmul.bf16.gmra.mxu0 %v9710_v42 }
 0x792   : > { %v4324_v17 = vpack.c.bf16 %v4143_v15, %v4143_v15 }
 0x793   : > { %v3800_v48 = vsel %vm3739_vm1, %v3797_v63, %v3799_v30  ;;  %v4935_v56 = vpop.f32.mrf.mxu2 }
 0x794   : > { %v3992_v21 = vadd.f32 %v3800_v48, %v13251_v27  ;;  %v5156_v32 = vpop.f32.mrf.mxu3  ;;  %v4472_v42 = vunpack.c.l.b16 %v4324_v17 }
 0x795   : > { %v11316_v18 = vadd.f32 %v5156_v32, %v11271_v0  ;;  %v4703_v45 = vpop.f32.mrf.mxu1 }
 0x796   : > { %v4070_v16 = vadd.f32 %v11173_v58, %v3992_v21  ;;  %v4928_v8 = vadd.f32 %v4927_v55, %v4703_v45  ;;  %v3471_v23 = vpop.f32.mrf.mxu0  ;;  %v9711_v55 = vld [vmem:[%s10055_s11 + $0xe0] sm:$0xff]  ;;  %v13252_v45 = vld [vmem:[#allocation30_spill] sm:$0xff] }
 0x798   : > { %v4144_v12 = vmax.f32 %v4070_v16, 0.0 }
 0x79a   : > { %v4325_v60 = vpack.c.bf16 %v4144_v12, %v4144_v12  ;;  %v13254_v12 = vld [vmem:[#allocation59_spill] sm:$0xff] }
 0x79b   : > { %v4937_v50 = vpop.f32.mrf.mxu2 }
 0x79c   : > { %v4473_v63 = vunpack.c.l.b16 %v4325_v60  ;;  %v5158_v30 = vpop.f32.mrf.mxu3 }
 0x79d   : > { %v11320_v37 = vadd.f32 %v5158_v30, %v11282_v1  ;;  %v4706_v48 = vpop.f32.mrf.mxu1 }
 0x79e   : > { %v11322_v27 = vpack.c.b16 %v4473_v63, %v4472_v42  ;;  %v11324_v0 = vadd.f32 %v4930_v7, %v4706_v48  ;;  %v3474_v32 = vpop.f32.mrf.mxu0 }
 0x79f   : > { %v3621_v16 = vadd.f32 %v3474_v32, %v13252_v45  ;;  %v13257_v45 = vld [vmem:[#allocation60_spill] sm:$0xff] }
 0x7a0   : > { %4745 = vmatmul.bf16.gmra.mxu1 %v11322_v27  ;;  %4979 = vmatmul.bf16.gmra.mxu2 %v11322_v27 }
 0x7a1   : > { %5200 = vmatmul.bf16.gmra.mxu3 %v11322_v27  ;;  %3513 = vmatmul.bf16.gmra.mxu0 %v9711_v55  ;;  %v3803_v42 = vrot.slane %v3621_v16, 2  ;;  %v13255_v55 = vld [vmem:[#allocation49_spill] sm:$0xff] }
 0x7a3   : > { %v4940_v15 = vpop.f32.mrf.mxu2 }
 0x7a4   : > { %v5161_v21 = vpop.f32.mrf.mxu3 }
 0x7a5   : > { %v11332_v1 = vadd.f32 %v5161_v21, %v11288_v10  ;;  %v4708_v23 = vpop.f32.mrf.mxu1 }
 0x7a6   : > { %v11334_v17 = vadd.f32 %v4932_v35, %v4708_v23  ;;  %v3476_v7 = vpop.f32.mrf.mxu0 }
 0x7a7   : > { %13253 = vst [vmem:[#allocation41_spill] sm:$0xff] %v11332_v1  ;;  %v3622_v60 = vadd.f32 %v3476_v7, %v13254_v12  ;;  %v9712_v12 = vld [vmem:[%s10055_s11 + $0xe8] sm:$0xff] }
 0x7a9   : > { %v3805_v63 = vrot.slane %v3622_v60, 2 }
 0x7ab   : > { %v3806_v30 = vsel %vm3739_vm1, %v3803_v42, %v3805_v63  ;;  %v4942_v48 = vpop.f32.mrf.mxu2 }
 0x7ac   : > { %v3995_v52 = vadd.f32 %v3806_v30, %v13255_v55  ;;  %v5163_v14 = vpop.f32.mrf.mxu3 }
 0x7ad   : > { %v11340_v32 = vadd.f32 %v5163_v14, %v11297_v53  ;;  %v4711_v10 = vpop.f32.mrf.mxu1 }
 0x7ae   : > { %v11342_v21 = vadd.f32 %v4935_v56, %v4711_v10  ;;  %v3479_v35 = vpop.f32.mrf.mxu0  ;;  %v4073_v7 = vadd.f32 %v11173_v58, %v3995_v52  ;;  %v13258_v56 = vld [vmem:[#allocation50_spill] sm:$0xff] }
 0x7af   : > { %13256 = vst [vmem:[#allocation16_spill] sm:$0xff] %v11340_v32  ;;  %v3623_v23 = vadd.f32 %v3479_v35, %v13257_v45 }
 0x7b0   : > { %4750 = vmatmul.bf16.gmra.mxu1 %v11151_v38  ;;  %4984 = vmatmul.bf16.gmra.mxu2 %v11151_v38  ;;  %v4147_v60 = vmax.f32 %v4073_v7, 0.0 }
 0x7b1   : > { %v3807_v16 = vrot.slane %v3623_v23, 2  ;;  %5205 = vmatmul.bf16.gmra.mxu3 %v11151_v38  ;;  %3518 = vmatmul.bf16.gmra.mxu0 %v9712_v12 }
 0x7b2   : > { %v4328_v23 = vpack.c.bf16 %v4147_v60, %v4147_v60 }
 0x7b3   : > { %v3808_v14 = vsel %vm3739_vm1, %v3805_v63, %v3807_v16  ;;  %v4945_v53 = vpop.f32.mrf.mxu2 }
 0x7b4   : > { %v3996_v42 = vadd.f32 %v3808_v14, %v13258_v56  ;;  %v5166_v30 = vpop.f32.mrf.mxu3  ;;  %v4476_v63 = vunpack.c.l.b16 %v4328_v23 }
 0x7b5   : > { %v11353_v55 = vadd.f32 %v5166_v30, %v11305_v44  ;;  %v4713_v52 = vpop.f32.mrf.mxu1 }
 0x7b6   : > { %v4074_v10 = vadd.f32 %v11173_v58, %v3996_v42  ;;  %v11356_v35 = vadd.f32 %v4937_v50, %v4713_v52  ;;  %v3481_v45 = vpop.f32.mrf.mxu0  ;;  %v9477_v42 = vld [vmem:[#allocation7 + $0x58] sm:$0xff] }
 0x7b7   : > { %13259 = vst [vmem:[#allocation38_spill] sm:$0xff] %v11353_v55  ;;  %v9485_v50 = vld [vmem:[#allocation7 + $0x118] sm:$0xff]  ;;  %5688 = vmatpush.bf16.msrb.mxu2 %v9477_v42  ;;  %v13263_v42 = vld [vmem:[#allocation25_spill] sm:$0xff] }
 0x7b8   : > { %v4148_v28 = vmax.f32 %v4074_v10, 0.0  ;;  %5465 = vmatpush.bf16.msrb.mxu1 %v9485_v50 }
 0x7ba   : > { %v4329_v12 = vpack.c.bf16 %v4148_v28, %v4148_v28  ;;  %v9713_v28 = vld [vmem:[%s10055_s11 + $0xf0] sm:$0xff] }
 0x7bb   : > { %v4947_v32 = vpop.f32.mrf.mxu2 }
 0x7bc   : > { %v4477_v16 = vunpack.c.l.b16 %v4329_v12  ;;  %v5168_v7 = vpop.f32.mrf.mxu3  ;;  %v13262_v12 = vld [vmem:[#allocation61_spill] sm:$0xff] }
 0x7bd   : > { %v11358_v1 = vadd.f32 %v5168_v7, %v4928_v8  ;;  %v4716_v14 = vpop.f32.mrf.mxu1 }
 0x7be   : > { %v11360_v56 = vpack.c.b16 %v4477_v16, %v4476_v63  ;;  %v11362_v44 = vadd.f32 %v4940_v15, %v4716_v14  ;;  %v3484_v30 = vpop.f32.mrf.mxu0 }
 0x7bf   : > { %13260 = vst [vmem:[#allocation64_spill] sm:$0xff] %v11358_v1  ;;  %v3625_v52 = vadd.f32 %v3484_v30, %v11010_v43 }
 0x7c0   : > { %4755 = vmatmul.bf16.gmra.mxu1 %v11360_v56  ;;  %4989 = vmatmul.bf16.gmra.mxu2 %v11360_v56 }
 0x7c1   : > { %5210 = vmatmul.bf16.gmra.mxu3 %v11360_v56  ;;  %3523 = vmatmul.bf16.gmra.mxu0 %v9713_v28  ;;  %v3811_v16 = vrot.slane %v3625_v52, 2 }
 0x7c3   : > { %v4950_v60 = vpop.f32.mrf.mxu2 }
 0x7c4   : > { %v5171_v8 = vpop.f32.mrf.mxu3 }
 0x7c5   : > { %v11370_v15 = vadd.f32 %v5171_v8, %v11324_v0  ;;  %v4718_v10 = vpop.f32.mrf.mxu1 }
 0x7c6   : > { %v4943_v45 = vadd.f32 %v4942_v48, %v4718_v10  ;;  %v3486_v23 = vpop.f32.mrf.mxu0  ;;  %v13265_v48 = vld [vmem:[#allocation33_spill] sm:$0xff] }
 0x7c7   : > { %13261 = vst [vmem:[#allocation21_spill] sm:$0xff] %v11370_v15  ;;  %v3626_v63 = vadd.f32 %v3486_v23, %v13262_v12  ;;  %v9714_v23 = vld [vmem:[%s10055_s11 + $0xf8] sm:$0xff] }
 0x7c9   : > { %v3813_v7 = vrot.slane %v3626_v63, 2 }
 0x7cb   : > { %v3814_v14 = vsel %vm3739_vm1, %v3811_v16, %v3813_v7  ;;  %v4952_v28 = vpop.f32.mrf.mxu2 }
 0x7cc   : > { %v3999_v1 = vadd.f32 %v3814_v14, %v13263_v42  ;;  %v5173_v50 = vpop.f32.mrf.mxu3 }
 0x7cd   : > { %v11376_v55 = vadd.f32 %v5173_v50, %v11334_v17  ;;  %v4721_v43 = vpop.f32.mrf.mxu1 }
 0x7ce   : > { %v11378_v0 = vadd.f32 %v4945_v53, %v4721_v43  ;;  %v3489_v30 = vpop.f32.mrf.mxu0  ;;  %v4077_v10 = vadd.f32 %v11173_v58, %v3999_v1  ;;  %v13266_v53 = vld [vmem:[#allocation51_spill] sm:$0xff] }
 0x7cf   : > { %13264 = vst [vmem:[#allocation44_spill] sm:$0xff] %v11376_v55  ;;  %v3627_v8 = vadd.f32 %v3489_v30, %v13265_v48 }
 0x7d0   : > { %4760 = vmatmul.bf16.gmra.mxu1 %v11151_v38  ;;  %4994 = vmatmul.bf16.gmra.mxu2 %v11151_v38  ;;  %v4151_v63 = vmax.f32 %v4077_v10, 0.0 }
 0x7d1   : > { %v3815_v52 = vrot.slane %v3627_v8, 2  ;;  %5215 = vmatmul.bf16.gmra.mxu3 %v11151_v38  ;;  %3528 = vmatmul.bf16.gmra.mxu0 %v9714_v23 }
 0x7d2   : > { %v4332_v48 = vpack.c.bf16 %v4151_v63, %v4151_v63 }
 0x7d3   : > { %v3816_v17 = vsel %vm3739_vm1, %v3813_v7, %v3815_v52  ;;  %v4955_v12 = vpop.f32.mrf.mxu2 }
 0x7d4   : > { %v4000_v16 = vadd.f32 %v3816_v17, %v13266_v53  ;;  %v5176_v14 = vpop.f32.mrf.mxu3  ;;  %v4480_v15 = vunpack.c.l.b16 %v4332_v48 }
 0x7d5   : > { %v11389_v42 = vadd.f32 %v5176_v14, %v11342_v21  ;;  %v4723_v1 = vpop.f32.mrf.mxu1 }
 0x7d6   : > { %v4078_v50 = vadd.f32 %v11173_v58, %v4000_v16  ;;  %v4948_v43 = vadd.f32 %v4947_v32, %v4723_v1  ;;  %v3491_v30 = vpop.f32.mrf.mxu0  ;;  %v9715_v32 = vld [vmem:[%s10055_s11 + $0x100] sm:$0xff] }
 0x7d8   : > { %v4152_v8 = vmax.f32 %v4078_v50, 0.0 }
 0x7da   : > { %v4333_v55 = vpack.c.bf16 %v4152_v8, %v4152_v8 }
 0x7db   : > { %v4957_v23 = vpop.f32.mrf.mxu2 }
 0x7dc   : > { %v4481_v7 = vunpack.c.l.b16 %v4333_v55  ;;  %v5178_v52 = vpop.f32.mrf.mxu3 }
 0x7dd   : > { %v11393_v10 = vadd.f32 %v5178_v52, %v11356_v35  ;;  %v4726_v17 = vpop.f32.mrf.mxu1  ;;  %v13269_v52 = vld [vmem:[#allocation52_spill] sm:$0xff] }
 0x7de   : > { %v11395_v53 = vpack.c.b16 %v4481_v7, %v4480_v15  ;;  %v11397_v21 = vadd.f32 %v4950_v60, %v4726_v17  ;;  %v3494_v14 = vpop.f32.mrf.mxu0 }
 0x7df   : > { %13267 = vst [vmem:[#allocation23_spill] sm:$0xff] %v11393_v10  ;;  %v3629_v16 = vadd.f32 %v3494_v14, %v11040_v4 }
 0x7e0   : > { %4765 = vmatmul.bf16.gmra.mxu1 %v11395_v53  ;;  %4999 = vmatmul.bf16.gmra.mxu2 %v11395_v53 }
 0x7e1   : > { %5220 = vmatmul.bf16.gmra.mxu3 %v11395_v53  ;;  %3533 = vmatmul.bf16.gmra.mxu0 %v9715_v32  ;;  %v3819_v30 = vrot.slane %v3629_v16, 2  ;;  %v9716_v16 = vld [vmem:[%s10055_s11 + $0x108] sm:$0xff] }
 0x7e3   : > { %v4960_v63 = vpop.f32.mrf.mxu2 }
 0x7e4   : > { %v5181_v55 = vpop.f32.mrf.mxu3 }
 0x7e5   : > { %v11405_v35 = vadd.f32 %v5181_v55, %v11362_v44  ;;  %v4728_v15 = vpop.f32.mrf.mxu1 }
 0x7e6   : > { %v11407_v1 = vadd.f32 %v4952_v28, %v4728_v15  ;;  %v3496_v60 = vpop.f32.mrf.mxu0  ;;  %v13271_v28 = vld [vmem:[#allocation62_spill] sm:$0xff] }
 0x7e7   : > { %13268 = vst [vmem:[#allocation45_spill] sm:$0xff] %v11405_v35  ;;  %v3630_v50 = vadd.f32 %v3496_v60, %v11050_v5 }
 0x7e9   : > { %v3821_v48 = vrot.slane %v3630_v50, 2 }
 0x7eb   : > { %v3822_v8 = vsel %vm3739_vm1, %v3819_v30, %v3821_v48  ;;  %v4962_v7 = vpop.f32.mrf.mxu2 }
 0x7ec   : > { %v4003_v17 = vadd.f32 %v3822_v8, %v13269_v52  ;;  %v5183_v32 = vpop.f32.mrf.mxu3 }
 0x7ed   : > { %v11412_v10 = vadd.f32 %v5183_v32, %v4943_v45  ;;  %v4731_v4 = vpop.f32.mrf.mxu1 }
 0x7ee   : > { %v11414_v44 = vadd.f32 %v4955_v12, %v4731_v4  ;;  %v3499_v14 = vpop.f32.mrf.mxu0  ;;  %v4081_v15 = vadd.f32 %v11173_v58, %v4003_v17  ;;  %v13272_v12 = vld [vmem:[#allocation27_spill] sm:$0xff] }
 0x7ef   : > { %13270 = vst [vmem:[#allocation19_spill] sm:$0xff] %v11412_v10  ;;  %v3631_v55 = vadd.f32 %v3499_v14, %v13271_v28 }
 0x7f0   : > { %4770 = vmatmul.bf16.gmra.mxu1 %v11151_v38  ;;  %5004 = vmatmul.bf16.gmra.mxu2 %v11151_v38  ;;  %v4155_v50 = vmax.f32 %v4081_v15, 0.0 }
 0x7f1   : > { %v3823_v5 = vrot.slane %v3631_v55, 2  ;;  %5225 = vmatmul.bf16.gmra.mxu3 %v11151_v38  ;;  %3538 = vmatmul.bf16.gmra.mxu0 %v9716_v16 }
 0x7f2   : > { %v4336_v28 = vpack.c.bf16 %v4155_v50, %v4155_v50  ;;  %v9476_v50 = vld [vmem:[#allocation7 + $0x50] sm:$0xff] }
 0x7f3   : > { %v3824_v45 = vsel %vm3739_vm1, %v3821_v48, %v3823_v5  ;;  %v4965_v60 = vpop.f32.mrf.mxu2  ;;  %5689 = vmatpush.bf16.msrb.mxu2 %v9476_v50 }
 0x7f4   : > { %v4004_v30 = vadd.f32 %v3824_v45, %v13272_v12  ;;  %v5186_v8 = vpop.f32.mrf.mxu3  ;;  %v4484_v48 = vunpack.c.l.b16 %v4336_v28 }
 0x7f5   : > { %v11425_v52 = vadd.f32 %v5186_v8, %v11378_v0  ;;  %v4733_v17 = vpop.f32.mrf.mxu1 }
 0x7f6   : > { %v4082_v32 = vadd.f32 %v11173_v58, %v4004_v30  ;;  %v11428_v4 = vadd.f32 %v4957_v23, %v4733_v17  ;;  %v3501_v14 = vpop.f32.mrf.mxu0  ;;  %v9717_v23 = vld [vmem:[%s10055_s11 + $0x110] sm:$0xff] }
 0x7f7   : > { %v9484_v14 = vld [vmem:[#allocation7 + $0x110] sm:$0xff] }
 0x7f8   : > { %v4156_v55 = vmax.f32 %v4082_v32, 0.0  ;;  %5466 = vmatpush.bf16.msrb.mxu1 %v9484_v14  ;;  %v9718_v14 = vld [vmem:[%s10055_s11 + $0x118] sm:$0xff] }
 0x7fa   : > { %v4337_v16 = vpack.c.bf16 %v4156_v55, %v4156_v55 }
 0x7fb   : > { %v4967_v10 = vpop.f32.mrf.mxu2 }
 0x7fc   : > { %v4485_v5 = vunpack.c.l.b16 %v4337_v16  ;;  %v5188_v15 = vpop.f32.mrf.mxu3 }
 0x7fd   : > { %v11430_v35 = vadd.f32 %v5188_v15, %v4948_v43  ;;  %v4736_v45 = vpop.f32.mrf.mxu1 }
 0x7fe   : > { %v11432_v12 = vpack.c.b16 %v4485_v5, %v4484_v48  ;;  %v11434_v0 = vadd.f32 %v4960_v63, %v4736_v45  ;;  %v3504_v8 = vpop.f32.mrf.mxu0 }
 0x7ff   : > { %v3633_v43 = vadd.f32 %v3504_v8, %v11066_v25 }
 0x800   : > { %4775 = vmatmul.bf16.gmra.mxu1 %v11432_v12  ;;  %5009 = vmatmul.bf16.gmra.mxu2 %v11432_v12 }
 0x801   : > { %5230 = vmatmul.bf16.gmra.mxu3 %v11432_v12  ;;  %3543 = vmatmul.bf16.gmra.mxu0 %v9717_v23  ;;  %v3827_v48 = vrot.slane %v3633_v43, 2  ;;  %v13273_v23 = vld [vmem:[#allocation55_spill] sm:$0xff] }
 0x803   : > { %v4970_v30 = vpop.f32.mrf.mxu2 }
 0x804   : > { %v5191_v17 = vpop.f32.mrf.mxu3 }
 0x805   : > { %v11442_v32 = vadd.f32 %v5191_v17, %v11397_v21  ;;  %v4738_v63 = vpop.f32.mrf.mxu1 }
 0x806   : > { %v11444_v28 = vadd.f32 %v4962_v7, %v4738_v63  ;;  %v3506_v55 = vpop.f32.mrf.mxu0 }
 0x807   : > { %v3634_v16 = vadd.f32 %v3506_v55, %v11076_v2 }
 0x809   : > { %v3829_v5 = vrot.slane %v3634_v16, 2 }
 0x80b   : > { %v3830_v15 = vsel %vm3739_vm1, %v3827_v48, %v3829_v5  ;;  %v4972_v45 = vpop.f32.mrf.mxu2 }
 0x80c   : > { %v4007_v50 = vadd.f32 %v3830_v15, %v13273_v23  ;;  %v5193_v25 = vpop.f32.mrf.mxu3 }
 0x80d   : > { %v11450_v21 = vadd.f32 %v5193_v25, %v11407_v1  ;;  %v4741_v8 = vpop.f32.mrf.mxu1 }
 0x80e   : > { %v11452_v17 = vadd.f32 %v4965_v60, %v4741_v8  ;;  %v3509_v7 = vpop.f32.mrf.mxu0  ;;  %v4085_v2 = vadd.f32 %v11173_v58, %v4007_v50  ;;  %v13275_v60 = vld [vmem:[#allocation29_spill] sm:$0xff] }
 0x80f   : > { %13274 = vst [vmem:[#allocation43_spill] sm:$0xff] %v11450_v21  ;;  %v3635_v63 = vadd.f32 %v3509_v7, %v11084_v20 }
 0x810   : > { %4780 = vmatmul.bf16.gmra.mxu1 %v11151_v38  ;;  %5014 = vmatmul.bf16.gmra.mxu2 %v11151_v38  ;;  %v4159_v16 = vmax.f32 %v4085_v2, 0.0 }
 0x811   : > { %v3831_v43 = vrot.slane %v3635_v63, 2  ;;  %5235 = vmatmul.bf16.gmra.mxu3 %v11151_v38  ;;  %3548 = vmatmul.bf16.gmra.mxu0 %v9718_v14 }
 0x812   : > { %v4340_v7 = vpack.c.bf16 %v4159_v16, %v4159_v16 }
 0x813   : > { %v3832_v1 = vsel %vm3739_vm1, %v3829_v5, %v3831_v43  ;;  %v4975_v55 = vpop.f32.mrf.mxu2 }
 0x814   : > { %v4008_v48 = vadd.f32 %v3832_v1, %v13275_v60  ;;  %v5196_v15 = vpop.f32.mrf.mxu3  ;;  %v4488_v5 = vunpack.c.l.b16 %v4340_v7 }
 0x815   : > { %v11463_v20 = vadd.f32 %v5196_v15, %v11414_v44  ;;  %v4743_v23 = vpop.f32.mrf.mxu1 }
 0x816   : > { %v4086_v50 = vadd.f32 %v11173_v58, %v4008_v48  ;;  %v11466_v25 = vadd.f32 %v4967_v10, %v4743_v23  ;;  %v3511_v8 = vpop.f32.mrf.mxu0  ;;  %v9719_v10 = vld [vmem:[%s10055_s11 + $0x120] sm:$0xff] }
 0x818   : > { %v4160_v63 = vmax.f32 %v4086_v50, 0.0 }
 0x81a   : > { %v4341_v14 = vpack.c.bf16 %v4160_v63, %v4160_v63 }
 0x81b   : > { %v4977_v21 = vpop.f32.mrf.mxu2 }
 0x81c   : > { %v4489_v43 = vunpack.c.l.b16 %v4341_v14  ;;  %v5198_v2 = vpop.f32.mrf.mxu3 }
 0x81d   : > { %v11469_v1 = vadd.f32 %v5198_v2, %v11428_v4  ;;  %v4746_v60 = vpop.f32.mrf.mxu1  ;;  %v13277_v2 = vld [vmem:[#allocation58_spill] sm:$0xff] }
 0x81e   : > { %v11471_v44 = vpack.c.b16 %v4489_v43, %v4488_v5  ;;  %v11473_v15 = vadd.f32 %v4970_v30, %v4746_v60  ;;  %v3514_v58 = vpop.f32.mrf.mxu0 }
 0x81f   : > { %v3637_v23 = vadd.f32 %v3514_v58, %v11091_v6 }
 0x820   : > { %4785 = vmatmul.bf16.gmra.mxu1 %v11471_v44  ;;  %5019 = vmatmul.bf16.gmra.mxu2 %v11471_v44 }
 0x821   : > { %5240 = vmatmul.bf16.gmra.mxu3 %v11471_v44  ;;  %3553 = vmatmul.bf16.gmra.mxu0 %v9719_v10  ;;  %v3835_v63 = vrot.slane %v3637_v23, 2 }
 0x823   : > { %v4980_v16 = vpop.f32.mrf.mxu2 }
 0x824   : > { %v5201_v48 = vpop.f32.mrf.mxu3 }
 0x825   : > { %v11481_v4 = vadd.f32 %v5201_v48, %v11434_v0  ;;  %v4748_v50 = vpop.f32.mrf.mxu1 }
 0x826   : > { %v11483_v8 = vadd.f32 %v4972_v45, %v4748_v50  ;;  %v3516_v30 = vpop.f32.mrf.mxu0 }
 0x827   : > { %13276 = vst [vmem:[#allocation24_spill] sm:$0xff] %v11481_v4  ;;  %v3638_v7 = vadd.f32 %v3516_v30, %v11101_v13  ;;  %v11497_v13 = vld [vmem:[%s13043_s2] ss:$0 sm:$0xff] }
 0x829   : > { %v3837_v14 = vrot.slane %v3638_v7, 2  ;;  %v13279_v7 = vld [vmem:[#allocation31_spill] sm:$0xff] }
 0x82b   : > { %v3838_v5 = vsel %vm3739_vm1, %v3835_v63, %v3837_v14  ;;  %v4982_v43 = vpop.f32.mrf.mxu2 }
 0x82c   : > { %v4011_v60 = vadd.f32 %v3838_v5, %v13277_v2  ;;  %v5203_v10 = vpop.f32.mrf.mxu3 }
 0x82d   : > { %v11489_v6 = vadd.f32 %v5203_v10, %v11444_v28  ;;  %v4751_v0 = vpop.f32.mrf.mxu1  ;;  %v9721_v28 = vld [vmem:[%s10055_s11 + $0x128] sm:$0xff] }
 0x82e   : > { %v11491_v58 = vadd.f32 %v4975_v55, %v4751_v0  ;;  %v3519_v45 = vpop.f32.mrf.mxu0  ;;  %v4089_v23 = vadd.f32 %v11497_v13, %v4011_v60 }
 0x82f   : > { %13278 = vst [vmem:[#allocation65_spill] sm:$0xff] %v11489_v6  ;;  %v3639_v48 = vadd.f32 %v3519_v45, %v11109_v54 }
 0x830   : > { %4790 = vmatmul.bf16.gmra.mxu1 %v11151_v38  ;;  %5024 = vmatmul.bf16.gmra.mxu2 %v11151_v38  ;;  %v4163_v54 = vmax.f32 %v4089_v23, 0.0 }
 0x831   : > { %v3839_v50 = vrot.slane %v3639_v48, 2  ;;  %5245 = vmatmul.bf16.gmra.mxu3 %v11151_v38  ;;  %3558 = vmatmul.bf16.gmra.mxu0 %v9721_v28 }
 0x832   : > { %v4344_v48 = vpack.c.bf16 %v4163_v54, %v4163_v54 }
 0x833   : > { %v3840_v55 = vsel %vm3739_vm1, %v3837_v14, %v3839_v50  ;;  %v4985_v30 = vpop.f32.mrf.mxu2 }
 0x834   : > { %v4012_v63 = vadd.f32 %v3840_v55, %v13279_v7  ;;  %v5206_v5 = vpop.f32.mrf.mxu3  ;;  %v4492_v14 = vunpack.c.l.b16 %v4344_v48 }
 0x835   : > { %v11507_v2 = vadd.f32 %v5206_v5, %v11452_v17  ;;  %v4753_v60 = vpop.f32.mrf.mxu1 }
 0x836   : > { %v4090_v10 = vadd.f32 %v11497_v13, %v4012_v63  ;;  %v11510_v0 = vadd.f32 %v4977_v21, %v4753_v60  ;;  %v3521_v45 = vpop.f32.mrf.mxu0  ;;  %v9722_v21 = vld [vmem:[%s10055_s11 + $0x130] sm:$0xff] }
 0x837   : > { %v9475_v45 = vld [vmem:[#allocation7 + $0x48] sm:$0xff] }
 0x838   : > { %v4164_v6 = vmax.f32 %v4090_v10, 0.0  ;;  %5690 = vmatpush.bf16.msrb.mxu2 %v9475_v45  ;;  %v9723_v45 = vld [vmem:[%s10055_s11 + $0x138] sm:$0xff] }
 0x83a   : > { %v4345_v28 = vpack.c.bf16 %v4164_v6, %v4164_v6 }
 0x83b   : > { %v4987_v4 = vpop.f32.mrf.mxu2 }
 0x83c   : > { %v4493_v50 = vunpack.c.l.b16 %v4345_v28  ;;  %v5208_v23 = vpop.f32.mrf.mxu3 }
 0x83d   : > { %v11513_v55 = vadd.f32 %v5208_v23, %v11466_v25  ;;  %v4756_v7 = vpop.f32.mrf.mxu1 }
 0x83e   : > { %v11515_v17 = vpack.c.b16 %v4493_v50, %v4492_v14  ;;  %v11517_v5 = vadd.f32 %v4980_v16, %v4756_v7  ;;  %v3524_v63 = vpop.f32.mrf.mxu0 }
 0x83f   : > { %13280 = vst [vmem:[#allocation47_spill] sm:$0xff] %v11513_v55  ;;  %v3641_v60 = vadd.f32 %v3524_v63, %v11114_v31 }
 0x840   : > { %4795 = vmatmul.bf16.gmra.mxu1 %v11515_v17  ;;  %5029 = vmatmul.bf16.gmra.mxu2 %v11515_v17 }
 0x841   : > { %5250 = vmatmul.bf16.gmra.mxu3 %v11515_v17  ;;  %3563 = vmatmul.bf16.gmra.mxu0 %v9722_v21  ;;  %v3843_v14 = vrot.slane %v3641_v60, 2  ;;  %v13281_v21 = vld [vmem:[#allocation32_spill] sm:$0xff] }
 0x843   : > { %v4990_v6 = vpop.f32.mrf.mxu2 }
 0x844   : > { %v5211_v54 = vpop.f32.mrf.mxu3 }
 0x845   : > { %v11525_v25 = vadd.f32 %v5211_v54, %v11473_v15  ;;  %v4758_v10 = vpop.f32.mrf.mxu1 }
 0x846   : > { %v11527_v16 = vadd.f32 %v4982_v43, %v4758_v10  ;;  %v3526_v48 = vpop.f32.mrf.mxu0 }
 0x847   : > { %v3642_v28 = vadd.f32 %v3526_v48, %v11117_v9 }
 0x849   : > { %v3845_v50 = vrot.slane %v3642_v28, 2 }
 0x84b   : > { %v3846_v23 = vsel %vm3739_vm1, %v3843_v14, %v3845_v50  ;;  %v4992_v7 = vpop.f32.mrf.mxu2 }
 0x84c   : > { %v4015_v55 = vadd.f32 %v3846_v23, %v13281_v21  ;;  %v5213_v31 = vpop.f32.mrf.mxu3  ;;  %v9483_v21 = vld [vmem:[#allocation7 + $0x108] sm:$0xff] }
 0x84d   : > { %v11533_v15 = vadd.f32 %v5213_v31, %v11483_v8  ;;  %v4761_v63 = vpop.f32.mrf.mxu1  ;;  %5467 = vmatpush.bf16.msrb.mxu1 %v9483_v21 }
 0x84e   : > { %v11535_v54 = vadd.f32 %v4985_v30, %v4761_v63  ;;  %v3529_v43 = vpop.f32.mrf.mxu0  ;;  %v4093_v9 = vadd.f32 %v11497_v13, %v4015_v55  ;;  %v13283_v30 = vld [vmem:[#allocation12_spill] sm:$0xff] }
 0x84f   : > { %13282 = vst [vmem:[#allocation66_spill] sm:$0xff] %v11533_v15  ;;  %v3643_v10 = vadd.f32 %v3529_v43, %v11121_v62 }
 0x850   : > { %4800 = vmatmul.bf16.gmra.mxu1 %v11151_v38  ;;  %5034 = vmatmul.bf16.gmra.mxu2 %v11151_v38  ;;  %v4167_v28 = vmax.f32 %v4093_v9, 0.0 }
 0x851   : > { %v3847_v60 = vrot.slane %v3643_v10, 2  ;;  %5255 = vmatmul.bf16.gmra.mxu3 %v11151_v38  ;;  %3568 = vmatmul.bf16.gmra.mxu0 %v9723_v45 }
 0x852   : > { %v4348_v10 = vpack.c.bf16 %v4167_v28, %v4167_v28  ;;  %v9724_v28 = vld [vmem:[%s10055_s11 + $0x140] sm:$0xff] }
 0x853   : > { %v3848_v8 = vsel %vm3739_vm1, %v3845_v50, %v3847_v60  ;;  %v4995_v48 = vpop.f32.mrf.mxu2 }
 0x854   : > { %v4016_v14 = vadd.f32 %v3848_v8, %v13283_v30  ;;  %v5216_v23 = vpop.f32.mrf.mxu3  ;;  %v4496_v9 = vunpack.c.l.b16 %v4348_v10 }
 0x855   : > { %v11546_v62 = vadd.f32 %v5216_v23, %v11491_v58  ;;  %v4763_v55 = vpop.f32.mrf.mxu1 }
 0x856   : > { %v4094_v31 = vadd.f32 %v11497_v13, %v4016_v14  ;;  %v11549_v63 = vadd.f32 %v4987_v4, %v4763_v55  ;;  %v3531_v43 = vpop.f32.mrf.mxu0  ;;  %v9513_v14 = vld [vmem:[#allocation7 + $0x178] sm:$0xff] }
 0x857   : > { %13284 = vst [vmem:[#allocation48_spill] sm:$0xff] %v11546_v62  ;;  %6566 = vmatpush.bf16.msra.mxu0 %v9513_v14 }
 0x858   : > { %v4168_v45 = vmax.f32 %v4094_v31, 0.0  ;;  %v9512_v31 = vld [vmem:[#allocation7 + $0x170] sm:$0xff] }
 0x85a   : > { %v4349_v50 = vpack.c.bf16 %v4168_v45, %v4168_v45 }
 0x85b   : > { %v4997_v60 = vpop.f32.mrf.mxu2  ;;  %6567 = vmatpush.bf16.msra.mxu0 %v9512_v31 }
 0x85c   : > { %v4497_v15 = vunpack.c.l.b16 %v4349_v50  ;;  %v5218_v8 = vpop.f32.mrf.mxu3 }
 0x85d   : > { %v11552_v30 = vadd.f32 %v5218_v8, %v11510_v0  ;;  %v4766_v58 = vpop.f32.mrf.mxu1  ;;  %v9511_v8 = vld [vmem:[#allocation7 + $0x168] sm:$0xff] }
 0x85e   : > { %v11554_v23 = vpack.c.b16 %v4497_v15, %v4496_v9  ;;  %v11556_v62 = vadd.f32 %v4990_v6, %v4766_v58  ;;  %v3534_v4 = vpop.f32.mrf.mxu0 }
 0x85f   : > { %v3645_v0 = vadd.f32 %v3534_v4, %v11126_v19  ;;  %6568 = vmatpush.bf16.msra.mxu0 %v9511_v8  ;;  %v13285_v19 = vld [vmem:[#allocation14_spill] sm:$0xff] }
 0x860   : > { %4805 = vmatmul.bf16.gmra.mxu1 %v11554_v23  ;;  %5039 = vmatmul.bf16.gmra.mxu2 %v11554_v23 }
 0x861   : > { %5260 = vmatmul.bf16.gmra.mxu3 %v11554_v23  ;;  %3573 = vmatmul.bf16.gmra.mxu0 %v9724_v28  ;;  %v3851_v50 = vrot.slane %v3645_v0, 2 }
 0x863   : > { %v5000_v21 = vpop.f32.mrf.mxu2 }
 0x864   : > { %v5221_v55 = vpop.f32.mrf.mxu3 }
 0x865   : > { %v11564_v15 = vadd.f32 %v5221_v55, %v11517_v5  ;;  %v4768_v6 = vpop.f32.mrf.mxu1  ;;  %v9510_v55 = vld [vmem:[#allocation7 + $0x160] sm:$0xff] }
 0x866   : > { %v11566_v43 = vadd.f32 %v4992_v7, %v4768_v6  ;;  %v3536_v10 = vpop.f32.mrf.mxu0  ;;  %6569 = vmatpush.bf16.msra.mxu0 %v9510_v55 }
 0x867   : > { %v3646_v45 = vadd.f32 %v3536_v10, %v11129_v33 }
 0x869   : > { %v3853_v9 = vrot.slane %v3646_v45, 2  ;;  %v9725_v45 = vld [vmem:[%s10055_s11 + $0x148] sm:$0xff] }
 0x86b   : > { %v3854_v58 = vsel %vm3739_vm1, %v3851_v50, %v3853_v9  ;;  %v5002_v28 = vpop.f32.mrf.mxu2 }
 0x86c   : > { %v4019_v4 = vadd.f32 %v3854_v58, %v13285_v19  ;;  %v5223_v5 = vpop.f32.mrf.mxu3  ;;  %v13287_v58 = vld [vmem:[#allocation35_spill] sm:$0xff] }
 0x86d   : > { %v11572_v14 = vadd.f32 %v5223_v5, %v11527_v16  ;;  %v4771_v7 = vpop.f32.mrf.mxu1  ;;  %v9509_v16 = vld [vmem:[#allocation7 + $0x158] sm:$0xff] }
 0x86e   : > { %v11574_v6 = vadd.f32 %v4995_v48, %v4771_v7  ;;  %v3539_v33 = vpop.f32.mrf.mxu0  ;;  %v4097_v31 = vadd.f32 %v11497_v13, %v4019_v4  ;;  %6570 = vmatpush.bf16.msra.mxu0 %v9509_v16  ;;  %v9508_v7 = vld [vmem:[#allocation7 + $0x150] sm:$0xff] }
 0x86f   : > { %13286 = vst [vmem:[#allocation22_spill] sm:$0xff] %v11572_v14  ;;  %v3647_v0 = vadd.f32 %v3539_v33, %v11133_v29 }
 0x870   : > { %4810 = vmatmul.bf16.gmra.mxu1 %v11151_v38  ;;  %5044 = vmatmul.bf16.gmra.mxu2 %v11151_v38  ;;  %v4171_v8 = vmax.f32 %v4097_v31, 0.0 }
 0x871   : > { %v3855_v10 = vrot.slane %v3647_v0, 2  ;;  %5265 = vmatmul.bf16.gmra.mxu3 %v11151_v38  ;;  %3578 = vmatmul.bf16.gmra.mxu0 %v9725_v45 }
 0x872   : > { %6571 = vmatpush.bf16.msra.mxu0 %v9508_v7  ;;  %v4352_v45 = vpack.c.bf16 %v4171_v8, %v4171_v8 }
 0x873   : > { %v3856_v50 = vsel %vm3739_vm1, %v3853_v9, %v3855_v10  ;;  %v5005_v48 = vpop.f32.mrf.mxu2  ;;  %v9507_v9 = vld [vmem:[#allocation7 + $0x148] sm:$0xff] }
 0x874   : > { %v4020_v29 = vadd.f32 %v3856_v50, %v13287_v58  ;;  %v5226_v19 = vpop.f32.mrf.mxu3  ;;  %v4500_v16 = vunpack.c.l.b16 %v4352_v45 }
 0x875   : > { %v11585_v4 = vadd.f32 %v5226_v19, %v11535_v54  ;;  %v4773_v5 = vpop.f32.mrf.mxu1 }
 0x876   : > { %v4098_v55 = vadd.f32 %v11497_v13, %v4020_v29  ;;  %v11588_v33 = vadd.f32 %v4997_v60, %v4773_v5  ;;  %v3541_v0 = vpop.f32.mrf.mxu0  ;;  %6572 = vmatpush.bf16.msra.mxu0 %v9507_v9 }
 0x877   : > { %13288 = vst [vmem:[#allocation46_spill] sm:$0xff] %v11585_v4  ;;  %v9506_v4 = vld [vmem:[#allocation7 + $0x140] sm:$0xff] }
 0x878   : > { %v4172_v14 = vmax.f32 %v4098_v55, 0.0 }
 0x87a   : > { %v4353_v10 = vpack.c.bf16 %v4172_v14, %v4172_v14  ;;  %6573 = vmatpush.bf16.msra.mxu0 %v9506_v4  ;;  %v9726_v14 = vld [vmem:[%s10055_s11 + $0x150] sm:$0xff] }
 0x87b   : > { %v5007_v31 = vpop.f32.mrf.mxu2 }
 0x87c   : > { %v4501_v50 = vunpack.c.l.b16 %v4353_v10  ;;  %v5228_v58 = vpop.f32.mrf.mxu3 }
 0x87d   : > { %v11591_v54 = vadd.f32 %v5228_v58, %v11549_v63  ;;  %v4776_v19 = vpop.f32.mrf.mxu1  ;;  %v3278_v63 = vadd.f32 %v11142_v26, %v11135_v3 }
 0x87e   : > { %v11593_v29 = vpack.c.b16 %v4501_v50, %v4500_v16  ;;  %v11595_v60 = vadd.f32 %v5000_v21, %v4776_v19  ;;  %v3544_v5 = vpop.f32.mrf.mxu0  ;;  %v13290_v19 = vld [vmem:[#allocation15_spill] sm:$0xff] }
 0x87f   : > { %13289 = vst [vmem:[#allocation39_spill] sm:$0xff] %v11591_v54  ;;  %v3649_v55 = vadd.f32 %v3544_v5, %v11140_v41 }
 0x880   : > { %4815 = vmatmul.bf16.gmra.mxu1 %v11593_v29  ;;  %5049 = vmatmul.bf16.gmra.mxu2 %v11593_v29 }
 0x881   : > { %5270 = vmatmul.bf16.gmra.mxu3 %v11593_v29  ;;  %3582 = vmatmul.bf16.gmra.mxu0 %v9726_v14  ;;  %v3859_v10 = vrot.slane %v3649_v55, 2 }
 0x883   : > { %v5010_v8 = vpop.f32.mrf.mxu2 }
 0x884   : > { %v5231_v7 = vpop.f32.mrf.mxu3 }
 0x885   : > { %v11605_v21 = vadd.f32 %v5231_v7, %v11556_v62  ;;  %v4778_v0 = vpop.f32.mrf.mxu1 }
 0x886   : > { %v11607_v4 = vadd.f32 %v5002_v28, %v4778_v0  ;;  %v3546_v45 = vpop.f32.mrf.mxu0 }
 0x887   : > { %v3650_v9 = vadd.f32 %v3546_v45, %v3278_v63  ;;  %v9727_v63 = vld [vmem:[%s10055_s11 + $0x158] sm:$0xff] }
 0x889   : > { %v3861_v16 = vrot.slane %v3650_v9, 2  ;;  %v9474_v9 = vld [vmem:[#allocation7 + $0x40] sm:$0xff] }
 0x88a   : > { %5691 = vmatpush.bf16.msrb.mxu2 %v9474_v9  ;;  %v3288_v9 = vadd.f32 %v11159_v46, %v11149_v57 }
 0x88b   : > { %v3862_v50 = vsel %vm3739_vm1, %v3859_v10, %v3861_v16  ;;  %v5012_v58 = vpop.f32.mrf.mxu2 }
 0x88c   : > { %v4023_v14 = vadd.f32 %v3862_v50, %v13290_v19  ;;  %v5233_v54 = vpop.f32.mrf.mxu3 }
 0x88d   : > { %v11612_v3 = vadd.f32 %v5233_v54, %v11566_v43  ;;  %v4781_v41 = vpop.f32.mrf.mxu1 }
 0x88e   : > { %v11614_v26 = vadd.f32 %v5005_v48, %v4781_v41  ;;  %v3549_v62 = vpop.f32.mrf.mxu0  ;;  %v4101_v5 = vadd.f32 %v11497_v13, %v4023_v14  ;;  %v13291_v48 = vld [vmem:[#allocation36_spill] sm:$0xff] }
 0x88f   : > { %v3651_v28 = vadd.f32 %v3549_v62, %v11147_v22  ;;  %v9482_v22 = vld [vmem:[#allocation7 + $0x100] sm:$0xff] }
 0x890   : > { %4820 = vmatmul.bf16.gmra.mxu1 %v11151_v38  ;;  %5054 = vmatmul.bf16.gmra.mxu2 %v11151_v38  ;;  %v4175_v55 = vmax.f32 %v4101_v5, 0.0 }
 0x891   : > { %v3863_v7 = vrot.slane %v3651_v28, 2  ;;  %5275 = vmatmul.bf16.gmra.mxu3 %v11151_v38  ;;  %3585 = vmatmul.bf16.gmra.mxu0 %v9727_v63 }
 0x892   : > { %5468 = vmatpush.bf16.msrb.mxu1 %v9482_v22  ;;  %v4356_v62 = vpack.c.bf16 %v4175_v55, %v4175_v55 }
 0x893   : > { %v3864_v43 = vsel %vm3739_vm1, %v3861_v16, %v3863_v7  ;;  %v5015_v54 = vpop.f32.mrf.mxu2 }
 0x894   : > { %v4024_v0 = vadd.f32 %v3864_v43, %v13291_v48  ;;  %v5236_v45 = vpop.f32.mrf.mxu3  ;;  %v4504_v7 = vunpack.c.l.b16 %v4356_v62 }
 0x895   : > { %v11625_v10 = vadd.f32 %v5236_v45, %v11574_v6  ;;  %v4783_v50 = vpop.f32.mrf.mxu1 }
 0x896   : > { %v4102_v19 = vadd.f32 %v11497_v13, %v4024_v0  ;;  %v11628_v14 = vadd.f32 %v5007_v31, %v4783_v50  ;;  %v3551_v41 = vpop.f32.mrf.mxu0 }
 0x897   : > { %13292 = vst [vmem:[#allocation26_spill] sm:$0xff] %v11625_v10 }
 0x898   : > { %v4176_v16 = vmax.f32 %v4102_v19, 0.0 }
 0x89a   : > { %v4357_v28 = vpack.c.bf16 %v4176_v16, %v4176_v16 }
 0x89b   : > { %v5017_v5 = vpop.f32.mrf.mxu2 }
 0x89c   : > { %v4505_v63 = vunpack.c.l.b16 %v4357_v28  ;;  %v5238_v43 = vpop.f32.mrf.mxu3 }
 0x89d   : > { %v11631_v48 = vadd.f32 %v5238_v43, %v11588_v33  ;;  %v4786_v6 = vpop.f32.mrf.mxu1 }
 0x89e   : > { %v11633_v45 = vpack.c.b16 %v4505_v63, %v4504_v7  ;;  %v5011_v10 = vadd.f32 %v5010_v8, %v4786_v6  ;;  %v3554_v0 = vpop.f32.mrf.mxu0 }
 0x89f   : > { %v3653_v33 = vadd.f32 %v3554_v0, %v11157_v34 }
 0x8a0   : > { %4825 = vmatmul.bf16.gmra.mxu1 %v11633_v45  ;;  %5059 = vmatmul.bf16.gmra.mxu2 %v11633_v45 }
 0x8a1   : > { %5280 = vmatmul.bf16.gmra.mxu3 %v11633_v45  ;;  %6574 = vmatmul.bf16.vlgmr.msra.gmra.mxu0 %v11151_v38  ;;  %v3867_v62 = vrot.slane %v3653_v33, 2 }
 0x8a3   : > { %v5020_v31 = vpop.f32.mrf.mxu2 }
 0x8a4   : > { %v5241_v55 = vpop.f32.mrf.mxu3 }
 0x8a5   : > { %v11643_v22 = vadd.f32 %v5241_v55, %v11595_v60  ;;  %v4788_v8 = vpop.f32.mrf.mxu1 }
 0x8a6   : > { %v5013_v50 = vadd.f32 %v5012_v58, %v4788_v8  ;;  %v3556_v19 = vpop.f32.mrf.mxu0 }
 0x8a7   : > { %v3654_v41 = vadd.f32 %v3556_v19, %v3288_v9  ;;  %v13293_v9 = vld [vmem:[#allocation17_spill] sm:$0xff] }
 0x8a9   : > { %v3869_v16 = vrot.slane %v3654_v41, 2 }
 0x8ab   : > { %v3870_v28 = vsel %vm3739_vm1, %v3867_v62, %v3869_v16  ;;  %v5022_v7 = vpop.f32.mrf.mxu2 }
 0x8ac   : > { %v4027_v63 = vadd.f32 %v3870_v28, %v11095_v40  ;;  %v5243_v43 = vpop.f32.mrf.mxu3 }
 0x8ad   : > { %v11648_v6 = vadd.f32 %v5243_v43, %v11607_v4  ;;  %v4791_v57 = vpop.f32.mrf.mxu1 }
 0x8ae   : > { %v5016_v34 = vadd.f32 %v5015_v54, %v4791_v57  ;;  %v3559_v46 = vpop.f32.mrf.mxu0  ;;  %v4105_v58 = vadd.f32 %v11497_v13, %v4027_v63 }
 0x8af   : > { %v3655_v60 = vadd.f32 %v3559_v46, %v11163_v49 }
 0x8b0   : > { %4830 = vmatmul.bf16.gmra.mxu1 %v11151_v38  ;;  %5064 = vmatmul.bf16.gmra.mxu2 %v11151_v38  ;;  %v4179_v55 = vmax.f32 %v4105_v58, 0.0 }
 0x8b1   : > { %v3871_v0 = vrot.slane %v3655_v60, 2  ;;  %5285 = vmatmul.bf16.gmra.mxu3 %v11151_v38  ;;  %6577 = vmatmul.bf16.gmra.mxu0 %v11181_v39 }
 0x8b2   : > { %v4360_v28 = vpack.c.bf16 %v4179_v55, %v4179_v55 }
 0x8b3   : > { %v3872_v40 = vsel %vm3739_vm1, %v3869_v16, %v3871_v0  ;;  %v5025_v4 = vpop.f32.mrf.mxu2 }
 0x8b4   : > { %v4028_v54 = vadd.f32 %v3872_v40, %v13293_v9  ;;  %v5246_v33 = vpop.f32.mrf.mxu3  ;;  %v4508_v46 = vunpack.c.l.b16 %v4360_v28  ;;  %v9521_v28 = vld [vmem:[#allocation7 + $0x238] sm:$0xff] }
 0x8b5   : > { %v11659_v49 = vadd.f32 %v5246_v33, %v11614_v26  ;;  %v4793_v8 = vpop.f32.mrf.mxu1  ;;  %7031 = vmatpush.bf16.msra.mxu2 %v9521_v28 }
 0x8b6   : > { %v4106_v19 = vadd.f32 %v11497_v13, %v4028_v54  ;;  %v5018_v41 = vadd.f32 %v5017_v5, %v4793_v8  ;;  %v3561_v62 = vpop.f32.mrf.mxu0 }
 0x8b8   : > { %v4180_v63 = vmax.f32 %v4106_v19, 0.0 }
 0x8ba   : > { %v4361_v43 = vpack.c.bf16 %v4180_v63, %v4180_v63 }
 0x8bb   : > { %v5027_v57 = vpop.f32.mrf.mxu2 }
 0x8bc   : > { %v4509_v60 = vunpack.c.l.b16 %v4361_v43  ;;  %v5248_v16 = vpop.f32.mrf.mxu3 }
 0x8bd   : > { %v11663_v58 = vadd.f32 %v5248_v16, %v11628_v14  ;;  %v4796_v0 = vpop.f32.mrf.mxu1  ;;  %v9496_v16 = vld [vmem:[#allocation7 + $0x1f0] sm:$0xff] }
 0x8be   : > { %v11665_v40 = vpack.c.b16 %v4509_v60, %v4508_v46  ;;  %v5021_v26 = vadd.f32 %v5020_v31, %v4796_v0  ;;  %v3564_v9 = vpop.f32.mrf.mxu0  ;;  %v13294_v46 = vmov 0   ;;  %v9497_v60 = vld [vmem:[#allocation7 + $0x1f8] sm:$0xff] }
 0x8bf   : > { %5924 = vmatpush.bf16.msrb.mxu3 %v9497_v60 }
 0x8c0   : > { %4835 = vmatmul.bf16.gmra.mxu1 %v11665_v40  ;;  %5069 = vmatmul.bf16.gmra.mxu2 %v11665_v40 }
 0x8c1   : > { %5290 = vmatmul.bf16.gmra.mxu3 %v11665_v40  ;;  %6582 = vmatmul.bf16.gmra.mxu0 %v11151_v38 }
 0x8c3   : > { %v5030_v13 = vpop.f32.mrf.mxu2  ;;  %5925 = vmatpush.bf16.msrb.mxu3 %v9496_v16 }
 0x8c4   : > { %v5251_v5 = vpop.f32.mrf.mxu3 }
 0x8c5   : > { %v11671_v55 = vadd.f32 %v5251_v5, %v5011_v10  ;;  %v4798_v54 = vpop.f32.mrf.mxu1  ;;  %v9505_v10 = vld [vmem:[#allocation7 + $0xb8] sm:$0xff] }
 0x8c6   : > { %v5023_v14 = vadd.f32 %v5022_v7, %v4798_v54  ;;  %v3566_v33 = vpop.f32.mrf.mxu0  ;;  %6790 = vmatpush.bf16.msra.mxu1 %v9505_v10  ;;  %v9495_v54 = vld [vmem:[#allocation7 + $0x1e8] sm:$0xff] }
 0x8c7   : > { %5926 = vmatpush.bf16.msrb.mxu3 %v9495_v54 }
 0x8cb   : > { %v5032_v8 = vpop.f32.mrf.mxu2 }
 0x8cc   : > { %v5253_v19 = vpop.f32.mrf.mxu3 }
 0x8cd   : > { %v11673_v62 = vadd.f32 %v5253_v19, %v5013_v50  ;;  %v4801_v31 = vpop.f32.mrf.mxu1 }
 0x8ce   : > { %v5026_v63 = vadd.f32 %v5025_v4, %v4801_v31  ;;  %v3569_v43 = vpop.f32.mrf.mxu0  ;;  %v9494_v31 = vld [vmem:[#allocation7 + $0x1e0] sm:$0xff] }
 0x8cf   : > { %5927 = vmatpush.bf16.msrb.mxu3 %v9494_v31  ;;  %v9490_v31 = vld [vmem:[#allocation7 + $0x1c0] sm:$0xff] }
 0x8d0   : > { %4840 = vmatmul.bf16.gmra.mxu1 %v11151_v38  ;;  %5692 = vmatmul.bf16.vlgmr.msrb.gmra.mxu2 %v13294_v46 }
 0x8d1   : > { %5295 = vmatmul.bf16.gmra.mxu3 %v11151_v38  ;;  %6587 = vmatmul.bf16.gmra.mxu0 %v11198_v11 }
 0x8d3   : > { %v5035_v7 = vpop.f32.mrf.mxu2 }
 0x8d4   : > { %v5256_v50 = vpop.f32.mrf.mxu3 }
 0x8d5   : > { %v11679_v0 = vadd.f32 %v5256_v50, %v5016_v34  ;;  %v4803_v4 = vpop.f32.mrf.mxu1  ;;  %v9493_v34 = vld [vmem:[#allocation7 + $0x1d8] sm:$0xff]  ;;  %v9492_v50 = vld [vmem:[#allocation7 + $0x1d0] sm:$0xff] }
 0x8d6   : > { %v5028_v9 = vadd.f32 %v5027_v57, %v4803_v4  ;;  %v3571_v5 = vpop.f32.mrf.mxu0  ;;  %5928 = vmatpush.bf16.msrb.mxu3 %v9493_v34 }
 0x8d7   : > { %13295 = vst [vmem:[#allocation53_spill] sm:$0xff] %v11679_v0  ;;  %v9491_v5 = vld [vmem:[#allocation7 + $0x1c8] sm:$0xff] }
 0x8da   : > { %5929 = vmatpush.bf16.msrb.mxu3 %v9492_v50 }
 0x8db   : > { %v5037_v33 = vpop.f32.mrf.mxu2 }
 0x8dc   : > { %v5258_v19 = vpop.f32.mrf.mxu3 }
 0x8dd   : > { %v11681_v28 = vadd.f32 %v5258_v19, %v5018_v41  ;;  %v4806_v43 = vpop.f32.mrf.mxu1 }
 0x8de   : > { %v5031_v46 = vadd.f32 %v5030_v13, %v4806_v43  ;;  %v3574_v60 = vpop.f32.mrf.mxu0  ;;  %5930 = vmatpush.bf16.msrb.mxu3 %v9491_v5 }
 0x8df   : > { %13296 = vst [vmem:[#allocation42_spill] sm:$0xff] %v11681_v28 }
 0x8e0   : > { %4845 = vmatmul.bf16.gmra.mxu1 %v11151_v38  ;;  %5695 = vmatmul.bf16.gmra.mxu2 %v11151_v38 }
 0x8e1   : > { %5300 = vmatmul.bf16.gmra.mxu3 %v11151_v38  ;;  %6592 = vmatmul.bf16.gmra.mxu0 %v11151_v38 }
 0x8e2   : > { %5931 = vmatpush.bf16.msrb.mxu3 %v9490_v31 }
 0x8e3   : > { %v5040_v57 = vpop.f32.mrf.mxu2 }
 0x8e4   : > { %v5261_v10 = vpop.f32.mrf.mxu3 }
 0x8e5   : > { %v11687_v16 = vadd.f32 %v5261_v10, %v5021_v26  ;;  %v4808_v41 = vpop.f32.mrf.mxu1 }
 0x8e6   : > { %v5033_v4 = vadd.f32 %v5032_v8, %v4808_v41  ;;  %v3576_v13 = vpop.f32.mrf.mxu0 }
 0x8eb   : > { %v5042_v54 = vpop.f32.mrf.mxu2 }
 0x8ec   : > { %v5263_v19 = vpop.f32.mrf.mxu3 }
 0x8ed   : > { %v11689_v43 = vadd.f32 %v5263_v19, %v5023_v14  ;;  %v4811_v60 = vpop.f32.mrf.mxu1 }
 0x8ee   : > { %v5036_v28 = vadd.f32 %v5035_v7, %v4811_v60  ;;  %v3579_v0 = vpop.f32.mrf.mxu0 }
 0x8f0   : > { %5469 = vmatmul.bf16.vlgmr.msrb.gmra.mxu1 %v11151_v38  ;;  %5700 = vmatmul.bf16.gmra.mxu2 %v11151_v38 }
 0x8f1   : > { %5305 = vmatmul.bf16.gmra.mxu3 %v11151_v38  ;;  %6597 = vmatmul.bf16.gmra.mxu0 %v11217_v61 }
 0x8f3   : > { %v5045_v26 = vpop.f32.mrf.mxu2 }
 0x8f4   : > { %v5266_v8 = vpop.f32.mrf.mxu3 }
 0x8f5   : > { %v11695_v34 = vadd.f32 %v5266_v8, %v5026_v63  ;;  %v4813_v10 = vpop.f32.mrf.mxu1 }
 0x8f6   : > { %v5038_v50 = vadd.f32 %v5037_v33, %v4813_v10  ;;  %v3581_v14 = vpop.f32.mrf.mxu0 }
 0x8fb   : > { %v5047_v41 = vpop.f32.mrf.mxu2 }
 0x8fc   : > { %v5268_v13 = vpop.f32.mrf.mxu3 }
 0x8fd   : > { %v11697_v7 = vadd.f32 %v5268_v13, %v5028_v9  ;;  %v4816_v0 = vpop.f32.mrf.mxu1 }
 0x8fe   : > { %v5041_v5 = vadd.f32 %v5040_v57, %v4816_v0  ;;  %v3583_v19 = vpop.f32.mrf.mxu0 }
 0x8ff   : > { %13297 = vst [vmem:[#allocation54_spill] sm:$0xff] %v11697_v7 }
 0x900   : > { %5472 = vmatmul.bf16.gmra.mxu1 %v11181_v39  ;;  %5705 = vmatmul.bf16.gmra.mxu2 %v11181_v39 }
 0x901   : > { %5310 = vmatmul.bf16.gmra.mxu3 %v11151_v38  ;;  %6602 = vmatmul.bf16.gmra.mxu0 %v11151_v38 }
 0x903   : > { %v5050_v63 = vpop.f32.mrf.mxu2 }
 0x904   : > { %v5271_v31 = vpop.f32.mrf.mxu3 }
 0x905   : > { %v11703_v60 = vadd.f32 %v5271_v31, %v5031_v46  ;;  %v4818_v33 = vpop.f32.mrf.mxu1  ;;  %v9520_v46 = vld [vmem:[#allocation7 + $0x230] sm:$0xff] }
 0x906   : > { %v5043_v8 = vadd.f32 %v5042_v54, %v4818_v33  ;;  %v3584_v10 = vpop.f32.mrf.mxu0  ;;  %7032 = vmatpush.bf16.msra.mxu2 %v9520_v46 }
 0x907   : > { %13298 = vst [vmem:[#allocation67_spill] sm:$0xff] %v11703_v60 }
 0x90b   : > { %v5052_v9 = vpop.f32.mrf.mxu2 }
 0x90c   : > { %v5273_v14 = vpop.f32.mrf.mxu3 }
 0x90d   : > { %v11705_v13 = vadd.f32 %v5273_v14, %v5033_v4  ;;  %v4821_v57 = vpop.f32.mrf.mxu1  ;;  %v9504_v4 = vld [vmem:[#allocation7 + $0xb0] sm:$0xff] }
 0x90e   : > { %v5046_v0 = vadd.f32 %v5045_v26, %v4821_v57  ;;  %v3586_v19 = vpop.f32.mrf.mxu0  ;;  %6791 = vmatpush.bf16.msra.mxu1 %v9504_v4 }
 0x90f   : > { %13299 = vst [vmem:[#allocation28_spill] sm:$0xff] %v11705_v13 }
 0x910   : > { %5477 = vmatmul.bf16.gmra.mxu1 %v11151_v38  ;;  %5710 = vmatmul.bf16.gmra.mxu2 %v11151_v38 }
 0x911   : > { %5932 = vmatmul.bf16.vlgmr.msrb.gmra.mxu3 %v11151_v38  ;;  %6607 = vmatmul.bf16.gmra.mxu0 %v11238_v59 }
 0x913   : > { %v5055_v31 = vpop.f32.mrf.mxu2 }
 0x914   : > { %v5276_v54 = vpop.f32.mrf.mxu3 }
 0x915   : > { %v11711_v33 = vadd.f32 %v5276_v54, %v5036_v28  ;;  %v4823_v10 = vpop.f32.mrf.mxu1 }
 0x916   : > { %v5048_v14 = vadd.f32 %v5047_v41, %v4823_v10  ;;  %v3587_v39 = vpop.f32.mrf.mxu0 }
 0x917   : > { %13300 = vst [vmem:[#allocation56_spill] sm:$0xff] %v11711_v33 }
 0x91b   : > { %v5057_v26 = vpop.f32.mrf.mxu2 }
 0x91c   : > { %v5278_v57 = vpop.f32.mrf.mxu3 }
 0x91d   : > { %v11713_v19 = vadd.f32 %v5278_v57, %v5038_v50  ;;  %v4826_v13 = vpop.f32.mrf.mxu1 }
 0x91e   : > { %v5051_v60 = vadd.f32 %v5050_v63, %v4826_v13  ;;  %v6575_v7 = vpop.f32.mrf.mxu0 }
 0x91f   : > { %13301 = vst [vmem:[#allocation68_spill] sm:$0xff] %v11713_v19 }
 0x920   : > { %5482 = vmatmul.bf16.gmra.mxu1 %v11198_v11  ;;  %5715 = vmatmul.bf16.gmra.mxu2 %v11198_v11 }
 0x921   : > { %5935 = vmatmul.bf16.gmra.mxu3 %v11198_v11  ;;  %6612 = vmatmul.bf16.gmra.mxu0 %v11151_v38 }
 0x923   : > { %v5060_v28 = vpop.f32.mrf.mxu2 }
 0x924   : > { %v5281_v46 = vpop.f32.mrf.mxu3 }
 0x925   : > { %v11719_v41 = vadd.f32 %v5281_v46, %v5041_v5  ;;  %v4828_v39 = vpop.f32.mrf.mxu1 }
 0x926   : > { %v5053_v54 = vadd.f32 %v5052_v9, %v4828_v39  ;;  %v6576_v10 = vpop.f32.mrf.mxu0 }
 0x927   : > { %13302 = vst [vmem:[#allocation57_spill] sm:$0xff] %v11719_v41 }
 0x92b   : > { %v5062_v50 = vpop.f32.mrf.mxu2 }
 0x92c   : > { %v5283_v4 = vpop.f32.mrf.mxu3 }
 0x92d   : > { %v11721_v57 = vadd.f32 %v5283_v4, %v5043_v8  ;;  %v4831_v7 = vpop.f32.mrf.mxu1 }
 0x92e   : > { %v5056_v63 = vadd.f32 %v5055_v31, %v4831_v7  ;;  %v11723_v13 = vpop.f32.mrf.mxu0 }
 0x92f   : > { %13303 = vst [vmem:[#allocation69_spill] sm:$0xff] %v11721_v57 }
 0x930   : > { %13304 = vst [vmem:[#allocation30_spill] sm:$0xff] %v11723_v13  ;;  %5487 = vmatmul.bf16.gmra.mxu1 %v11151_v38  ;;  %5720 = vmatmul.bf16.gmra.mxu2 %v11151_v38 }
 0x931   : > { %5940 = vmatmul.bf16.gmra.mxu3 %v11151_v38  ;;  %6617 = vmatmul.bf16.gmra.mxu0 %v11261_v51 }
 0x933   : > { %v5065_v5 = vpop.f32.mrf.mxu2 }
 0x934   : > { %v5286_v46 = vpop.f32.mrf.mxu3 }
 0x935   : > { %v11729_v9 = vadd.f32 %v5286_v46, %v5046_v0  ;;  %v4833_v39 = vpop.f32.mrf.mxu1 }
 0x936   : > { %v5058_v10 = vadd.f32 %v5057_v26, %v4833_v39  ;;  %v11731_v8 = vpop.f32.mrf.mxu0 }
 0x937   : > { %13305 = vst [vmem:[#allocation59_spill] sm:$0xff] %v11729_v9 }
 0x938   : > { %13306 = vst [vmem:[#allocation49_spill] sm:$0xff] %v11731_v8 }
 0x93b   : > { %v5067_v4 = vpop.f32.mrf.mxu2 }
 0x93c   : > { %v5288_v31 = vpop.f32.mrf.mxu3 }
 0x93d   : > { %v11733_v7 = vadd.f32 %v5288_v31, %v5048_v14  ;;  %v4836_v13 = vpop.f32.mrf.mxu1 }
 0x93e   : > { %v5061_v57 = vadd.f32 %v5060_v28, %v4836_v13  ;;  %v11735_v41 = vpop.f32.mrf.mxu0 }
 0x93f   : > { %13307 = vst [vmem:[#allocation60_spill] sm:$0xff] %v11733_v7 }
 0x940   : > { %13308 = vst [vmem:[#allocation50_spill] sm:$0xff] %v11735_v41  ;;  %5492 = vmatmul.bf16.gmra.mxu1 %v11217_v61  ;;  %5725 = vmatmul.bf16.gmra.mxu2 %v11217_v61 }
 0x941   : > { %5945 = vmatmul.bf16.gmra.mxu3 %v11217_v61  ;;  %6622 = vmatmul.bf16.gmra.mxu0 %v11151_v38 }
 0x943   : > { %v5070_v0 = vpop.f32.mrf.mxu2 }
 0x944   : > { %v5291_v26 = vpop.f32.mrf.mxu3 }
 0x945   : > { %v11741_v46 = vadd.f32 %v5291_v26, %v5051_v60  ;;  %v4838_v39 = vpop.f32.mrf.mxu1 }
 0x946   : > { %v5063_v8 = vadd.f32 %v5062_v50, %v4838_v39  ;;  %v11743_v14 = vpop.f32.mrf.mxu0  ;;  %v9519_v39 = vld [vmem:[#allocation7 + $0x228] sm:$0xff] }
 0x947   : > { %13309 = vst [vmem:[#allocation61_spill] sm:$0xff] %v11741_v46  ;;  %7033 = vmatpush.bf16.msra.mxu2 %v9519_v39 }
 0x948   : > { %13310 = vst [vmem:[#allocation25_spill] sm:$0xff] %v11743_v14 }
 0x94b   : > { %v5071_v31 = vpop.f32.mrf.mxu2 }
 0x94c   : > { %v5293_v28 = vpop.f32.mrf.mxu3 }
 0x94d   : > { %v11745_v13 = vadd.f32 %v5293_v28, %v5053_v54  ;;  %v4841_v41 = vpop.f32.mrf.mxu1 }
 0x94e   : > { %v5066_v7 = vadd.f32 %v5065_v5, %v4841_v41  ;;  %v11747_v9 = vpop.f32.mrf.mxu0  ;;  %v9503_v41 = vld [vmem:[#allocation7 + $0xa8] sm:$0xff] }
 0x94f   : > { %13311 = vst [vmem:[#allocation33_spill] sm:$0xff] %v11745_v13  ;;  %6792 = vmatpush.bf16.msra.mxu1 %v9503_v41 }
 0x950   : > { %13312 = vst [vmem:[#allocation51_spill] sm:$0xff] %v11747_v9  ;;  %5497 = vmatmul.bf16.gmra.mxu1 %v11151_v38  ;;  %5730 = vmatmul.bf16.gmra.mxu2 %v11151_v38 }
 0x951   : > { %5950 = vmatmul.bf16.gmra.mxu3 %v11151_v38  ;;  %6627 = vmatmul.bf16.gmra.mxu0 %v11286_v36 }
 0x953   : > { %v5693_v60 = vpop.f32.mrf.mxu2 }
 0x954   : > { %v5296_v50 = vpop.f32.mrf.mxu3 }
 0x955   : > { %v11753_v0 = vadd.f32 %v5296_v50, %v5056_v63  ;;  %v4843_v26 = vpop.f32.mrf.mxu1 }
 0x956   : > { %v5068_v54 = vadd.f32 %v5067_v4, %v4843_v26  ;;  %v11755_v31 = vpop.f32.mrf.mxu0 }
 0x957   : > { %13313 = vst [vmem:[#allocation52_spill] sm:$0xff] %v11753_v0 }
 0x958   : > { %13314 = vst [vmem:[#allocation62_spill] sm:$0xff] %v11755_v31 }
 0x95b   : > { %v5694_v5 = vpop.f32.mrf.mxu2 }
 0x95c   : > { %v5298_v28 = vpop.f32.mrf.mxu3 }
 0x95d   : > { %v11757_v9 = vadd.f32 %v5298_v28, %v5058_v10  ;;  %v4846_v14 = vpop.f32.mrf.mxu1 }
 0x95e   : > { %v11759_v13 = vpop.f32.mrf.mxu0 }
 0x95f   : > { %13315 = vst [vmem:[#allocation27_spill] sm:$0xff] %v11757_v9 }
 0x960   : > { %13316 = vst [vmem:[#allocation55_spill] sm:$0xff] %v11759_v13  ;;  %5502 = vmatmul.bf16.gmra.mxu1 %v11238_v59  ;;  %5735 = vmatmul.bf16.gmra.mxu2 %v11238_v59 }
 0x961   : > { %5955 = vmatmul.bf16.gmra.mxu3 %v11238_v59  ;;  %6632 = vmatmul.bf16.gmra.mxu0 %v11151_v38 }
 0x963   : > { %v5696_v63 = vpop.f32.mrf.mxu2 }
 0x964   : > { %v5301_v4 = vpop.f32.mrf.mxu3 }
 0x965   : > { %v11765_v60 = vadd.f32 %v5301_v4, %v5061_v57  ;;  %v4847_v50 = vpop.f32.mrf.mxu1 }
 0x966   : > { %v11767_v26 = vpop.f32.mrf.mxu0 }
 0x967   : > { %13317 = vst [vmem:[#allocation29_spill] sm:$0xff] %v11765_v60 }
 0x968   : > { %13318 = vst [vmem:[#allocation58_spill] sm:$0xff] %v11767_v26 }
 0x96b   : > { %v5698_v10 = vpop.f32.mrf.mxu2 }
 0x96c   : > { %v5303_v39 = vpop.f32.mrf.mxu3 }
 0x96d   : > { %v11769_v14 = vadd.f32 %v5303_v39, %v5063_v8  ;;  %v5470_v41 = vpop.f32.mrf.mxu1 }
 0x96e   : > { %v11771_v5 = vpop.f32.mrf.mxu0 }
 0x96f   : > { %13319 = vst [vmem:[#allocation31_spill] sm:$0xff] %v11769_v14 }
 0x970   : > { %13320 = vst [vmem:[#allocation32_spill] sm:$0xff] %v11771_v5  ;;  %5507 = vmatmul.bf16.gmra.mxu1 %v11151_v38  ;;  %5740 = vmatmul.bf16.gmra.mxu2 %v11151_v38 }
 0x971   : > { %5960 = vmatmul.bf16.gmra.mxu3 %v11151_v38  ;;  %6637 = vmatmul.bf16.gmra.mxu0 %v11322_v27 }
 0x973   : > { %v5701_v57 = vpop.f32.mrf.mxu2 }
 0x974   : > { %v5306_v28 = vpop.f32.mrf.mxu3 }
 0x975   : > { %v11777_v4 = vadd.f32 %v5306_v28, %v5066_v7  ;;  %v5471_v50 = vpop.f32.mrf.mxu1 }
 0x976   : > { %v11779_v26 = vpop.f32.mrf.mxu0 }
 0x977   : > { %13321 = vst [vmem:[#allocation12_spill] sm:$0xff] %v11777_v4 }
 0x978   : > { %13322 = vst [vmem:[#allocation14_spill] sm:$0xff] %v11779_v26 }
 0x97b   : > { %v5703_v8 = vpop.f32.mrf.mxu2 }
 0x97c   : > { %v5308_v39 = vpop.f32.mrf.mxu3 }
 0x97d   : > { %v11781_v41 = vadd.f32 %v5308_v39, %v5068_v54  ;;  %v5473_v5 = vpop.f32.mrf.mxu1 }
 0x97e   : > { %v5697_v13 = vadd.f32 %v5696_v63, %v5473_v5  ;;  %v11783_v31 = vpop.f32.mrf.mxu0 }
 0x97f   : > { %13323 = vst [vmem:[#allocation35_spill] sm:$0xff] %v11781_v41 }
 0x980   : > { %13324 = vst [vmem:[#allocation15_spill] sm:$0xff] %v11783_v31  ;;  %5512 = vmatmul.bf16.gmra.mxu1 %v11261_v51  ;;  %5745 = vmatmul.bf16.gmra.mxu2 %v11261_v51 }
 0x981   : > { %5965 = vmatmul.bf16.gmra.mxu3 %v11261_v51  ;;  %6642 = vmatmul.bf16.gmra.mxu0 %v11151_v38 }
 0x983   : > { %v5706_v7 = vpop.f32.mrf.mxu2 }
 0x984   : > { %v5311_v28 = vpop.f32.mrf.mxu3 }
 0x985   : > { %v5475_v50 = vpop.f32.mrf.mxu1 }
 0x986   : > { %v5699_v26 = vadd.f32 %v5698_v10, %v5475_v50  ;;  %v11789_v4 = vpop.f32.mrf.mxu0 }
 0x987   : > { %13325 = vst [vmem:[#allocation36_spill] sm:$0xff] %v11789_v4  ;;  %v9518_v4 = vld [vmem:[#allocation7 + $0x220] sm:$0xff] }
 0x988   : > { %7034 = vmatpush.bf16.msra.mxu2 %v9518_v4 }
 0x98b   : > { %v5708_v54 = vpop.f32.mrf.mxu2 }
 0x98c   : > { %v5312_v39 = vpop.f32.mrf.mxu3 }
 0x98d   : > { %v5478_v41 = vpop.f32.mrf.mxu1 }
 0x98e   : > { %v5702_v63 = vadd.f32 %v5701_v57, %v5478_v41  ;;  %v11791_v5 = vpop.f32.mrf.mxu0 }
 0x98f   : > { %13326 = vst [vmem:[#allocation17_spill] sm:$0xff] %v11791_v5  ;;  %v9502_v5 = vld [vmem:[#allocation7 + $0xa0] sm:$0xff] }
 0x990   : > { %5517 = vmatmul.bf16.gmra.mxu1 %v11151_v38  ;;  %5750 = vmatmul.bf16.gmra.mxu2 %v11151_v38 }
 0x991   : > { %5970 = vmatmul.bf16.gmra.mxu3 %v11151_v38  ;;  %6647 = vmatmul.bf16.gmra.mxu0 %v11360_v56 }
 0x992   : > { %6793 = vmatpush.bf16.msra.mxu1 %v9502_v5 }
 0x993   : > { %v5711_v31 = vpop.f32.mrf.mxu2 }
 0x994   : > { %v5933_v28 = vpop.f32.mrf.mxu3 }
 0x995   : > { %v5480_v14 = vpop.f32.mrf.mxu1 }
 0x996   : > { %v5704_v10 = vadd.f32 %v5703_v8, %v5480_v14  ;;  %v11797_v50 = vpop.f32.mrf.mxu0 }
 0x997   : > { %13327 = vst [vmem:[#allocation70_spill] sm:$0xff] %v11797_v50 }
 0x99b   : > { %v5713_v39 = vpop.f32.mrf.mxu2 }
 0x99c   : > { %v5934_v60 = vpop.f32.mrf.mxu3 }
 0x99d   : > { %v5483_v57 = vpop.f32.mrf.mxu1 }
 0x99e   : > { %v5707_v41 = vadd.f32 %v5706_v7, %v5483_v57  ;;  %v11803_v28 = vpop.f32.mrf.mxu0 }
 0x99f   : > { %13328 = vst [vmem:[#allocation71_spill] sm:$0xff] %v11803_v28 }
 0x9a0   : > { %5522 = vmatmul.bf16.gmra.mxu1 %v11286_v36  ;;  %5755 = vmatmul.bf16.gmra.mxu2 %v11286_v36 }
 0x9a1   : > { %5975 = vmatmul.bf16.gmra.mxu3 %v11286_v36  ;;  %6652 = vmatmul.bf16.gmra.mxu0 %v11151_v38 }
 0x9a3   : > { %v5716_v14 = vpop.f32.mrf.mxu2 }
 0x9a4   : > { %v5936_v8 = vpop.f32.mrf.mxu3 }
 0x9a5   : > { %v11805_v50 = vadd.f32 %v5936_v8, %v5697_v13  ;;  %v5485_v60 = vpop.f32.mrf.mxu1 }
 0x9a6   : > { %v5709_v4 = vadd.f32 %v5708_v54, %v5485_v60  ;;  %v11807_v57 = vpop.f32.mrf.mxu0 }
 0x9a7   : > { %13329 = vst [vmem:[#allocation72_spill] sm:$0xff] %v11805_v50  ;;  %v13056_v36 = vrot.slane %v11805_v50, 1 }
 0x9a8   : > { %13330 = vst [vmem:[#allocation73_spill] sm:$0xff] %v11807_v57 }
 0x9ab   : > { %v5718_v9 = vpop.f32.mrf.mxu2 }
 0x9ac   : > { %v5938_v7 = vpop.f32.mrf.mxu3 }
 0x9ad   : > { %v6100_v0 = vadd.f32 %v5938_v7, %v5699_v26  ;;  %v5488_v46 = vpop.f32.mrf.mxu1 }
 0x9ae   : > { %v5712_v51 = vadd.f32 %v5711_v31, %v5488_v46  ;;  %v11820_v8 = vpop.f32.mrf.mxu0 }
 0x9af   : > { %v6228_v19 = vrot.slane %v6100_v0, 1  ;;  %13331 = vst [vmem:[#allocation74_spill] sm:$0xff] %v11820_v8 }
 0x9b0   : > { %5527 = vmatmul.bf16.gmra.mxu1 %v11151_v38  ;;  %5760 = vmatmul.bf16.gmra.mxu2 %v11151_v38 }
 0x9b1   : > { %v6229_v13 = vsel %vm2484_vm0, %v13056_v36, %v6228_v19  ;;  %5980 = vmatmul.bf16.gmra.mxu3 %v11151_v38  ;;  %6657 = vmatmul.bf16.gmra.mxu0 %v11395_v53 }
 0x9b2   : > { %v11818_v54 = vadd.f32 %v6229_v13, %v11295_v47 }
 0x9b3   : > { %v5721_v26 = vpop.f32.mrf.mxu2 }
 0x9b4   : > { %v5941_v46 = vpop.f32.mrf.mxu3 }
 0x9b5   : > { %v6101_v31 = vadd.f32 %v5941_v46, %v5702_v63  ;;  %v5490_v5 = vpop.f32.mrf.mxu1 }
 0x9b6   : > { %v5714_v0 = vadd.f32 %v5713_v39, %v5490_v5  ;;  %v11828_v63 = vpop.f32.mrf.mxu0 }
 0x9b7   : > { %v6230_v60 = vrot.slane %v6101_v31, 1  ;;  %13332 = vst [vmem:[#allocation75_spill] sm:$0xff] %v11828_v63 }
 0x9b9   : > { %v6231_v7 = vsel %vm2484_vm0, %v6228_v19, %v6230_v60 }
 0x9ba   : > { %v11824_v57 = vadd.f32 %v6231_v7, %v11303_v24 }
 0x9bb   : > { %v5723_v36 = vpop.f32.mrf.mxu2 }
 0x9bc   : > { %v5943_v28 = vpop.f32.mrf.mxu3 }
 0x9bd   : > { %v6102_v50 = vadd.f32 %v5943_v28, %v5704_v10  ;;  %v5493_v33 = vpop.f32.mrf.mxu1 }
 0x9be   : > { %v5717_v59 = vadd.f32 %v5716_v14, %v5493_v33  ;;  %v11840_v31 = vpop.f32.mrf.mxu0 }
 0x9bf   : > { %v6232_v47 = vrot.slane %v6102_v50, 1  ;;  %13335 = vst [vmem:[#allocation78_spill] sm:$0xff] %v11840_v31 }
 0x9c0   : > { %5532 = vmatmul.bf16.gmra.mxu1 %v11322_v27  ;;  %5765 = vmatmul.bf16.gmra.mxu2 %v11322_v27 }
 0x9c1   : > { %v6233_v39 = vsel %vm2484_vm0, %v6230_v60, %v6232_v47  ;;  %5985 = vmatmul.bf16.gmra.mxu3 %v11322_v27  ;;  %6662 = vmatmul.bf16.gmra.mxu0 %v11151_v38 }
 0x9c2   : > { %v11834_v24 = vadd.f32 %v6233_v39, %v11316_v18 }
 0x9c3   : > { %v5726_v19 = vpop.f32.mrf.mxu2 }
 0x9c4   : > { %13333 = vst [vmem:[#allocation76_spill] sm:$0xff] %v11834_v24  ;;  %v5946_v10 = vpop.f32.mrf.mxu3 }
 0x9c5   : > { %v6103_v28 = vadd.f32 %v5946_v10, %v5707_v41  ;;  %v5495_v33 = vpop.f32.mrf.mxu1 }
 0x9c6   : > { %v5719_v50 = vadd.f32 %v5718_v9, %v5495_v33  ;;  %v11850_v10 = vpop.f32.mrf.mxu0 }
 0x9c7   : > { %v6234_v14 = vrot.slane %v6103_v28, 1  ;;  %13338 = vst [vmem:[#allocation79_spill] sm:$0xff] %v11850_v10 }
 0x9c9   : > { %v6235_v13 = vsel %vm2484_vm0, %v6232_v47, %v6234_v14 }
 0x9ca   : > { %v11838_v46 = vadd.f32 %v6235_v13, %v11320_v37  ;;  %v13336_v37 = vld [vmem:[#allocation41_spill] sm:$0xff]  ;;  %v13339_v13 = vld [vmem:[#allocation16_spill] sm:$0xff] }
 0x9cb   : > { %v5728_v5 = vpop.f32.mrf.mxu2 }
 0x9cc   : > { %13334 = vst [vmem:[#allocation77_spill] sm:$0xff] %v11838_v46  ;;  %v5948_v60 = vpop.f32.mrf.mxu3 }
 0x9cd   : > { %v6104_v7 = vadd.f32 %v5948_v60, %v5709_v4  ;;  %v5498_v63 = vpop.f32.mrf.mxu1 }
 0x9ce   : > { %v5722_v8 = vadd.f32 %v5721_v26, %v5498_v63 }
 0x9cf   : > { %v6236_v18 = vrot.slane %v6104_v7, 1 }
 0x9d0   : > { %5537 = vmatmul.bf16.gmra.mxu1 %v11151_v38  ;;  %5770 = vmatmul.bf16.gmra.mxu2 %v11151_v38 }
 0x9d1   : > { %v6237_v9 = vsel %vm2484_vm0, %v6234_v14, %v6236_v18  ;;  %5990 = vmatmul.bf16.gmra.mxu3 %v11151_v38  ;;  %6667 = vmatmul.bf16.gmra.mxu0 %v11432_v12 }
 0x9d2   : > { %v11848_v41 = vadd.f32 %v6237_v9, %v13336_v37  ;;  %v11856_v9 = vpop.f32.mrf.mxu0 }
 0x9d3   : > { %v5731_v47 = vpop.f32.mrf.mxu2  ;;  %13341 = vst [vmem:[#allocation80_spill] sm:$0xff] %v11856_v9 }
 0x9d4   : > { %13337 = vst [vmem:[#allocation41_spill] sm:$0xff] %v11848_v41  ;;  %v5951_v39 = vpop.f32.mrf.mxu3 }
 0x9d5   : > { %v6105_v4 = vadd.f32 %v5951_v39, %v5712_v51  ;;  %v5500_v26 = vpop.f32.mrf.mxu1  ;;  %v9517_v39 = vld [vmem:[#allocation7 + $0x218] sm:$0xff] }
 0x9d6   : > { %v5724_v63 = vadd.f32 %v5723_v36, %v5500_v26  ;;  %v13342_v36 = vld [vmem:[#allocation38_spill] sm:$0xff]  ;;  %7035 = vmatpush.bf16.msra.mxu2 %v9517_v39 }
 0x9d7   : > { %v6238_v28 = vrot.slane %v6105_v4, 1 }
 0x9d9   : > { %v6239_v33 = vsel %vm2484_vm0, %v6236_v18, %v6238_v28 }
 0x9da   : > { %v11854_v60 = vadd.f32 %v6239_v33, %v13339_v13  ;;  %v11866_v13 = vpop.f32.mrf.mxu0 }
 0x9db   : > { %v5733_v14 = vpop.f32.mrf.mxu2  ;;  %13344 = vst [vmem:[#allocation81_spill] sm:$0xff] %v11866_v13 }
 0x9dc   : > { %13340 = vst [vmem:[#allocation16_spill] sm:$0xff] %v11854_v60  ;;  %v5953_v7 = vpop.f32.mrf.mxu3 }
 0x9dd   : > { %v6106_v31 = vadd.f32 %v5953_v7, %v5714_v0  ;;  %v5503_v46 = vpop.f32.mrf.mxu1  ;;  %v9501_v0 = vld [vmem:[#allocation7 + $0x98] sm:$0xff]  ;;  %v13345_v7 = vld [vmem:[#allocation64_spill] sm:$0xff] }
 0x9de   : > { %v5727_v24 = vadd.f32 %v5726_v19, %v5503_v46  ;;  %6794 = vmatpush.bf16.msra.mxu1 %v9501_v0 }
 0x9df   : > { %v6240_v37 = vrot.slane %v6106_v31, 1 }
 0x9e0   : > { %5542 = vmatmul.bf16.gmra.mxu1 %v11360_v56  ;;  %5775 = vmatmul.bf16.gmra.mxu2 %v11360_v56 }
 0x9e1   : > { %v6241_v51 = vsel %vm2484_vm0, %v6238_v28, %v6240_v37  ;;  %5995 = vmatmul.bf16.gmra.mxu3 %v11360_v56  ;;  %6672 = vmatmul.bf16.gmra.mxu0 %v11151_v38 }
 0x9e2   : > { %v11864_v18 = vadd.f32 %v6241_v51, %v13342_v36  ;;  %v11880_v39 = vpop.f32.mrf.mxu0 }
 0x9e3   : > { %v5736_v4 = vpop.f32.mrf.mxu2 }
 0x9e4   : > { %13343 = vst [vmem:[#allocation38_spill] sm:$0xff] %v11864_v18  ;;  %v5956_v19 = vpop.f32.mrf.mxu3 }
 0x9e5   : > { %v6107_v46 = vadd.f32 %v5956_v19, %v5717_v59  ;;  %v5505_v31 = vpop.f32.mrf.mxu1 }
 0x9e6   : > { %v5729_v26 = vadd.f32 %v5728_v5, %v5505_v31  ;;  %v13346_v5 = vld [vmem:[#allocation21_spill] sm:$0xff] }
 0x9e7   : > { %v6242_v33 = vrot.slane %v6107_v46, 1  ;;  %13348 = vst [vmem:[#allocation21_spill] sm:$0xff] %v11880_v39 }
 0x9e9   : > { %v6243_v28 = vsel %vm2484_vm0, %v6240_v37, %v6242_v33 }
 0x9ea   : > { %v11870_v9 = vadd.f32 %v6243_v28, %v13345_v7  ;;  %v13349_v28 = vld [vmem:[#allocation44_spill] sm:$0xff] }
 0x9eb   : > { %v5738_v10 = vpop.f32.mrf.mxu2 }
 0x9ec   : > { %v5958_v51 = vpop.f32.mrf.mxu3 }
 0x9ed   : > { %v6108_v36 = vadd.f32 %v5958_v51, %v5719_v50  ;;  %v5508_v18 = vpop.f32.mrf.mxu1 }
 0x9ee   : > { %v5732_v60 = vadd.f32 %v5731_v47, %v5508_v18 }
 0x9ef   : > { %v6244_v41 = vrot.slane %v6108_v36, 1  ;;  %v11886_v36 = vpop.f32.mrf.mxu0 }
 0x9f0   : > { %5547 = vmatmul.bf16.gmra.mxu1 %v11151_v38  ;;  %5780 = vmatmul.bf16.gmra.mxu2 %v11151_v38  ;;  %13351 = vst [vmem:[#allocation82_spill] sm:$0xff] %v11886_v36 }
 0x9f1   : > { %v6245_v59 = vsel %vm2484_vm0, %v6242_v33, %v6244_v41  ;;  %6000 = vmatmul.bf16.gmra.mxu3 %v11151_v38  ;;  %6677 = vmatmul.bf16.gmra.mxu0 %v11471_v44 }
 0x9f2   : > { %v11878_v37 = vadd.f32 %v6245_v59, %v13346_v5 }
 0x9f3   : > { %v5741_v0 = vpop.f32.mrf.mxu2 }
 0x9f4   : > { %13347 = vst [vmem:[#allocation64_spill] sm:$0xff] %v11878_v37  ;;  %v5961_v50 = vpop.f32.mrf.mxu3 }
 0x9f5   : > { %v6109_v19 = vadd.f32 %v5961_v50, %v5722_v8  ;;  %v5510_v47 = vpop.f32.mrf.mxu1 }
 0x9f6   : > { %v5734_v18 = vadd.f32 %v5733_v14, %v5510_v47 }
 0x9f7   : > { %v6246_v46 = vrot.slane %v6109_v19, 1 }
 0x9f9   : > { %v6247_v31 = vsel %vm2484_vm0, %v6244_v41, %v6246_v46 }
 0x9fa   : > { %v11884_v7 = vadd.f32 %v6247_v31, %v13349_v28  ;;  %v13354_v28 = vld [vmem:[#allocation23_spill] sm:$0xff] }
 0x9fb   : > { %v5743_v33 = vpop.f32.mrf.mxu2 }
 0x9fc   : > { %13350 = vst [vmem:[#allocation44_spill] sm:$0xff] %v11884_v7  ;;  %v5963_v51 = vpop.f32.mrf.mxu3 }
 0x9fd   : > { %v6110_v13 = vadd.f32 %v5963_v51, %v5724_v63  ;;  %v5513_v59 = vpop.f32.mrf.mxu1 }
 0x9fe   : > { %v5737_v5 = vadd.f32 %v5736_v4, %v5513_v59  ;;  %v11896_v4 = vpop.f32.mrf.mxu0 }
 0x9ff   : > { %v6248_v37 = vrot.slane %v6110_v13, 1  ;;  %13353 = vst [vmem:[#allocation84_spill] sm:$0xff] %v11896_v4 }
 0xa00   : > { %5552 = vmatmul.bf16.gmra.mxu1 %v11395_v53  ;;  %5785 = vmatmul.bf16.gmra.mxu2 %v11395_v53 }
 0xa01   : > { %v6249_v8 = vsel %vm2484_vm0, %v6246_v46, %v6248_v37  ;;  %6005 = vmatmul.bf16.gmra.mxu3 %v11395_v53  ;;  %6682 = vmatmul.bf16.gmra.mxu0 %v11151_v38 }
 0xa02   : > { %v11894_v41 = vadd.f32 %v6249_v8, %v11389_v42 }
 0xa03   : > { %v5746_v14 = vpop.f32.mrf.mxu2 }
 0xa04   : > { %13352 = vst [vmem:[#allocation83_spill] sm:$0xff] %v11894_v41  ;;  %v5966_v50 = vpop.f32.mrf.mxu3 }
 0xa05   : > { %v6111_v19 = vadd.f32 %v5966_v50, %v5727_v24  ;;  %v5515_v63 = vpop.f32.mrf.mxu1 }
 0xa06   : > { %v5739_v47 = vadd.f32 %v5738_v10, %v5515_v63  ;;  %v11904_v24 = vpop.f32.mrf.mxu0 }
 0xa07   : > { %v6250_v13 = vrot.slane %v6111_v19, 1  ;;  %13356 = vst [vmem:[#allocation85_spill] sm:$0xff] %v11904_v24 }
 0xa09   : > { %v6251_v31 = vsel %vm2484_vm0, %v6248_v37, %v6250_v13  ;;  %v13357_v37 = vld [vmem:[#allocation45_spill] sm:$0xff] }
 0xa0a   : > { %v11900_v51 = vadd.f32 %v6251_v31, %v13354_v28  ;;  %v13358_v31 = vld [vmem:[#allocation19_spill] sm:$0xff] }
 0xa0b   : > { %v5748_v46 = vpop.f32.mrf.mxu2 }
 0xa0c   : > { %13355 = vst [vmem:[#allocation23_spill] sm:$0xff] %v11900_v51  ;;  %v5968_v59 = vpop.f32.mrf.mxu3 }
 0xa0d   : > { %v6112_v36 = vadd.f32 %v5968_v59, %v5729_v26  ;;  %v5518_v39 = vpop.f32.mrf.mxu1 }
 0xa0e   : > { %v5742_v7 = vadd.f32 %v5741_v0, %v5518_v39  ;;  %v11916_v59 = vpop.f32.mrf.mxu0 }
 0xa0f   : > { %v6252_v42 = vrot.slane %v6112_v36, 1  ;;  %13359 = vst [vmem:[#allocation45_spill] sm:$0xff] %v11916_v59 }
 0xa10   : > { %5557 = vmatmul.bf16.gmra.mxu1 %v11151_v38  ;;  %5790 = vmatmul.bf16.gmra.mxu2 %v11151_v38 }
 0xa11   : > { %v6253_v10 = vsel %vm2484_vm0, %v6250_v13, %v6252_v42  ;;  %6010 = vmatmul.bf16.gmra.mxu3 %v11151_v38  ;;  %6687 = vmatmul.bf16.gmra.mxu0 %v11515_v17 }
 0xa12   : > { %v11910_v8 = vadd.f32 %v6253_v10, %v13357_v37 }
 0xa13   : > { %v5751_v50 = vpop.f32.mrf.mxu2 }
 0xa14   : > { %v5971_v26 = vpop.f32.mrf.mxu3 }
 0xa15   : > { %v6113_v19 = vadd.f32 %v5971_v26, %v5732_v60  ;;  %v5520_v39 = vpop.f32.mrf.mxu1 }
 0xa16   : > { %v5744_v0 = vadd.f32 %v5743_v33, %v5520_v39 }
 0xa17   : > { %v6254_v36 = vrot.slane %v6113_v19, 1 }
 0xa19   : > { %v6255_v63 = vsel %vm2484_vm0, %v6252_v42, %v6254_v36  ;;  %v9516_v42 = vld [vmem:[#allocation7 + $0x210] sm:$0xff] }
 0xa1a   : > { %v11914_v28 = vadd.f32 %v6255_v63, %v13358_v31  ;;  %7036 = vmatpush.bf16.msra.mxu2 %v9516_v42 }
 0xa1b   : > { %v5753_v13 = vpop.f32.mrf.mxu2 }
 0xa1c   : > { %v5973_v24 = vpop.f32.mrf.mxu3 }
 0xa1d   : > { %v6114_v4 = vadd.f32 %v5973_v24, %v5734_v18  ;;  %v5523_v51 = vpop.f32.mrf.mxu1  ;;  %v11926_v18 = vpop.f32.mrf.mxu0 }
 0xa1e   : > { %v5747_v41 = vadd.f32 %v5746_v14, %v5523_v51  ;;  %13361 = vst [vmem:[#allocation86_spill] sm:$0xff] %v11926_v18 }
 0xa1f   : > { %v6256_v10 = vrot.slane %v6114_v4, 1 }
 0xa20   : > { %5562 = vmatmul.bf16.gmra.mxu1 %v11432_v12  ;;  %5795 = vmatmul.bf16.gmra.mxu2 %v11432_v12 }
 0xa21   : > { %v6257_v60 = vsel %vm2484_vm0, %v6254_v36, %v6256_v10  ;;  %6015 = vmatmul.bf16.gmra.mxu3 %v11432_v12  ;;  %6692 = vmatmul.bf16.gmra.mxu0 %v11151_v38  ;;  %v9500_v36 = vld [vmem:[#allocation7 + $0x90] sm:$0xff] }
 0xa22   : > { %v11924_v33 = vadd.f32 %v6257_v60, %v11425_v52  ;;  %6795 = vmatpush.bf16.msra.mxu1 %v9500_v36  ;;  %v13364_v36 = vld [vmem:[#allocation43_spill] sm:$0xff] }
 0xa23   : > { %v5756_v37 = vpop.f32.mrf.mxu2 }
 0xa24   : > { %13360 = vst [vmem:[#allocation19_spill] sm:$0xff] %v11924_v33  ;;  %v5976_v26 = vpop.f32.mrf.mxu3 }
 0xa25   : > { %v6115_v14 = vadd.f32 %v5976_v26, %v5737_v5  ;;  %v5525_v4 = vpop.f32.mrf.mxu1  ;;  %v11932_v33 = vpop.f32.mrf.mxu0 }
 0xa26   : > { %v5749_v51 = vadd.f32 %v5748_v46, %v5525_v4  ;;  %13362 = vst [vmem:[#allocation87_spill] sm:$0xff] %v11932_v33 }
 0xa27   : > { %v6258_v24 = vrot.slane %v6115_v14, 1 }
 0xa29   : > { %v6259_v19 = vsel %vm2484_vm0, %v6256_v10, %v6258_v24 }
 0xa2a   : > { %v11930_v39 = vadd.f32 %v6259_v19, %v11430_v35 }
 0xa2b   : > { %v5758_v63 = vpop.f32.mrf.mxu2 }
 0xa2c   : > { %v5978_v31 = vpop.f32.mrf.mxu3 }
 0xa2d   : > { %v6116_v52 = vadd.f32 %v5978_v31, %v5739_v47  ;;  %v5528_v60 = vpop.f32.mrf.mxu1  ;;  %v11942_v4 = vpop.f32.mrf.mxu0 }
 0xa2e   : > { %v5752_v59 = vadd.f32 %v5751_v50, %v5528_v60  ;;  %13363 = vst [vmem:[#allocation88_spill] sm:$0xff] %v11942_v4 }
 0xa2f   : > { %v6260_v42 = vrot.slane %v6116_v52, 1 }
 0xa30   : > { %5567 = vmatmul.bf16.gmra.mxu1 %v11151_v38  ;;  %5800 = vmatmul.bf16.gmra.mxu2 %v11151_v38 }
 0xa31   : > { %v6261_v5 = vsel %vm2484_vm0, %v6258_v24, %v6260_v42  ;;  %6020 = vmatmul.bf16.gmra.mxu3 %v11151_v38  ;;  %6697 = vmatmul.bf16.gmra.mxu0 %v11554_v23 }
 0xa32   : > { %v11940_v35 = vadd.f32 %v6261_v5, %v11442_v32 }
 0xa33   : > { %v5761_v46 = vpop.f32.mrf.mxu2 }
 0xa34   : > { %v5981_v47 = vpop.f32.mrf.mxu3 }
 0xa35   : > { %v6117_v10 = vadd.f32 %v5981_v47, %v5742_v7  ;;  %v5530_v50 = vpop.f32.mrf.mxu1 }
 0xa36   : > { %v5754_v26 = vadd.f32 %v5753_v13, %v5530_v50 }
 0xa37   : > { %v6262_v14 = vrot.slane %v6117_v10, 1 }
 0xa39   : > { %v6263_v19 = vsel %vm2484_vm0, %v6260_v42, %v6262_v14  ;;  %v11956_v42 = vpop.f32.mrf.mxu0 }
 0xa3a   : > { %v11946_v31 = vadd.f32 %v6263_v19, %v13364_v36  ;;  %13366 = vst [vmem:[#allocation89_spill] sm:$0xff] %v11956_v42 }
 0xa3b   : > { %v5763_v24 = vpop.f32.mrf.mxu2 }
 0xa3c   : > { %v5983_v52 = vpop.f32.mrf.mxu3 }
 0xa3d   : > { %v6118_v60 = vadd.f32 %v5983_v52, %v5744_v0  ;;  %v5533_v33 = vpop.f32.mrf.mxu1 }
 0xa3e   : > { %v5757_v18 = vadd.f32 %v5756_v37, %v5533_v33 }
 0xa3f   : > { %v6264_v32 = vrot.slane %v6118_v60, 1 }
 0xa40   : > { %5572 = vmatmul.bf16.gmra.mxu1 %v11471_v44  ;;  %5805 = vmatmul.bf16.gmra.mxu2 %v11471_v44 }
 0xa41   : > { %v6265_v7 = vsel %vm2484_vm0, %v6262_v14, %v6264_v32  ;;  %6025 = vmatmul.bf16.gmra.mxu3 %v11471_v44  ;;  %6702 = vmatmul.bf16.gmra.mxu0 %v11151_v38  ;;  %v11962_v52 = vpop.f32.mrf.mxu0 }
 0xa42   : > { %v11954_v13 = vadd.f32 %v6265_v7, %v11463_v20  ;;  %13368 = vst [vmem:[#allocation91_spill] sm:$0xff] %v11962_v52 }
 0xa43   : > { %v5766_v5 = vpop.f32.mrf.mxu2 }
 0xa44   : > { %13365 = vst [vmem:[#allocation43_spill] sm:$0xff] %v11954_v13  ;;  %v5986_v0 = vpop.f32.mrf.mxu3 }
 0xa45   : > { %v6119_v47 = vadd.f32 %v5986_v0, %v5747_v41  ;;  %v5535_v33 = vpop.f32.mrf.mxu1 }
 0xa46   : > { %v5759_v37 = vadd.f32 %v5758_v63, %v5535_v33 }
 0xa47   : > { %v6266_v10 = vrot.slane %v6119_v47, 1 }
 0xa49   : > { %v6267_v50 = vsel %vm2484_vm0, %v6264_v32, %v6266_v10 }
 0xa4a   : > { %v11960_v19 = vadd.f32 %v6267_v50, %v11469_v1  ;;  %v13369_v1 = vld [vmem:[#allocation24_spill] sm:$0xff] }
 0xa4b   : > { %v5768_v14 = vpop.f32.mrf.mxu2 }
 0xa4c   : > { %13367 = vst [vmem:[#allocation90_spill] sm:$0xff] %v11960_v19  ;;  %v5988_v36 = vpop.f32.mrf.mxu3 }
 0xa4d   : > { %v6120_v60 = vadd.f32 %v5988_v36, %v5749_v51  ;;  %v5538_v20 = vpop.f32.mrf.mxu1 }
 0xa4e   : > { %v5762_v7 = vadd.f32 %v5761_v46, %v5538_v20  ;;  %v11972_v46 = vpop.f32.mrf.mxu0 }
 0xa4f   : > { %v6268_v4 = vrot.slane %v6120_v60, 1  ;;  %13370 = vst [vmem:[#allocation24_spill] sm:$0xff] %v11972_v46  ;;  %v13371_v60 = vld [vmem:[#allocation65_spill] sm:$0xff] }
 0xa50   : > { %5577 = vmatmul.bf16.gmra.mxu1 %v11151_v38  ;;  %5810 = vmatmul.bf16.gmra.mxu2 %v11151_v38 }
 0xa51   : > { %v6269_v41 = vsel %vm2484_vm0, %v6266_v10, %v6268_v4  ;;  %6030 = vmatmul.bf16.gmra.mxu3 %v11151_v38  ;;  %6707 = vmatmul.bf16.gmra.mxu0 %v11593_v29 }
 0xa52   : > { %v11970_v63 = vadd.f32 %v6269_v41, %v13369_v1 }
 0xa53   : > { %v5771_v32 = vpop.f32.mrf.mxu2 }
 0xa54   : > { %v5991_v0 = vpop.f32.mrf.mxu3 }
 0xa55   : > { %v6121_v47 = vadd.f32 %v5991_v0, %v5752_v59  ;;  %v5540_v51 = vpop.f32.mrf.mxu1 }
 0xa56   : > { %v5764_v33 = vadd.f32 %v5763_v24, %v5540_v51  ;;  %v11980_v59 = vpop.f32.mrf.mxu0 }
 0xa57   : > { %v6270_v50 = vrot.slane %v6121_v47, 1  ;;  %13372 = vst [vmem:[#allocation65_spill] sm:$0xff] %v11980_v59  ;;  %v13374_v47 = vld [vmem:[#allocation47_spill] sm:$0xff] }
 0xa59   : > { %v6271_v36 = vsel %vm2484_vm0, %v6268_v4, %v6270_v50 }
 0xa5a   : > { %v11976_v20 = vadd.f32 %v6271_v36, %v13371_v60  ;;  %v9515_v36 = vld [vmem:[#allocation7 + $0x208] sm:$0xff] }
 0xa5b   : > { %v5773_v10 = vpop.f32.mrf.mxu2  ;;  %7037 = vmatpush.bf16.msra.mxu2 %v9515_v36  ;;  %v13378_v36 = vld [vmem:[#allocation66_spill] sm:$0xff] }
 0xa5c   : > { %v5993_v52 = vpop.f32.mrf.mxu3 }
 0xa5d   : > { %v6122_v42 = vadd.f32 %v5993_v52, %v5754_v26  ;;  %v5543_v19 = vpop.f32.mrf.mxu1 }
 0xa5e   : > { %v5767_v13 = vadd.f32 %v5766_v5, %v5543_v19  ;;  %v11992_v60 = vpop.f32.mrf.mxu0 }
 0xa5f   : > { %v6272_v41 = vrot.slane %v6122_v42, 1  ;;  %13376 = vst [vmem:[#allocation93_spill] sm:$0xff] %v11992_v60 }
 0xa60   : > { %5582 = vmatmul.bf16.gmra.mxu1 %v11515_v17  ;;  %5815 = vmatmul.bf16.gmra.mxu2 %v11515_v17 }
 0xa61   : > { %v6273_v24 = vsel %vm2484_vm0, %v6270_v50, %v6272_v41  ;;  %6035 = vmatmul.bf16.gmra.mxu3 %v11515_v17  ;;  %6712 = vmatmul.bf16.gmra.mxu0 %v11151_v38  ;;  %v9499_v50 = vld [vmem:[#allocation7 + $0x88] sm:$0xff] }
 0xa62   : > { %v11986_v4 = vadd.f32 %v6273_v24, %v11507_v2  ;;  %6796 = vmatpush.bf16.msra.mxu1 %v9499_v50 }
 0xa63   : > { %v5776_v1 = vpop.f32.mrf.mxu2 }
 0xa64   : > { %13373 = vst [vmem:[#allocation92_spill] sm:$0xff] %v11986_v4  ;;  %v5996_v26 = vpop.f32.mrf.mxu3 }
 0xa65   : > { %v6123_v52 = vadd.f32 %v5996_v26, %v5757_v18  ;;  %v5545_v5 = vpop.f32.mrf.mxu1 }
 0xa66   : > { %v5769_v42 = vadd.f32 %v5768_v14, %v5545_v5  ;;  %v12002_v5 = vpop.f32.mrf.mxu0 }
 0xa67   : > { %v6274_v19 = vrot.slane %v6123_v52, 1  ;;  %13377 = vst [vmem:[#allocation94_spill] sm:$0xff] %v12002_v5 }
 0xa69   : > { %v6275_v0 = vsel %vm2484_vm0, %v6272_v41, %v6274_v19 }
 0xa6a   : > { %v11990_v51 = vadd.f32 %v6275_v0, %v13374_v47 }
 0xa6b   : > { %v5778_v59 = vpop.f32.mrf.mxu2 }
 0xa6c   : > { %13375 = vst [vmem:[#allocation47_spill] sm:$0xff] %v11990_v51  ;;  %v5998_v46 = vpop.f32.mrf.mxu3 }
 0xa6d   : > { %v6124_v2 = vadd.f32 %v5998_v46, %v5759_v37  ;;  %v5548_v24 = vpop.f32.mrf.mxu1 }
 0xa6e   : > { %v5772_v4 = vadd.f32 %v5771_v32, %v5548_v24 }
 0xa6f   : > { %v6276_v18 = vrot.slane %v6124_v2, 1 }
 0xa70   : > { %5587 = vmatmul.bf16.gmra.mxu1 %v11151_v38  ;;  %5820 = vmatmul.bf16.gmra.mxu2 %v11151_v38 }
 0xa71   : > { %v6277_v14 = vsel %vm2484_vm0, %v6274_v19, %v6276_v18  ;;  %6040 = vmatmul.bf16.gmra.mxu3 %v11151_v38  ;;  %6717 = vmatmul.bf16.gmra.mxu0 %v11633_v45 }
 0xa72   : > { %v12000_v41 = vadd.f32 %v6277_v14, %v11525_v25  ;;  %v12008_v25 = vpop.f32.mrf.mxu0 }
 0xa73   : > { %v5781_v26 = vpop.f32.mrf.mxu2  ;;  %13380 = vst [vmem:[#allocation95_spill] sm:$0xff] %v12008_v25 }
 0xa74   : > { %v6001_v52 = vpop.f32.mrf.mxu3 }
 0xa75   : > { %v6125_v37 = vadd.f32 %v6001_v52, %v5762_v7  ;;  %v5550_v32 = vpop.f32.mrf.mxu1 }
 0xa76   : > { %v5774_v46 = vadd.f32 %v5773_v10, %v5550_v32  ;;  %v13381_v10 = vld [vmem:[#allocation48_spill] sm:$0xff] }
 0xa77   : > { %v6278_v0 = vrot.slane %v6125_v37, 1 }
 0xa79   : > { %v6279_v47 = vsel %vm2484_vm0, %v6276_v18, %v6278_v0 }
 0xa7a   : > { %v12006_v50 = vadd.f32 %v6279_v47, %v13378_v36  ;;  %v12018_v47 = vpop.f32.mrf.mxu0 }
 0xa7b   : > { %v5783_v19 = vpop.f32.mrf.mxu2  ;;  %13382 = vst [vmem:[#allocation48_spill] sm:$0xff] %v12018_v47 }
 0xa7c   : > { %13379 = vst [vmem:[#allocation66_spill] sm:$0xff] %v12006_v50  ;;  %v6003_v2 = vpop.f32.mrf.mxu3 }
 0xa7d   : > { %v6126_v24 = vadd.f32 %v6003_v2, %v5764_v33  ;;  %v5553_v60 = vpop.f32.mrf.mxu1 }
 0xa7e   : > { %v5777_v51 = vadd.f32 %v5776_v1, %v5553_v60 }
 0xa7f   : > { %v6280_v14 = vrot.slane %v6126_v24, 1 }
 0xa80   : > { %5592 = vmatmul.bf16.gmra.mxu1 %v11554_v23  ;;  %5825 = vmatmul.bf16.gmra.mxu2 %v11554_v23 }
 0xa81   : > { %v6281_v7 = vsel %vm2484_vm0, %v6278_v0, %v6280_v14  ;;  %6045 = vmatmul.bf16.gmra.mxu3 %v11554_v23  ;;  %6722 = vmatmul.bf16.gmra.mxu0 %v11151_v38 }
 0xa82   : > { %v12016_v18 = vadd.f32 %v6281_v7, %v13381_v10 }
 0xa83   : > { %v5786_v52 = vpop.f32.mrf.mxu2 }
 0xa84   : > { %v6006_v33 = vpop.f32.mrf.mxu3 }
 0xa85   : > { %v6127_v37 = vadd.f32 %v6006_v33, %v5767_v13  ;;  %v5555_v1 = vpop.f32.mrf.mxu1 }
 0xa86   : > { %v5779_v60 = vadd.f32 %v5778_v59, %v5555_v1 }
 0xa87   : > { %v6282_v32 = vrot.slane %v6127_v37, 1  ;;  %v13385_v37 = vld [vmem:[#allocation22_spill] sm:$0xff] }
 0xa89   : > { %v6283_v36 = vsel %vm2484_vm0, %v6280_v14, %v6282_v32 }
 0xa8a   : > { %v12022_v2 = vadd.f32 %v6283_v36, %v11552_v30  ;;  %v12032_v30 = vpop.f32.mrf.mxu0 }
 0xa8b   : > { %v5788_v0 = vpop.f32.mrf.mxu2  ;;  %13384 = vst [vmem:[#allocation97_spill] sm:$0xff] %v12032_v30 }
 0xa8c   : > { %v6008_v24 = vpop.f32.mrf.mxu3 }
 0xa8d   : > { %v6128_v25 = vadd.f32 %v6008_v24, %v5769_v42  ;;  %v5558_v5 = vpop.f32.mrf.mxu1 }
 0xa8e   : > { %v5782_v50 = vadd.f32 %v5781_v26, %v5558_v5 }
 0xa8f   : > { %v6284_v7 = vrot.slane %v6128_v25, 1 }
 0xa90   : > { %5597 = vmatmul.bf16.gmra.mxu1 %v11151_v38  ;;  %5830 = vmatmul.bf16.gmra.mxu2 %v11151_v38 }
 0xa91   : > { %v6285_v13 = vsel %vm2484_vm0, %v6282_v32, %v6284_v7  ;;  %6050 = vmatmul.bf16.gmra.mxu3 %v11151_v38  ;;  %6727 = vmatmul.bf16.gmra.mxu0 %v11665_v40 }
 0xa92   : > { %v12030_v59 = vadd.f32 %v6285_v13, %v11564_v15  ;;  %v12038_v24 = vpop.f32.mrf.mxu0 }
 0xa93   : > { %v5791_v14 = vpop.f32.mrf.mxu2  ;;  %13387 = vst [vmem:[#allocation98_spill] sm:$0xff] %v12038_v24 }
 0xa94   : > { %13383 = vst [vmem:[#allocation96_spill] sm:$0xff] %v12030_v59  ;;  %v6011_v42 = vpop.f32.mrf.mxu3 }
 0xa95   : > { %v6129_v10 = vadd.f32 %v6011_v42, %v5772_v4  ;;  %v5560_v26 = vpop.f32.mrf.mxu1 }
 0xa96   : > { %v5784_v5 = vadd.f32 %v5783_v19, %v5560_v26  ;;  %v13388_v19 = vld [vmem:[#allocation46_spill] sm:$0xff] }
 0xa97   : > { %v6286_v25 = vrot.slane %v6129_v10, 1 }
 0xa99   : > { %v6287_v33 = vsel %vm2484_vm0, %v6284_v7, %v6286_v25 }
 0xa9a   : > { %v12036_v1 = vadd.f32 %v6287_v33, %v13385_v37 }
 0xa9b   : > { %v5793_v32 = vpop.f32.mrf.mxu2 }
 0xa9c   : > { %13386 = vst [vmem:[#allocation22_spill] sm:$0xff] %v12036_v1  ;;  %v6013_v36 = vpop.f32.mrf.mxu3 }
 0xa9d   : > { %v6130_v47 = vadd.f32 %v6013_v36, %v5774_v46  ;;  %v5563_v15 = vpop.f32.mrf.mxu1  ;;  %v13391_v36 = vld [vmem:[#allocation39_spill] sm:$0xff] }
 0xa9e   : > { %v5787_v13 = vadd.f32 %v5786_v52, %v5563_v15  ;;  %v12048_v52 = vpop.f32.mrf.mxu0 }
 0xa9f   : > { %v6288_v59 = vrot.slane %v6130_v47, 1  ;;  %13390 = vst [vmem:[#allocation99_spill] sm:$0xff] %v12048_v52 }
 0xaa0   : > { %5602 = vmatmul.bf16.gmra.mxu1 %v11593_v29  ;;  %5835 = vmatmul.bf16.gmra.mxu2 %v11593_v29 }
 0xaa1   : > { %v6289_v4 = vsel %vm2484_vm0, %v6286_v25, %v6288_v59  ;;  %6055 = vmatmul.bf16.gmra.mxu3 %v11593_v29  ;;  %6732 = vmatmul.bf16.gmra.mxu0 %v11151_v38  ;;  %v9514_v25 = vld [vmem:[#allocation7 + $0x200] sm:$0xff] }
 0xaa2   : > { %v12046_v7 = vadd.f32 %v6289_v4, %v13388_v19  ;;  %7038 = vmatpush.bf16.msra.mxu2 %v9514_v25 }
 0xaa3   : > { %v5796_v42 = vpop.f32.mrf.mxu2 }
 0xaa4   : > { %13389 = vst [vmem:[#allocation46_spill] sm:$0xff] %v12046_v7  ;;  %v6016_v10 = vpop.f32.mrf.mxu3 }
 0xaa5   : > { %v6131_v26 = vadd.f32 %v6016_v10, %v5777_v51  ;;  %v5565_v46 = vpop.f32.mrf.mxu1  ;;  %v9498_v10 = vld [vmem:[#allocation7 + $0x80] sm:$0xff] }
 0xaa6   : > { %v5789_v33 = vadd.f32 %v5788_v0, %v5565_v46  ;;  %v12056_v51 = vpop.f32.mrf.mxu0  ;;  %6797 = vmatpush.bf16.msra.mxu1 %v9498_v10 }
 0xaa7   : > { %v6290_v47 = vrot.slane %v6131_v26, 1  ;;  %13392 = vst [vmem:[#allocation39_spill] sm:$0xff] %v12056_v51 }
 0xaa9   : > { %v6291_v37 = vsel %vm2484_vm0, %v6288_v59, %v6290_v47 }
 0xaaa   : > { %v12052_v15 = vadd.f32 %v6291_v37, %v13391_v36 }
 0xaab   : > { %v5798_v24 = vpop.f32.mrf.mxu2 }
 0xaac   : > { %v6018_v30 = vpop.f32.mrf.mxu3 }
 0xaad   : > { %v6132_v1 = vadd.f32 %v6018_v30, %v5779_v60  ;;  %v5568_v4 = vpop.f32.mrf.mxu1 }
 0xaae   : > { %v5792_v19 = vadd.f32 %v5791_v14, %v5568_v4 }
 0xaaf   : > { %v6292_v7 = vrot.slane %v6132_v1, 1 }
 0xab0   : > { %5607 = vmatmul.bf16.gmra.mxu1 %v11151_v38  ;;  %5840 = vmatmul.bf16.gmra.mxu2 %v11151_v38 }
 0xab1   : > { %v6293_v0 = vsel %vm2484_vm0, %v6290_v47, %v6292_v7  ;;  %6060 = vmatmul.bf16.gmra.mxu3 %v11151_v38  ;;  %6737 = vmatmul.bf16.gmra.mxu0 %v11151_v38 }
 0xab2   : > { %v12062_v59 = vadd.f32 %v6293_v0, %v11605_v21 }
 0xab3   : > { %v5801_v60 = vpop.f32.mrf.mxu2 }
 0xab4   : > { %v6021_v30 = vpop.f32.mrf.mxu3 }
 0xab5   : > { %v6133_v14 = vadd.f32 %v6021_v30, %v5782_v50  ;;  %v5570_v1 = vpop.f32.mrf.mxu1 }
 0xab6   : > { %v5794_v26 = vadd.f32 %v5793_v32, %v5570_v1  ;;  %v13394_v32 = vld [vmem:[#allocation26_spill] sm:$0xff] }
 0xab7   : > { %v6294_v46 = vrot.slane %v6133_v14, 1 }
 0xab9   : > { %v6295_v37 = vsel %vm2484_vm0, %v6292_v7, %v6294_v46 }
 0xaba   : > { %v12066_v36 = vadd.f32 %v6295_v37, %v11612_v3 }
 0xabb   : > { %v5803_v47 = vpop.f32.mrf.mxu2 }
 0xabc   : > { %13393 = vst [vmem:[#allocation100_spill] sm:$0xff] %v12066_v36  ;;  %v6023_v25 = vpop.f32.mrf.mxu3 }
 0xabd   : > { %v6134_v4 = vadd.f32 %v6023_v25, %v5784_v5  ;;  %v5573_v51 = vpop.f32.mrf.mxu1 }
 0xabe   : > { %v5797_v52 = vadd.f32 %v5796_v42, %v5573_v51 }
 0xabf   : > { %v6296_v21 = vrot.slane %v6134_v4, 1 }
 0xac0   : > { %5612 = vmatmul.bf16.gmra.mxu1 %v11633_v45  ;;  %5845 = vmatmul.bf16.gmra.mxu2 %v11633_v45 }
 0xac1   : > { %v6297_v50 = vsel %vm2484_vm0, %v6294_v46, %v6296_v21  ;;  %6065 = vmatmul.bf16.gmra.mxu3 %v11633_v45 }
 0xac2   : > { %v12073_v0 = vadd.f32 %v6297_v50, %v13394_v32 }
 0xac3   : > { %v5806_v7 = vpop.f32.mrf.mxu2 }
 0xac4   : > { %v6026_v3 = vpop.f32.mrf.mxu3 }
 0xac5   : > { %v6135_v10 = vadd.f32 %v6026_v3, %v5787_v13  ;;  %v5575_v30 = vpop.f32.mrf.mxu1 }
 0xac6   : > { %v5799_v14 = vadd.f32 %v5798_v24, %v5575_v30 }
 0xac7   : > { %v6298_v5 = vrot.slane %v6135_v10, 1 }
 0xac9   : > { %v6299_v42 = vsel %vm2484_vm0, %v6296_v21, %v6298_v5 }
 0xaca   : > { %v12077_v51 = vadd.f32 %v6299_v42, %v11631_v48 }
 0xacb   : > { %v5808_v1 = vpop.f32.mrf.mxu2 }
 0xacc   : > { %v6028_v37 = vpop.f32.mrf.mxu3 }
 0xacd   : > { %v6136_v25 = vadd.f32 %v6028_v37, %v5789_v33  ;;  %v5578_v46 = vpop.f32.mrf.mxu1 }
 0xace   : > { %v5802_v4 = vadd.f32 %v5801_v60, %v5578_v46 }
 0xacf   : > { %v6300_v36 = vrot.slane %v6136_v25, 1 }
 0xad0   : > { %5617 = vmatmul.bf16.gmra.mxu1 %v11151_v38  ;;  %5850 = vmatmul.bf16.gmra.mxu2 %v11151_v38 }
 0xad1   : > { %v6301_v13 = vsel %vm2484_vm0, %v6298_v5, %v6300_v36  ;;  %6070 = vmatmul.bf16.gmra.mxu3 %v11151_v38 }
 0xad2   : > { %v12084_v24 = vadd.f32 %v6301_v13, %v11643_v22 }
 0xad3   : > { %v5811_v21 = vpop.f32.mrf.mxu2 }
 0xad4   : > { %v6031_v48 = vpop.f32.mrf.mxu3 }
 0xad5   : > { %v6137_v50 = vadd.f32 %v6031_v48, %v5792_v19  ;;  %v5580_v32 = vpop.f32.mrf.mxu1 }
 0xad6   : > { %v5804_v3 = vadd.f32 %v5803_v47, %v5580_v32 }
 0xad7   : > { %v6302_v33 = vrot.slane %v6137_v50, 1 }
 0xad9   : > { %v6303_v60 = vsel %vm2484_vm0, %v6300_v36, %v6302_v33 }
 0xada   : > { %v12088_v10 = vadd.f32 %v6303_v60, %v11648_v6 }
 0xadb   : > { %v5813_v30 = vpop.f32.mrf.mxu2 }
 0xadc   : > { %v6033_v42 = vpop.f32.mrf.mxu3 }
 0xadd   : > { %v6138_v37 = vadd.f32 %v6033_v42, %v5794_v26  ;;  %v5583_v5 = vpop.f32.mrf.mxu1 }
 0xade   : > { %v5807_v25 = vadd.f32 %v5806_v7, %v5583_v5 }
 0xadf   : > { %v6304_v46 = vrot.slane %v6138_v37, 1 }
 0xae0   : > { %5622 = vmatmul.bf16.gmra.mxu1 %v11665_v40  ;;  %5855 = vmatmul.bf16.gmra.mxu2 %v11665_v40 }
 0xae1   : > { %v6305_v22 = vsel %vm2484_vm0, %v6302_v33, %v6304_v46  ;;  %6075 = vmatmul.bf16.gmra.mxu3 %v11665_v40 }
 0xae2   : > { %v12095_v19 = vadd.f32 %v6305_v22, %v11659_v49 }
 0xae3   : > { %v5816_v36 = vpop.f32.mrf.mxu2 }
 0xae4   : > { %v6036_v6 = vpop.f32.mrf.mxu3 }
 0xae5   : > { %v6139_v47 = vadd.f32 %v6036_v6, %v5797_v52  ;;  %v5585_v13 = vpop.f32.mrf.mxu1 }
 0xae6   : > { %v5809_v48 = vadd.f32 %v5808_v1, %v5585_v13 }
 0xae7   : > { %v6306_v26 = vrot.slane %v6139_v47, 1 }
 0xae9   : > { %v6307_v7 = vsel %vm2484_vm0, %v6304_v46, %v6306_v26 }
 0xaea   : > { %v12099_v50 = vadd.f32 %v6307_v7, %v11663_v58 }
 0xaeb   : > { %v5818_v32 = vpop.f32.mrf.mxu2 }
 0xaec   : > { %13395 = vst [vmem:[#allocation26_spill] sm:$0xff] %v12099_v50  ;;  %v6038_v60 = vpop.f32.mrf.mxu3  ;;  %v13400_v50 = vmov 0  }
 0xaed   : > { %v6140_v42 = vadd.f32 %v6038_v60, %v5799_v14  ;;  %v5588_v33 = vpop.f32.mrf.mxu1 }
 0xaee   : > { %v5812_v37 = vadd.f32 %v5811_v21, %v5588_v33 }
 0xaef   : > { %v6308_v5 = vrot.slane %v6140_v42, 1 }
 0xaf0   : > { %5627 = vmatmul.bf16.gmra.mxu1 %v11151_v38  ;;  %7039 = vmatmul.bf16.vlgmr.msra.gmra.mxu2 %v11151_v38 }
 0xaf1   : > { %v6309_v49 = vsel %vm2484_vm0, %v6306_v26, %v6308_v5  ;;  %6080 = vmatmul.bf16.gmra.mxu3 %v11151_v38 }
 0xaf2   : > { %v12106_v52 = vadd.f32 %v6309_v49, %v11671_v55 }
 0xaf3   : > { %v5821_v1 = vpop.f32.mrf.mxu2 }
 0xaf4   : > { %13396 = vst [vmem:[#allocation101_spill] sm:$0xff] %v12106_v52  ;;  %v6041_v58 = vpop.f32.mrf.mxu3 }
 0xaf5   : > { %v6141_v46 = vadd.f32 %v6041_v58, %v5802_v4  ;;  %v5590_v22 = vpop.f32.mrf.mxu1  ;;  %v13398_v4 = vld [vmem:[#allocation53_spill] sm:$0xff] }
 0xaf6   : > { %v5814_v6 = vadd.f32 %v5813_v30, %v5590_v22  ;;  %v13399_v22 = vld [vmem:[#allocation42_spill] sm:$0xff] }
 0xaf7   : > { %v6310_v14 = vrot.slane %v6141_v46, 1 }
 0xaf9   : > { %v6311_v21 = vsel %vm2484_vm0, %v6308_v5, %v6310_v14 }
 0xafa   : > { %v12110_v47 = vadd.f32 %v6311_v21, %v11673_v62 }
 0xafb   : > { %v5823_v13 = vpop.f32.mrf.mxu2 }
 0xafc   : > { %13397 = vst [vmem:[#allocation102_spill] sm:$0xff] %v12110_v47  ;;  %v6043_v7 = vpop.f32.mrf.mxu3 }
 0xafd   : > { %v6142_v60 = vadd.f32 %v6043_v7, %v5804_v3  ;;  %v5593_v26 = vpop.f32.mrf.mxu1 }
 0xafe   : > { %v5817_v42 = vadd.f32 %v5816_v36, %v5593_v26 }
 0xaff   : > { %v6312_v33 = vrot.slane %v6142_v60, 1 }
 0xb00   : > { %5632 = vmatmul.bf16.gmra.mxu1 %v11151_v38  ;;  %7042 = vmatmul.bf16.gmra.mxu2 %v11198_v11 }
 0xb01   : > { %v6313_v55 = vsel %vm2484_vm0, %v6310_v14, %v6312_v33  ;;  %6085 = vmatmul.bf16.gmra.mxu3 %v11151_v38 }
 0xb02   : > { %v12117_v30 = vadd.f32 %v6313_v55, %v13398_v4 }
 0xb03   : > { %v5826_v5 = vpop.f32.mrf.mxu2 }
 0xb04   : > { %v6046_v62 = vpop.f32.mrf.mxu3 }
 0xb05   : > { %v6143_v49 = vadd.f32 %v6046_v62, %v5807_v25  ;;  %v5595_v58 = vpop.f32.mrf.mxu1 }
 0xb06   : > { %v5819_v46 = vadd.f32 %v5818_v32, %v5595_v58 }
 0xb07   : > { %v6314_v3 = vrot.slane %v6143_v49, 1 }
 0xb09   : > { %v6315_v36 = vsel %vm2484_vm0, %v6312_v33, %v6314_v3 }
 0xb0a   : > { %v12121_v21 = vadd.f32 %v6315_v36, %v13399_v22 }
 0xb0b   : > { %v5828_v7 = vpop.f32.mrf.mxu2 }
 0xb0c   : > { %v6048_v60 = vpop.f32.mrf.mxu3 }
 0xb0d   : > { %v6144_v26 = vadd.f32 %v6048_v60, %v5809_v48  ;;  %v5598_v14 = vpop.f32.mrf.mxu1 }
 0xb0e   : > { %v5822_v47 = vadd.f32 %v5821_v1, %v5598_v14 }
 0xb0f   : > { %v6316_v52 = vrot.slane %v6144_v26, 1 }
 0xb10   : > { %6798 = vmatmul.bf16.vlgmr.msra.gmra.mxu1 %v13400_v50  ;;  %7047 = vmatmul.bf16.gmra.mxu2 %v11151_v38 }
 0xb11   : > { %v6317_v25 = vsel %vm2484_vm0, %v6314_v3, %v6316_v52  ;;  %6090 = vmatmul.bf16.gmra.mxu3 %v11151_v38 }
 0xb12   : > { %v12128_v32 = vadd.f32 %v6317_v25, %v11687_v16 }
 0xb13   : > { %v5831_v33 = vpop.f32.mrf.mxu2 }
 0xb14   : > { %v6051_v55 = vpop.f32.mrf.mxu3 }
 0xb15   : > { %v6145_v4 = vadd.f32 %v6051_v55, %v5812_v37  ;;  %v5600_v62 = vpop.f32.mrf.mxu1  ;;  %v13403_v55 = vld [vmem:[#allocation54_spill] sm:$0xff] }
 0xb16   : > { %v5824_v49 = vadd.f32 %v5823_v13, %v5600_v62 }
 0xb17   : > { %v6318_v48 = vrot.slane %v6145_v4, 1 }
 0xb19   : > { %v6319_v1 = vsel %vm2484_vm0, %v6316_v52, %v6318_v48 }
 0xb1a   : > { %v12132_v58 = vadd.f32 %v6319_v1, %v11689_v43 }
 0xb1b   : > { %v5833_v50 = vpop.f32.mrf.mxu2 }
 0xb1c   : > { %13401 = vst [vmem:[#allocation53_spill] sm:$0xff] %v12132_v58  ;;  %v6053_v36 = vpop.f32.mrf.mxu3  ;;  %v13409_v58 = vld [vmem:[#allocation37_spill] sm:$0xff] }
 0xb1d   : > { %v6146_v22 = vadd.f32 %v6053_v36, %v5814_v6  ;;  %v5603_v3 = vpop.f32.mrf.mxu1 }
 0xb1e   : > { %v5827_v60 = vadd.f32 %v5826_v5, %v5603_v3 }
 0xb1f   : > { %v6320_v26 = vrot.slane %v6146_v22, 1 }
 0xb20   : > { %6801 = vmatmul.bf16.gmra.mxu1 %v11151_v38  ;;  %7052 = vmatmul.bf16.gmra.mxu2 %v11217_v61 }
 0xb21   : > { %v6321_v16 = vsel %vm2484_vm0, %v6318_v48, %v6320_v26  ;;  %6095 = vmatmul.bf16.gmra.mxu3 %v11151_v38 }
 0xb22   : > { %v12139_v37 = vadd.f32 %v6321_v16, %v11695_v34 }
 0xb23   : > { %v5836_v52 = vpop.f32.mrf.mxu2 }
 0xb24   : > { %13402 = vst [vmem:[#allocation42_spill] sm:$0xff] %v12139_v37  ;;  %v6056_v43 = vpop.f32.mrf.mxu3 }
 0xb25   : > { %v6147_v13 = vadd.f32 %v6056_v43, %v5817_v42  ;;  %v5605_v14 = vpop.f32.mrf.mxu1  ;;  %v13405_v42 = vld [vmem:[#allocation67_spill] sm:$0xff] }
 0xb26   : > { %v5829_v25 = vadd.f32 %v5828_v7, %v5605_v14 }
 0xb27   : > { %v6322_v6 = vrot.slane %v6147_v13, 1 }
 0xb29   : > { %v6323_v5 = vsel %vm2484_vm0, %v6320_v26, %v6322_v6 }
 0xb2a   : > { %v12143_v4 = vadd.f32 %v6323_v5, %v13403_v55  ;;  %v13407_v55 = vld [vmem:[#allocation28_spill] sm:$0xff] }
 0xb2b   : > { %v5838_v62 = vpop.f32.mrf.mxu2 }
 0xb2c   : > { %13404 = vst [vmem:[#allocation54_spill] sm:$0xff] %v12143_v4  ;;  %v6058_v1 = vpop.f32.mrf.mxu3 }
 0xb2d   : > { %v6148_v36 = vadd.f32 %v6058_v1, %v5819_v46  ;;  %v5608_v48 = vpop.f32.mrf.mxu1 }
 0xb2e   : > { %v5832_v22 = vadd.f32 %v5831_v33, %v5608_v48 }
 0xb2f   : > { %v6324_v3 = vrot.slane %v6148_v36, 1 }
 0xb30   : > { %6806 = vmatmul.bf16.gmra.mxu1 %v11151_v38  ;;  %7057 = vmatmul.bf16.gmra.mxu2 %v11151_v38 }
 0xb31   : > { %v6325_v34 = vsel %vm2484_vm0, %v6322_v6, %v6324_v3 }
 0xb32   : > { %v12149_v7 = vadd.f32 %v6325_v34, %v13405_v42  ;;  %v13410_v34 = vld [vmem:[#allocation34_spill] sm:$0xff]  ;;  %v13411_v42 = vld [vmem:[#allocation56_spill] sm:$0xff] }
 0xb33   : > { %v5841_v16 = vpop.f32.mrf.mxu2 }
 0xb34   : > { %13406 = vst [vmem:[#allocation67_spill] sm:$0xff] %v12149_v7  ;;  %v6061_v26 = vpop.f32.mrf.mxu3 }
 0xb35   : > { %v6149_v43 = vadd.f32 %v6061_v26, %v5822_v47  ;;  %v5610_v13 = vpop.f32.mrf.mxu1 }
 0xb36   : > { %v5834_v14 = vadd.f32 %v5833_v50, %v5610_v13 }
 0xb37   : > { %v6326_v5 = vrot.slane %v6149_v43, 1 }
 0xb39   : > { %v6327_v46 = vsel %vm2484_vm0, %v6324_v3, %v6326_v5 }
 0xb3a   : > { %v12153_v33 = vadd.f32 %v6327_v46, %v13407_v55 }
 0xb3b   : > { %v5843_v1 = vpop.f32.mrf.mxu2 }
 0xb3c   : > { %13408 = vst [vmem:[#allocation28_spill] sm:$0xff] %v12153_v33  ;;  %v6063_v36 = vpop.f32.mrf.mxu3 }
 0xb3d   : > { %v6150_v48 = vadd.f32 %v6063_v36, %v5824_v49  ;;  %v5613_v4 = vpop.f32.mrf.mxu1  ;;  %v13413_v36 = vld [vmem:[#allocation68_spill] sm:$0xff] }
 0xb3e   : > { %v5837_v37 = vadd.f32 %v5836_v52, %v5613_v4 }
 0xb3f   : > { %v6328_v6 = vrot.slane %v6150_v48, 1 }
 0xb40   : > { %6811 = vmatmul.bf16.gmra.mxu1 %v13409_v58  ;;  %7062 = vmatmul.bf16.gmra.mxu2 %v13410_v34 }
 0xb41   : > { %v6329_v47 = vsel %vm2484_vm0, %v6326_v5, %v6328_v6 }
 0xb42   : > { %v12159_v50 = vadd.f32 %v6329_v47, %v13411_v42  ;;  %v13415_v47 = vld [vmem:[#allocation57_spill] sm:$0xff] }
 0xb43   : > { %v5846_v26 = vpop.f32.mrf.mxu2 }
 0xb44   : > { %13412 = vst [vmem:[#allocation37_spill] sm:$0xff] %v12159_v50  ;;  %v6066_v3 = vpop.f32.mrf.mxu3 }
 0xb45   : > { %v6151_v43 = vadd.f32 %v6066_v3, %v5827_v60  ;;  %v5615_v13 = vpop.f32.mrf.mxu1 }
 0xb46   : > { %v5839_v46 = vadd.f32 %v5838_v62, %v5615_v13 }
 0xb47   : > { %v6330_v55 = vrot.slane %v6151_v43, 1 }
 0xb49   : > { %v6331_v49 = vsel %vm2484_vm0, %v6328_v6, %v6330_v55 }
 0xb4a   : > { %v12163_v52 = vadd.f32 %v6331_v49, %v13413_v36  ;;  %v13417_v36 = vld [vmem:[#allocation69_spill] sm:$0xff] }
 0xb4b   : > { %v5848_v4 = vpop.f32.mrf.mxu2 }
 0xb4c   : > { %13414 = vst [vmem:[#allocation34_spill] sm:$0xff] %v12163_v52  ;;  %v6068_v58 = vpop.f32.mrf.mxu3 }
 0xb4d   : > { %v6152_v48 = vadd.f32 %v6068_v58, %v5829_v25  ;;  %v5618_v33 = vpop.f32.mrf.mxu1 }
 0xb4e   : > { %v5842_v7 = vadd.f32 %v5841_v16, %v5618_v33 }
 0xb4f   : > { %v6332_v5 = vrot.slane %v6152_v48, 1 }
 0xb50   : > { %6816 = vmatmul.bf16.gmra.mxu1 %v11151_v38  ;;  %7067 = vmatmul.bf16.gmra.mxu2 %v11151_v38 }
 0xb51   : > { %v6333_v60 = vsel %vm2484_vm0, %v6330_v55, %v6332_v5 }
 0xb52   : > { %v12169_v62 = vadd.f32 %v6333_v60, %v13415_v47  ;;  %v13419_v60 = vld [vmem:[#allocation18_spill] sm:$0xff]  ;;  %v13420_v47 = vld [vmem:[#allocation59_spill] sm:$0xff] }
 0xb53   : > { %v5851_v42 = vpop.f32.mrf.mxu2 }
 0xb54   : > { %13416 = vst [vmem:[#allocation56_spill] sm:$0xff] %v12169_v62  ;;  %v6071_v6 = vpop.f32.mrf.mxu3 }
 0xb55   : > { %v6153_v3 = vadd.f32 %v6071_v6, %v5832_v22  ;;  %v5620_v43 = vpop.f32.mrf.mxu1 }
 0xb56   : > { %v5844_v13 = vadd.f32 %v5843_v1, %v5620_v43 }
 0xb57   : > { %v6334_v49 = vrot.slane %v6153_v3, 1 }
 0xb59   : > { %v6335_v25 = vsel %vm2484_vm0, %v6332_v5, %v6334_v49 }
 0xb5a   : > { %v12173_v16 = vadd.f32 %v6335_v25, %v13417_v36 }
 0xb5b   : > { %v5853_v33 = vpop.f32.mrf.mxu2 }
 0xb5c   : > { %13418 = vst [vmem:[#allocation68_spill] sm:$0xff] %v12173_v16  ;;  %v6073_v58 = vpop.f32.mrf.mxu3 }
 0xb5d   : > { %v6154_v48 = vadd.f32 %v6073_v58, %v5834_v14  ;;  %v5623_v52 = vpop.f32.mrf.mxu1  ;;  %v13421_v58 = vld [vmem:[#allocation60_spill] sm:$0xff] }
 0xb5e   : > { %v5847_v50 = vadd.f32 %v5846_v26, %v5623_v52 }
 0xb5f   : > { %v6336_v55 = vrot.slane %v6154_v48, 1 }
 0xb60   : > { %6821 = vmatmul.bf16.gmra.mxu1 %v11198_v11  ;;  %7072 = vmatmul.bf16.gmra.mxu2 %v13419_v60 }
 0xb61   : > { %v6337_v22 = vsel %vm2484_vm0, %v6334_v49, %v6336_v55 }
 0xb62   : > { %v12179_v1 = vadd.f32 %v6337_v22, %v13420_v47  ;;  %v13422_v22 = vld [vmem:[#allocation61_spill] sm:$0xff] }
 0xb63   : > { %v5856_v6 = vpop.f32.mrf.mxu2 }
 0xb64   : > { %v6076_v5 = vpop.f32.mrf.mxu3 }
 0xb65   : > { %v6155_v3 = vadd.f32 %v6076_v5, %v5837_v37  ;;  %v5625_v43 = vpop.f32.mrf.mxu1 }
 0xb66   : > { %v5849_v25 = vadd.f32 %v5848_v4, %v5625_v43 }
 0xb67   : > { %v6338_v36 = vrot.slane %v6155_v3, 1 }
 0xb69   : > { %v6339_v14 = vsel %vm2484_vm0, %v6336_v55, %v6338_v36 }
 0xb6a   : > { %v12183_v26 = vadd.f32 %v6339_v14, %v13421_v58  ;;  %v13424_v14 = vld [vmem:[#allocation33_spill] sm:$0xff] }
 0xb6b   : > { %v5857_v52 = vpop.f32.mrf.mxu2 }
 0xb6c   : > { %v6078_v11 = vpop.f32.mrf.mxu3 }
 0xb6d   : > { %v6156_v48 = vadd.f32 %v6078_v11, %v5839_v46  ;;  %v5628_v16 = vpop.f32.mrf.mxu1 }
 0xb6e   : > { %v5852_v62 = vadd.f32 %v5851_v42, %v5628_v16 }
 0xb6f   : > { %v6340_v49 = vrot.slane %v6156_v48, 1 }
 0xb70   : > { %6826 = vmatmul.bf16.gmra.mxu1 %v11151_v38  ;;  %7077 = vmatmul.bf16.gmra.mxu2 %v11151_v38 }
 0xb71   : > { %v6341_v37 = vsel %vm2484_vm0, %v6338_v36, %v6340_v49  ;;  %v13426_v36 = vld [vmem:[#allocation20_spill] sm:$0xff] }
 0xb72   : > { %v12189_v4 = vadd.f32 %v6341_v37, %v13422_v22 }
 0xb73   : > { %v7040_v47 = vpop.f32.mrf.mxu2 }
 0xb74   : > { %13423 = vst [vmem:[#allocation57_spill] sm:$0xff] %v12189_v4  ;;  %v6081_v55 = vpop.f32.mrf.mxu3 }
 0xb75   : > { %v6157_v6 = vadd.f32 %v6081_v55, %v5842_v7  ;;  %v5630_v5 = vpop.f32.mrf.mxu1  ;;  %v13427_v7 = vld [vmem:[#allocation52_spill] sm:$0xff] }
 0xb76   : > { %v5854_v3 = vadd.f32 %v5853_v33, %v5630_v5 }
 0xb77   : > { %v6342_v43 = vrot.slane %v6157_v6, 1 }
 0xb79   : > { %v6343_v46 = vsel %vm2484_vm0, %v6340_v49, %v6342_v43 }
 0xb7a   : > { %v12193_v42 = vadd.f32 %v6343_v46, %v13424_v14  ;;  %v13429_v46 = vld [vmem:[#allocation27_spill] sm:$0xff] }
 0xb7b   : > { %v7041_v16 = vpop.f32.mrf.mxu2 }
 0xb7c   : > { %13425 = vst [vmem:[#allocation69_spill] sm:$0xff] %v12193_v42  ;;  %v6083_v58 = vpop.f32.mrf.mxu3 }
 0xb7d   : > { %v6158_v52 = vadd.f32 %v6083_v58, %v5844_v13  ;;  %v5633_v11 = vpop.f32.mrf.mxu1 }
 0xb7e   : > { %v13431_v11 = vld [vmem:[#allocation29_spill] sm:$0xff] }
 0xb7f   : > { %v6344_v48 = vrot.slane %v6158_v52, 1 }
 0xb80   : > { %6831 = vmatmul.bf16.gmra.mxu1 %v11217_v61  ;;  %7082 = vmatmul.bf16.gmra.mxu2 %v13426_v36 }
 0xb81   : > { %v6345_v37 = vsel %vm2484_vm0, %v6342_v43, %v6344_v48 }
 0xb82   : > { %v12199_v22 = vadd.f32 %v6345_v37, %v13427_v7 }
 0xb83   : > { %v7043_v33 = vpop.f32.mrf.mxu2 }
 0xb84   : > { %13428 = vst [vmem:[#allocation18_spill] sm:$0xff] %v12199_v22  ;;  %v6086_v47 = vpop.f32.mrf.mxu3 }
 0xb85   : > { %v6159_v49 = vadd.f32 %v6086_v47, %v5847_v50  ;;  %v5634_v55 = vpop.f32.mrf.mxu1 }
 0xb87   : > { %v6346_v6 = vrot.slane %v6159_v49, 1 }
 0xb89   : > { %v6347_v5 = vsel %vm2484_vm0, %v6344_v48, %v6346_v6 }
 0xb8a   : > { %v12203_v13 = vadd.f32 %v6347_v5, %v13429_v46  ;;  %v13433_v5 = vld [vmem:[#allocation31_spill] sm:$0xff] }
 0xb8b   : > { %v7045_v14 = vpop.f32.mrf.mxu2 }
 0xb8c   : > { %13430 = vst [vmem:[#allocation59_spill] sm:$0xff] %v12203_v13  ;;  %v6088_v16 = vpop.f32.mrf.mxu3 }
 0xb8d   : > { %v6160_v61 = vadd.f32 %v6088_v16, %v5849_v25  ;;  %v6799_v58 = vpop.f32.mrf.mxu1 }
 0xb8e   : > { %v13436_v58 = vld [vmem:[#allocation13_spill] sm:$0xff] }
 0xb8f   : > { %v6348_v52 = vrot.slane %v6160_v61, 1  ;;  %v13435_v61 = vld [vmem:[#allocation63_spill] sm:$0xff] }
 0xb90   : > { %6836 = vmatmul.bf16.gmra.mxu1 %v11151_v38  ;;  %7087 = vmatmul.bf16.gmra.mxu2 %v11151_v38 }
 0xb91   : > { %v6349_v43 = vsel %vm2484_vm0, %v6346_v6, %v6348_v52  ;;  %v4908_v6 = vadd.f32 %v13436_v58, %v13435_v61  ;;  %v13443_v61 = vld [vmem:[#allocation72_spill] sm:$0xff] }
 0xb92   : > { %v12209_v50 = vadd.f32 %v6349_v43, %v13431_v11  ;;  %v13437_v11 = vld [vmem:[#allocation30_spill] sm:$0xff]  ;;  %v13444_v58 = vrot.slane %v13443_v61, 1 }
 0xb93   : > { %v7048_v37 = vpop.f32.mrf.mxu2 }
 0xb94   : > { %13432 = vst [vmem:[#allocation60_spill] sm:$0xff] %v12209_v50  ;;  %v6091_v7 = vpop.f32.mrf.mxu3 }
 0xb95   : > { %v6161_v48 = vadd.f32 %v6091_v7, %v5852_v62  ;;  %v6800_v47 = vpop.f32.mrf.mxu1 }
 0xb96   : > { %v13439_v47 = vld [vmem:[#allocation35_spill] sm:$0xff] }
 0xb97   : > { %v6350_v49 = vrot.slane %v6161_v48, 1 }
 0xb99   : > { %v6351_v55 = vsel %vm2484_vm0, %v6348_v52, %v6350_v49  ;;  %v13438_v52 = vld [vmem:[#allocation40_spill] sm:$0xff] }
 0xb9a   : > { %v12213_v25 = vadd.f32 %v6351_v55, %v13433_v5  ;;  %v5314_v7 = vadd.f32 %v13438_v52, %v4908_v6  ;;  %v13441_v5 = vld [vmem:[#allocation12_spill] sm:$0xff]  ;;  %v13445_v6 = vld [vmem:[#allocation49_spill] sm:$0xff] }
 0xb9b   : > { %v12215_v46 = vpop.f32.mrf.mxu2 }
 0xb9c   : > { %13434 = vst [vmem:[#allocation61_spill] sm:$0xff] %v12213_v25  ;;  %v6093_v16 = vpop.f32.mrf.mxu3 }
 0xb9d   : > { %v6162_v13 = vadd.f32 %v6093_v16, %v5854_v3  ;;  %v6802_v43 = vpop.f32.mrf.mxu1  ;;  %v306_v3 = vld [vmem:[%s10055_s11 + $0x20] sm:$0xff]  }
 0xb9e   : > { %v6803_v50 = vadd.f32 %v6802_v43, %v13437_v11  ;;  %v7596_v43 = vunpack.c.l.bf16 %v306_v3  ;;  %v7597_v52 = vunpack.c.h.bf16 %v306_v3  ;;  %v13446_v3 = vld [vmem:[#allocation50_spill] sm:$0xff] }
 0xb9f   : > { %v6352_v22 = vrot.slane %v6162_v13, 1 }
 0xba0   : > { %v7207_v62 = vadd.f32 %v7043_v33, %v6803_v50  ;;  %6841 = vmatmul.bf16.gmra.mxu1 %v13410_v34  ;;  %7092 = vmatmul.bf16.gmra.mxu2 %v11322_v27  ;;  %v6419_v33 = vadd.f32 %v13444_v58, %v5314_v7  ;;  %v7796_v7 = vrot.slane %v7597_v52, 2  ;;  %v308_v58 = vld [vmem:[%s10055_s11 + $0x28] sm:$0xff]  }
 0xba1   : > { %v6353_v48 = vsel %vm2484_vm0, %v6350_v49, %v6352_v22  ;;  %v12225_v55 = vadd.f32 %v6352_v22, %v13439_v47  ;;  %v12238_v49 = vld [vmem:[%s13045_s4] ss:$0 sm:$0xff]  ;;  %v7795_v47 = vrot.slane %v7596_v43, 2 }
 0xba2   : > { %v12228_v25 = vadd.f32 %v6353_v48, %v13441_v5  ;;  %v7337_v16 = vrot.slane %v7207_v62, 2 }
 0xba3   : > { %13440 = vst [vmem:[#allocation33_spill] sm:$0xff] %v12225_v55  ;;  %v12233_v13 = vpop.f32.mrf.mxu2 }
 0xba4   : > { %13442 = vst [vmem:[#allocation20_spill] sm:$0xff] %v12228_v25  ;;  %v6096_v34 = vpop.f32.mrf.mxu3  ;;  %v7531_v50 = vadd.f32 %v7337_v16, %v6419_v33 }
 0xba5   : > { %v6804_v22 = vpop.f32.mrf.mxu1 }
 0xba6   : > { %v6805_v11 = vadd.f32 %v6804_v22, %v13445_v6  ;;  %v7665_v62 = vadd.f32 %v12238_v49, %v7531_v50  ;;  %v7797_v22 = vsel %vm3739_vm1, %v7795_v47, %v7796_v7  ;;  %v7598_v6 = vunpack.c.l.bf16 %v308_v58 }
 0xba8   : > { %v7208_v48 = vadd.f32 %v7045_v14, %v6805_v11  ;;  %v7989_v55 = vadd.f32 %v7795_v47, %v7665_v62 }
 0xbaa   : > { %v7338_v5 = vrot.slane %v7208_v48, 2  ;;  %v8054_v11 = vmax.f32 %v7989_v55, 0.0  ;;  %v7798_v48 = vrot.slane %v7598_v6, 2 }
 0xbab   : > { %v12242_v61 = vpop.f32.mrf.mxu2 }
 0xbac   : > { %v7339_v33 = vsel %vm3739_vm1, %v7337_v16, %v7338_v5  ;;  %v6097_v34 = vpop.f32.mrf.mxu3 }
 0xbad   : > { %v7532_v25 = vadd.f32 %v7339_v33, %v11818_v54  ;;  %v6807_v42 = vpop.f32.mrf.mxu1  ;;  %v7799_v34 = vsel %vm3739_vm1, %v7796_v7, %v7798_v48  ;;  %v310_v7 = vld [vmem:[%s10055_s11 + $0x30] sm:$0xff]  }
 0xbae   : > { %v6808_v14 = vadd.f32 %v6807_v42, %v13446_v3  ;;  %v8185_v42 = vrot.slane %v8054_v11, 7  ;;  %v13447_v3 = vld [vmem:[#allocation25_spill] sm:$0xff]  ;;  %v7600_v4 = vunpack.c.l.bf16 %v310_v7 }
 0xbaf   : > { %v7666_v50 = vadd.f32 %v12238_v49, %v7532_v25 }
 0xbb0   : > { %v7209_v43 = vadd.f32 %v7048_v37, %v6808_v14  ;;  %6846 = vmatmul.bf16.gmra.mxu1 %v11151_v38  ;;  %7097 = vmatmul.bf16.gmra.mxu2 %v11151_v38 }
 0xbb1   : > { %v7990_v52 = vadd.f32 %v7797_v22, %v7666_v50  ;;  %v7599_v22 = vunpack.c.h.bf16 %v308_v58 }
 0xbb2   : > { %v7340_v16 = vrot.slane %v7209_v43, 2 }
 0xbb3   : > { %v8055_v62 = vmax.f32 %v7990_v52, 0.0  ;;  %v12253_v54 = vpop.f32.mrf.mxu2 }
 0xbb4   : > { %v7341_v47 = vsel %vm3739_vm1, %v7338_v5, %v7340_v16 }
 0xbb5   : > { %v8186_v33 = vrot.slane %v8055_v62, 7  ;;  %v7533_v37 = vadd.f32 %v7341_v47, %v11824_v57  ;;  %v6809_v25 = vpop.f32.mrf.mxu1  ;;  %v7800_v57 = vrot.slane %v7599_v22, 2  ;;  %v13448_v47 = vld [vmem:[#allocation76_spill] sm:$0xff] }
 0xbb6   : > { %v6810_v55 = vadd.f32 %v6809_v25, %v13447_v3  ;;  %v13449_v3 = vld [vmem:[#allocation51_spill] sm:$0xff] }
 0xbb7   : > { %v8187_v14 = vsel %vm8184_vm2, %v8185_v42, %v8186_v33  ;;  %v7667_v6 = vadd.f32 %v12238_v49, %v7533_v37  ;;  %v7801_v25 = vsel %vm3739_vm1, %v7798_v48, %v7800_v57 }
 0xbb8   : > { %8378 = vst [vmem:[%s12261_s7] sm:$0xff] %v8187_v14  ;;  %v7210_v5 = vadd.f32 %v12215_v46, %v6810_v55 }
 0xbb9   : > { %v7991_v50 = vadd.f32 %v7799_v34, %v7667_v6  ;;  %v7802_v6 = vrot.slane %v7600_v4, 2 }
 0xbba   : > { %v7342_v43 = vrot.slane %v7210_v5, 2 }
 0xbbb   : > { %v8056_v11 = vmax.f32 %v7991_v50, 0.0  ;;  %v12265_v52 = vpop.f32.mrf.mxu2 }
 0xbbc   : > { %v7343_v58 = vsel %vm3739_vm1, %v7340_v16, %v7342_v43 }
 0xbbd   : > { %v8188_v62 = vrot.slane %v8056_v11, 7  ;;  %v7534_v42 = vadd.f32 %v7343_v58, %v13448_v47  ;;  %v6812_v37 = vpop.f32.mrf.mxu1  ;;  %v13450_v11 = vld [vmem:[#allocation77_spill] sm:$0xff] }
 0xbbe   : > { %v6813_v14 = vadd.f32 %v6812_v37, %v13449_v3  ;;  %v7601_v37 = vunpack.c.h.bf16 %v310_v7 }
 0xbbf   : > { %v8189_v46 = vsel %vm8184_vm2, %v8186_v33, %v8188_v62  ;;  %v7668_v34 = vadd.f32 %v12238_v49, %v7534_v42  ;;  %v13451_v42 = vld [vmem:[#allocation62_spill] sm:$0xff] }
 0xbc0   : > { %8379 = vst [vmem:[%s12261_s7 + $0x8] sm:$0xff] %v8189_v46  ;;  %v7211_v55 = vadd.f32 %v12233_v13, %v6813_v14  ;;  %6851 = vmatmul.bf16.gmra.mxu1 %v13419_v60  ;;  %7102 = vmatmul.bf16.gmra.mxu2 %v11360_v56  ;;  %v7803_v13 = vsel %vm3739_vm1, %v7800_v57, %v7802_v6  ;;  %v7804_v46 = vrot.slane %v7601_v37, 2 }
 0xbc1   : > { %v7992_v16 = vadd.f32 %v7801_v25, %v7668_v34 }
 0xbc2   : > { %v7344_v22 = vrot.slane %v7211_v55, 2 }
 0xbc3   : > { %v8057_v5 = vmax.f32 %v7992_v16, 0.0  ;;  %v12278_v48 = vpop.f32.mrf.mxu2  ;;  %v312_v16 = vld [vmem:[%s10055_s11 + $0x38] sm:$0xff]  }
 0xbc4   : > { %v7345_v50 = vsel %vm3739_vm1, %v7342_v43, %v7344_v22 }
 0xbc5   : > { %v8190_v33 = vrot.slane %v8057_v5, 7  ;;  %v7535_v58 = vadd.f32 %v7345_v50, %v13450_v11  ;;  %v6814_v47 = vpop.f32.mrf.mxu1  ;;  %v13452_v50 = vld [vmem:[#allocation41_spill] sm:$0xff] }
 0xbc6   : > { %v6815_v60 = vadd.f32 %v6814_v47, %v13451_v42  ;;  %v7602_v42 = vunpack.c.l.bf16 %v312_v16 }
 0xbc7   : > { %v8191_v3 = vsel %vm8184_vm2, %v8188_v62, %v8190_v33  ;;  %v7669_v25 = vadd.f32 %v12238_v49, %v7535_v58  ;;  %v7805_v62 = vsel %vm3739_vm1, %v7802_v6, %v7804_v46  ;;  %v13453_v58 = vld [vmem:[#allocation55_spill] sm:$0xff] }
 0xbc8   : > { %8380 = vst [vmem:[%s12261_s7 + $0x10] sm:$0xff] %v8191_v3  ;;  %v7212_v4 = vadd.f32 %v12242_v61, %v6815_v60  ;;  %v7806_v3 = vrot.slane %v7602_v42, 2 }
 0xbc9   : > { %v7993_v14 = vadd.f32 %v7803_v13, %v7669_v25 }
 0xbca   : > { %v7346_v43 = vrot.slane %v7212_v4, 2 }
 0xbcb   : > { %v8058_v34 = vmax.f32 %v7993_v14, 0.0  ;;  %v12288_v55 = vpop.f32.mrf.mxu2  ;;  %v13454_v14 = vld [vmem:[#allocation16_spill] sm:$0xff] }
 0xbcc   : > { %v7347_v57 = vsel %vm3739_vm1, %v7344_v22, %v7346_v43 }
 0xbcd   : > { %v8192_v5 = vrot.slane %v8058_v34, 7  ;;  %v7536_v7 = vadd.f32 %v7347_v57, %v13452_v50  ;;  %v6817_v11 = vpop.f32.mrf.mxu1  ;;  %v13455_v50 = vld [vmem:[#allocation58_spill] sm:$0xff] }
 0xbce   : > { %v6818_v47 = vadd.f32 %v6817_v11, %v13453_v58  ;;  %v7603_v11 = vunpack.c.h.bf16 %v312_v16 }
 0xbcf   : > { %v8193_v61 = vsel %vm8184_vm2, %v8190_v33, %v8192_v5  ;;  %v7670_v13 = vadd.f32 %v12238_v49, %v7536_v7 }
 0xbd0   : > { %8381 = vst [vmem:[%s12261_s7 + $0x18] sm:$0xff] %v8193_v61  ;;  %v7213_v60 = vadd.f32 %v12253_v54, %v6818_v47  ;;  %6856 = vmatmul.bf16.gmra.mxu1 %v11151_v38  ;;  %7107 = vmatmul.bf16.gmra.mxu2 %v11151_v38  ;;  %v7807_v54 = vsel %vm3739_vm1, %v7804_v46, %v7806_v3  ;;  %v7808_v61 = vrot.slane %v7603_v11, 2 }
 0xbd1   : > { %v7994_v22 = vadd.f32 %v7805_v62, %v7670_v13 }
 0xbd2   : > { %v7348_v37 = vrot.slane %v7213_v60, 2 }
 0xbd3   : > { %v8059_v25 = vmax.f32 %v7994_v22, 0.0  ;;  %v12301_v6 = vpop.f32.mrf.mxu2  ;;  %v314_v22 = vld [vmem:[%s10055_s11 + $0x40] sm:$0xff]  }
 0xbd4   : > { %v7349_v4 = vsel %vm3739_vm1, %v7346_v43, %v7348_v37 }
 0xbd5   : > { %v8194_v33 = vrot.slane %v8059_v25, 7  ;;  %v7537_v34 = vadd.f32 %v7349_v4, %v13454_v14  ;;  %v6819_v57 = vpop.f32.mrf.mxu1  ;;  %v13456_v4 = vld [vmem:[#allocation38_spill] sm:$0xff] }
 0xbd6   : > { %v6820_v7 = vadd.f32 %v6819_v57, %v13455_v50  ;;  %v7604_v50 = vunpack.c.l.bf16 %v314_v22 }
 0xbd7   : > { %v8195_v58 = vsel %vm8184_vm2, %v8192_v5, %v8194_v33  ;;  %v7671_v62 = vadd.f32 %v12238_v49, %v7537_v34  ;;  %v7809_v5 = vsel %vm3739_vm1, %v7806_v3, %v7808_v61  ;;  %v13457_v34 = vld [vmem:[#allocation32_spill] sm:$0xff] }
 0xbd8   : > { %8382 = vst [vmem:[%s12261_s7 + $0x20] sm:$0xff] %v8195_v58  ;;  %v7214_v47 = vadd.f32 %v12265_v52, %v6820_v7  ;;  %v7810_v58 = vrot.slane %v7604_v50, 2 }
 0xbd9   : > { %v7995_v42 = vadd.f32 %v7807_v54, %v7671_v62 }
 0xbda   : > { %v7350_v43 = vrot.slane %v7214_v47, 2 }
 0xbdb   : > { %v8060_v13 = vmax.f32 %v7995_v42, 0.0  ;;  %v12311_v60 = vpop.f32.mrf.mxu2 }
 0xbdc   : > { %v7351_v46 = vsel %vm3739_vm1, %v7348_v37, %v7350_v43 }
 0xbdd   : > { %v8196_v25 = vrot.slane %v8060_v13, 7  ;;  %v7538_v16 = vadd.f32 %v7351_v46, %v13456_v4  ;;  %v6822_v14 = vpop.f32.mrf.mxu1  ;;  %v13458_v46 = vld [vmem:[#allocation14_spill] sm:$0xff]  ;;  %v7605_v4 = vunpack.c.h.bf16 %v314_v22 }
 0xbde   : > { %v6823_v57 = vadd.f32 %v6822_v14, %v13457_v34 }
 0xbdf   : > { %v8197_v52 = vsel %vm8184_vm2, %v8194_v33, %v8196_v25  ;;  %v7672_v54 = vadd.f32 %v12238_v49, %v7538_v16 }
 0xbe0   : > { %8383 = vst [vmem:[%s12261_s7 + $0x28] sm:$0xff] %v8197_v52  ;;  %v7215_v7 = vadd.f32 %v12278_v48, %v6823_v57  ;;  %6861 = vmatmul.bf16.gmra.mxu1 %v13426_v36  ;;  %7112 = vmatmul.bf16.gmra.mxu2 %v11395_v53  ;;  %v7811_v48 = vsel %vm3739_vm1, %v7808_v61, %v7810_v58  ;;  %v7812_v57 = vrot.slane %v7605_v4, 2 }
 0xbe1   : > { %v7996_v37 = vadd.f32 %v7809_v5, %v7672_v54 }
 0xbe2   : > { %v7352_v11 = vrot.slane %v7215_v7, 2  ;;  %v13459_v7 = vld [vmem:[#allocation64_spill] sm:$0xff] }
 0xbe3   : > { %v8061_v62 = vmax.f32 %v7996_v37, 0.0  ;;  %v12324_v3 = vpop.f32.mrf.mxu2 }
 0xbe4   : > { %v7353_v47 = vsel %vm3739_vm1, %v7350_v43, %v7352_v11 }
 0xbe5   : > { %v8198_v33 = vrot.slane %v8061_v62, 7  ;;  %v7539_v42 = vadd.f32 %v7353_v47, %v11870_v9  ;;  %v6824_v13 = vpop.f32.mrf.mxu1  ;;  %v316_v9 = vld [vmem:[%s10055_s11 + $0x48] sm:$0xff]   ;;  %v13460_v62 = vld [vmem:[#allocation15_spill] sm:$0xff] }
 0xbe6   : > { %v6825_v36 = vadd.f32 %v6824_v13, %v13458_v46 }
 0xbe7   : > { %v8199_v16 = vsel %vm8184_vm2, %v8196_v25, %v8198_v33  ;;  %v7673_v14 = vadd.f32 %v12238_v49, %v7539_v42  ;;  %v7813_v25 = vsel %vm3739_vm1, %v7810_v58, %v7812_v57  ;;  %v7606_v42 = vunpack.c.l.bf16 %v316_v9 }
 0xbe8   : > { %8384 = vst [vmem:[%s12261_s7 + $0x30] sm:$0xff] %v8199_v16  ;;  %v7216_v5 = vadd.f32 %v12288_v55, %v6825_v36 }
 0xbe9   : > { %v7997_v34 = vadd.f32 %v7811_v48, %v7673_v14  ;;  %v7814_v36 = vrot.slane %v7606_v42, 2  ;;  %v13461_v14 = vld [vmem:[#allocation44_spill] sm:$0xff] }
 0xbea   : > { %v7354_v43 = vrot.slane %v7216_v5, 2 }
 0xbeb   : > { %v8062_v50 = vmax.f32 %v7997_v34, 0.0  ;;  %v12334_v52 = vpop.f32.mrf.mxu2 }
 0xbec   : > { %v7355_v61 = vsel %vm3739_vm1, %v7352_v11, %v7354_v43 }
 0xbed   : > { %v8200_v54 = vrot.slane %v8062_v50, 7  ;;  %v7540_v22 = vadd.f32 %v7355_v61, %v13459_v7  ;;  %v6827_v37 = vpop.f32.mrf.mxu1  ;;  %v13462_v50 = vld [vmem:[#allocation36_spill] sm:$0xff]  ;;  %v7607_v7 = vunpack.c.h.bf16 %v316_v9 }
 0xbee   : > { %v6828_v47 = vadd.f32 %v6827_v37, %v13460_v62 }
 0xbef   : > { %v8201_v55 = vsel %vm8184_vm2, %v8198_v33, %v8200_v54  ;;  %v7674_v13 = vadd.f32 %v12238_v49, %v7540_v22 }
 0xbf0   : > { %8385 = vst [vmem:[%s12261_s7 + $0x38] sm:$0xff] %v8201_v55  ;;  %v7217_v48 = vadd.f32 %v12301_v6, %v6828_v47  ;;  %6866 = vmatmul.bf16.gmra.mxu1 %v11151_v38  ;;  %7117 = vmatmul.bf16.gmra.mxu2 %v11151_v38  ;;  %v7815_v6 = vsel %vm3739_vm1, %v7812_v57, %v7814_v36  ;;  %v7816_v47 = vrot.slane %v7607_v7, 2 }
 0xbf1   : > { %v7998_v11 = vadd.f32 %v7813_v25, %v7674_v13  ;;  %v318_v13 = vld [vmem:[%s10055_s11 + $0x50] sm:$0xff]  }
 0xbf2   : > { %v7356_v46 = vrot.slane %v7217_v48, 2 }
 0xbf3   : > { %v8063_v4 = vmax.f32 %v7998_v11, 0.0  ;;  %v12347_v58 = vpop.f32.mrf.mxu2  ;;  %v13463_v11 = vld [vmem:[#allocation83_spill] sm:$0xff] }
 0xbf4   : > { %v7357_v16 = vsel %vm3739_vm1, %v7354_v43, %v7356_v46 }
 0xbf5   : > { %v8202_v33 = vrot.slane %v8063_v4, 7  ;;  %v7541_v5 = vadd.f32 %v7357_v16, %v13461_v14  ;;  %v6829_v34 = vpop.f32.mrf.mxu1  ;;  %v13464_v16 = vld [vmem:[#allocation17_spill] sm:$0xff] }
 0xbf6   : > { %v6830_v61 = vadd.f32 %v6829_v34, %v13462_v50 }
 0xbf7   : > { %v8203_v22 = vsel %vm8184_vm2, %v8200_v54, %v8202_v33  ;;  %v7675_v37 = vadd.f32 %v12238_v49, %v7541_v5  ;;  %v7817_v54 = vsel %vm3739_vm1, %v7814_v36, %v7816_v47  ;;  %v7608_v5 = vunpack.c.l.bf16 %v318_v13 }
 0xbf8   : > { %8386 = vst [vmem:[%s12261_s7 + $0x40] sm:$0xff] %v8203_v22  ;;  %v7218_v25 = vadd.f32 %v12311_v60, %v6830_v61 }
 0xbf9   : > { %v7999_v62 = vadd.f32 %v7815_v6, %v7675_v37  ;;  %v7818_v61 = vrot.slane %v7608_v5, 2  ;;  %v13465_v37 = vld [vmem:[#allocation23_spill] sm:$0xff] }
 0xbfa   : > { %v7358_v43 = vrot.slane %v7218_v25, 2 }
 0xbfb   : > { %v8064_v42 = vmax.f32 %v7999_v62, 0.0  ;;  %v12357_v55 = vpop.f32.mrf.mxu2 }
 0xbfc   : > { %v7359_v57 = vsel %vm3739_vm1, %v7356_v46, %v7358_v43 }
 0xbfd   : > { %v8204_v48 = vrot.slane %v8064_v42, 7  ;;  %v7542_v9 = vadd.f32 %v7359_v57, %v13463_v11  ;;  %v6832_v4 = vpop.f32.mrf.mxu1  ;;  %v13466_v42 = vld [vmem:[#allocation70_spill] sm:$0xff]  ;;  %v7609_v57 = vunpack.c.h.bf16 %v318_v13 }
 0xbfe   : > { %v6833_v14 = vadd.f32 %v6832_v4, %v13464_v16 }
 0xbff   : > { %v8205_v60 = vsel %vm8184_vm2, %v8202_v33, %v8204_v48  ;;  %v7676_v34 = vadd.f32 %v12238_v49, %v7542_v9  ;;  %v7820_v16 = vrot.slane %v7609_v57, 2 }
 0xc00   : > { %8387 = vst [vmem:[%s12261_s7 + $0x48] sm:$0xff] %v8205_v60  ;;  %v7219_v6 = vadd.f32 %v12324_v3, %v6833_v14  ;;  %6871 = vmatmul.bf16.gmra.mxu1 %v11322_v27  ;;  %7122 = vmatmul.bf16.gmra.mxu2 %v11432_v12  ;;  %v7819_v3 = vsel %vm3739_vm1, %v7816_v47, %v7818_v61  ;;  %v320_v60 = vld [vmem:[%s10055_s11 + $0x58] sm:$0xff]  }
 0xc01   : > { %v8000_v46 = vadd.f32 %v7817_v54, %v7676_v34 }
 0xc02   : > { %v7360_v50 = vrot.slane %v7219_v6, 2 }
 0xc03   : > { %v8065_v7 = vmax.f32 %v8000_v46, 0.0  ;;  %v12370_v36 = vpop.f32.mrf.mxu2  ;;  %v13467_v46 = vld [vmem:[#allocation71_spill] sm:$0xff] }
 0xc04   : > { %v7361_v22 = vsel %vm3739_vm1, %v7358_v43, %v7360_v50 }
 0xc05   : > { %v8206_v33 = vrot.slane %v8065_v7, 7  ;;  %v7543_v25 = vadd.f32 %v7361_v22, %v13465_v37  ;;  %v6834_v62 = vpop.f32.mrf.mxu1  ;;  %v7610_v22 = vunpack.c.l.bf16 %v320_v60 }
 0xc06   : > { %v6835_v27 = vadd.f32 %v6834_v62, %v13466_v42 }
 0xc07   : > { %v8207_v11 = vsel %vm8184_vm2, %v8204_v48, %v8206_v33  ;;  %v7677_v9 = vadd.f32 %v12238_v49, %v7543_v25  ;;  %v7821_v48 = vsel %vm3739_vm1, %v7818_v61, %v7820_v16  ;;  %v7822_v62 = vrot.slane %v7610_v22, 2  ;;  %v13469_v22 = vld [vmem:[#allocation19_spill] sm:$0xff] }
 0xc08   : > { %8388 = vst [vmem:[%s12261_s7 + $0x50] sm:$0xff] %v8207_v11  ;;  %v7220_v4 = vadd.f32 %v12334_v52, %v6835_v27  ;;  %v13468_v11 = vld [vmem:[#allocation73_spill] sm:$0xff] }
 0xc09   : > { %v8001_v54 = vadd.f32 %v7819_v3, %v7677_v9 }
 0xc0a   : > { %v7362_v43 = vrot.slane %v7220_v4, 2  ;;  %v7611_v4 = vunpack.c.h.bf16 %v320_v60 }
 0xc0b   : > { %v8066_v14 = vmax.f32 %v8001_v54, 0.0  ;;  %v12380_v5 = vpop.f32.mrf.mxu2 }
 0xc0c   : > { %v7363_v47 = vsel %vm3739_vm1, %v7360_v50, %v7362_v43 }
 0xc0d   : > { %v8208_v34 = vrot.slane %v8066_v14, 7  ;;  %v7544_v13 = vadd.f32 %v7363_v47, %v11910_v8  ;;  %v6837_v6 = vpop.f32.mrf.mxu1 }
 0xc0e   : > { %v6838_v7 = vadd.f32 %v6837_v6, %v13467_v46  ;;  %v7824_v6 = vrot.slane %v7611_v4, 2 }
 0xc0f   : > { %v8209_v52 = vsel %vm8184_vm2, %v8206_v33, %v8208_v34  ;;  %v7678_v37 = vadd.f32 %v12238_v49, %v7544_v13 }
 0xc10   : > { %8389 = vst [vmem:[%s12261_s7 + $0x58] sm:$0xff] %v8209_v52  ;;  %v7221_v25 = vadd.f32 %v12347_v58, %v6838_v7  ;;  %6876 = vmatmul.bf16.gmra.mxu1 %v11151_v38  ;;  %7127 = vmatmul.bf16.gmra.mxu2 %v11151_v38  ;;  %v7823_v58 = vsel %vm3739_vm1, %v7820_v16, %v7822_v62 }
 0xc11   : > { %v8002_v50 = vadd.f32 %v7821_v48, %v7678_v37  ;;  %v13470_v37 = vld [vmem:[#allocation74_spill] sm:$0xff] }
 0xc12   : > { %v7364_v8 = vrot.slane %v7221_v25, 2 }
 0xc13   : > { %v8067_v3 = vmax.f32 %v8002_v50, 0.0  ;;  %v12393_v61 = vpop.f32.mrf.mxu2 }
 0xc14   : > { %v7365_v42 = vsel %vm3739_vm1, %v7362_v43, %v7364_v8 }
 0xc15   : > { %v8210_v33 = vrot.slane %v8067_v3, 7  ;;  %v7545_v27 = vadd.f32 %v7365_v42, %v11914_v28  ;;  %v6839_v57 = vpop.f32.mrf.mxu1  ;;  %v322_v28 = vld [vmem:[%s10055_s11 + $0x60] sm:$0xff]  }
 0xc16   : > { %v6840_v9 = vadd.f32 %v6839_v57, %v13468_v11  ;;  %v7612_v50 = vunpack.c.l.bf16 %v322_v28 }
 0xc17   : > { %v8211_v54 = vsel %vm8184_vm2, %v8208_v34, %v8210_v33  ;;  %v7679_v14 = vadd.f32 %v12238_v49, %v7545_v27  ;;  %v7825_v34 = vsel %vm3739_vm1, %v7822_v62, %v7824_v6 }
 0xc18   : > { %8390 = vst [vmem:[%s12261_s7 + $0x60] sm:$0xff] %v8211_v54  ;;  %v7222_v47 = vadd.f32 %v12357_v55, %v6840_v9  ;;  %v7826_v57 = vrot.slane %v7612_v50, 2  ;;  %v13471_v54 = vld [vmem:[#allocation75_spill] sm:$0xff] }
 0xc19   : > { %v8003_v13 = vadd.f32 %v7823_v58, %v7679_v14  ;;  %v7613_v14 = vunpack.c.h.bf16 %v322_v28 }
 0xc1a   : > { %v7366_v43 = vrot.slane %v7222_v47, 2 }
 0xc1b   : > { %v8068_v48 = vmax.f32 %v8003_v13, 0.0  ;;  %v12403_v46 = vpop.f32.mrf.mxu2 }
 0xc1c   : > { %v7367_v16 = vsel %vm3739_vm1, %v7364_v8, %v7366_v43 }
 0xc1d   : > { %v8212_v7 = vrot.slane %v8068_v48, 7  ;;  %v7546_v60 = vadd.f32 %v7367_v16, %v13469_v22  ;;  %v6842_v52 = vpop.f32.mrf.mxu1  ;;  %v7828_v22 = vrot.slane %v7613_v14, 2 }
 0xc1e   : > { %v6843_v25 = vadd.f32 %v6842_v52, %v13470_v37 }
 0xc1f   : > { %v8213_v55 = vsel %vm8184_vm2, %v8210_v33, %v8212_v7  ;;  %v7680_v3 = vadd.f32 %v12238_v49, %v7546_v60 }
 0xc20   : > { %8391 = vst [vmem:[%s12261_s7 + $0x68] sm:$0xff] %v8213_v55  ;;  %v7223_v42 = vadd.f32 %v12370_v36, %v6843_v25  ;;  %6881 = vmatmul.bf16.gmra.mxu1 %v11360_v56  ;;  %7132 = vmatmul.bf16.gmra.mxu2 %v11471_v44  ;;  %v7827_v36 = vsel %vm3739_vm1, %v7824_v6, %v7826_v57  ;;  %v13472_v25 = vld [vmem:[#allocation78_spill] sm:$0xff] }
 0xc21   : > { %v8004_v8 = vadd.f32 %v7825_v34, %v7680_v3 }
 0xc22   : > { %v7368_v27 = vrot.slane %v7223_v42, 2 }
 0xc23   : > { %v8069_v58 = vmax.f32 %v8004_v8, 0.0  ;;  %v12416_v62 = vpop.f32.mrf.mxu2 }
 0xc24   : > { %v7369_v11 = vsel %vm3739_vm1, %v7366_v43, %v7368_v27 }
 0xc25   : > { %v8214_v33 = vrot.slane %v8069_v58, 7  ;;  %v7547_v9 = vadd.f32 %v7369_v11, %v11930_v39  ;;  %v6844_v4 = vpop.f32.mrf.mxu1  ;;  %v324_v39 = vld [vmem:[%s10055_s11 + $0x68] sm:$0xff]  }
 0xc26   : > { %v6845_v56 = vadd.f32 %v6844_v4, %v13471_v54  ;;  %v7614_v55 = vunpack.c.l.bf16 %v324_v39 }
 0xc27   : > { %v8215_v47 = vsel %vm8184_vm2, %v8212_v7, %v8214_v33  ;;  %v7681_v13 = vadd.f32 %v12238_v49, %v7547_v9  ;;  %v7829_v7 = vsel %vm3739_vm1, %v7826_v57, %v7828_v22 }
 0xc28   : > { %8392 = vst [vmem:[%s12261_s7 + $0x70] sm:$0xff] %v8215_v47  ;;  %v7224_v48 = vadd.f32 %v12380_v5, %v6845_v56  ;;  %v7615_v56 = vunpack.c.h.bf16 %v324_v39 }
 0xc29   : > { %v8005_v16 = vadd.f32 %v7827_v36, %v7681_v13  ;;  %v13473_v36 = vld [vmem:[#allocation79_spill] sm:$0xff] }
 0xc2a   : > { %v7370_v43 = vrot.slane %v7224_v48, 2 }
 0xc2b   : > { %v8070_v60 = vmax.f32 %v8005_v16, 0.0  ;;  %v12426_v52 = vpop.f32.mrf.mxu2 }
 0xc2c   : > { %v7371_v6 = vsel %vm3739_vm1, %v7368_v27, %v7370_v43  ;;  %v7830_v27 = vrot.slane %v7614_v55, 2 }
 0xc2d   : > { %v8216_v34 = vrot.slane %v8070_v60, 7  ;;  %v7548_v28 = vadd.f32 %v7371_v6, %v11940_v35  ;;  %v6847_v37 = vpop.f32.mrf.mxu1 }
 0xc2e   : > { %v6848_v50 = vadd.f32 %v6847_v37, %v13472_v25  ;;  %v13474_v37 = vld [vmem:[#allocation43_spill] sm:$0xff]  ;;  %v13475_v25 = vld [vmem:[#allocation80_spill] sm:$0xff] }
 0xc2f   : > { %v8217_v5 = vsel %vm8184_vm2, %v8214_v33, %v8216_v34  ;;  %v7682_v3 = vadd.f32 %v12238_v49, %v7548_v28 }
 0xc30   : > { %8393 = vst [vmem:[%s12261_s7 + $0x78] sm:$0xff] %v8217_v5  ;;  %v7225_v42 = vadd.f32 %v12393_v61, %v6848_v50  ;;  %6886 = vmatmul.bf16.gmra.mxu1 %v11151_v38  ;;  %7137 = vmatmul.bf16.gmra.mxu2 %v11151_v38  ;;  %v7831_v61 = vsel %vm3739_vm1, %v7828_v22, %v7830_v27 }
 0xc31   : > { %v8006_v8 = vadd.f32 %v7829_v7, %v7682_v3 }
 0xc32   : > { %v7372_v35 = vrot.slane %v7225_v42, 2 }
 0xc33   : > { %v8071_v58 = vmax.f32 %v8006_v8, 0.0  ;;  %v12439_v57 = vpop.f32.mrf.mxu2 }
 0xc34   : > { %v7373_v11 = vsel %vm3739_vm1, %v7370_v43, %v7372_v35  ;;  %v7832_v43 = vrot.slane %v7615_v56, 2 }
 0xc35   : > { %v8218_v33 = vrot.slane %v8071_v58, 7  ;;  %v7549_v9 = vadd.f32 %v7373_v11, %v11946_v31  ;;  %v6849_v4 = vpop.f32.mrf.mxu1  ;;  %v326_v31 = vld [vmem:[%s10055_s11 + $0x70] sm:$0xff]  }
 0xc36   : > { %v6850_v54 = vadd.f32 %v6849_v4, %v13473_v36  ;;  %v7616_v55 = vunpack.c.l.bf16 %v326_v31  ;;  %v13477_v36 = vld [vmem:[#allocation81_spill] sm:$0xff] }
 0xc37   : > { %v8219_v14 = vsel %vm8184_vm2, %v8216_v34, %v8218_v33  ;;  %v7683_v47 = vadd.f32 %v12238_v49, %v7549_v9  ;;  %v7833_v34 = vsel %vm3739_vm1, %v7830_v27, %v7832_v43  ;;  %v13476_v9 = vld [vmem:[#allocation90_spill] sm:$0xff] }
 0xc38   : > { %8394 = vst [vmem:[%s12261_s7 + $0x80] sm:$0xff] %v8219_v14  ;;  %v7226_v13 = vadd.f32 %v12403_v46, %v6850_v54  ;;  %v7617_v54 = vunpack.c.h.bf16 %v326_v31 }
 0xc39   : > { %v8007_v48 = vadd.f32 %v7831_v61, %v7683_v47 }
 0xc3a   : > { %v7374_v16 = vrot.slane %v7226_v13, 2 }
 0xc3b   : > { %v8072_v60 = vmax.f32 %v8007_v48, 0.0  ;;  %v12449_v6 = vpop.f32.mrf.mxu2 }
 0xc3c   : > { %v7375_v22 = vsel %vm3739_vm1, %v7372_v35, %v7374_v16  ;;  %v7834_v35 = vrot.slane %v7616_v55, 2 }
 0xc3d   : > { %v8220_v28 = vrot.slane %v8072_v60, 7  ;;  %v7550_v39 = vadd.f32 %v7375_v22, %v13474_v37  ;;  %v6852_v7 = vpop.f32.mrf.mxu1  ;;  %v328_v37 = vld [vmem:[%s10055_s11 + $0x78] sm:$0xff]  }
 0xc3e   : > { %v6853_v50 = vadd.f32 %v6852_v7, %v13475_v25 }
 0xc3f   : > { %v8221_v46 = vsel %vm8184_vm2, %v8218_v33, %v8220_v28  ;;  %v7684_v5 = vadd.f32 %v12238_v49, %v7550_v39 }
 0xc40   : > { %8395 = vst [vmem:[%s12261_s7 + $0x88] sm:$0xff] %v8221_v46  ;;  %v7227_v3 = vadd.f32 %v12416_v62, %v6853_v50  ;;  %6891 = vmatmul.bf16.gmra.mxu1 %v11395_v53  ;;  %7142 = vmatmul.bf16.gmra.mxu2 %v11515_v17  ;;  %v7835_v62 = vsel %vm3739_vm1, %v7832_v43, %v7834_v35  ;;  %v7618_v50 = vunpack.c.l.bf16 %v328_v37 }
 0xc41   : > { %v8008_v42 = vadd.f32 %v7833_v34, %v7684_v5  ;;  %v13478_v34 = vld [vmem:[#allocation21_spill] sm:$0xff] }
 0xc42   : > { %v7376_v8 = vrot.slane %v7227_v3, 2  ;;  %v7838_v3 = vrot.slane %v7618_v50, 2 }
 0xc43   : > { %v8073_v58 = vmax.f32 %v8008_v42, 0.0  ;;  %v12462_v27 = vpop.f32.mrf.mxu2 }
 0xc44   : > { %v7377_v11 = vsel %vm3739_vm1, %v7374_v16, %v7376_v8  ;;  %v7836_v16 = vrot.slane %v7617_v54, 2 }
 0xc45   : > { %v8222_v33 = vrot.slane %v8073_v58, 7  ;;  %v7551_v4 = vadd.f32 %v7377_v11, %v13476_v9  ;;  %v6854_v61 = vpop.f32.mrf.mxu1  ;;  %v13479_v9 = vld [vmem:[#allocation82_spill] sm:$0xff] }
 0xc46   : > { %v6855_v53 = vadd.f32 %v6854_v61, %v13477_v36  ;;  %v7619_v61 = vunpack.c.h.bf16 %v328_v37 }
 0xc47   : > { %v8223_v56 = vsel %vm8184_vm2, %v8220_v28, %v8222_v33  ;;  %v7685_v14 = vadd.f32 %v12238_v49, %v7551_v4  ;;  %v7837_v28 = vsel %vm3739_vm1, %v7834_v35, %v7836_v16 }
 0xc48   : > { %8396 = vst [vmem:[%s12261_s7 + $0x90] sm:$0xff] %v8223_v56  ;;  %v7228_v47 = vadd.f32 %v12426_v52, %v6855_v53 }
 0xc49   : > { %v8009_v13 = vadd.f32 %v7835_v62, %v7685_v14  ;;  %v7840_v14 = vrot.slane %v7619_v61, 2 }
 0xc4a   : > { %v7378_v48 = vrot.slane %v7228_v47, 2 }
 0xc4b   : > { %v8074_v60 = vmax.f32 %v8009_v13, 0.0  ;;  %v12472_v22 = vpop.f32.mrf.mxu2 }
 0xc4c   : > { %v7379_v43 = vsel %vm3739_vm1, %v7376_v8, %v7378_v48 }
 0xc4d   : > { %v8224_v39 = vrot.slane %v8074_v60, 7  ;;  %v7552_v31 = vadd.f32 %v7379_v43, %v11970_v63  ;;  %v6857_v7 = vpop.f32.mrf.mxu1  ;;  %v13480_v60 = vld [vmem:[#allocation92_spill] sm:$0xff] }
 0xc4e   : > { %v6858_v25 = vadd.f32 %v6857_v7, %v13478_v34 }
 0xc4f   : > { %v8225_v52 = vsel %vm8184_vm2, %v8222_v33, %v8224_v39  ;;  %v7686_v55 = vadd.f32 %v12238_v49, %v7552_v31  ;;  %v13481_v31 = vld [vmem:[#allocation84_spill] sm:$0xff] }
 0xc50   : > { %8397 = vst [vmem:[%s12261_s7 + $0x98] sm:$0xff] %v8225_v52  ;;  %v7229_v46 = vadd.f32 %v12439_v57, %v6858_v25  ;;  %6896 = vmatmul.bf16.gmra.mxu1 %v11151_v38  ;;  %7147 = vmatmul.bf16.gmra.mxu2 %v11151_v38  ;;  %v7839_v57 = vsel %vm3739_vm1, %v7836_v16, %v7838_v3 }
 0xc51   : > { %v8010_v5 = vadd.f32 %v7837_v28, %v7686_v55 }
 0xc52   : > { %v7380_v63 = vrot.slane %v7229_v46, 2 }
 0xc53   : > { %v8075_v42 = vmax.f32 %v8010_v5, 0.0  ;;  %v12485_v8 = vpop.f32.mrf.mxu2 }
 0xc54   : > { %v7381_v35 = vsel %vm3739_vm1, %v7378_v48, %v7380_v63 }
 0xc55   : > { %v8226_v58 = vrot.slane %v8075_v42, 7  ;;  %v7553_v11 = vadd.f32 %v7381_v35, %v11976_v20  ;;  %v6859_v33 = vpop.f32.mrf.mxu1  ;;  %v330_v20 = vld [vmem:[%s10055_s11 + $0x80] sm:$0xff]   ;;  %v13482_v42 = vld [vmem:[#allocation47_spill] sm:$0xff] }
 0xc56   : > { %v6860_v4 = vadd.f32 %v6859_v33, %v13479_v9  ;;  %v7620_v28 = vunpack.c.l.bf16 %v330_v20  ;;  %v7621_v33 = vunpack.c.h.bf16 %v330_v20 }
 0xc57   : > { %v8227_v62 = vsel %vm8184_vm2, %v8224_v39, %v8226_v58  ;;  %v7687_v36 = vadd.f32 %v12238_v49, %v7553_v11  ;;  %v7841_v39 = vsel %vm3739_vm1, %v7838_v3, %v7840_v14  ;;  %v13483_v11 = vld [vmem:[#allocation85_spill] sm:$0xff] }
 0xc58   : > { %8398 = vst [vmem:[%s12261_s7 + $0xa0] sm:$0xff] %v8227_v62  ;;  %v7230_v53 = vadd.f32 %v12449_v6, %v6860_v4  ;;  %v7842_v55 = vrot.slane %v7620_v28, 2 }
 0xc59   : > { %v8011_v54 = vadd.f32 %v7839_v57, %v7687_v36  ;;  %v7844_v36 = vrot.slane %v7621_v33, 2 }
 0xc5a   : > { %v7382_v56 = vrot.slane %v7230_v53, 2 }
 0xc5b   : > { %v8076_v47 = vmax.f32 %v8011_v54, 0.0  ;;  %v12495_v13 = vpop.f32.mrf.mxu2 }
 0xc5c   : > { %v7383_v48 = vsel %vm3739_vm1, %v7380_v63, %v7382_v56 }
 0xc5d   : > { %v8228_v16 = vrot.slane %v8076_v47, 7  ;;  %v7554_v37 = vadd.f32 %v7383_v48, %v13480_v60  ;;  %v6862_v43 = vpop.f32.mrf.mxu1  ;;  %v13484_v60 = vld [vmem:[#allocation45_spill] sm:$0xff] }
 0xc5e   : > { %v6863_v7 = vadd.f32 %v6862_v43, %v13481_v31 }
 0xc5f   : > { %v8229_v6 = vsel %vm8184_vm2, %v8226_v58, %v8228_v16  ;;  %v7688_v34 = vadd.f32 %v12238_v49, %v7554_v37 }
 0xc60   : > { %8399 = vst [vmem:[%s12261_s7 + $0xa8] sm:$0xff] %v8229_v6  ;;  %v7231_v25 = vadd.f32 %v12462_v27, %v6863_v7  ;;  %6901 = vmatmul.bf16.gmra.mxu1 %v11432_v12  ;;  %7152 = vmatmul.bf16.gmra.mxu2 %v11554_v23  ;;  %v7843_v27 = vsel %vm3739_vm1, %v7840_v14, %v7842_v55 }
 0xc61   : > { %v8012_v50 = vadd.f32 %v7841_v39, %v7688_v34 }
 0xc62   : > { %v7384_v52 = vrot.slane %v7231_v25, 2 }
 0xc63   : > { %v8077_v46 = vmax.f32 %v8012_v50, 0.0  ;;  %v12508_v5 = vpop.f32.mrf.mxu2 }
 0xc64   : > { %v7385_v63 = vsel %vm3739_vm1, %v7382_v56, %v7384_v52  ;;  %v332_v56 = vld [vmem:[%s10055_s11 + $0x88] sm:$0xff]  }
 0xc65   : > { %v8230_v3 = vrot.slane %v8077_v46, 7  ;;  %v7555_v35 = vadd.f32 %v7385_v63, %v13482_v42  ;;  %v6864_v58 = vpop.f32.mrf.mxu1  ;;  %v7622_v43 = vunpack.c.l.bf16 %v332_v56  ;;  %v13486_v63 = vld [vmem:[#allocation86_spill] sm:$0xff]  ;;  %v7623_v42 = vunpack.c.h.bf16 %v332_v56 }
 0xc66   : > { %v6865_v12 = vadd.f32 %v6864_v58, %v13483_v11 }
 0xc67   : > { %v8231_v57 = vsel %vm8184_vm2, %v8228_v16, %v8230_v3  ;;  %v7689_v9 = vadd.f32 %v12238_v49, %v7555_v35  ;;  %v7845_v16 = vsel %vm3739_vm1, %v7842_v55, %v7844_v36  ;;  %v7846_v28 = vrot.slane %v7622_v43, 2 }
 0xc68   : > { %8400 = vst [vmem:[%s12261_s7 + $0xb0] sm:$0xff] %v8231_v57  ;;  %v7232_v4 = vadd.f32 %v12472_v22, %v6865_v12  ;;  %v7848_v33 = vrot.slane %v7623_v42, 2 }
 0xc69   : > { %v8013_v61 = vadd.f32 %v7843_v27, %v7689_v9 }
 0xc6a   : > { %v7386_v62 = vrot.slane %v7232_v4, 2  ;;  %v334_v4 = vld [vmem:[%s10055_s11 + $0x90] sm:$0xff]   ;;  %v7849_v56 = vsel %vm3739_vm1, %v7846_v28, %v7848_v33 }
 0xc6b   : > { %v8078_v53 = vmax.f32 %v8013_v61, 0.0  ;;  %v12518_v54 = vpop.f32.mrf.mxu2 }
 0xc6c   : > { %v7387_v14 = vsel %vm3739_vm1, %v7384_v52, %v7386_v62  ;;  %v13485_v52 = vld [vmem:[#allocation66_spill] sm:$0xff] }
 0xc6d   : > { %v8232_v47 = vrot.slane %v8078_v53, 7  ;;  %v7556_v20 = vadd.f32 %v7387_v14, %v12000_v41  ;;  %v6867_v48 = vpop.f32.mrf.mxu1  ;;  %v13487_v14 = vld [vmem:[#allocation87_spill] sm:$0xff] }
 0xc6e   : > { %v6868_v37 = vadd.f32 %v6867_v48, %v13484_v60 }
 0xc6f   : > { %v8233_v22 = vsel %vm8184_vm2, %v8230_v3, %v8232_v47  ;;  %v7690_v39 = vadd.f32 %v12238_v49, %v7556_v20  ;;  %v7624_v20 = vunpack.c.l.bf16 %v334_v4 }
 0xc70   : > { %8401 = vst [vmem:[%s12261_s7 + $0xb8] sm:$0xff] %v8233_v22  ;;  %v7233_v31 = vadd.f32 %v12485_v8, %v6868_v37  ;;  %6906 = vmatmul.bf16.gmra.mxu1 %v11151_v38  ;;  %7157 = vmatmul.bf16.gmra.mxu2 %v11151_v38  ;;  %v7847_v8 = vsel %vm3739_vm1, %v7844_v36, %v7846_v28  ;;  %v13488_v28 = vld [vmem:[#allocation88_spill] sm:$0xff] }
 0xc71   : > { %v8014_v7 = vadd.f32 %v7845_v16, %v7690_v39  ;;  %v7850_v37 = vrot.slane %v7624_v20, 2 }
 0xc72   : > { %v7388_v41 = vrot.slane %v7233_v31, 2 }
 0xc73   : > { %v8079_v6 = vmax.f32 %v8014_v7, 0.0  ;;  %v12531_v34 = vpop.f32.mrf.mxu2 }
 0xc74   : > { %v7389_v25 = vsel %vm3739_vm1, %v7386_v62, %v7388_v41 }
 0xc75   : > { %v8234_v50 = vrot.slane %v8079_v6, 7  ;;  %v7557_v55 = vadd.f32 %v7389_v25, %v13485_v52  ;;  %v6869_v46 = vpop.f32.mrf.mxu1  ;;  %v7625_v6 = vunpack.c.h.bf16 %v334_v4  ;;  %v12575_v4 = vld [vmem:[%s13045_s4] ss:$0 sm:$0xff] }
 0xc76   : > { %v6870_v3 = vadd.f32 %v6869_v46, %v13486_v63 }
 0xc77   : > { %v8235_v35 = vsel %vm8184_vm2, %v8232_v47, %v8234_v50  ;;  %v7691_v58 = vadd.f32 %v12238_v49, %v7557_v55 }
 0xc78   : > { %8402 = vst [vmem:[%s12261_s7 + $0xc0] sm:$0xff] %v8235_v35  ;;  %v7234_v27 = vadd.f32 %v12495_v13, %v6870_v3 }
 0xc79   : > { %v8015_v11 = vadd.f32 %v7847_v8, %v7691_v58  ;;  %v7852_v8 = vrot.slane %v7625_v6, 2  ;;  %v13489_v58 = vld [vmem:[#allocation96_spill] sm:$0xff] }
 0xc7a   : > { %v7390_v12 = vrot.slane %v7234_v27, 2 }
 0xc7b   : > { %v8080_v57 = vmax.f32 %v8015_v11, 0.0  ;;  %v12541_v9 = vpop.f32.mrf.mxu2 }
 0xc7c   : > { %v7391_v61 = vsel %vm3739_vm1, %v7388_v41, %v7390_v12 }
 0xc7d   : > { %v8236_v62 = vrot.slane %v8080_v57, 7  ;;  %v7558_v36 = vadd.f32 %v7391_v61, %v12016_v18  ;;  %v6872_v53 = vpop.f32.mrf.mxu1 }
 0xc7e   : > { %v6873_v47 = vadd.f32 %v6872_v53, %v13487_v14 }
 0xc7f   : > { %v8237_v13 = vsel %vm8184_vm2, %v8234_v50, %v8236_v62  ;;  %v7692_v48 = vadd.f32 %v12238_v49, %v7558_v36 }
 0xc80   : > { %8403 = vst [vmem:[%s12261_s7 + $0xc8] sm:$0xff] %v8237_v13  ;;  %v7235_v16 = vadd.f32 %v12508_v5, %v6873_v47  ;;  %6911 = vmatmul.bf16.gmra.mxu1 %v11471_v44  ;;  %7162 = vmatmul.bf16.gmra.mxu2 %v11593_v29  ;;  %v7851_v5 = vsel %vm3739_vm1, %v7848_v33, %v7850_v37 }
 0xc81   : > { %v8016_v60 = vadd.f32 %v7849_v56, %v7692_v48  ;;  %v13491_v48 = vld [vmem:[#allocation22_spill] sm:$0xff] }
 0xc82   : > { %v7392_v18 = vrot.slane %v7235_v16, 2 }
 0xc83   : > { %v8081_v43 = vmax.f32 %v8016_v60, 0.0  ;;  %v12554_v22 = vpop.f32.mrf.mxu2 }
 0xc84   : > { %v7393_v39 = vsel %vm3739_vm1, %v7390_v12, %v7392_v18  ;;  %v7853_v12 = vsel %vm3739_vm1, %v7850_v37, %v7852_v8 }
 0xc85   : > { %v8238_v31 = vrot.slane %v8081_v43, 7  ;;  %v7559_v7 = vadd.f32 %v7393_v39, %v12022_v2  ;;  %v6874_v41 = vpop.f32.mrf.mxu1  ;;  %v336_v2 = vld [vmem:[%s10055_s11 + $0x98] sm:$0xff]  }
 0xc86   : > { %v6875_v44 = vadd.f32 %v6874_v41, %v13488_v28  ;;  %v7626_v57 = vunpack.c.l.bf16 %v336_v2  ;;  %v7627_v43 = vunpack.c.h.bf16 %v336_v2  ;;  %v13494_v2 = vld [vmem:[#allocation24_spill] sm:$0xff] }
 0xc87   : > { %v8239_v25 = vsel %vm8184_vm2, %v8236_v62, %v8238_v31  ;;  %v7693_v50 = vadd.f32 %v12238_v49, %v7559_v7  ;;  %v13490_v49 = vld [vmem:[#allocation89_spill] sm:$0xff] }
 0xc88   : > { %8404 = vst [vmem:[%s12261_s7 + $0xd0] sm:$0xff] %v8239_v25  ;;  %v7236_v52 = vadd.f32 %v12518_v54, %v6875_v44  ;;  %v7854_v56 = vrot.slane %v7626_v57, 2  ;;  %v7856_v28 = vrot.slane %v7627_v43, 2  ;;  %v338_v25 = vld [vmem:[%s10055_s11 + $0xa0] sm:$0xff]   ;;  %v340_v43 = vld [vmem:[%s10055_s11 + $0xa8] sm:$0xff]  }
 0xc89   : > { %v8017_v55 = vadd.f32 %v7851_v5, %v7693_v50 }
 0xc8a   : > { %v7394_v46 = vrot.slane %v7236_v52, 2 }
 0xc8b   : > { %v8082_v63 = vmax.f32 %v8017_v55, 0.0  ;;  %v12564_v3 = vpop.f32.mrf.mxu2  ;;  %v13493_v55 = vld [vmem:[#allocation46_spill] sm:$0xff] }
 0xc8c   : > { %v7395_v42 = vsel %vm3739_vm1, %v7392_v18, %v7394_v46  ;;  %v13492_v18 = vld [vmem:[#allocation91_spill] sm:$0xff] }
 0xc8d   : > { %v8240_v35 = vrot.slane %v8082_v63, 7  ;;  %v7560_v27 = vadd.f32 %v7395_v42, %v13489_v58  ;;  %v6877_v11 = vpop.f32.mrf.mxu1  ;;  %v7857_v63 = vsel %vm3739_vm1, %v7854_v56, %v7856_v28 }
 0xc8e   : > { %v6878_v33 = vadd.f32 %v6877_v11, %v13490_v49 }
 0xc8f   : > { %v8241_v54 = vsel %vm8184_vm2, %v8238_v31, %v8240_v35  ;;  %v7694_v61 = vadd.f32 %v12575_v4, %v7560_v27  ;;  %v12601_v27 = vpop.f32.mrf.mxu0 }
 0xc90   : > { %8405 = vst [vmem:[%s12261_s7 + $0xd8] sm:$0xff] %v8241_v54  ;;  %v7237_v62 = vadd.f32 %v12531_v34, %v6878_v33  ;;  %6916 = vmatmul.bf16.gmra.mxu1 %v11151_v38  ;;  %7167 = vmatmul.bf16.gmra.mxu2 %v11151_v38  ;;  %v7855_v34 = vsel %vm3739_vm1, %v7852_v8, %v7854_v56  ;;  %v13495_v56 = vld [vmem:[#allocation65_spill] sm:$0xff] }
 0xc91   : > { %v8018_v36 = vadd.f32 %v7853_v12, %v7694_v61 }
 0xc92   : > { %v7396_v53 = vrot.slane %v7237_v62, 2 }
 0xc93   : > { %v8083_v14 = vmax.f32 %v8018_v36, 0.0  ;;  %v12582_v47 = vpop.f32.mrf.mxu2 }
 0xc94   : > { %v7397_v20 = vsel %vm3739_vm1, %v7394_v46, %v7396_v53 }
 0xc95   : > { %v8242_v13 = vrot.slane %v8083_v14, 7  ;;  %v7561_v16 = vadd.f32 %v7397_v20, %v13491_v48  ;;  %v6879_v60 = vpop.f32.mrf.mxu1  ;;  %v7629_v14 = vunpack.c.h.bf16 %v338_v25 }
 0xc96   : > { %v6880_v37 = vadd.f32 %v6879_v60, %v13492_v18 }
 0xc97   : > { %v8243_v39 = vsel %vm8184_vm2, %v8240_v35, %v8242_v13  ;;  %v7695_v31 = vadd.f32 %v12575_v4, %v7561_v16  ;;  %v7628_v35 = vunpack.c.l.bf16 %v338_v25  ;;  %v12617_v60 = vpop.f32.mrf.mxu0  ;;  %v7860_v18 = vrot.slane %v7629_v14, 2  ;;  %v342_v14 = vld [vmem:[%s10055_s11 + $0xb0] sm:$0xff]  }
 0xc98   : > { %8406 = vst [vmem:[%s12261_s7 + $0xe0] sm:$0xff] %v8243_v39  ;;  %v7238_v7 = vadd.f32 %v12541_v9, %v6880_v37 }
 0xc99   : > { %v8019_v41 = vadd.f32 %v7855_v34, %v7695_v31  ;;  %v7858_v33 = vrot.slane %v7628_v35, 2 }
 0xc9a   : > { %v7398_v5 = vrot.slane %v7238_v7, 2 }
 0xc9b   : > { %v8084_v44 = vmax.f32 %v8019_v41, 0.0  ;;  %v12592_v6 = vpop.f32.mrf.mxu2 }
 0xc9c   : > { %v7399_v50 = vsel %vm3739_vm1, %v7396_v53, %v7398_v5 }
 0xc9d   : > { %v8244_v52 = vrot.slane %v8084_v44, 7  ;;  %v7562_v46 = vadd.f32 %v7399_v50, %v13493_v55  ;;  %v6882_v8 = vpop.f32.mrf.mxu1  ;;  %v7630_v44 = vunpack.c.l.bf16 %v340_v43 }
 0xc9e   : > { %v6883_v42 = vadd.f32 %v6882_v8, %v13494_v2 }
 0xc9f   : > { %v8245_v9 = vsel %vm8184_vm2, %v8242_v13, %v8244_v52  ;;  %v7696_v58 = vadd.f32 %v12575_v4, %v7562_v46  ;;  %v7862_v46 = vrot.slane %v7630_v44, 2  ;;  %v12634_v2 = vpop.f32.mrf.mxu0 }
 0xca0   : > { %8407 = vst [vmem:[%s12261_s7 + $0xe8] sm:$0xff] %v8245_v9  ;;  %v7239_v11 = vadd.f32 %v12554_v22, %v6883_v42  ;;  %6921 = vmatmul.bf16.gmra.mxu1 %v11515_v17  ;;  %7172 = vmatmul.bf16.gmra.mxu2 %v11633_v45  ;;  %v7859_v22 = vsel %vm3739_vm1, %v7856_v28, %v7858_v33  ;;  %v13496_v28 = vld [vmem:[#allocation93_spill] sm:$0xff]  ;;  %v13497_v9 = vld [vmem:[#allocation100_spill] sm:$0xff] }
 0xca1   : > { %v8020_v12 = vadd.f32 %v7857_v63, %v7696_v58 }
 0xca2   : > { %v7400_v49 = vrot.slane %v7239_v11, 2  ;;  %v7863_v11 = vsel %vm3739_vm1, %v7860_v18, %v7862_v46 }
 0xca3   : > { %v8085_v57 = vmax.f32 %v8020_v12, 0.0  ;;  %v12607_v54 = vpop.f32.mrf.mxu2  ;;  %v13498_v12 = vld [vmem:[#allocation94_spill] sm:$0xff] }
 0xca4   : > { %v7401_v61 = vsel %vm3739_vm1, %v7398_v5, %v7400_v49  ;;  %v7861_v5 = vsel %vm3739_vm1, %v7858_v33, %v7860_v18  ;;  %v7631_v33 = vunpack.c.h.bf16 %v340_v43  ;;  %v7632_v43 = vunpack.c.l.bf16 %v342_v14 }
 0xca5   : > { %v8246_v62 = vrot.slane %v8085_v57, 7  ;;  %v7563_v36 = vadd.f32 %v7401_v61, %v12052_v15  ;;  %v6884_v53 = vpop.f32.mrf.mxu1 }
 0xca6   : > { %v6885_v17 = vadd.f32 %v6884_v53, %v13495_v56 }
 0xca7   : > { %v8247_v20 = vsel %vm8184_vm2, %v8244_v52, %v8246_v62  ;;  %v7697_v13 = vadd.f32 %v12575_v4, %v7563_v36 }
 0xca8   : > { %8408 = vst [vmem:[%s12261_s7 + $0xf0] sm:$0xff] %v8247_v20  ;;  %v7240_v48 = vadd.f32 %v12564_v3, %v6885_v17 }
 0xca9   : > { %v8021_v16 = vadd.f32 %v7859_v22, %v7697_v13  ;;  %v7864_v22 = vrot.slane %v7631_v33, 2 }
 0xcaa   : > { %v7402_v34 = vrot.slane %v7240_v48, 2 }
 0xcab   : > { %v8086_v15 = vmax.f32 %v8021_v16, 0.0  ;;  %v12619_v37 = vpop.f32.mrf.mxu2  ;;  %v7865_v18 = vsel %vm3739_vm1, %v7862_v46, %v7864_v22 }
 0xcac   : > { %v7403_v39 = vsel %vm3739_vm1, %v7400_v49, %v7402_v34 }
 0xcad   : > { %v8248_v31 = vrot.slane %v8086_v15, 7  ;;  %v7564_v7 = vadd.f32 %v7403_v39, %v12062_v59  ;;  %v6887_v41 = vpop.f32.mrf.mxu1  ;;  %v13499_v15 = vld [vmem:[#allocation95_spill] sm:$0xff] }
 0xcae   : > { %v6888_v3 = vadd.f32 %v6887_v41, %v13496_v28 }
 0xcaf   : > { %v8249_v25 = vsel %vm8184_vm2, %v8246_v62, %v8248_v31  ;;  %v7698_v50 = vadd.f32 %v12575_v4, %v7564_v7 }
 0xcb0   : > { %8409 = vst [vmem:[%s12261_s7 + $0xf8] sm:$0xff] %v8249_v25  ;;  %v7241_v52 = vadd.f32 %v12582_v47, %v6888_v3  ;;  %6926 = vmatmul.bf16.gmra.mxu1 %v11151_v38  ;;  %7177 = vmatmul.bf16.gmra.mxu2 %v11151_v38 }
 0xcb1   : > { %v8022_v55 = vadd.f32 %v7861_v5, %v7698_v50  ;;  %v7866_v5 = vrot.slane %v7632_v43, 2 }
 0xcb2   : > { %v7404_v59 = vrot.slane %v7241_v52, 2 }
 0xcb3   : > { %v8087_v8 = vmax.f32 %v8022_v55, 0.0  ;;  %v12632_v63 = vpop.f32.mrf.mxu2  ;;  %v13500_v55 = vld [vmem:[#allocation48_spill] sm:$0xff] }
 0xcb4   : > { %v7405_v42 = vsel %vm3739_vm1, %v7402_v34, %v7404_v59  ;;  %v12649_v34 = vpop.f32.mrf.mxu0 }
 0xcb5   : > { %v8250_v35 = vrot.slane %v8087_v8, 7  ;;  %v7565_v58 = vadd.f32 %v7405_v42, %v13497_v9  ;;  %v6889_v47 = vpop.f32.mrf.mxu1 }
 0xcb6   : > { %v6890_v49 = vadd.f32 %v6889_v47, %v13498_v12  ;;  %v344_v12 = vld [vmem:[%s10055_s11 + $0xb8] sm:$0xff]  }
 0xcb7   : > { %v8251_v57 = vsel %vm8184_vm2, %v8248_v31, %v8250_v35  ;;  %v7699_v61 = vadd.f32 %v12575_v4, %v7565_v58 }
 0xcb8   : > { %8410 = vst [vmem:[%s12261_s7 + $0x100] sm:$0xff] %v8251_v57  ;;  %v7242_v62 = vadd.f32 %v12592_v6, %v6890_v49 }
 0xcb9   : > { %v8023_v36 = vadd.f32 %v7863_v11, %v7699_v61 }
 0xcba   : > { %v7406_v53 = vrot.slane %v7242_v62, 2 }
 0xcbb   : > { %v8088_v56 = vmax.f32 %v8023_v36, 0.0  ;;  %v12644_v17 = vpop.f32.mrf.mxu2  ;;  %v13501_v36 = vld [vmem:[#allocation97_spill] sm:$0xff] }
 0xcbc   : > { %v7407_v20 = vsel %vm3739_vm1, %v7404_v59, %v7406_v53  ;;  %v7633_v59 = vunpack.c.h.bf16 %v342_v14  ;;  %v12667_v42 = vpop.f32.mrf.mxu0 }
 0xcbd   : > { %v8252_v13 = vrot.slane %v8088_v56, 7  ;;  %v7566_v48 = vadd.f32 %v7407_v20, %v12073_v0  ;;  %v6892_v16 = vpop.f32.mrf.mxu1 }
 0xcbe   : > { %v6893_v6 = vadd.f32 %v6892_v16, %v13499_v15  ;;  %v7868_v47 = vrot.slane %v7633_v59, 2 }
 0xcbf   : > { %v8253_v39 = vsel %vm8184_vm2, %v8250_v35, %v8252_v13  ;;  %v7700_v31 = vadd.f32 %v12575_v4, %v7566_v48 }
 0xcc0   : > { %8411 = vst [vmem:[%s12261_s7 + $0x108] sm:$0xff] %v8253_v39  ;;  %v7243_v7 = vadd.f32 %v12607_v54, %v6893_v6  ;;  %6931 = vmatmul.bf16.gmra.mxu1 %v11554_v23  ;;  %7182 = vmatmul.bf16.gmra.mxu2 %v11665_v40  ;;  %v7867_v54 = vsel %vm3739_vm1, %v7864_v22, %v7866_v5  ;;  %v7634_v22 = vunpack.c.l.bf16 %v344_v12 }
 0xcc1   : > { %v8024_v0 = vadd.f32 %v7865_v18, %v7700_v31  ;;  %v7869_v62 = vsel %vm3739_vm1, %v7866_v5, %v7868_v47  ;;  %v13502_v31 = vld [vmem:[#allocation98_spill] sm:$0xff] }
 0xcc2   : > { %v7408_v41 = vrot.slane %v7243_v7, 2  ;;  %v7870_v48 = vrot.slane %v7634_v22, 2 }
 0xcc3   : > { %v8089_v28 = vmax.f32 %v8024_v0, 0.0  ;;  %v12659_v3 = vpop.f32.mrf.mxu2  ;;  %v7635_v0 = vunpack.c.h.bf16 %v344_v12 }
 0xcc4   : > { %v7409_v44 = vsel %vm3739_vm1, %v7406_v53, %v7408_v41  ;;  %v7871_v39 = vsel %vm3739_vm1, %v7868_v47, %v7870_v48 }
 0xcc5   : > { %v8254_v25 = vrot.slane %v8089_v28, 7  ;;  %v7567_v50 = vadd.f32 %v7409_v44, %v12077_v51  ;;  %v6894_v52 = vpop.f32.mrf.mxu1 }
 0xcc6   : > { %v6895_v23 = vadd.f32 %v6894_v52, %v13500_v55 }
 0xcc7   : > { %v8255_v46 = vsel %vm8184_vm2, %v8252_v13, %v8254_v25  ;;  %v7701_v8 = vadd.f32 %v12575_v4, %v7567_v50  ;;  %v7872_v50 = vrot.slane %v7635_v0, 2 }
 0xcc8   : > { %8412 = vst [vmem:[%s12261_s7 + $0x110] sm:$0xff] %v8255_v46  ;;  %v7244_v35 = vadd.f32 %v12619_v37, %v6895_v23 }
 0xcc9   : > { %v8025_v9 = vadd.f32 %v7867_v54, %v7701_v8 }
 0xcca   : > { %v7410_v58 = vrot.slane %v7244_v35, 2  ;;  %v7873_v35 = vsel %vm3739_vm1, %v7870_v48, %v7872_v50 }
 0xccb   : > { %v8090_v51 = vmax.f32 %v8025_v9, 0.0  ;;  %v12671_v11 = vpop.f32.mrf.mxu2  ;;  %v13503_v9 = vld [vmem:[#allocation99_spill] sm:$0xff] }
 0xccc   : > { %v7411_v49 = vsel %vm3739_vm1, %v7408_v41, %v7410_v58 }
 0xccd   : > { %v8256_v33 = vrot.slane %v8090_v51, 7  ;;  %v7568_v57 = vadd.f32 %v7411_v49, %v12084_v24  ;;  %v6897_v61 = vpop.f32.mrf.mxu1  ;;  %v12684_v24 = vpop.f32.mrf.mxu0 }
 0xcce   : > { %v6898_v53 = vadd.f32 %v6897_v61, %v13501_v36 }
 0xccf   : > { %v8257_v37 = vsel %vm8184_vm2, %v8254_v25, %v8256_v33  ;;  %v7702_v56 = vadd.f32 %v12575_v4, %v7568_v57 }
 0xcd0   : > { %8413 = vst [vmem:[%s12261_s7 + $0x118] sm:$0xff] %v8257_v37  ;;  %v7245_v14 = vadd.f32 %v12632_v63, %v6898_v53  ;;  %6936 = vmatmul.bf16.gmra.mxu1 %v11151_v38  ;;  %7187 = vmatmul.bf16.gmra.mxu2 %v11151_v38  ;;  %v13504_v53 = vld [vmem:[#allocation26_spill] sm:$0xff] }
 0xcd1   : > { %v8026_v20 = vadd.f32 %v7869_v62, %v7702_v56 }
 0xcd2   : > { %v7412_v13 = vrot.slane %v7245_v14, 2 }
 0xcd3   : > { %v8091_v16 = vmax.f32 %v8026_v20, 0.0  ;;  %v12686_v18 = vpop.f32.mrf.mxu2 }
 0xcd4   : > { %v7413_v15 = vsel %vm3739_vm1, %v7410_v58, %v7412_v13 }
 0xcd5   : > { %v8258_v6 = vrot.slane %v8091_v16, 7  ;;  %v7569_v43 = vadd.f32 %v7413_v15, %v12088_v10  ;;  %v6899_v63 = vpop.f32.mrf.mxu1  ;;  %v346_v10 = vld [vmem:[%s10055_s11 + $0xc0] sm:$0xff]   ;;  %v12699_v55 = vpop.f32.mrf.mxu0 }
 0xcd6   : > { %v6900_v7 = vadd.f32 %v6899_v63, %v13502_v31  ;;  %v7636_v58 = vunpack.c.l.bf16 %v346_v10  ;;  %v7637_v20 = vunpack.c.h.bf16 %v346_v10  ;;  %v348_v31 = vld [vmem:[%s10055_s11 + $0xc8] sm:$0xff]  }
 0xcd7   : > { %v8259_v41 = vsel %vm8184_vm2, %v8256_v33, %v8258_v6  ;;  %v7703_v5 = vadd.f32 %v12575_v4, %v7569_v43 }
 0xcd8   : > { %8414 = vst [vmem:[%s12261_s7 + $0x120] sm:$0xff] %v8259_v41  ;;  %v7246_v28 = vadd.f32 %v12644_v17, %v6900_v7  ;;  %v7874_v33 = vrot.slane %v7636_v58, 2  ;;  %v7876_v43 = vrot.slane %v7637_v20, 2  ;;  %v13506_v41 = vld [vmem:[#allocation101_spill] sm:$0xff]  ;;  %v13507_v58 = vld [vmem:[#allocation102_spill] sm:$0xff] }
 0xcd9   : > { %v8027_v44 = vadd.f32 %v7871_v39, %v7703_v5 }
 0xcda   : > { %v7414_v25 = vrot.slane %v7246_v28, 2 }
 0xcdb   : > { %v8092_v52 = vmax.f32 %v8027_v44, 0.0  ;;  %v12696_v54 = vpop.f32.mrf.mxu2  ;;  %v7877_v44 = vsel %vm3739_vm1, %v7874_v33, %v7876_v43 }
 0xcdc   : > { %v7415_v23 = vsel %vm3739_vm1, %v7412_v13, %v7414_v25 }
 0xcdd   : > { %v8260_v59 = vrot.slane %v8092_v52, 7  ;;  %v7570_v46 = vadd.f32 %v7415_v23, %v12095_v19  ;;  %v6902_v8 = vpop.f32.mrf.mxu1  ;;  %v12715_v56 = vpop.f32.mrf.mxu0 }
 0xcde   : > { %v6903_v17 = vadd.f32 %v6902_v8, %v13503_v9 }
 0xcdf   : > { %v8261_v47 = vsel %vm8184_vm2, %v8258_v6, %v8260_v59  ;;  %v7704_v51 = vadd.f32 %v12575_v4, %v7570_v46 }
 0xce0   : > { %8415 = vst [vmem:[%s12261_s7 + $0x128] sm:$0xff] %v8261_v47  ;;  %v7247_v12 = vadd.f32 %v12659_v3, %v6903_v17  ;;  %6941 = vmatmul.bf16.gmra.mxu1 %v11593_v29  ;;  %7192 = vmatmul.bf16.gmra.mxu2 %v11151_v38  ;;  %v7875_v29 = vsel %vm3739_vm1, %v7872_v50, %v7874_v33  ;;  %v13505_v3 = vld [vmem:[#allocation39_spill] sm:$0xff]  ;;  %v7638_v50 = vunpack.c.l.bf16 %v348_v31 }
 0xce1   : > { %v8028_v49 = vadd.f32 %v7873_v35, %v7704_v51 }
 0xce2   : > { %v7416_v19 = vrot.slane %v7247_v12, 2  ;;  %v7878_v8 = vrot.slane %v7638_v50, 2 }
 0xce3   : > { %v8093_v57 = vmax.f32 %v8028_v49, 0.0  ;;  %v12711_v61 = vpop.f32.mrf.mxu2  ;;  %v7639_v49 = vunpack.c.h.bf16 %v348_v31 }
 0xce4   : > { %v7417_v62 = vsel %vm3739_vm1, %v7414_v25, %v7416_v19 }
 0xce5   : > { %v8262_v36 = vrot.slane %v8093_v57, 7  ;;  %v7571_v22 = vadd.f32 %v7417_v62, %v13504_v53  ;;  %v6904_v37 = vpop.f32.mrf.mxu1  ;;  %v12732_v10 = vpop.f32.mrf.mxu0 }
 0xce6   : > { %v6905_v14 = vadd.f32 %v6904_v37, %v13505_v3  ;;  %v350_v3 = vld [vmem:[%s10055_s11 + $0xd0] sm:$0xff]  }
 0xce7   : > { %v8263_v13 = vsel %vm8184_vm2, %v8260_v59, %v8262_v36  ;;  %v7705_v48 = vadd.f32 %v12575_v4, %v7571_v22  ;;  %v7880_v22 = vrot.slane %v7639_v49, 2 }
 0xce8   : > { %8416 = vst [vmem:[%s12261_s7 + $0x130] sm:$0xff] %v8263_v13  ;;  %v7248_v16 = vadd.f32 %v12671_v11, %v6905_v14 }
 0xce9   : > { %v8029_v15 = vadd.f32 %v7875_v29, %v7705_v48  ;;  %v7881_v48 = vsel %vm3739_vm1, %v7878_v8, %v7880_v22 }
 0xcea   : > { %v7418_v6 = vrot.slane %v7248_v16, 2  ;;  %v7640_v16 = vunpack.c.l.bf16 %v350_v3 }
 0xceb   : > { %v8094_v63 = vmax.f32 %v8029_v15, 0.0  ;;  %v12723_v39 = vpop.f32.mrf.mxu2 }
 0xcec   : > { %v7419_v7 = vsel %vm3739_vm1, %v7416_v19, %v7418_v6  ;;  %v7882_v31 = vrot.slane %v7640_v16, 2 }
 0xced   : > { %v8264_v0 = vrot.slane %v8094_v63, 7  ;;  %v7572_v5 = vadd.f32 %v7419_v7, %v13506_v41  ;;  %v6907_v28 = vpop.f32.mrf.mxu1 }
 0xcee   : > { %v6908_v25 = vadd.f32 %v6907_v28, %v12601_v27 }
 0xcef   : > { %v8265_v11 = vsel %vm8184_vm2, %v8262_v36, %v8264_v0  ;;  %v7706_v52 = vadd.f32 %v12575_v4, %v7572_v5  ;;  %v12748_v36 = vpop.f32.mrf.mxu0 }
 0xcf0   : > { %8417 = vst [vmem:[%s12261_s7 + $0x138] sm:$0xff] %v8265_v11  ;;  %v7249_v23 = vadd.f32 %v12686_v18, %v6908_v25  ;;  %6946 = vmatmul.bf16.gmra.mxu1 %v11151_v38  ;;  %7197 = vmatmul.bf16.gmra.mxu2 %v11151_v38  ;;  %v7879_v18 = vsel %vm3739_vm1, %v7876_v43, %v7878_v8  ;;  %v7641_v25 = vunpack.c.h.bf16 %v350_v3 }
 0xcf1   : > { %v8030_v59 = vadd.f32 %v7877_v44, %v7706_v52 }
 0xcf2   : > { %v7420_v46 = vrot.slane %v7249_v23, 2 }
 0xcf3   : > { %v8095_v35 = vmax.f32 %v8030_v59, 0.0  ;;  %v12738_v27 = vpop.f32.mrf.mxu2 }
 0xcf4   : > { %v7421_v9 = vsel %vm3739_vm1, %v7418_v6, %v7420_v46 }
 0xcf5   : > { %v8266_v17 = vrot.slane %v8095_v35, 7  ;;  %v7573_v47 = vadd.f32 %v7421_v9, %v13507_v58  ;;  %v6909_v51 = vpop.f32.mrf.mxu1 }
 0xcf6   : > { %v6910_v12 = vadd.f32 %v6909_v51, %v12617_v60 }
 0xcf7   : > { %v8267_v19 = vsel %vm8184_vm2, %v8264_v0, %v8266_v17  ;;  %v7707_v33 = vadd.f32 %v12575_v4, %v7573_v47 }
 0xcf8   : > { %8418 = vst [vmem:[%s12261_s7 + $0x140] sm:$0xff] %v8267_v19  ;;  %v7250_v57 = vadd.f32 %v12696_v54, %v6910_v12 }
 0xcf9   : > { %v8031_v62 = vadd.f32 %v7879_v18, %v7707_v33 }
 0xcfa   : > { %v7422_v53 = vrot.slane %v7250_v57, 2 }
 0xcfb   : > { %v8096_v37 = vmax.f32 %v8031_v62, 0.0  ;;  %v12750_v29 = vpop.f32.mrf.mxu2 }
 0xcfc   : > { %v7423_v60 = vsel %vm3739_vm1, %v7420_v46, %v7422_v53  ;;  %v7884_v46 = vrot.slane %v7641_v25, 2 }
 0xcfd   : > { %v8268_v14 = vrot.slane %v8096_v37, 7  ;;  %v7574_v20 = vadd.f32 %v7423_v60, %v12117_v30  ;;  %v6912_v13 = vpop.f32.mrf.mxu1  ;;  %v13508_v37 = vld [vmem:[#allocation53_spill] sm:$0xff] }
 0xcfe   : > { %v6913_v54 = vadd.f32 %v6912_v13, %v12634_v2  ;;  %v12765_v2 = vpop.f32.mrf.mxu0  ;;  %v7885_v51 = vsel %vm3739_vm1, %v7882_v31, %v7884_v46 }
 0xcff   : > { %v8269_v15 = vsel %vm8184_vm2, %v8266_v17, %v8268_v14  ;;  %v7708_v6 = vadd.f32 %v12575_v4, %v7574_v20 }
 0xd00   : > { %8419 = vst [vmem:[%s12261_s7 + $0x148] sm:$0xff] %v8269_v15  ;;  %v7251_v43 = vadd.f32 %v12711_v61, %v6913_v54  ;;  %6951 = vmatmul.bf16.gmra.mxu1 %v11633_v45  ;;  %7202 = vmatmul.bf16.gmra.mxu2 %v11151_v38  ;;  %v7883_v45 = vsel %vm3739_vm1, %v7880_v22, %v7882_v31 }
 0xd01   : > { %v8032_v63 = vadd.f32 %v7881_v48, %v7708_v6 }
 0xd02   : > { %v7424_v30 = vrot.slane %v7251_v43, 2 }
 0xd03   : > { %v8097_v7 = vmax.f32 %v8032_v63, 0.0  ;;  %v12763_v0 = vpop.f32.mrf.mxu2 }
 0xd04   : > { %v7425_v41 = vsel %vm3739_vm1, %v7422_v53, %v7424_v30 }
 0xd05   : > { %v8270_v5 = vrot.slane %v8097_v7, 7  ;;  %v7575_v28 = vadd.f32 %v7425_v41, %v12121_v21  ;;  %v6914_v61 = vpop.f32.mrf.mxu1  ;;  %v352_v21 = vld [vmem:[%s10055_s11 + $0xd8] sm:$0xff]   ;;  %v13509_v7 = vld [vmem:[#allocation42_spill] sm:$0xff] }
 0xd06   : > { %v6915_v44 = vadd.f32 %v6914_v61, %v12649_v34  ;;  %v12780_v47 = vpop.f32.mrf.mxu0  ;;  %v7642_v18 = vunpack.c.l.bf16 %v352_v21  ;;  %v7643_v20 = vunpack.c.h.bf16 %v352_v21  ;;  %v13510_v21 = vld [vmem:[#allocation54_spill] sm:$0xff] }
 0xd07   : > { %v8271_v50 = vsel %vm8184_vm2, %v8268_v14, %v8270_v5  ;;  %v7709_v11 = vadd.f32 %v12575_v4, %v7575_v28 }
 0xd08   : > { %8420 = vst [vmem:[%s12261_s7 + $0x150] sm:$0xff] %v8271_v50  ;;  %v7252_v52 = vadd.f32 %v12723_v39, %v6915_v44  ;;  %v7886_v57 = vrot.slane %v7642_v18, 2  ;;  %v7888_v6 = vrot.slane %v7643_v20, 2 }
 0xd09   : > { %v8033_v23 = vadd.f32 %v7883_v45, %v7709_v11 }
 0xd0a   : > { %v7426_v59 = vrot.slane %v7252_v52, 2  ;;  %v7887_v14 = vsel %vm3739_vm1, %v7884_v46, %v7886_v57  ;;  %v7889_v28 = vsel %vm3739_vm1, %v7886_v57, %v7888_v6 }
 0xd0b   : > { %v8098_v8 = vmax.f32 %v8033_v23, 0.0  ;;  %v12775_v35 = vpop.f32.mrf.mxu2 }
 0xd0c   : > { %v7427_v9 = vsel %vm3739_vm1, %v7424_v30, %v7426_v59  ;;  %v354_v30 = vld [vmem:[%s10055_s11 + $0xe0] sm:$0xff]  }
 0xd0d   : > { %v8272_v17 = vrot.slane %v8098_v8, 7  ;;  %v7576_v34 = vadd.f32 %v7427_v9, %v12128_v32  ;;  %v6917_v58 = vpop.f32.mrf.mxu1  ;;  %v7644_v45 = vunpack.c.l.bf16 %v354_v30 }
 0xd0e   : > { %v6918_v39 = vadd.f32 %v6917_v58, %v12667_v42  ;;  %v12797_v48 = vpop.f32.mrf.mxu0 }
 0xd0f   : > { %v8273_v12 = vsel %vm8184_vm2, %v8270_v5, %v8272_v17  ;;  %v7710_v49 = vadd.f32 %v12575_v4, %v7576_v34  ;;  %v7890_v23 = vrot.slane %v7644_v45, 2  ;;  %v7645_v34 = vunpack.c.h.bf16 %v354_v30  ;;  %v13512_v30 = vld [vmem:[#allocation28_spill] sm:$0xff] }
 0xd10   : > { %8421 = vst [vmem:[%s12261_s7 + $0x158] sm:$0xff] %v8273_v12  ;;  %v7253_v19 = vadd.f32 %v12738_v27, %v6918_v39  ;;  %6956 = vmatmul.bf16.gmra.mxu1 %v11151_v38 }
 0xd11   : > { %v8034_v33 = vadd.f32 %v7885_v51, %v7710_v49  ;;  %v7892_v49 = vrot.slane %v7645_v34, 2 }
 0xd12   : > { %v7428_v32 = vrot.slane %v7253_v19, 2 }
 0xd13   : > { %v8099_v62 = vmax.f32 %v8034_v33, 0.0  ;;  %v12789_v53 = vpop.f32.mrf.mxu2 }
 0xd14   : > { %v7429_v22 = vsel %vm3739_vm1, %v7426_v59, %v7428_v32 }
 0xd15   : > { %v8274_v42 = vrot.slane %v8099_v62, 7  ;;  %v7577_v3 = vadd.f32 %v7429_v22, %v13508_v37  ;;  %v6919_v60 = vpop.f32.mrf.mxu1  ;;  %v13511_v22 = vld [vmem:[#allocation67_spill] sm:$0xff] }
 0xd16   : > { %v6920_v27 = vadd.f32 %v6919_v60, %v12684_v24  ;;  %v12813_v11 = vpop.f32.mrf.mxu0 }
 0xd17   : > { %v8275_v38 = vsel %vm8184_vm2, %v8272_v17, %v8274_v42  ;;  %v7711_v13 = vadd.f32 %v12575_v4, %v7577_v3  ;;  %v7893_v3 = vsel %vm3739_vm1, %v7890_v23, %v7892_v49 }
 0xd18   : > { %8422 = vst [vmem:[%s12261_s7 + $0x160] sm:$0xff] %v8275_v38  ;;  %v7254_v54 = vadd.f32 %v12750_v29, %v6920_v27 }
 0xd19   : > { %v8035_v16 = vadd.f32 %v7887_v14, %v7711_v13 }
 0xd1a   : > { %v7430_v15 = vrot.slane %v7254_v54, 2 }
 0xd1b   : > { %v8100_v43 = vmax.f32 %v8035_v16, 0.0  ;;  %v12801_v63 = vpop.f32.mrf.mxu2 }
 0xd1c   : > { %v7431_v24 = vsel %vm3739_vm1, %v7428_v32, %v7430_v15  ;;  %v356_v32 = vld [vmem:[%s10055_s11 + $0xe8] sm:$0xff]  }
 0xd1d   : > { %v8276_v31 = vrot.slane %v8100_v43, 7  ;;  %v7578_v41 = vadd.f32 %v7431_v24, %v13509_v7  ;;  %v6922_v5 = vpop.f32.mrf.mxu1  ;;  %v7646_v60 = vunpack.c.l.bf16 %v356_v32 }
 0xd1e   : > { %v6923_v61 = vadd.f32 %v6922_v5, %v12699_v55  ;;  %v12828_v57 = vpop.f32.mrf.mxu0 }
 0xd1f   : > { %v8277_v29 = vsel %vm8184_vm2, %v8274_v42, %v8276_v31  ;;  %v7712_v44 = vadd.f32 %v12575_v4, %v7578_v41  ;;  %v7894_v54 = vrot.slane %v7646_v60, 2  ;;  %v7647_v41 = vunpack.c.h.bf16 %v356_v32 }
 0xd20   : > { %8423 = vst [vmem:[%s12261_s7 + $0x168] sm:$0xff] %v8277_v29  ;;  %v7255_v25 = vadd.f32 %v12763_v0, %v6923_v61  ;;  %6961 = vmatmul.bf16.gmra.mxu1 %v11665_v40  ;;  %v7891_v0 = vsel %vm3739_vm1, %v7888_v6, %v7890_v23 }
 0xd21   : > { %v8036_v50 = vadd.f32 %v7889_v28, %v7712_v44  ;;  %v7895_v7 = vsel %vm3739_vm1, %v7892_v49, %v7894_v54  ;;  %v7896_v44 = vrot.slane %v7647_v41, 2 }
 0xd22   : > { %v7432_v52 = vrot.slane %v7255_v25, 2 }
 0xd23   : > { %v8101_v59 = vmax.f32 %v8036_v50, 0.0  ;;  %v12815_v46 = vpop.f32.mrf.mxu2 }
 0xd24   : > { %v7433_v55 = vsel %vm3739_vm1, %v7430_v15, %v7432_v52 }
 0xd25   : > { %v8278_v8 = vrot.slane %v8101_v59, 7  ;;  %v7579_v9 = vadd.f32 %v7433_v55, %v13510_v21  ;;  %v6924_v17 = vpop.f32.mrf.mxu1  ;;  %v7897_v21 = vsel %vm3739_vm1, %v7894_v54, %v7896_v44 }
 0xd26   : > { %v6925_v40 = vadd.f32 %v6924_v17, %v12715_v56 }
 0xd27   : > { %v8279_v58 = vsel %vm8184_vm2, %v8276_v31, %v8278_v8  ;;  %v7713_v51 = vadd.f32 %v12575_v4, %v7579_v9  ;;  %v12842_v31 = vpop.f32.mrf.mxu0 }
 0xd28   : > { %8424 = vst [vmem:[%s12261_s7 + $0x170] sm:$0xff] %v8279_v58  ;;  %v7256_v39 = vadd.f32 %v12775_v35, %v6925_v40 }
 0xd29   : > { %v8037_v18 = vadd.f32 %v7891_v0, %v7713_v51 }
 0xd2a   : > { %v7434_v12 = vrot.slane %v7256_v39, 2 }
 0xd2b   : > { %v8102_v19 = vmax.f32 %v8037_v18, 0.0  ;;  %v12825_v33 = vpop.f32.mrf.mxu2 }
 0xd2c   : > { %v7435_v56 = vsel %vm3739_vm1, %v7432_v52, %v7434_v12  ;;  %v358_v52 = vld [vmem:[%s10055_s11 + $0xf0] sm:$0xff]  }
 0xd2d   : > { %v8280_v62 = vrot.slane %v8102_v19, 7  ;;  %v7580_v42 = vadd.f32 %v7435_v56, %v13511_v22  ;;  %v6927_v37 = vpop.f32.mrf.mxu1  ;;  %v7648_v17 = vunpack.c.l.bf16 %v358_v52  ;;  %v13514_v19 = vld [vmem:[#allocation34_spill] sm:$0xff] }
 0xd2e   : > { %v6928_v35 = vadd.f32 %v6927_v37, %v12732_v10 }
 0xd2f   : > { %v8281_v14 = vsel %vm8184_vm2, %v8278_v8, %v8280_v62  ;;  %v7714_v27 = vadd.f32 %v12575_v4, %v7580_v42  ;;  %v12859_v40 = vpop.f32.mrf.mxu0  ;;  %v7898_v39 = vrot.slane %v7648_v17, 2  ;;  %v7649_v42 = vunpack.c.h.bf16 %v358_v52 }
 0xd30   : > { %8425 = vst [vmem:[%s12261_s7 + $0x178] sm:$0xff] %v8281_v14  ;;  %v7257_v20 = vadd.f32 %v12789_v53, %v6928_v35 }
 0xd31   : > { %v8038_v38 = vadd.f32 %v7893_v3, %v7714_v27  ;;  %v7900_v27 = vrot.slane %v7649_v42, 2 }
 0xd32   : > { %v7436_v13 = vrot.slane %v7257_v20, 2 }
 0xd33   : > { %v8103_v16 = vmax.f32 %v8038_v38, 0.0  ;;  %v12838_v15 = vpop.f32.mrf.mxu2 }
 0xd34   : > { %v7437_v6 = vsel %vm3739_vm1, %v7434_v12, %v7436_v13 }
 0xd35   : > { %v8282_v43 = vrot.slane %v8103_v16, 7  ;;  %v7581_v10 = vadd.f32 %v7437_v6, %v13512_v30  ;;  %v6929_v24 = vpop.f32.mrf.mxu1  ;;  %v13515_v16 = vld [vmem:[#allocation56_spill] sm:$0xff]  ;;  %v7901_v30 = vsel %vm3739_vm1, %v7898_v39, %v7900_v27 }
 0xd36   : > { %v6930_v53 = vadd.f32 %v6929_v24, %v12748_v36  ;;  %v13513_v36 = vld [vmem:[#allocation37_spill] sm:$0xff] }
 0xd37   : > { %v8283_v5 = vsel %vm8184_vm2, %v8280_v62, %v8282_v43  ;;  %v7715_v28 = vadd.f32 %v12575_v4, %v7581_v10  ;;  %v7899_v62 = vsel %vm3739_vm1, %v7896_v44, %v7898_v39  ;;  %v12873_v60 = vpop.f32.mrf.mxu0 }
 0xd38   : > { %8426 = vst [vmem:[%s12261_s7 + $0x180] sm:$0xff] %v8283_v5  ;;  %v7258_v61 = vadd.f32 %v12801_v63, %v6930_v53 }
 0xd39   : > { %v8039_v45 = vadd.f32 %v7895_v7, %v7715_v28 }
 0xd3a   : > { %v7438_v29 = vrot.slane %v7258_v61, 2 }
 0xd3b   : > { %v8104_v25 = vmax.f32 %v8039_v45, 0.0  ;;  %v12850_v50 = vpop.f32.mrf.mxu2 }
 0xd3c   : > { %v7439_v23 = vsel %vm3739_vm1, %v7436_v13, %v7438_v29  ;;  %v360_v13 = vld [vmem:[%s10055_s11 + $0xf8] sm:$0xff]  }
 0xd3d   : > { %v8284_v59 = vrot.slane %v8104_v25, 7  ;;  %v7582_v55 = vadd.f32 %v7439_v23, %v13513_v36  ;;  %v6932_v8 = vpop.f32.mrf.mxu1  ;;  %v7650_v10 = vunpack.c.l.bf16 %v360_v13  ;;  %v13516_v25 = vld [vmem:[#allocation68_spill] sm:$0xff]  ;;  %v7651_v36 = vunpack.c.h.bf16 %v360_v13 }
 0xd3e   : > { %v6933_v9 = vadd.f32 %v6932_v8, %v12765_v2 }
 0xd3f   : > { %v8285_v63 = vsel %vm8184_vm2, %v8282_v43, %v8284_v59  ;;  %v7716_v0 = vadd.f32 %v12575_v4, %v7582_v55  ;;  %v7902_v28 = vrot.slane %v7650_v10, 2 }
 0xd40   : > { %8427 = vst [vmem:[%s12261_s7 + $0x188] sm:$0xff] %v8285_v63  ;;  %v7259_v34 = vadd.f32 %v12815_v46, %v6933_v9  ;;  %v7904_v63 = vrot.slane %v7651_v36, 2 }
 0xd41   : > { %v8040_v58 = vadd.f32 %v7897_v21, %v7716_v0 }
 0xd42   : > { %v7440_v51 = vrot.slane %v7259_v34, 2  ;;  %v362_v34 = vld [vmem:[%s10055_s11 + $0x100] sm:$0xff]  }
 0xd43   : > { %v8105_v18 = vmax.f32 %v8040_v58, 0.0  ;;  %v12863_v12 = vpop.f32.mrf.mxu2  ;;  %v7653_v13 = vunpack.c.h.bf16 %v362_v34 }
 0xd44   : > { %v7441_v49 = vsel %vm3739_vm1, %v7438_v29, %v7440_v51  ;;  %v12888_v29 = vpop.f32.mrf.mxu0 }
 0xd45   : > { %v8286_v2 = vrot.slane %v8105_v18, 7  ;;  %v7583_v32 = vadd.f32 %v7441_v49, %v13514_v19  ;;  %v6934_v56 = vpop.f32.mrf.mxu1  ;;  %v7652_v19 = vunpack.c.l.bf16 %v362_v34  ;;  %v12948_v34 = vld [vmem:[%s13045_s4] ss:$0 sm:$0xff] }
 0xd46   : > { %v6935_v22 = vadd.f32 %v6934_v56, %v12780_v47 }
 0xd47   : > { %v8287_v46 = vsel %vm8184_vm2, %v8284_v59, %v8286_v2  ;;  %v7717_v37 = vadd.f32 %v12575_v4, %v7583_v32  ;;  %v7903_v59 = vsel %vm3739_vm1, %v7900_v27, %v7902_v28 }
 0xd48   : > { %8428 = vst [vmem:[%s12261_s7 + $0x190] sm:$0xff] %v8287_v46  ;;  %v7260_v3 = vadd.f32 %v12825_v33, %v6935_v22  ;;  %v7906_v46 = vrot.slane %v7652_v19, 2 }
 0xd49   : > { %v8041_v35 = vadd.f32 %v7899_v62, %v7717_v37 }
 0xd4a   : > { %v7442_v14 = vrot.slane %v7260_v3, 2  ;;  %v7907_v27 = vsel %vm3739_vm1, %v7904_v63, %v7906_v46 }
 0xd4b   : > { %v8106_v20 = vmax.f32 %v8041_v35, 0.0  ;;  %v12875_v38 = vpop.f32.mrf.mxu2 }
 0xd4c   : > { %v7443_v47 = vsel %vm3739_vm1, %v7440_v51, %v7442_v14  ;;  %v12903_v49 = vpop.f32.mrf.mxu0 }
 0xd4d   : > { %v8288_v54 = vrot.slane %v8106_v20, 7  ;;  %v7584_v6 = vadd.f32 %v7443_v47, %v13515_v16  ;;  %v6937_v43 = vpop.f32.mrf.mxu1 }
 0xd4e   : > { %v6938_v33 = vadd.f32 %v6937_v43, %v12797_v48 }
 0xd4f   : > { %v8289_v24 = vsel %vm8184_vm2, %v8286_v2, %v8288_v54  ;;  %v7718_v7 = vadd.f32 %v12575_v4, %v7584_v6  ;;  %v7905_v2 = vsel %vm3739_vm1, %v7902_v28, %v7904_v63 }
 0xd50   : > { %8429 = vst [vmem:[%s12261_s7 + $0x198] sm:$0xff] %v8289_v24  ;;  %v7261_v53 = vadd.f32 %v12838_v15, %v6938_v33  ;;  %v364_v33 = vld [vmem:[%s10055_s11 + $0x108] sm:$0xff]  }
 0xd51   : > { %v8042_v41 = vadd.f32 %v7901_v30, %v7718_v7  ;;  %v7908_v30 = vrot.slane %v7653_v13, 2  ;;  %v13517_v7 = vld [vmem:[#allocation57_spill] sm:$0xff]  ;;  %v7655_v63 = vunpack.c.h.bf16 %v364_v33 }
 0xd52   : > { %v7444_v5 = vrot.slane %v7261_v53, 2 }
 0xd53   : > { %v8107_v61 = vmax.f32 %v8042_v41, 0.0  ;;  %v12886_v45 = vpop.f32.mrf.mxu2 }
 0xd54   : > { %v7445_v48 = vsel %vm3739_vm1, %v7442_v14, %v7444_v5 }
 0xd55   : > { %v8290_v44 = vrot.slane %v8107_v61, 7  ;;  %v7585_v52 = vadd.f32 %v7445_v48, %v13516_v25  ;;  %v6939_v23 = vpop.f32.mrf.mxu1  ;;  %v7654_v61 = vunpack.c.l.bf16 %v364_v33 }
 0xd56   : > { %v6940_v15 = vadd.f32 %v6939_v23, %v12813_v11 }
 0xd57   : > { %v8291_v55 = vsel %vm8184_vm2, %v8288_v54, %v8290_v44  ;;  %v7719_v8 = vadd.f32 %v12575_v4, %v7585_v52 }
 0xd58   : > { %8430 = vst [vmem:[%s12261_s7 + $0x1a0] sm:$0xff] %v8291_v55  ;;  %v7262_v21 = vadd.f32 %v12850_v50, %v6940_v15 }
 0xd59   : > { %v8043_v9 = vadd.f32 %v7903_v59, %v7719_v8  ;;  %v7910_v59 = vrot.slane %v7654_v61, 2  ;;  %v13518_v8 = vld [vmem:[#allocation69_spill] sm:$0xff]  ;;  %v368_v61 = vld [vmem:[%s10055_s11 + $0x118] sm:$0xff]  }
 0xd5a   : > { %v7446_v17 = vrot.slane %v7262_v21, 2 }
 0xd5b   : > { %v8108_v0 = vmax.f32 %v8043_v9, 0.0  ;;  %v12899_v58 = vpop.f32.mrf.mxu2 }
 0xd5c   : > { %v7447_v51 = vsel %vm3739_vm1, %v7444_v5, %v7446_v17  ;;  %v7909_v5 = vsel %vm3739_vm1, %v7906_v46, %v7908_v30 }
 0xd5d   : > { %v8292_v39 = vrot.slane %v8108_v0, 7  ;;  %v7586_v11 = vadd.f32 %v7447_v51, %v12179_v1  ;;  %v6942_v18 = vpop.f32.mrf.mxu1 }
 0xd5e   : > { %v6943_v50 = vadd.f32 %v6942_v18, %v12828_v57 }
 0xd5f   : > { %v8293_v32 = vsel %vm8184_vm2, %v8290_v44, %v8292_v39  ;;  %v7720_v56 = vadd.f32 %v12575_v4, %v7586_v11 }
 0xd60   : > { %8431 = vst [vmem:[%s12261_s7 + $0x1a8] sm:$0xff] %v8293_v32  ;;  %v7263_v62 = vadd.f32 %v12863_v12, %v6943_v50  ;;  %v12917_v12 = vpop.f32.mrf.mxu0  ;;  %v366_v50 = vld [vmem:[%s10055_s11 + $0x110] sm:$0xff]  }
 0xd61   : > { %v8044_v22 = vadd.f32 %v7905_v2, %v7720_v56  ;;  %v7912_v2 = vrot.slane %v7655_v63, 2 }
 0xd62   : > { %v7448_v42 = vrot.slane %v7263_v62, 2  ;;  %v13519_v62 = vld [vmem:[#allocation18_spill] sm:$0xff] }
 0xd63   : > { %v8109_v1 = vmax.f32 %v8044_v22, 0.0  ;;  %v12911_v37 = vpop.f32.mrf.mxu2  ;;  %v7913_v46 = vsel %vm3739_vm1, %v7910_v59, %v7912_v2 }
 0xd64   : > { %v7449_v3 = vsel %vm3739_vm1, %v7446_v17, %v7448_v42  ;;  %v7911_v17 = vsel %vm3739_vm1, %v7908_v30, %v7910_v59 }
 0xd65   : > { %v8294_v35 = vrot.slane %v8109_v1, 7  ;;  %v7587_v57 = vadd.f32 %v7449_v3, %v12183_v26  ;;  %v6944_v14 = vpop.f32.mrf.mxu1  ;;  %v7656_v3 = vunpack.c.l.bf16 %v366_v50 }
 0xd66   : > { %v6945_v20 = vadd.f32 %v6944_v14, %v12842_v31 }
 0xd67   : > { %v8295_v47 = vsel %vm8184_vm2, %v8292_v39, %v8294_v35  ;;  %v7721_v54 = vadd.f32 %v12575_v4, %v7587_v57  ;;  %v7914_v13 = vrot.slane %v7656_v3, 2  ;;  %v13523_v3 = vld [vmem:[#allocation20_spill] sm:$0xff] }
 0xd68   : > { %8432 = vst [vmem:[%s12261_s7 + $0x1b0] sm:$0xff] %v8295_v47  ;;  %v7264_v16 = vadd.f32 %v12875_v38, %v6945_v20  ;;  %v12930_v38 = vpop.f32.mrf.mxu0 }
 0xd69   : > { %v8045_v6 = vadd.f32 %v7907_v27, %v7721_v54 }
 0xd6a   : > { %v7450_v43 = vrot.slane %v7264_v16, 2 }
 0xd6b   : > { %v8110_v26 = vmax.f32 %v8045_v6, 0.0  ;;  %v12924_v10 = vpop.f32.mrf.mxu2 }
 0xd6c   : > { %v7451_v31 = vsel %vm3739_vm1, %v7448_v42, %v7450_v43 }
 0xd6d   : > { %v8296_v24 = vrot.slane %v8110_v26, 7  ;;  %v7588_v53 = vadd.f32 %v7451_v31, %v13517_v7  ;;  %v6947_v41 = vpop.f32.mrf.mxu1  ;;  %v7915_v26 = vsel %vm3739_vm1, %v7912_v2, %v7914_v13  ;;  %v7657_v31 = vunpack.c.h.bf16 %v366_v50 }
 0xd6e   : > { %v6948_v28 = vadd.f32 %v6947_v41, %v12859_v40  ;;  %v7659_v2 = vunpack.c.h.bf16 %v368_v61 }
 0xd6f   : > { %v8297_v48 = vsel %vm8184_vm2, %v8294_v35, %v8296_v24  ;;  %v7722_v44 = vadd.f32 %v12575_v4, %v7588_v53 }
 0xd70   : > { %8433 = vst [vmem:[%s12261_s7 + $0x1b8] sm:$0xff] %v8297_v48  ;;  %v7265_v25 = vadd.f32 %v12886_v45, %v6948_v28  ;;  %v12942_v45 = vpop.f32.mrf.mxu0 }
 0xd71   : > { %v8046_v52 = vadd.f32 %v7909_v5, %v7722_v44  ;;  %v7916_v5 = vrot.slane %v7657_v31, 2 }
 0xd72   : > { %v7452_v23 = vrot.slane %v7265_v25, 2 }
 0xd73   : > { %v8111_v15 = vmax.f32 %v8046_v52, 0.0  ;;  %v12936_v36 = vpop.f32.mrf.mxu2  ;;  %v13521_v52 = vld [vmem:[#allocation60_spill] sm:$0xff]  ;;  %v7917_v59 = vsel %vm3739_vm1, %v7914_v13, %v7916_v5 }
 0xd74   : > { %v7453_v55 = vsel %vm3739_vm1, %v7450_v43, %v7452_v23 }
 0xd75   : > { %v8298_v40 = vrot.slane %v8111_v15, 7  ;;  %v7589_v21 = vadd.f32 %v7453_v55, %v13518_v8  ;;  %v6949_v9 = vpop.f32.mrf.mxu1  ;;  %v7658_v55 = vunpack.c.l.bf16 %v368_v61 }
 0xd76   : > { %v6950_v4 = vadd.f32 %v6949_v9, %v12873_v60 }
 0xd77   : > { %v8299_v0 = vsel %vm8184_vm2, %v8296_v24, %v8298_v40  ;;  %v7723_v51 = vadd.f32 %v12948_v34, %v7589_v21 }
 0xd78   : > { %8434 = vst [vmem:[%s12261_s7 + $0x1c0] sm:$0xff] %v8299_v0  ;;  %v7266_v39 = vadd.f32 %v12899_v58, %v6950_v4  ;;  %v6740_v35 = vpop.f32.mrf.mxu0 }
 0xd79   : > { %v8047_v11 = vadd.f32 %v7911_v17, %v7723_v51  ;;  %v7918_v17 = vrot.slane %v7658_v55, 2  ;;  %v13522_v51 = vld [vmem:[#allocation61_spill] sm:$0xff] }
 0xd7a   : > { %v7454_v18 = vrot.slane %v7266_v39, 2 }
 0xd7b   : > { %v8112_v60 = vmax.f32 %v8047_v11, 0.0  ;;  %v7200_v19 = vpop.f32.mrf.mxu2  ;;  %v7919_v11 = vsel %vm3739_vm1, %v7916_v5, %v7918_v17 }
 0xd7c   : > { %v7455_v32 = vsel %vm3739_vm1, %v7452_v23, %v7454_v18 }
 0xd7d   : > { %v8300_v56 = vrot.slane %v8112_v60, 7  ;;  %v7590_v22 = vadd.f32 %v7455_v32, %v13519_v62  ;;  %v6952_v42 = vpop.f32.mrf.mxu1  ;;  %v7920_v62 = vrot.slane %v7659_v2, 2 }
 0xd7e   : > { %v6953_v1 = vadd.f32 %v6952_v42, %v12888_v29  ;;  %v13520_v29 = vld [vmem:[#allocation59_spill] sm:$0xff]  ;;  %v370_v42 = vld [vmem:[%s10055_s11 + $0x120] sm:$0xf]  ;;  %s8457_s11 = scalar_lea.hbm %s13046_s5, %s9522_s27 }
 0xd7f   : > { %v8301_v58 = vsel %vm8184_vm2, %v8298_v40, %v8300_v56  ;;  %v7724_v57 = vadd.f32 %v12948_v34, %v7590_v22  ;;  %s8460_s1 = sshll.u32 %s8457_s11, 4  ;;  %s8461_s1 = int_to_ptr.hbm [resolvable:$true] %s8460_s1 }
 0xd80   : > { %8435 = vst [vmem:[%s12261_s7 + $0x1c8] sm:$0xff] %v8301_v58  ;;  %v7267_v14 = vadd.f32 %v12911_v37, %v6953_v1  ;;  %v7921_v58 = vsel %vm3739_vm1, %v7918_v17, %v7920_v62  ;;  %s9834_s26 = sshra.s32 %s8461_s1, 4  ;;  %s9835_s26 = int_to_ptr.hbm [resolvable:$true] %s9834_s26 }
 0xd81   : > { %v8048_v27 = vadd.f32 %v7913_v46, %v7724_v57  ;;  %s9836_s28 = scalar_lea.hbm %s9835_s26, 512  ;;  %p9841_p8 = scmp.lt.s32.totalorder %s9835_s26, %s13046_s5 }
 0xd82   : > { %v7456_v20 = vrot.slane %v7267_v14, 2  ;;  %v7660_v14 = vunpack.c.l.bf16 %v370_v42  ;;  %p9837_p1 = scmp.ne.s32.totalorder %s9835_s26, %s9836_s28  ;;  %p9842_p12 = scmp.lt.s32.totalorder %s9840_s15, %s9836_s28 }
 0xd83   : > { %v8113_v47 = vmax.f32 %v8048_v27, 0.0  ;;  %v7203_v54 = vpop.f32.mrf.mxu2 }
 0xd84   : > { %v7457_v16 = vsel %vm3739_vm1, %v7454_v18, %v7456_v20  ;;  %p9838_p2 = pnand %p9837_p1, %p10031_p7  ;;  %p9843_p13 = por %p9842_p12, %p9841_p8 }
 0xd85   : > { %v8302_v6 = vrot.slane %v8113_v47, 7  ;;  %v7591_v43 = vadd.f32 %v7457_v16, %v13520_v29  ;;  %v6954_v30 = vpop.f32.mrf.mxu1  ;;  %v7922_v16 = vrot.slane %v7660_v14, 2 }
 0xd86   : > { %v6955_v33 = vadd.f32 %v6954_v30, %v12903_v49  ;;  %v13524_v30 = vld [vmem:[#allocation33_spill] sm:$0xff]  ;;  %p9839_p4 = pneg %p9838_p2 }
 0xd87   : > { %v8303_v24 = vsel %vm8184_vm2, %v8300_v56, %v8302_v6  ;;  %v7725_v37 = vadd.f32 %v12948_v34, %v7591_v43 }
 0xd88   : > { %8436 = vst [vmem:[%s12261_s7 + $0x1d0] sm:$0xff] %v8303_v24  ;;  %v7268_v7 = vadd.f32 %v12924_v10, %v6955_v33  ;;  %v7923_v33 = vsel %vm3739_vm1, %v7920_v62, %v7922_v16  ;;  %p9844_p0 = pnand %p9843_p13, %p9839_p4 }
 0xd89   : > { %v8049_v53 = vadd.f32 %v7915_v26, %v7725_v37 }
 0xd8a   : > { %v7458_v41 = vrot.slane %v7268_v7, 2 }
 0xd8b   : > { %v8114_v28 = vmax.f32 %v8049_v53, 0.0  ;;  %v7205_v48 = vpop.f32.mrf.mxu2 }
 0xd8c   : > { %v7459_v44 = vsel %vm3739_vm1, %v7456_v20, %v7458_v41 }
 0xd8d   : > { %v8304_v25 = vrot.slane %v8114_v28, 7  ;;  %v7592_v49 = vadd.f32 %v7459_v44, %v13521_v52  ;;  %v6957_v23 = vpop.f32.mrf.mxu1 }
 0xd8e   : > { %v6958_v15 = vadd.f32 %v6957_v23, %v12917_v12 }
 0xd8f   : > { %v8305_v10 = vsel %vm8184_vm2, %v8302_v6, %v8304_v25  ;;  %v7726_v40 = vadd.f32 %v12948_v34, %v7592_v49 }
 0xd90   : > { %8437 = vst [vmem:[%s12261_s7 + $0x1d8] sm:$0xff] %v8305_v10  ;;  %v7269_v8 = vadd.f32 %v12936_v36, %v6958_v15 }
 0xd91   : > { %v8050_v21 = vadd.f32 %v7917_v59, %v7726_v40 }
 0xd92   : > { %v7460_v9 = vrot.slane %v7269_v8, 2 }
 0xd93   : > { %v8115_v4 = vmax.f32 %v8050_v21, 0.0 }
 0xd94   : > { %v7461_v63 = vsel %vm3739_vm1, %v7458_v41, %v7460_v9 }
 0xd95   : > { %v8306_v0 = vrot.slane %v8115_v4, 7  ;;  %v7593_v39 = vadd.f32 %v7461_v63, %v13522_v51  ;;  %v6959_v12 = vpop.f32.mrf.mxu1 }
 0xd96   : > { %v6960_v18 = vadd.f32 %v6959_v12, %v12930_v38 }
 0xd97   : > { %v8307_v60 = vsel %vm8184_vm2, %v8304_v25, %v8306_v0  ;;  %v7727_v36 = vadd.f32 %v12948_v34, %v7593_v39 }
 0xd98   : > { %8438 = vst [vmem:[%s12261_s7 + $0x1e0] sm:$0xff] %v8307_v60  ;;  %v7270_v50 = vadd.f32 %v7200_v19, %v6960_v18 }
 0xd99   : > { %v8051_v32 = vadd.f32 %v7919_v11, %v7727_v36 }
 0xd9a   : > { %v7462_v56 = vrot.slane %v7270_v50, 2 }
 0xd9b   : > { %v8116_v22 = vmax.f32 %v8051_v32, 0.0 }
 0xd9c   : > { %v7463_v46 = vsel %vm3739_vm1, %v7460_v9, %v7462_v56 }
 0xd9d   : > { %v8308_v1 = vrot.slane %v8116_v22, 7  ;;  %v7594_v35 = vadd.f32 %v7463_v46, %v13523_v3  ;;  %v6962_v38 = vpop.f32.mrf.mxu1 }
 0xd9e   : > { %v6963_v57 = vadd.f32 %v6962_v38, %v12942_v45 }
 0xd9f   : > { %v8309_v27 = vsel %vm8184_vm2, %v8306_v0, %v8308_v1  ;;  %v7728_v19 = vadd.f32 %v12948_v34, %v7594_v35 }
 0xda0   : > { %8439 = vst [vmem:[%s12261_s7 + $0x1e8] sm:$0xff] %v8309_v27  ;;  %v7271_v20 = vadd.f32 %v7203_v54, %v6963_v57 }
 0xda1   : > { %v8052_v13 = vadd.f32 %v7921_v58, %v7728_v19 }
 0xda2   : > { %v7464_v47 = vrot.slane %v7271_v20, 2 }
 0xda3   : > { %v8117_v6 = vmax.f32 %v8052_v13, 0.0 }
 0xda4   : > { %v7465_v29 = vsel %vm3739_vm1, %v7462_v56, %v7464_v47 }
 0xda5   : > { %v8310_v43 = vrot.slane %v8117_v6, 7  ;;  %v7595_v45 = vadd.f32 %v7465_v29, %v13524_v30  ;;  %v6964_v26 = vpop.f32.mrf.mxu1 }
 0xda7   : > { %v8311_v31 = vsel %vm8184_vm2, %v8308_v1, %v8310_v43  ;;  %v7729_v54 = vadd.f32 %v12948_v34, %v7595_v45 }
 0xda8   : > { %8440 = vst [vmem:[%s12261_s7 + $0x1f0] sm:$0xff] %v8311_v31 }
 0xda9   : > { %v8053_v24 = vadd.f32 %v7923_v33, %v7729_v54 }
 0xdab   : > { %v8118_v37 = vmax.f32 %v8053_v24, 0.0 }
 0xdad   : > { %v8312_v7 = vrot.slane %v8118_v37, 7 }
 0xdaf   : > { %v8313_v53 = vsel %vm8184_vm2, %v8310_v43, %v8312_v7 }
 0xdb0   : > { %8441 = vst [vmem:[%s12261_s7 + $0x1f8] sm:$0xff] %v8313_v53 }
 0xdb1   : > { %9847 = shalt.err (!%p9844_p0)
}
 0xdb2   : > { %s9914_s25 = smov 128   ;;  %s9915_s7 = smov 8  }
 0xdb3   : > { %9560 = dma.vmem_to_hbm [thread:$0]  (%p10031_p7), %s8459_s21, 8192, %s8461_s1, %s8443_s3, %s9914_s25, %s9914_s25, %s9915_s7  }
 0xdb4 PF: > { %s8475_s16 = sand.u32 1, %s9886_s18   ;;  %p9574_p3 = pnand %p8571_p11, %p9995_p6 }
 0xdb5   : > { %s8476_s17 = scalar_lea.sflag [#allocation4], %s8475_s16 }
 0xdb6   : > { %p9575_p5 = pneg %p9574_p3 }
 0xdb8   : > { %9881 = dma.done.wait (%p9575_p5), %s8476_s17, 8192  }
 0xdb9   : > { %9883 = vsyncadd (%p9575_p5), %s8476_s17, 4294959104  ;;  %s22_s23 = sadd.s32 1, %s9906_s23   ;;  %s13525_s18 = smov %s9890_s19 }
 0xdba   : > { %p19_p9 = scmp.ge.s32.totalorder %s22_s23, 4   ;;  %s13526_s19 = smov %s9894_s20 }
 0xdbb   : > { %s13527_s20 = smov %s10039_s10  ;;  %s13528_s21 = smov %s9902_s22 }
 0xdbc   : > { %s13529_s22 = smov %s13531_s24  ;;  %21 = sbr.rel (!%p19_p9) target bundleno = 10 (0xa), region = 110 }
 0xdc1   :  { %8482 = vsyncpa [#allocation3], 1 }
 0xdc2   :  { %8484 = vsyncpa [#allocation3 + $0x1], 1 }
 0xdc3   :  { %8485 = vsyncpa [#allocation6], 1 }
 0xdc4   :  { %8486 = vsyncpa [#allocation4], 1 }
 0xdc5   :  { %8488 = vsyncpa [#allocation4 + $0x1], 1 }

</bundles_post_ra>
